<compile_context>
chip_gen: v7x
topology: tpu7x:2x2x1
jax: 0.10.0
libtpu: 0.0.40
codegen_flags: <defaults>
</compile_context>

<pallas_src>
import jax
import jax.numpy as jnp
from jax import lax
from jax.experimental import pallas as pl
from jax.experimental.pallas import tpu as pltpu

LEAK = 0.01  # nn.LeakyReLU() default negative_slope


def _leaky(x):
    return jnp.where(x >= 0, x, LEAK * x)


def bead_kernel(x_ref, w_ref, b_ref, out_ref):
    """Fully fused BEAD block for one batch element (NHWC).

    x_ref   : (H, W, Cin)      un-padded input tile (bf16)
    w_ref   : (9*Cin, 2*Cout)  packed weights: [:, :Cout] = 3x3 taps flattened
                               in (dy, dx, cin) order; [:, Cout:] = 1x1 conv on
                               the centre-tap rows, zero elsewhere.
    b_ref   : (1, 2*Cout)      packed biases [b3 | b1] (f32)
    out_ref : (H, W, Cout)     block output (bf16)
    """
    H, W, Cout = out_ref.shape
    Cin = x_ref.shape[-1]

    x = x_ref[...]  # bf16

    # --- reflection pad (1 px) entirely in VMEM: no HBM round trip ---
    xh = jnp.concatenate([x[1:2], x, x[H - 2:H - 1]], axis=0)             # (H+2, W,   Cin)
    xp = jnp.concatenate([xh[:, 1:2], xh, xh[:, W - 2:W - 1]], axis=1)    # (H+2, W+2, Cin)

    # --- im2col: one fat-K patch matrix, channel order (dy, dx, cin) ---
    cols = jnp.concatenate([xp[:, 0:W], xp[:, 1:W + 1], xp[:, 2:W + 2]],
                           axis=-1)                                       # (H+2, W, 3*Cin)
    patches = jnp.concatenate([cols[0:H], cols[1:H + 1], cols[2:H + 2]],
                              axis=-1)                                    # (H, W, 9*Cin)
    patches = patches.reshape(H * W, 9 * Cin)

    # 3x3 conv and 1x1 residual conv in a single MXU matmul (bf16 in, f32 acc).
    y = jnp.dot(patches, w_ref[...], preferred_element_type=jnp.float32)  # (H*W, 2*Cout)
    y = y + b_ref[...]

    conv = _leaky(y[:, :Cout])       # LeakyReLU after 3x3 conv
    res = _leaky(y[:, Cout:])        # LeakyReLU after 1x1 conv
    out = _leaky(conv * res + res)   # BEAD combine + outer LeakyReLU (encode.forward)
    out_ref[...] = out.reshape(H, W, Cout).astype(out_ref.dtype)


def bead_pallas(x, w_big, b_big):
    """x: (N, H, W, Cin) bf16 NHWC -> (N, H, W, Cout) bf16."""
    N, H, W, Cin = x.shape
    K2, C2 = w_big.shape
    Cout = C2 // 2
    assert K2 == 9 * Cin

    flops = 2 * N * H * W * K2 * C2
    bytes_accessed = (N * H * W * Cin * 2 + N * H * W * Cout * 2
                      + K2 * C2 * 2 + C2 * 4)

    # TODO(synk): for large H,W (v7x has only 64 MiB VMEM per TC) add a row-tiled
    # grid with a 1-row reflect halo; the full-image-per-step block below is
    # sized for the small feature maps used here and fits scoped VMEM easily.
    return pl.pallas_call(
        bead_kernel,
        out_shape=jax.ShapeDtypeStruct((N, H, W, Cout), jnp.bfloat16),
        grid_spec=pltpu.PrefetchScalarGridSpec(
            num_scalar_prefetch=0,
            grid=(N,),
            in_specs=[
                pl.BlockSpec((None, H, W, Cin), lambda n: (n, 0, 0, 0)),
                pl.BlockSpec((K2, C2), lambda n: (0, 0)),
                pl.BlockSpec((1, C2), lambda n: (0, 0)),
            ],
            out_specs=pl.BlockSpec((None, H, W, Cout), lambda n: (n, 0, 0, 0)),
        ),
        compiler_params=pltpu.CompilerParams(
            dimension_semantics=("parallel",),
            vmem_limit_bytes=64 * 1024 * 1024),
        cost_estimate=pl.CostEstimate(
            flops=flops, transcendentals=0, bytes_accessed=bytes_accessed),
    )(x, w_big, b_big)


def pack_bead_params(p):
    """Pack (w3, b3, w1, b1) into the fused (9*Cin, 2*Cout) weight + (1, 2*Cout) bias."""
    w3, b3, w1, b1 = p["w3"], p["b3"], p["w1"], p["b1"]
    cin, cout = w1.shape
    w3_flat = w3.reshape(9 * cin, cout)                        # (dy, dx, cin) row order
    w1_full = jnp.zeros((9 * cin, cout), w1.dtype).at[4 * cin:5 * cin].set(w1)
    w_big = jnp.concatenate([w3_flat, w1_full], axis=-1).astype(jnp.bfloat16)
    b_big = jnp.concatenate([b3, b1]).reshape(1, 2 * cout).astype(jnp.float32)
    return w_big, b_big


def encode_pallas(x_nchw, packed_params):
    """Mirrors encode.forward. Input NCHW (PyTorch); compute/outputs NHWC bf16."""
    x = jnp.transpose(x_nchw, (0, 2, 3, 1)).astype(jnp.bfloat16)
    feats = []
    for w_big, b_big in packed_params:
        x = bead_pallas(x, w_big, b_big)
        feats.append(x)
    return tuple(feats)  # (x1, x2, x3, x4) in NHWC


def init_bead_params(key, cin, cout):
    k1, k2, k3, k4 = jax.random.split(key, 4)
    scale3 = 1.0 / jnp.sqrt(cin * 9.0)
    scale1 = 1.0 / jnp.sqrt(cin * 1.0)
    w3 = jax.random.normal(k1, (3, 3, cin, cout), jnp.float32) * scale3
    b3 = jax.random.normal(k2, (cout,), jnp.float32) * scale3
    w1 = jax.random.normal(k3, (cin, cout), jnp.float32) * scale1
    b1 = jax.random.normal(k4, (cout,), jnp.float32) * scale1
    return dict(w3=w3, b3=b3, w1=w1, b1=b1)


# --- pure-JAX reference (matches the kernel's bf16-operand / f32-accum numerics) ---
def _bead_ref(x, p):
    xpad = jnp.pad(x, ((0, 0), (1, 1), (1, 1), (0, 0)), mode="reflect")
    conv = lax.conv_general_dilated(
        xpad, p["w3"].astype(jnp.bfloat16), (1, 1), "VALID",
        dimension_numbers=("NHWC", "HWIO", "NHWC"),
        preferred_element_type=jnp.float32) + p["b3"]
    conv = _leaky(conv)
    res = jnp.einsum("nhwc,cd->nhwd", x, p["w1"].astype(jnp.bfloat16),
                     preferred_element_type=jnp.float32) + p["b1"]
    res = _leaky(res)
    return _leaky(conv * res + res).astype(jnp.bfloat16)


def _encode_ref(x_nchw, params):
    x = jnp.transpose(x_nchw, (0, 2, 3, 1)).astype(jnp.bfloat16)
    feats = []
    for p in params:
        x = _bead_ref(x, p)
        feats.append(x)
    return tuple(feats)


if __name__ == "__main__":
    key = jax.random.PRNGKey(0)
    kx, kp = jax.random.split(key)

    # Small, module-consistent shapes: batch=2, in_channels=2, spatial=16 (NCHW).
    x = jax.random.normal(kx, (2, 2, 16, 16), jnp.float32)

    chans = [(2, 16), (16, 32), (32, 64), (64, 128)]
    pkeys = jax.random.split(kp, len(chans))
    params = [init_bead_params(k, ci, co) for k, (ci, co) in zip(pkeys, chans)]
    packed = [pack_bead_params(p) for p in params]

    encode_fn = jax.jit(encode_pallas)
    outs = jax.block_until_ready(encode_fn(x, packed))

    refs = jax.block_until_ready(_encode_ref(x, params))
    for o, r in zip(outs, refs):
        assert o.shape == r.shape
        assert jnp.allclose(o.astype(jnp.float32), r.astype(jnp.float32),
                            atol=3e-2, rtol=3e-2), "mismatch vs reference"

    print("KERNEL_OK")
</pallas_src>

<mosaic_0001>
module attributes {stable_mosaic.version = 11 : i64} {
  func.func @bead_kernel(%arg0: i32, %arg1: memref<1x16x16x2xbf16, #tpu.memory_space<vmem>>, %arg2: memref<18x32xbf16, #tpu.memory_space<vmem>>, %arg3: memref<1x32xf32, #tpu.memory_space<vmem>>, %arg4: memref<1x16x16x16xbf16, #tpu.memory_space<vmem>>) attributes {dimension_semantics = [#tpu.dimension_semantics<parallel>], iteration_bounds = array<i64: 2>, scalar_prefetch = 0 : i64, scratch_operands = 0 : i64, tpu.core_type = #tpu.core_type<tc>, window_params = [{transform_indices = @transform_0, window_bounds = array<i64: 1, 16, 16, 2>}, {pipeline_mode = #tpu.pipeline_mode<synchronous>, transform_indices = @transform_1, window_bounds = array<i64: 18, 32>}, {pipeline_mode = #tpu.pipeline_mode<synchronous>, transform_indices = @transform_2, window_bounds = array<i64: 1, 32>}, {transform_indices = @transform_3, window_bounds = array<i64: 1, 16, 16, 16>}]} {
    %c0 = arith.constant 0 : index
    %c0_0 = arith.constant 0 : index
    %c0_1 = arith.constant 0 : index
    %c0_2 = arith.constant 0 : index
    %0 = vector.load %arg1[%c0, %c0_0, %c0_1, %c0_2] : memref<1x16x16x2xbf16, #tpu.memory_space<vmem>>, vector<1x16x16x2xbf16>
    %1 = vector.shape_cast %0 : vector<1x16x16x2xbf16> to vector<16x16x2xbf16>
    %2 = vector.extract_strided_slice %1 {offsets = [1, 0, 0], sizes = [1, 16, 2], strides = [1, 1, 1]} : vector<16x16x2xbf16> to vector<1x16x2xbf16>
    %3 = vector.extract_strided_slice %1 {offsets = [14, 0, 0], sizes = [1, 16, 2], strides = [1, 1, 1]} : vector<16x16x2xbf16> to vector<1x16x2xbf16>
    %4 = tpu.concatenate %2, %1, %3 in 0 : vector<1x16x2xbf16>, vector<16x16x2xbf16>, vector<1x16x2xbf16> -> vector<18x16x2xbf16>
    %5 = vector.extract_strided_slice %4 {offsets = [0, 1, 0], sizes = [18, 1, 2], strides = [1, 1, 1]} : vector<18x16x2xbf16> to vector<18x1x2xbf16>
    %6 = vector.extract_strided_slice %4 {offsets = [0, 14, 0], sizes = [18, 1, 2], strides = [1, 1, 1]} : vector<18x16x2xbf16> to vector<18x1x2xbf16>
    %7 = tpu.concatenate %5, %4, %6 in 1 : vector<18x1x2xbf16>, vector<18x16x2xbf16>, vector<18x1x2xbf16> -> vector<18x18x2xbf16>
    %8 = vector.extract_strided_slice %7 {offsets = [0, 0, 0], sizes = [18, 16, 2], strides = [1, 1, 1]} : vector<18x18x2xbf16> to vector<18x16x2xbf16>
    %9 = vector.extract_strided_slice %7 {offsets = [0, 1, 0], sizes = [18, 16, 2], strides = [1, 1, 1]} : vector<18x18x2xbf16> to vector<18x16x2xbf16>
    %10 = vector.extract_strided_slice %7 {offsets = [0, 2, 0], sizes = [18, 16, 2], strides = [1, 1, 1]} : vector<18x18x2xbf16> to vector<18x16x2xbf16>
    %11 = tpu.concatenate %8, %9, %10 in 2 : vector<18x16x2xbf16>, vector<18x16x2xbf16>, vector<18x16x2xbf16> -> vector<18x16x6xbf16>
    %12 = vector.extract_strided_slice %11 {offsets = [0, 0, 0], sizes = [16, 16, 6], strides = [1, 1, 1]} : vector<18x16x6xbf16> to vector<16x16x6xbf16>
    %13 = vector.extract_strided_slice %11 {offsets = [1, 0, 0], sizes = [16, 16, 6], strides = [1, 1, 1]} : vector<18x16x6xbf16> to vector<16x16x6xbf16>
    %14 = vector.extract_strided_slice %11 {offsets = [2, 0, 0], sizes = [16, 16, 6], strides = [1, 1, 1]} : vector<18x16x6xbf16> to vector<16x16x6xbf16>
    %15 = tpu.concatenate %12, %13, %14 in 2 : vector<16x16x6xbf16>, vector<16x16x6xbf16>, vector<16x16x6xbf16> -> vector<16x16x18xbf16>
    %16 = vector.shape_cast %15 : vector<16x16x18xbf16> to vector<256x18xbf16>
    %c0_3 = arith.constant 0 : index
    %c0_4 = arith.constant 0 : index
    %17 = vector.load %arg2[%c0_3, %c0_4] : memref<18x32xbf16, #tpu.memory_space<vmem>>, vector<18x32xbf16>
    %cst = arith.constant dense<0.000000e+00> : vector<256x32xf32>
    %18 = tpu.matmul %16, %17, %cst {dimension_numbers = #tpu.dot_dimension_numbers<[1], [0], [0], [1], [0, 0, 1, 1], [], []>} : vector<256x18xbf16>, vector<18x32xbf16>, vector<256x32xf32> -> vector<256x32xf32>
    %c0_5 = arith.constant 0 : index
    %c0_6 = arith.constant 0 : index
    %19 = vector.load %arg3[%c0_5, %c0_6] : memref<1x32xf32, #tpu.memory_space<vmem>>, vector<1x32xf32>
    %20 = vector.broadcast %19 : vector<1x32xf32> to vector<256x32xf32>
    %21 = arith.addf %18, %20 : vector<256x32xf32>
    %22 = vector.extract_strided_slice %21 {offsets = [0, 0], sizes = [256, 16], strides = [1, 1]} : vector<256x32xf32> to vector<256x16xf32>
    %cst_7 = arith.constant 0.000000e+00 : f32
    %23 = vector.broadcast %cst_7 : f32 to vector<256x16xf32>
    %24 = arith.cmpf oge, %22, %23 : vector<256x16xf32>
    %cst_8 = arith.constant 0.00999999977 : f32
    %25 = vector.broadcast %cst_8 : f32 to vector<256x16xf32>
    %26 = arith.mulf %25, %22 : vector<256x16xf32>
    %27 = arith.select %24, %22, %26 : vector<256x16xi1>, vector<256x16xf32>
    %28 = vector.extract_strided_slice %21 {offsets = [0, 16], sizes = [256, 16], strides = [1, 1]} : vector<256x32xf32> to vector<256x16xf32>
    %cst_9 = arith.constant 0.000000e+00 : f32
    %29 = vector.broadcast %cst_9 : f32 to vector<256x16xf32>
    %30 = arith.cmpf oge, %28, %29 : vector<256x16xf32>
    %cst_10 = arith.constant 0.00999999977 : f32
    %31 = vector.broadcast %cst_10 : f32 to vector<256x16xf32>
    %32 = arith.mulf %31, %28 : vector<256x16xf32>
    %33 = arith.select %30, %28, %32 : vector<256x16xi1>, vector<256x16xf32>
    %34 = arith.mulf %27, %33 : vector<256x16xf32>
    %35 = arith.addf %34, %33 : vector<256x16xf32>
    %cst_11 = arith.constant 0.000000e+00 : f32
    %36 = vector.broadcast %cst_11 : f32 to vector<256x16xf32>
    %37 = arith.cmpf oge, %35, %36 : vector<256x16xf32>
    %cst_12 = arith.constant 0.00999999977 : f32
    %38 = vector.broadcast %cst_12 : f32 to vector<256x16xf32>
    %39 = arith.mulf %38, %35 : vector<256x16xf32>
    %40 = arith.select %37, %35, %39 : vector<256x16xi1>, vector<256x16xf32>
    %41 = vector.shape_cast %40 : vector<256x16xf32> to vector<16x16x16xf32>
    %42 = arith.truncf %41 : vector<16x16x16xf32> to vector<16x16x16xbf16>
    %c0_13 = arith.constant 0 : index
    %c0_14 = arith.constant 0 : index
    %c0_15 = arith.constant 0 : index
    %c0_16 = arith.constant 0 : index
    %43 = vector.load %arg4[%c0_13, %c0_14, %c0_15, %c0_16] : memref<1x16x16x16xbf16, #tpu.memory_space<vmem>>, vector<1x16x16x16xbf16>
    %44 = vector.shape_cast %43 : vector<1x16x16x16xbf16> to vector<16x16x16xbf16>
    %45 = vector.shape_cast %42 : vector<16x16x16xbf16> to vector<1x16x16x16xbf16>
    tpu.vector_store %arg4[%c0_13, %c0_14, %c0_15, %c0_16], %45 {strides = array<i32>} : memref<1x16x16x16xbf16, #tpu.memory_space<vmem>>, vector<1x16x16x16xbf16>,
    return
  }
  func.func @transform_0(%arg0: i32) -> (i32, i32, i32, i32) {
    %c0_i32 = arith.constant 0 : i32
    %c0_i32_0 = arith.constant 0 : i32
    %c0_i32_1 = arith.constant 0 : i32
    %c0_i32_2 = arith.constant 0 : i32
    return %arg0, %c0_i32, %c0_i32_0, %c0_i32_1 : i32, i32, i32, i32
  }
  func.func @transform_1(%arg0: i32) -> (i32, i32) {
    %c0_i32 = arith.constant 0 : i32
    %c0_i32_0 = arith.constant 0 : i32
    %c0_i32_1 = arith.constant 0 : i32
    return %c0_i32, %c0_i32_0 : i32, i32
  }
  func.func @transform_2(%arg0: i32) -> (i32, i32) {
    %c0_i32 = arith.constant 0 : i32
    %c0_i32_0 = arith.constant 0 : i32
    %c0_i32_1 = arith.constant 0 : i32
    return %c0_i32, %c0_i32_0 : i32, i32
  }
  func.func @transform_3(%arg0: i32) -> (i32, i32, i32, i32) {
    %c0_i32 = arith.constant 0 : i32
    %c0_i32_0 = arith.constant 0 : i32
    %c0_i32_1 = arith.constant 0 : i32
    %c0_i32_2 = arith.constant 0 : i32
    return %arg0, %c0_i32, %c0_i32_0, %c0_i32_1 : i32, i32, i32, i32
  }
}

module attributes {stable_mosaic.version = 11 : i64} {
  func.func @bead_kernel(%arg0: i32, %arg1: memref<1x16x16x16xbf16, #tpu.memory_space<vmem>>, %arg2: memref<144x64xbf16, #tpu.memory_space<vmem>>, %arg3: memref<1x64xf32, #tpu.memory_space<vmem>>, %arg4: memref<1x16x16x32xbf16, #tpu.memory_space<vmem>>) attributes {dimension_semantics = [#tpu.dimension_semantics<parallel>], iteration_bounds = array<i64: 2>, scalar_prefetch = 0 : i64, scratch_operands = 0 : i64, tpu.core_type = #tpu.core_type<tc>, window_params = [{transform_indices = @transform_0, window_bounds = array<i64: 1, 16, 16, 16>}, {pipeline_mode = #tpu.pipeline_mode<synchronous>, transform_indices = @transform_1, window_bounds = array<i64: 144, 64>}, {pipeline_mode = #tpu.pipeline_mode<synchronous>, transform_indices = @transform_2, window_bounds = array<i64: 1, 64>}, {transform_indices = @transform_3, window_bounds = array<i64: 1, 16, 16, 32>}]} {
    %c0 = arith.constant 0 : index
    %c0_0 = arith.constant 0 : index
    %c0_1 = arith.constant 0 : index
    %c0_2 = arith.constant 0 : index
    %0 = vector.load %arg1[%c0, %c0_0, %c0_1, %c0_2] : memref<1x16x16x16xbf16, #tpu.memory_space<vmem>>, vector<1x16x16x16xbf16>
    %1 = vector.shape_cast %0 : vector<1x16x16x16xbf16> to vector<16x16x16xbf16>
    %2 = vector.extract_strided_slice %1 {offsets = [1, 0, 0], sizes = [1, 16, 16], strides = [1, 1, 1]} : vector<16x16x16xbf16> to vector<1x16x16xbf16>
    %3 = vector.extract_strided_slice %1 {offsets = [14, 0, 0], sizes = [1, 16, 16], strides = [1, 1, 1]} : vector<16x16x16xbf16> to vector<1x16x16xbf16>
    %4 = tpu.concatenate %2, %1, %3 in 0 : vector<1x16x16xbf16>, vector<16x16x16xbf16>, vector<1x16x16xbf16> -> vector<18x16x16xbf16>
    %5 = vector.extract_strided_slice %4 {offsets = [0, 1, 0], sizes = [18, 1, 16], strides = [1, 1, 1]} : vector<18x16x16xbf16> to vector<18x1x16xbf16>
    %6 = vector.extract_strided_slice %4 {offsets = [0, 14, 0], sizes = [18, 1, 16], strides = [1, 1, 1]} : vector<18x16x16xbf16> to vector<18x1x16xbf16>
    %7 = tpu.concatenate %5, %4, %6 in 1 : vector<18x1x16xbf16>, vector<18x16x16xbf16>, vector<18x1x16xbf16> -> vector<18x18x16xbf16>
    %8 = vector.extract_strided_slice %7 {offsets = [0, 0, 0], sizes = [18, 16, 16], strides = [1, 1, 1]} : vector<18x18x16xbf16> to vector<18x16x16xbf16>
    %9 = vector.extract_strided_slice %7 {offsets = [0, 1, 0], sizes = [18, 16, 16], strides = [1, 1, 1]} : vector<18x18x16xbf16> to vector<18x16x16xbf16>
    %10 = vector.extract_strided_slice %7 {offsets = [0, 2, 0], sizes = [18, 16, 16], strides = [1, 1, 1]} : vector<18x18x16xbf16> to vector<18x16x16xbf16>
    %11 = tpu.concatenate %8, %9, %10 in 2 : vector<18x16x16xbf16>, vector<18x16x16xbf16>, vector<18x16x16xbf16> -> vector<18x16x48xbf16>
    %12 = vector.extract_strided_slice %11 {offsets = [0, 0, 0], sizes = [16, 16, 48], strides = [1, 1, 1]} : vector<18x16x48xbf16> to vector<16x16x48xbf16>
    %13 = vector.extract_strided_slice %11 {offsets = [1, 0, 0], sizes = [16, 16, 48], strides = [1, 1, 1]} : vector<18x16x48xbf16> to vector<16x16x48xbf16>
    %14 = vector.extract_strided_slice %11 {offsets = [2, 0, 0], sizes = [16, 16, 48], strides = [1, 1, 1]} : vector<18x16x48xbf16> to vector<16x16x48xbf16>
    %15 = tpu.concatenate %12, %13, %14 in 2 : vector<16x16x48xbf16>, vector<16x16x48xbf16>, vector<16x16x48xbf16> -> vector<16x16x144xbf16>
    %16 = vector.shape_cast %15 : vector<16x16x144xbf16> to vector<256x144xbf16>
    %c0_3 = arith.constant 0 : index
    %c0_4 = arith.constant 0 : index
    %17 = vector.load %arg2[%c0_3, %c0_4] : memref<144x64xbf16, #tpu.memory_space<vmem>>, vector<144x64xbf16>
    %cst = arith.constant dense<0.000000e+00> : vector<256x64xf32>
    %18 = tpu.matmul %16, %17, %cst {dimension_numbers = #tpu.dot_dimension_numbers<[1], [0], [0], [1], [0, 0, 1, 1], [], []>} : vector<256x144xbf16>, vector<144x64xbf16>, vector<256x64xf32> -> vector<256x64xf32>
    %c0_5 = arith.constant 0 : index
    %c0_6 = arith.constant 0 : index
    %19 = vector.load %arg3[%c0_5, %c0_6] : memref<1x64xf32, #tpu.memory_space<vmem>>, vector<1x64xf32>
    %20 = vector.broadcast %19 : vector<1x64xf32> to vector<256x64xf32>
    %21 = arith.addf %18, %20 : vector<256x64xf32>
    %22 = vector.extract_strided_slice %21 {offsets = [0, 0], sizes = [256, 32], strides = [1, 1]} : vector<256x64xf32> to vector<256x32xf32>
    %cst_7 = arith.constant 0.000000e+00 : f32
    %23 = vector.broadcast %cst_7 : f32 to vector<256x32xf32>
    %24 = arith.cmpf oge, %22, %23 : vector<256x32xf32>
    %cst_8 = arith.constant 0.00999999977 : f32
    %25 = vector.broadcast %cst_8 : f32 to vector<256x32xf32>
    %26 = arith.mulf %25, %22 : vector<256x32xf32>
    %27 = arith.select %24, %22, %26 : vector<256x32xi1>, vector<256x32xf32>
    %28 = vector.extract_strided_slice %21 {offsets = [0, 32], sizes = [256, 32], strides = [1, 1]} : vector<256x64xf32> to vector<256x32xf32>
    %cst_9 = arith.constant 0.000000e+00 : f32
    %29 = vector.broadcast %cst_9 : f32 to vector<256x32xf32>
    %30 = arith.cmpf oge, %28, %29 : vector<256x32xf32>
    %cst_10 = arith.constant 0.00999999977 : f32
    %31 = vector.broadcast %cst_10 : f32 to vector<256x32xf32>
    %32 = arith.mulf %31, %28 : vector<256x32xf32>
    %33 = arith.select %30, %28, %32 : vector<256x32xi1>, vector<256x32xf32>
    %34 = arith.mulf %27, %33 : vector<256x32xf32>
    %35 = arith.addf %34, %33 : vector<256x32xf32>
    %cst_11 = arith.constant 0.000000e+00 : f32
    %36 = vector.broadcast %cst_11 : f32 to vector<256x32xf32>
    %37 = arith.cmpf oge, %35, %36 : vector<256x32xf32>
    %cst_12 = arith.constant 0.00999999977 : f32
    %38 = vector.broadcast %cst_12 : f32 to vector<256x32xf32>
    %39 = arith.mulf %38, %35 : vector<256x32xf32>
    %40 = arith.select %37, %35, %39 : vector<256x32xi1>, vector<256x32xf32>
    %41 = vector.shape_cast %40 : vector<256x32xf32> to vector<16x16x32xf32>
    %42 = arith.truncf %41 : vector<16x16x32xf32> to vector<16x16x32xbf16>
    %c0_13 = arith.constant 0 : index
    %c0_14 = arith.constant 0 : index
    %c0_15 = arith.constant 0 : index
    %c0_16 = arith.constant 0 : index
    %43 = vector.load %arg4[%c0_13, %c0_14, %c0_15, %c0_16] : memref<1x16x16x32xbf16, #tpu.memory_space<vmem>>, vector<1x16x16x32xbf16>
    %44 = vector.shape_cast %43 : vector<1x16x16x32xbf16> to vector<16x16x32xbf16>
    %45 = vector.shape_cast %42 : vector<16x16x32xbf16> to vector<1x16x16x32xbf16>
    tpu.vector_store %arg4[%c0_13, %c0_14, %c0_15, %c0_16], %45 {strides = array<i32>} : memref<1x16x16x32xbf16, #tpu.memory_space<vmem>>, vector<1x16x16x32xbf16>,
    return
  }
  func.func @transform_0(%arg0: i32) -> (i32, i32, i32, i32) {
    %c0_i32 = arith.constant 0 : i32
    %c0_i32_0 = arith.constant 0 : i32
    %c0_i32_1 = arith.constant 0 : i32
    %c0_i32_2 = arith.constant 0 : i32
    return %arg0, %c0_i32, %c0_i32_0, %c0_i32_1 : i32, i32, i32, i32
  }
  func.func @transform_1(%arg0: i32) -> (i32, i32) {
    %c0_i32 = arith.constant 0 : i32
    %c0_i32_0 = arith.constant 0 : i32
    %c0_i32_1 = arith.constant 0 : i32
    return %c0_i32, %c0_i32_0 : i32, i32
  }
  func.func @transform_2(%arg0: i32) -> (i32, i32) {
    %c0_i32 = arith.constant 0 : i32
    %c0_i32_0 = arith.constant 0 : i32
    %c0_i32_1 = arith.constant 0 : i32
    return %c0_i32, %c0_i32_0 : i32, i32
  }
  func.func @transform_3(%arg0: i32) -> (i32, i32, i32, i32) {
    %c0_i32 = arith.constant 0 : i32
    %c0_i32_0 = arith.constant 0 : i32
    %c0_i32_1 = arith.constant 0 : i32
    %c0_i32_2 = arith.constant 0 : i32
    return %arg0, %c0_i32, %c0_i32_0, %c0_i32_1 : i32, i32, i32, i32
  }
}

module attributes {stable_mosaic.version = 11 : i64} {
  func.func @bead_kernel(%arg0: i32, %arg1: memref<1x16x16x64xbf16, #tpu.memory_space<vmem>>, %arg2: memref<576x256xbf16, #tpu.memory_space<vmem>>, %arg3: memref<1x256xf32, #tpu.memory_space<vmem>>, %arg4: memref<1x16x16x128xbf16, #tpu.memory_space<vmem>>) attributes {dimension_semantics = [#tpu.dimension_semantics<parallel>], iteration_bounds = array<i64: 2>, scalar_prefetch = 0 : i64, scratch_operands = 0 : i64, tpu.core_type = #tpu.core_type<tc>, window_params = [{transform_indices = @transform_0, window_bounds = array<i64: 1, 16, 16, 64>}, {pipeline_mode = #tpu.pipeline_mode<synchronous>, transform_indices = @transform_1, window_bounds = array<i64: 576, 256>}, {pipeline_mode = #tpu.pipeline_mode<synchronous>, transform_indices = @transform_2, window_bounds = array<i64: 1, 256>}, {transform_indices = @transform_3, window_bounds = array<i64: 1, 16, 16, 128>}]} {
    %c0 = arith.constant 0 : index
    %c0_0 = arith.constant 0 : index
    %c0_1 = arith.constant 0 : index
    %c0_2 = arith.constant 0 : index
    %0 = vector.load %arg1[%c0, %c0_0, %c0_1, %c0_2] : memref<1x16x16x64xbf16, #tpu.memory_space<vmem>>, vector<1x16x16x64xbf16>
    %1 = vector.shape_cast %0 : vector<1x16x16x64xbf16> to vector<16x16x64xbf16>
    %2 = vector.extract_strided_slice %1 {offsets = [1, 0, 0], sizes = [1, 16, 64], strides = [1, 1, 1]} : vector<16x16x64xbf16> to vector<1x16x64xbf16>
    %3 = vector.extract_strided_slice %1 {offsets = [14, 0, 0], sizes = [1, 16, 64], strides = [1, 1, 1]} : vector<16x16x64xbf16> to vector<1x16x64xbf16>
    %4 = tpu.concatenate %2, %1, %3 in 0 : vector<1x16x64xbf16>, vector<16x16x64xbf16>, vector<1x16x64xbf16> -> vector<18x16x64xbf16>
    %5 = vector.extract_strided_slice %4 {offsets = [0, 1, 0], sizes = [18, 1, 64], strides = [1, 1, 1]} : vector<18x16x64xbf16> to vector<18x1x64xbf16>
    %6 = vector.extract_strided_slice %4 {offsets = [0, 14, 0], sizes = [18, 1, 64], strides = [1, 1, 1]} : vector<18x16x64xbf16> to vector<18x1x64xbf16>
    %7 = tpu.concatenate %5, %4, %6 in 1 : vector<18x1x64xbf16>, vector<18x16x64xbf16>, vector<18x1x64xbf16> -> vector<18x18x64xbf16>
    %8 = vector.extract_strided_slice %7 {offsets = [0, 0, 0], sizes = [18, 16, 64], strides = [1, 1, 1]} : vector<18x18x64xbf16> to vector<18x16x64xbf16>
    %9 = vector.extract_strided_slice %7 {offsets = [0, 1, 0], sizes = [18, 16, 64], strides = [1, 1, 1]} : vector<18x18x64xbf16> to vector<18x16x64xbf16>
    %10 = vector.extract_strided_slice %7 {offsets = [0, 2, 0], sizes = [18, 16, 64], strides = [1, 1, 1]} : vector<18x18x64xbf16> to vector<18x16x64xbf16>
    %11 = tpu.concatenate %8, %9, %10 in 2 : vector<18x16x64xbf16>, vector<18x16x64xbf16>, vector<18x16x64xbf16> -> vector<18x16x192xbf16>
    %12 = vector.extract_strided_slice %11 {offsets = [0, 0, 0], sizes = [16, 16, 192], strides = [1, 1, 1]} : vector<18x16x192xbf16> to vector<16x16x192xbf16>
    %13 = vector.extract_strided_slice %11 {offsets = [1, 0, 0], sizes = [16, 16, 192], strides = [1, 1, 1]} : vector<18x16x192xbf16> to vector<16x16x192xbf16>
    %14 = vector.extract_strided_slice %11 {offsets = [2, 0, 0], sizes = [16, 16, 192], strides = [1, 1, 1]} : vector<18x16x192xbf16> to vector<16x16x192xbf16>
    %15 = tpu.concatenate %12, %13, %14 in 2 : vector<16x16x192xbf16>, vector<16x16x192xbf16>, vector<16x16x192xbf16> -> vector<16x16x576xbf16>
    %16 = vector.shape_cast %15 : vector<16x16x576xbf16> to vector<256x576xbf16>
    %c0_3 = arith.constant 0 : index
    %c0_4 = arith.constant 0 : index
    %17 = vector.load %arg2[%c0_3, %c0_4] : memref<576x256xbf16, #tpu.memory_space<vmem>>, vector<576x256xbf16>
    %cst = arith.constant dense<0.000000e+00> : vector<256x256xf32>
    %18 = tpu.matmul %16, %17, %cst {dimension_numbers = #tpu.dot_dimension_numbers<[1], [0], [0], [1], [0, 0, 1, 1], [], []>} : vector<256x576xbf16>, vector<576x256xbf16>, vector<256x256xf32> -> vector<256x256xf32>
    %c0_5 = arith.constant 0 : index
    %c0_6 = arith.constant 0 : index
    %19 = vector.load %arg3[%c0_5, %c0_6] : memref<1x256xf32, #tpu.memory_space<vmem>>, vector<1x256xf32>
    %20 = vector.broadcast %19 : vector<1x256xf32> to vector<256x256xf32>
    %21 = arith.addf %18, %20 : vector<256x256xf32>
    %22 = vector.extract_strided_slice %21 {offsets = [0, 0], sizes = [256, 128], strides = [1, 1]} : vector<256x256xf32> to vector<256x128xf32>
    %cst_7 = arith.constant 0.000000e+00 : f32
    %23 = vector.broadcast %cst_7 : f32 to vector<256x128xf32>
    %24 = arith.cmpf oge, %22, %23 : vector<256x128xf32>
    %cst_8 = arith.constant 0.00999999977 : f32
    %25 = vector.broadcast %cst_8 : f32 to vector<256x128xf32>
    %26 = arith.mulf %25, %22 : vector<256x128xf32>
    %27 = arith.select %24, %22, %26 : vector<256x128xi1>, vector<256x128xf32>
    %28 = vector.extract_strided_slice %21 {offsets = [0, 128], sizes = [256, 128], strides = [1, 1]} : vector<256x256xf32> to vector<256x128xf32>
    %cst_9 = arith.constant 0.000000e+00 : f32
    %29 = vector.broadcast %cst_9 : f32 to vector<256x128xf32>
    %30 = arith.cmpf oge, %28, %29 : vector<256x128xf32>
    %cst_10 = arith.constant 0.00999999977 : f32
    %31 = vector.broadcast %cst_10 : f32 to vector<256x128xf32>
    %32 = arith.mulf %31, %28 : vector<256x128xf32>
    %33 = arith.select %30, %28, %32 : vector<256x128xi1>, vector<256x128xf32>
    %34 = arith.mulf %27, %33 : vector<256x128xf32>
    %35 = arith.addf %34, %33 : vector<256x128xf32>
    %cst_11 = arith.constant 0.000000e+00 : f32
    %36 = vector.broadcast %cst_11 : f32 to vector<256x128xf32>
    %37 = arith.cmpf oge, %35, %36 : vector<256x128xf32>
    %cst_12 = arith.constant 0.00999999977 : f32
    %38 = vector.broadcast %cst_12 : f32 to vector<256x128xf32>
    %39 = arith.mulf %38, %35 : vector<256x128xf32>
    %40 = arith.select %37, %35, %39 : vector<256x128xi1>, vector<256x128xf32>
    %41 = vector.shape_cast %40 : vector<256x128xf32> to vector<16x16x128xf32>
    %42 = arith.truncf %41 : vector<16x16x128xf32> to vector<16x16x128xbf16>
    %c0_13 = arith.constant 0 : index
    %c0_14 = arith.constant 0 : index
    %c0_15 = arith.constant 0 : index
    %c0_16 = arith.constant 0 : index
    %43 = vector.load %arg4[%c0_13, %c0_14, %c0_15, %c0_16] : memref<1x16x16x128xbf16, #tpu.memory_space<vmem>>, vector<1x16x16x128xbf16>
    %44 = vector.shape_cast %43 : vector<1x16x16x128xbf16> to vector<16x16x128xbf16>
    %45 = vector.shape_cast %42 : vector<16x16x128xbf16> to vector<1x16x16x128xbf16>
    tpu.vector_store %arg4[%c0_13, %c0_14, %c0_15, %c0_16], %45 {strides = array<i32>} : memref<1x16x16x128xbf16, #tpu.memory_space<vmem>>, vector<1x16x16x128xbf16>,
    return
  }
  func.func @transform_0(%arg0: i32) -> (i32, i32, i32, i32) {
    %c0_i32 = arith.constant 0 : i32
    %c0_i32_0 = arith.constant 0 : i32
    %c0_i32_1 = arith.constant 0 : i32
    %c0_i32_2 = arith.constant 0 : i32
    return %arg0, %c0_i32, %c0_i32_0, %c0_i32_1 : i32, i32, i32, i32
  }
  func.func @transform_1(%arg0: i32) -> (i32, i32) {
    %c0_i32 = arith.constant 0 : i32
    %c0_i32_0 = arith.constant 0 : i32
    %c0_i32_1 = arith.constant 0 : i32
    return %c0_i32, %c0_i32_0 : i32, i32
  }
  func.func @transform_2(%arg0: i32) -> (i32, i32) {
    %c0_i32 = arith.constant 0 : i32
    %c0_i32_0 = arith.constant 0 : i32
    %c0_i32_1 = arith.constant 0 : i32
    return %c0_i32, %c0_i32_0 : i32, i32
  }
  func.func @transform_3(%arg0: i32) -> (i32, i32, i32, i32) {
    %c0_i32 = arith.constant 0 : i32
    %c0_i32_0 = arith.constant 0 : i32
    %c0_i32_1 = arith.constant 0 : i32
    %c0_i32_2 = arith.constant 0 : i32
    return %arg0, %c0_i32, %c0_i32_0, %c0_i32_1 : i32, i32, i32, i32
  }
}

module attributes {stable_mosaic.version = 11 : i64} {
  func.func @bead_kernel(%arg0: i32, %arg1: memref<1x16x16x32xbf16, #tpu.memory_space<vmem>>, %arg2: memref<288x128xbf16, #tpu.memory_space<vmem>>, %arg3: memref<1x128xf32, #tpu.memory_space<vmem>>, %arg4: memref<1x16x16x64xbf16, #tpu.memory_space<vmem>>) attributes {dimension_semantics = [#tpu.dimension_semantics<parallel>], iteration_bounds = array<i64: 2>, scalar_prefetch = 0 : i64, scratch_operands = 0 : i64, tpu.core_type = #tpu.core_type<tc>, window_params = [{transform_indices = @transform_0, window_bounds = array<i64: 1, 16, 16, 32>}, {pipeline_mode = #tpu.pipeline_mode<synchronous>, transform_indices = @transform_1, window_bounds = array<i64: 288, 128>}, {pipeline_mode = #tpu.pipeline_mode<synchronous>, transform_indices = @transform_2, window_bounds = array<i64: 1, 128>}, {transform_indices = @transform_3, window_bounds = array<i64: 1, 16, 16, 64>}]} {
    %c0 = arith.constant 0 : index
    %c0_0 = arith.constant 0 : index
    %c0_1 = arith.constant 0 : index
    %c0_2 = arith.constant 0 : index
    %0 = vector.load %arg1[%c0, %c0_0, %c0_1, %c0_2] : memref<1x16x16x32xbf16, #tpu.memory_space<vmem>>, vector<1x16x16x32xbf16>
    %1 = vector.shape_cast %0 : vector<1x16x16x32xbf16> to vector<16x16x32xbf16>
    %2 = vector.extract_strided_slice %1 {offsets = [1, 0, 0], sizes = [1, 16, 32], strides = [1, 1, 1]} : vector<16x16x32xbf16> to vector<1x16x32xbf16>
    %3 = vector.extract_strided_slice %1 {offsets = [14, 0, 0], sizes = [1, 16, 32], strides = [1, 1, 1]} : vector<16x16x32xbf16> to vector<1x16x32xbf16>
    %4 = tpu.concatenate %2, %1, %3 in 0 : vector<1x16x32xbf16>, vector<16x16x32xbf16>, vector<1x16x32xbf16> -> vector<18x16x32xbf16>
    %5 = vector.extract_strided_slice %4 {offsets = [0, 1, 0], sizes = [18, 1, 32], strides = [1, 1, 1]} : vector<18x16x32xbf16> to vector<18x1x32xbf16>
    %6 = vector.extract_strided_slice %4 {offsets = [0, 14, 0], sizes = [18, 1, 32], strides = [1, 1, 1]} : vector<18x16x32xbf16> to vector<18x1x32xbf16>
    %7 = tpu.concatenate %5, %4, %6 in 1 : vector<18x1x32xbf16>, vector<18x16x32xbf16>, vector<18x1x32xbf16> -> vector<18x18x32xbf16>
    %8 = vector.extract_strided_slice %7 {offsets = [0, 0, 0], sizes = [18, 16, 32], strides = [1, 1, 1]} : vector<18x18x32xbf16> to vector<18x16x32xbf16>
    %9 = vector.extract_strided_slice %7 {offsets = [0, 1, 0], sizes = [18, 16, 32], strides = [1, 1, 1]} : vector<18x18x32xbf16> to vector<18x16x32xbf16>
    %10 = vector.extract_strided_slice %7 {offsets = [0, 2, 0], sizes = [18, 16, 32], strides = [1, 1, 1]} : vector<18x18x32xbf16> to vector<18x16x32xbf16>
    %11 = tpu.concatenate %8, %9, %10 in 2 : vector<18x16x32xbf16>, vector<18x16x32xbf16>, vector<18x16x32xbf16> -> vector<18x16x96xbf16>
    %12 = vector.extract_strided_slice %11 {offsets = [0, 0, 0], sizes = [16, 16, 96], strides = [1, 1, 1]} : vector<18x16x96xbf16> to vector<16x16x96xbf16>
    %13 = vector.extract_strided_slice %11 {offsets = [1, 0, 0], sizes = [16, 16, 96], strides = [1, 1, 1]} : vector<18x16x96xbf16> to vector<16x16x96xbf16>
    %14 = vector.extract_strided_slice %11 {offsets = [2, 0, 0], sizes = [16, 16, 96], strides = [1, 1, 1]} : vector<18x16x96xbf16> to vector<16x16x96xbf16>
    %15 = tpu.concatenate %12, %13, %14 in 2 : vector<16x16x96xbf16>, vector<16x16x96xbf16>, vector<16x16x96xbf16> -> vector<16x16x288xbf16>
    %16 = vector.shape_cast %15 : vector<16x16x288xbf16> to vector<256x288xbf16>
    %c0_3 = arith.constant 0 : index
    %c0_4 = arith.constant 0 : index
    %17 = vector.load %arg2[%c0_3, %c0_4] : memref<288x128xbf16, #tpu.memory_space<vmem>>, vector<288x128xbf16>
    %cst = arith.constant dense<0.000000e+00> : vector<256x128xf32>
    %18 = tpu.matmul %16, %17, %cst {dimension_numbers = #tpu.dot_dimension_numbers<[1], [0], [0], [1], [0, 0, 1, 1], [], []>} : vector<256x288xbf16>, vector<288x128xbf16>, vector<256x128xf32> -> vector<256x128xf32>
    %c0_5 = arith.constant 0 : index
    %c0_6 = arith.constant 0 : index
    %19 = vector.load %arg3[%c0_5, %c0_6] : memref<1x128xf32, #tpu.memory_space<vmem>>, vector<1x128xf32>
    %20 = vector.broadcast %19 : vector<1x128xf32> to vector<256x128xf32>
    %21 = arith.addf %18, %20 : vector<256x128xf32>
    %22 = vector.extract_strided_slice %21 {offsets = [0, 0], sizes = [256, 64], strides = [1, 1]} : vector<256x128xf32> to vector<256x64xf32>
    %cst_7 = arith.constant 0.000000e+00 : f32
    %23 = vector.broadcast %cst_7 : f32 to vector<256x64xf32>
    %24 = arith.cmpf oge, %22, %23 : vector<256x64xf32>
    %cst_8 = arith.constant 0.00999999977 : f32
    %25 = vector.broadcast %cst_8 : f32 to vector<256x64xf32>
    %26 = arith.mulf %25, %22 : vector<256x64xf32>
    %27 = arith.select %24, %22, %26 : vector<256x64xi1>, vector<256x64xf32>
    %28 = vector.extract_strided_slice %21 {offsets = [0, 64], sizes = [256, 64], strides = [1, 1]} : vector<256x128xf32> to vector<256x64xf32>
    %cst_9 = arith.constant 0.000000e+00 : f32
    %29 = vector.broadcast %cst_9 : f32 to vector<256x64xf32>
    %30 = arith.cmpf oge, %28, %29 : vector<256x64xf32>
    %cst_10 = arith.constant 0.00999999977 : f32
    %31 = vector.broadcast %cst_10 : f32 to vector<256x64xf32>
    %32 = arith.mulf %31, %28 : vector<256x64xf32>
    %33 = arith.select %30, %28, %32 : vector<256x64xi1>, vector<256x64xf32>
    %34 = arith.mulf %27, %33 : vector<256x64xf32>
    %35 = arith.addf %34, %33 : vector<256x64xf32>
    %cst_11 = arith.constant 0.000000e+00 : f32
    %36 = vector.broadcast %cst_11 : f32 to vector<256x64xf32>
    %37 = arith.cmpf oge, %35, %36 : vector<256x64xf32>
    %cst_12 = arith.constant 0.00999999977 : f32
    %38 = vector.broadcast %cst_12 : f32 to vector<256x64xf32>
    %39 = arith.mulf %38, %35 : vector<256x64xf32>
    %40 = arith.select %37, %35, %39 : vector<256x64xi1>, vector<256x64xf32>
    %41 = vector.shape_cast %40 : vector<256x64xf32> to vector<16x16x64xf32>
    %42 = arith.truncf %41 : vector<16x16x64xf32> to vector<16x16x64xbf16>
    %c0_13 = arith.constant 0 : index
    %c0_14 = arith.constant 0 : index
    %c0_15 = arith.constant 0 : index
    %c0_16 = arith.constant 0 : index
    %43 = vector.load %arg4[%c0_13, %c0_14, %c0_15, %c0_16] : memref<1x16x16x64xbf16, #tpu.memory_space<vmem>>, vector<1x16x16x64xbf16>
    %44 = vector.shape_cast %43 : vector<1x16x16x64xbf16> to vector<16x16x64xbf16>
    %45 = vector.shape_cast %42 : vector<16x16x64xbf16> to vector<1x16x16x64xbf16>
    tpu.vector_store %arg4[%c0_13, %c0_14, %c0_15, %c0_16], %45 {strides = array<i32>} : memref<1x16x16x64xbf16, #tpu.memory_space<vmem>>, vector<1x16x16x64xbf16>,
    return
  }
  func.func @transform_0(%arg0: i32) -> (i32, i32, i32, i32) {
    %c0_i32 = arith.constant 0 : i32
    %c0_i32_0 = arith.constant 0 : i32
    %c0_i32_1 = arith.constant 0 : i32
    %c0_i32_2 = arith.constant 0 : i32
    return %arg0, %c0_i32, %c0_i32_0, %c0_i32_1 : i32, i32, i32, i32
  }
  func.func @transform_1(%arg0: i32) -> (i32, i32) {
    %c0_i32 = arith.constant 0 : i32
    %c0_i32_0 = arith.constant 0 : i32
    %c0_i32_1 = arith.constant 0 : i32
    return %c0_i32, %c0_i32_0 : i32, i32
  }
  func.func @transform_2(%arg0: i32) -> (i32, i32) {
    %c0_i32 = arith.constant 0 : i32
    %c0_i32_0 = arith.constant 0 : i32
    %c0_i32_1 = arith.constant 0 : i32
    return %c0_i32, %c0_i32_0 : i32, i32
  }
  func.func @transform_3(%arg0: i32) -> (i32, i32, i32, i32) {
    %c0_i32 = arith.constant 0 : i32
    %c0_i32_0 = arith.constant 0 : i32
    %c0_i32_1 = arith.constant 0 : i32
    %c0_i32_2 = arith.constant 0 : i32
    return %arg0, %c0_i32, %c0_i32_0, %c0_i32_1 : i32, i32, i32, i32
  }
}

</mosaic_0001>

<bundles_post_ra>
// kernel: encode_pallas.4
= control target key start
LH: loop header
LB: loop body
LE: loop exit
PB: predicated region body
PF: predicated region fallthrough
CT: control target
= control target key end

     0   :  { %8 = vsyncpa [#allocation3], 0  ;;  %s3604_s0 = inlined_call_operand.hbm [shape: bf16[2,16,16,2], index: 0, kind: input, shape index: {}]   ;;  %s3605_s1 = inlined_call_operand.hbm [shape: bf16[18,32], index: 1, kind: input, shape index: {}]   ;;  %s3606_s2 = inlined_call_operand.hbm [shape: f32[1,32], index: 2, kind: input, shape index: {}]   ;;  %s3607_s3 = inlined_call_operand.hbm [shape: bf16[2,16,16,16], index: 3, kind: output, shape index: {}]  }
   0x1   :  { %10 = vsyncpa [#allocation3 + $0x1], 0 }
   0x2   :  { %11 = vsyncpa [#allocation6], 0 }
   0x3   :  { %12 = vsyncpa [#allocation4], 0 }
   0x4   :  { %14 = vsyncpa [#allocation4 + $0x1], 0  ;;  %s2625_s12 = smov 0   ;;  %s2627_s13 = smov 0  }
   0x5   :  { %s2629_s14 = smov 0   ;;  %s2631_s15 = smov 0  }
   0x6 LB: > { %s2646_s16 = sadd.s32 4294967295, %s2591_s15   ;;  %s2099_s17 = sadd.s32 4294967294, %s2591_s15   ;;  %s2591_s15 = sphi %s2631_s15, %s3629_s15   ;;  %s2587_s14 = sphi %s2629_s14, %s3628_s14   ;;  %s2583_s13 = sphi %s2627_s13, %s3627_s13   ;;  %s2579_s12 = sphi %s2625_s12, %s3626_s12  }
   0x7   : > { %p40_p0 = scmp.ne.s32.totalorder %s2583_s13, %s2579_s12  ;;  %p3608_p1 = scmp.eq.s32.totalorder %s2646_s16, 0 }
   0x8   : > { %p112_p3 = scmp.eq.s32.totalorder %s2099_s17, 1  ;;  %p2100_p5 = scmp.ge.s32.totalorder %s2591_s15, 1 }
   0x9   : > { %p2655_p4 = por %p3608_p1, %p40_p0  ;;  %p119_p7 = scmp.lt.s32.totalorder %s2591_s15, 3 }
   0xa   : > { %p2660_p6 = por %p112_p3, %p40_p0  ;;  %s2593_s21 = smov [#allocation5]  }
   0xb   : > { %s3611_s18 = scalar_select %p2655_p4, 1, 0 }
   0xc   : > { %s3612_s19 = scalar_select %p2660_p6, 1, 0 }
   0xd   : > { %p2665_p8 = pnand %p2100_p5, %p119_p7  ;;  %s131_s22 = sshll.u32 %s2593_s21, 4  ;;  %s2669_s22 = int_to_ptr.vmem [resolvable:$true] %s131_s22 }
   0xe   : > { %s2594_s24 = smov [#allocation7]   ;;  %s2435_s28 = scalar_lea.hbm %s3605_s1, 192 }
   0xf   : > { %p2322_p9 = pneg %p2665_p8  ;;  %s145_s25 = sshll.u32 %s2594_s24, 4  ;;  %s2680_s25 = int_to_ptr.vmem [resolvable:$true] %s145_s25 }
  0x10   : > { %p2436_p12 = scmp.ne.s32.totalorder %s3605_s1, %s2435_s28  ;;  %p2442_p5 = scmp.lt.u32.totalorder %s2435_s28, %s3605_s1 }
  0x11   : > { %p2676_p11 = pnand %p2322_p9, %p3608_p1 }
  0x13   : > { %p2437_p13 = pneg %p2676_p11 }
  0x15   : > { %p2438_p0 = pnand %p2437_p13, %p2436_p12 }
  0x17   : > { %p2439_p3 = pneg %p2438_p0 }
  0x19   : > { %p2444_p7 = pnand %p2442_p5, %p2439_p3 }
  0x1b   : > { %2447 = shalt.err (!%p2444_p7)
}
  0x1c   : > { %s2448_s6 = scalar_lea.vmem %s2669_s22, 192  ;;  %p2456_p2 = scmp.lt.s32.totalorder %s2669_s22, %s2669_s22 }
  0x1d   : > { %p2449_p9 = scmp.ne.s32.totalorder %s2669_s22, %s2448_s6  ;;  %p2457_p12 = scmp.lt.s32.totalorder %s2448_s6, %s2448_s6 }
  0x1f   : > { %p2451_p10 = pnand %p2449_p9, %p2437_p13  ;;  %p2458_p0 = por %p2457_p12, %p2456_p2 }
  0x21   : > { %p2452_p1 = pneg %p2451_p10 }
  0x23   : > { %p2459_p6 = pnand %p2458_p0, %p2452_p1 }
  0x25   : > { %2462 = shalt.err (!%p2459_p6)
}
  0x26   : > { %s2595_s7 = smov 64   ;;  %s2596_s8 = smov 4  }
  0x27   : > { %2325 = dma.hbm_to_vmem [thread:$0]  (!%p2676_p11), %s3605_s1, 192, %s2669_s22, [#allocation6], %s2595_s7, %s2595_s7, %s2596_s8  }
  0x28   : > { %s2463_s21 = scalar_lea.hbm %s3606_s2, 16 }
  0x29   : > { %p2464_p1 = scmp.ne.s32.totalorder %s3606_s2, %s2463_s21  ;;  %p2470_p10 = scmp.lt.u32.totalorder %s2463_s21, %s3606_s2 }
  0x2b   : > { %p2466_p2 = pnand %p2464_p1, %p2437_p13 }
  0x2d   : > { %p2467_p6 = pneg %p2466_p2 }
  0x2f   : > { %p2472_p3 = pnand %p2470_p10, %p2467_p6 }
  0x31   : > { %2475 = shalt.err (!%p2472_p3)
}
  0x32   : > { %s2476_s22 = scalar_lea.vmem %s2680_s25, 16  ;;  %s2483_s29 = scalar_lea.vmem %s2680_s25, 32 }
  0x33   : > { %p2477_p5 = scmp.ne.s32.totalorder %s2680_s25, %s2476_s22  ;;  %p2484_p12 = scmp.lt.s32.totalorder %s2680_s25, %s2680_s25 }
  0x34   : > { %p2485_p0 = scmp.lt.s32.totalorder %s2483_s29, %s2476_s22 }
  0x35   : > { %p2479_p7 = pnand %p2477_p5, %p2437_p13 }
  0x36   : > { %p2486_p1 = por %p2485_p0, %p2484_p12 }
  0x37   : > { %p2480_p9 = pneg %p2479_p7 }
  0x39   : > { %p2487_p2 = pnand %p2486_p1, %p2480_p9 }
  0x3b   : > { %2490 = shalt.err (!%p2487_p2)
}
  0x3c   : > { %2328 = dma.hbm_to_vmem [thread:$0]  (!%p2676_p11), %s3606_s2, 16, %s2680_s25, [#allocation6]  }
  0x3d   : > { %s2739_s5 = sadd.s32 1, %s2591_s15   ;;  %s27_s23 = sadd.s32 1, %s2587_s14 }
  0x3e   : > { %s24_s6 = ssub.s32 %s2591_s15, %s2739_s5  ;;  %p34_p13 = scmp.ne.s32.totalorder %s2587_s14, %s2583_s13 }
  0x3f   : > { %p25_p6 = scmp.eq.s32.totalorder %s24_s6, 0  ;;  %p35_p10 = scmp.eq.s32.totalorder %s2591_s15, 0 }
  0x40   : > { %p3615_p3 = scmp.eq.s32.totalorder %s2646_s16, 1  ;;  %p2339_p7 = scmp.lt.s32.totalorder %s2591_s15, 2 }
  0x41   : > { %s2755_s10 = scalar_select %p25_p6, %s2587_s14, %s27_s23  }
  0x42   : > { %p2749_p5 = por %p3615_p3, %p34_p13  ;;  %p36_p9 = por %p35_p10, %p34_p13 }
  0x43   : > { %s156_s11 = sand.u32 1, %s2587_s14   ;;  %s2216_s25 = sshll.u32 %s2591_s15, 11 }
  0x44   : > { %s3616_s9 = scalar_select %p2749_p5, 1, 0 }
  0x45   : > { %s2104_s17 = sshll.u32 %s156_s11, 7  ;;  %s2762_s26 = scalar_lea.hbm %s3604_s0, %s2216_s25 }
  0x46   : > { %s160_s27 = scalar_lea.vmem [#allocation2], %s2104_s17  ;;  %p2766_p11 = pnand %p2339_p7, %p36_p9 }
  0x47   : > { %s167_s28 = sshll.u32 %s160_s27, 4  ;;  %s2770_s29 = scalar_lea.sflag [#allocation3], %s156_s11  ;;  %s2764_s28 = int_to_ptr.vmem [resolvable:$true] %s167_s28 }
  0x48   : > { %s2491_s30 = scalar_lea.hbm %s2762_s26, 2048  ;;  %p2493_p0 = pneg %p2766_p11 }
  0x49   : > { %p2492_p12 = scmp.ne.s32.totalorder %s2762_s26, %s2491_s30  ;;  %s2496_s6 = scalar_lea.hbm %s3604_s0, 4096 }
  0x4a   : > { %p2497_p13 = scmp.lt.u32.totalorder %s2762_s26, %s3604_s0  ;;  %p2498_p6 = scmp.lt.u32.totalorder %s2496_s6, %s2491_s30 }
  0x4b   : > { %p2494_p1 = pnand %p2493_p0, %p2492_p12  ;;  %p2500_p3 = scmp.lt.u32.totalorder %s2491_s30, %s2762_s26 }
  0x4c   : > { %p2499_p10 = por %p2498_p6, %p2497_p13 }
  0x4d   : > { %p2495_p2 = pneg %p2494_p1 }
  0x4e   : > { %p2501_p7 = por %p2500_p3, %p2499_p10 }
  0x50   : > { %p2502_p9 = pnand %p2501_p7, %p2495_p2 }
  0x52   : > { %2505 = shalt.err (!%p2502_p9)
}
  0x53   : > { %s2506_s11 = scalar_lea.vmem %s2764_s28, 2048  ;;  %s2597_s21 = smov [#allocation2]  }
  0x54   : > { %p2507_p12 = scmp.ne.s32.totalorder %s2764_s28, %s2506_s11  ;;  %s2511_s24 = sshll.u32 %s2597_s21, 4  ;;  %s2512_s24 = int_to_ptr.vmem [resolvable:$false] %s2511_s24 }
  0x55   : > { %s2513_s27 = scalar_lea.vmem %s2512_s24, 4096  ;;  %p2514_p4 = scmp.lt.s32.totalorder %s2764_s28, %s2512_s24 }
  0x56   : > { %p2509_p1 = pnand %p2507_p12, %p2493_p0  ;;  %p2515_p13 = scmp.lt.s32.totalorder %s2513_s27, %s2506_s11 }
  0x58   : > { %p2510_p5 = pneg %p2509_p1  ;;  %p2516_p6 = por %p2515_p13, %p2514_p4 }
  0x5a   : > { %p2517_p10 = pnand %p2516_p6, %p2510_p5 }
  0x5c   : > { %2520 = shalt.err (!%p2517_p10)
}
  0x5d   : > { %2332 = dma.hbm_to_vmem [thread:$0]  (!%p2766_p11), %s2762_s26, 2048, %s2764_s28, %s2770_s29, %s2595_s7, %s2595_s7, %s2596_s8  }
  0x5e   : > { %179 = sbr.rel (%p2665_p8) target bundleno = 819 (0x333), region = 32  ;;  %s2804_s30 = sand.u32 (!%p2665_p8), 1, %s2583_s13  }
  0x5f   : > { %s2108_s4 = sshll.u32 (!%p2665_p8), %s2804_s30, 7  ;;  %s182_s23 = scalar_lea.sflag (!%p2665_p8), [#allocation3], %s2804_s30 }
  0x60   : > { %s2810_s22 = scalar_lea.vmem (!%p2665_p8), [#allocation2], %s2108_s4  ;;  %p3618_p4 = scmp.ne.s32.totalorder (!%p2665_p8), %s3611_s18, 0 }
  0x65   : > { %2566 = dma.done.wait (%p3618_p4), %s182_s23, 2048  }
  0x66   : > { %2568 = vsyncadd (%p3618_p4), %s182_s23, 4294965248  ;;  %p3619_p5 = scmp.eq.s32.totalorder %s2646_s16, 0 }
  0x68   : > { %2570 = dma.done.wait (%p3619_p5), [#allocation6], 208   ;;  %p3620_p8 = pmov %p3619_p5 }
  0x69   : > { %vm649_vm0 = vcmask 1040384   ;;  %vm650_vm1 = vsmask.f32 256  ;;  %v233_v0 = vld [vmem:[%s2810_s22 + $0x40] sm:$0xf]  ;;  %vm941_vm2 = vcmask 1046528  }
  0x6a   : > { %2572 = vsyncadd (%p3620_p8), [#allocation6], 4294967088  ;;  %v234_v1 = vld [vmem:[%s2810_s22 + $0x44] sm:$0xf]  ;;  %v217_v2 = vld [vmem:[%s2810_s22] sm:$0xf]  ;;  %v2120_v3 = vcombine.low %v233_v0, %v233_v0 }
  0x6b   : > { %v2136_v4 = vcombine.low %v233_v0, %v234_v1  ;;  %v2152_v5 = vcombine.low %v234_v1, %v234_v1  ;;  %v218_v6 = vld [vmem:[%s2810_s22 + $0x4] sm:$0xf]  ;;  %v2113_v7 = vcombine.low %v217_v2, %v217_v2  ;;  %v235_v8 = vld [vmem:[%s2810_s22 + $0x48] sm:$0xf]  ;;  %v236_v9 = vld [vmem:[%s2810_s22 + $0x4c] sm:$0xf] }
  0x6c   : > { %v2129_v10 = vcombine.low %v217_v2, %v218_v6  ;;  %v2145_v11 = vcombine.low %v218_v6, %v218_v6  ;;  %v2121_v12 = vcombine.low %v235_v8, %v235_v8  ;;  %v2137_v13 = vcombine.low %v235_v8, %v236_v9  ;;  %vm2828_vm3 = vmand %vm649_vm0, %vm650_vm1  ;;  %v219_v31 = vld [vmem:[%s2810_s22 + $0x8] sm:$0xf]  ;;  %v220_v35 = vld [vmem:[%s2810_s22 + $0xc] sm:$0xf]  ;;  %s2598_s18 = smov 4   ;;  %s2599_s20 = smov 2  }
  0x6d   : > { %v322_v14 = vshrl.u32 %v2120_v3, 16  ;;  %v466_v15 = vshrl.u32 %v2136_v4, 16  ;;  %v469_v16 = vshll.u32 %v2136_v4, 16  ;;  %v602_v17 = vshll.u32 %v2152_v5, 16  ;;  %v237_v49 = vld [vmem:[%s2810_s22 + $0x50] sm:$0xf] }
  0x6e   : > { %v301_v19 = vshrl.u32 %v2113_v7, 16  ;;  %v417_v20 = vshrl.u32 %v2129_v10, 16  ;;  %v420_v21 = vshll.u32 %v2129_v10, 16  ;;  %v574_v22 = vshll.u32 %v2145_v11, 16  ;;  %v238_v53 = vld [vmem:[%s2810_s22 + $0x54] sm:$0xf] }
  0x6f   : > { %v468_v23 = vrot.slane %v466_v15, 7  ;;  %v604_v24 = vrot.slane %v602_v17, 3  ;;  %v325_v25 = vshrl.u32 %v2121_v12, 16  ;;  %v473_v26 = vshrl.u32 %v2137_v13, 16  ;;  %v221_v59 = vld [vmem:[%s2810_s22 + $0x10] sm:$0xf] }
  0x70   : > { %v419_v27 = vrot.slane %v417_v20, 7  ;;  %v576_v28 = vrot.slane %v574_v22, 3  ;;  %v476_v29 = vshll.u32 %v2137_v13, 16  ;;  %v2153_v30 = vcombine.low %v236_v9, %v236_v9  ;;  %v222_v60 = vld [vmem:[%s2810_s22 + $0x14] sm:$0xf]  ;;  %s2600_s7 = smov 6  }
  0x71   : > { %v471_v32 = vor.u32 %v469_v16, %v468_v23  ;;  %v2835_v33 = vsel %vm2828_vm3, %v468_v23, %v604_v24  ;;  %v475_v34 = vrot.slane %v473_v26, 7  ;;  %v2112_v36 = vcombine.low %v219_v31, %v219_v31  ;;  %s2601_s8 = smov 12   ;;  %s2602_s26 = smov 112  }
  0x72   : > { %v967_v37 = vrot.slane %v2835_v33, 1  ;;  %v422_v38 = vor.u32 %v420_v21, %v419_v27  ;;  %v2841_v39 = vsel %vm2828_vm3, %v419_v27, %v576_v28  ;;  %v606_v40 = vshll.u32 %v2153_v30, 16  ;;  %s3459_s28 = scalar_lea.vmem [#allocation8], %s2108_s4  ;;  %s2249_s29 = sshll.u32 %s2646_s16, 11 }
  0x73   : > { %v2845_v41 = vsel %vm2828_vm3, %v322_v14, %v471_v32  ;;  %v946_v42 = vrot.slane %v2841_v39, 1  ;;  %v478_v43 = vor.u32 %v476_v29, %v475_v34  ;;  %v298_v44 = vshrl.u32 %v2112_v36, 16  ;;  %s2007_s6 = sshll.u32 %s3459_s28, 4  ;;  %s3553_s11 = scalar_lea.hbm %s3607_s3, %s2249_s29  ;;  %s3557_s6 = int_to_ptr.vmem [resolvable:$true] %s2007_s6 }
  0x74   : > { %v966_v45 = vrot.slane %v2845_v41, 1  ;;  %v2851_v46 = vsel %vm2828_vm3, %v301_v19, %v422_v38  ;;  %v608_v47 = vrot.slane %v606_v40, 3  ;;  %v2128_v48 = vcombine.low %v219_v31, %v220_v35  ;;  %s1994_s16 = scalar_lea.sflag [#allocation4], %s2804_s30  ;;  %s2521_s21 = scalar_lea.vmem %s3557_s6, 2048 }
  0x75   : > { %v945_v50 = vrot.slane %v2851_v46, 1  ;;  %v2857_v51 = vsel %vm2828_vm3, %v325_v25, %v478_v43  ;;  %v2144_v52 = vcombine.low %v220_v35, %v220_v35  ;;  %v2122_v54 = vcombine.low %v237_v49, %v237_v49  ;;  %p2522_p11 = scmp.ne.s32.totalorder %s3557_s6, %s2521_s21  ;;  %p3623_p0 = scmp.ne.s32.totalorder %s3616_s9, 0 }
  0x76   : > { %v968_v55 = vsel %vm941_vm2, %v966_v45, %v967_v37  ;;  %v2863_v56 = vsel %vm2828_vm3, %v475_v34, %v608_v47  ;;  %v969_v57 = vrot.slane %v2857_v51, 1  ;;  %v410_v58 = vshrl.u32 %v2128_v48, 16  ;;  %s2603_s24 = smov [#allocation8]  }
  0x77   : > { %1006 = vrot.lane.b32.xlu1 %v968_v55, %s2598_s18  ;;  %v947_v61 = vsel %vm941_vm2, %v945_v50, %v946_v42  ;;  %v970_v62 = vrot.slane %v2863_v56, 1  ;;  %v413_v63 = vshll.u32 %v2128_v48, 16  ;;  %v570_v0 = vshll.u32 %v2144_v52, 16  ;;  %p2523_p2 = pnand %p2522_p11, %p3623_p0  ;;  %s2525_s27 = sshll.u32 %s2603_s24, 4  ;;  %s2526_s27 = int_to_ptr.vmem [resolvable:$false] %s2525_s27 }
  0x78   : > { %992 = vrot.lane.b32.xlu0 %v947_v61, %s2598_s18  ;;  %v412_v1 = vrot.slane %v410_v58, 7  ;;  %v328_v2 = vshrl.u32 %v2122_v54, 16  ;;  %v2138_v3 = vcombine.low %v237_v49, %v238_v53  ;;  %v2154_v4 = vcombine.low %v238_v53, %v238_v53  ;;  %s2527_s4 = scalar_lea.vmem %s2526_s27, 4096  ;;  %p2528_p7 = scmp.lt.s32.totalorder %s3557_s6, %s2526_s27 }
  0x79   : > { %v971_v5 = vsel %vm941_vm2, %v969_v57, %v970_v62  ;;  %v572_v6 = vrot.slane %v570_v0, 3  ;;  %v2114_v7 = vcombine.low %v221_v59, %v221_v59  ;;  %v2130_v8 = vcombine.low %v221_v59, %v222_v60  ;;  %p2524_p3 = pneg %p2523_p2  ;;  %p2529_p9 = scmp.lt.s32.totalorder %s2527_s4, %s2521_s21 }
  0x7a   : > { %vm684_vm4 = vsmask.f32 7424  ;;  %v415_v9 = vor.u32 %v413_v63, %v412_v1  ;;  %v480_v10 = vshrl.u32 %v2138_v3, 16  ;;  %v483_v11 = vshll.u32 %v2138_v3, 16 }
  0x7b   : > { %v610_v12 = vshll.u32 %v2154_v4, 16  ;;  %1008 = vrot.lane.b32.xlu1 %v971_v5, %s2598_s18  ;;  %v668_v13 = vsel %vm2828_vm3, %v412_v1, %v572_v6  ;;  %v304_v14 = vshrl.u32 %v2114_v7, 16  ;;  %v424_v15 = vshrl.u32 %v2130_v8, 16  ;;  %v239_v6 = vld [vmem:[%s2810_s22 + $0x58] sm:$0xf]  ;;  %p2530_p12 = por %p2529_p9, %p2528_p7 }
  0x7c   : > { %v427_v16 = vshll.u32 %v2130_v8, 16  ;;  %v2878_v17 = vsel %vm2828_vm3, %v298_v44, %v415_v9  ;;  %v943_v19 = vrot.slane %v668_v13, 1  ;;  %v482_v20 = vrot.slane %v480_v10, 7  ;;  %v240_v7 = vld [vmem:[%s2810_s22 + $0x5c] sm:$0xf] }
  0x7d   : > { %v612_v21 = vrot.slane %v610_v12, 3  ;;  %v942_v22 = vrot.slane %v2878_v17, 1  ;;  %v426_v23 = vrot.slane %v424_v15, 7  ;;  %v2146_v24 = vcombine.low %v222_v60, %v222_v60  ;;  %p2531_p1 = pnand %p2530_p12, %p2524_p3 }
  0x7e   : > { %v686_v25 = vshrl.u32 %v2878_v17, 16  ;;  %v485_v26 = vor.u32 %v483_v11, %v482_v20  ;;  %v688_v28 = vshll.u32 %v2878_v17, 16  ;;  %v693_v29 = vshll.u32 %v668_v13, 16 }
  0x7f   : > { %v678_v27 = vsel %vm2828_vm3, %v482_v20, %v612_v21  ;;  %v944_v30 = vsel %vm941_vm2, %v942_v22, %v943_v19  ;;  %v429_v32 = vor.u32 %v427_v16, %v426_v23  ;;  %v578_v34 = vshll.u32 %v2146_v24, 16  ;;  %v223_v21 = vld [vmem:[%s2810_s22 + $0x18] sm:$0xf]  ;;  %v224_v22 = vld [vmem:[%s2810_s22 + $0x1c] sm:$0xf] }
  0x80   : > { %v973_v31 = vrot.slane %v678_v27, 1  ;;  %990 = vrot.lane.b32.xlu0 %v944_v30, %s2598_s18  ;;  %v2889_v35 = vsel %vm2828_vm3, %v328_v2, %v485_v26  ;;  %v690_v36 = vrot.slane %v688_v28, 1  ;;  %v695_v37 = vrot.slane %v693_v29, 1 }
  0x81   : > { %v698_v38 = vshrl.u32 %v2851_v46, 16  ;;  %v972_v40 = vrot.slane %v2889_v35, 1  ;;  %v580_v42 = vrot.slane %v578_v34, 3  ;;  %v2895_v43 = vsel %vm2828_vm3, %v304_v14, %v429_v32 }
  0x82   : > { %v700_v44 = vshll.u32 %v2851_v46, 16  ;;  %v948_v45 = vrot.slane %v2895_v43, 1  ;;  %v691_v47 = vor.u32 %v690_v36, %v686_v25  ;;  %v705_v48 = vshll.u32 %v2841_v39, 16 }
  0x83   : > { %v794_v49 = vshrl.u32 %v2857_v51, 16  ;;  %v974_v50 = vsel %vm941_vm2, %v972_v40, %v973_v31  ;;  %v670_v52 = vsel %vm2828_vm3, %v426_v23, %v580_v42  ;;  %v796_v54 = vshll.u32 %v2857_v51, 16 }
  0x84   : > { %v702_v53 = vrot.slane %v700_v44, 1  ;;  %1010 = vrot.lane.b32.xlu1 %v974_v50, %s2598_s18  ;;  %v949_v55 = vrot.slane %v670_v52, 1  ;;  %v696_v57 = vsel %vm684_vm4, %v691_v47, %v695_v37  ;;  %v707_v58 = vrot.slane %v705_v48, 1  ;;  %v241_v37 = vld [vmem:[%s2810_s22 + $0x60] sm:$0xf] }
  0x85   : > { %v801_v39 = vshll.u32 %v2863_v56, 16  ;;  %v798_v60 = vrot.slane %v796_v54, 1  ;;  %v782_v61 = vshrl.u32 %v2845_v41, 16  ;;  %v784_v62 = vshll.u32 %v2845_v41, 16 }
  0x86   : > { %v703_v59 = vor.u32 %v702_v53, %v698_v38  ;;  %v950_v63 = vsel %vm941_vm2, %v948_v45, %v949_v55  ;;  %v789_v1 = vshll.u32 %v2835_v33, 16  ;;  %v806_v2 = vshrl.u32 %v2889_v35, 16  ;;  %v242_v38 = vld [vmem:[%s2810_s22 + $0x64] sm:$0xf] }
  0x87   : > { %v803_v0 = vrot.slane %v801_v39, 1  ;;  %994 = vrot.lane.b32.xlu0 %v950_v63, %s2598_s18  ;;  %v799_v4 = vor.u32 %v798_v60, %v794_v49  ;;  %v786_v5 = vrot.slane %v784_v62, 1  ;;  %v808_v56 = vshll.u32 %v2889_v35, 16 }
  0x88   : > { %v708_v3 = vsel %vm684_vm4, %v703_v59, %v707_v58  ;;  %877 = vrot.lane.b32.xlu1 %v696_v57, %s2599_s20  ;;  %v791_v8 = vrot.slane %v789_v1, 1  ;;  %v813_v9 = vshll.u32 %v678_v27, 16  ;;  %v710_v33 = vshrl.u32 %v2895_v43, 16  ;;  %v225_v57 = vld [vmem:[%s2810_s22 + $0x20] sm:$0xf] }
  0x89   : > { %v712_v10 = vshll.u32 %v2895_v43, 16  ;;  %v804_v11 = vsel %vm684_vm4, %v799_v4, %v803_v0  ;;  %v787_v12 = vor.u32 %v786_v5, %v782_v61  ;;  %v810_v13 = vrot.slane %v808_v56, 1 }
  0x8a   : > { %v717_v14 = vshll.u32 %v670_v52, 16  ;;  %v815_v15 = vrot.slane %v813_v9, 1  ;;  %v2123_v19 = vcombine.low %v239_v6, %v239_v6  ;;  %v2139_v20 = vcombine.low %v239_v6, %v240_v7 }
  0x8b   : > { %v714_v16 = vrot.slane %v712_v10, 1  ;;  %879 = vrot.lane.b32.xlu0 %v708_v3, %s2599_s20  ;;  %v792_v23 = vsel %vm684_vm4, %v787_v12, %v791_v8  ;;  %v811_v24 = vor.u32 %v810_v13, %v806_v2  ;;  %v2155_v26 = vcombine.low %v240_v7, %v240_v7  ;;  %v226_v8 = vld [vmem:[%s2810_s22 + $0x24] sm:$0xf] }
  0x8c   : > { %v719_v25 = vrot.slane %v717_v14, 1  ;;  %895 = vrot.lane.b32.xlu1 %v804_v11, %s2599_s20  ;;  %v331_v28 = vshrl.u32 %v2123_v19, 16  ;;  %v487_v29 = vshrl.u32 %v2139_v20, 16  ;;  %v490_v30 = vshll.u32 %v2139_v20, 16 }
  0x8d   : > { %v715_v27 = vor.u32 %v714_v16, %v710_v33  ;;  %v816_v31 = vsel %vm684_vm4, %v811_v24, %v815_v15  ;;  %v614_v32 = vshll.u32 %v2155_v26, 16  ;;  %v2115_v34 = vcombine.low %v223_v21, %v223_v21 }
  0x8e   : > { %v2131_v36 = vcombine.low %v223_v21, %v224_v22  ;;  %v489_v42 = vrot.slane %v487_v29, 7  ;;  %v2147_v44 = vcombine.low %v224_v22, %v224_v22  ;;  %v2124_v45 = vcombine.low %v241_v37, %v241_v37 }
  0x8f   : > { %v720_v40 = vsel %vm684_vm4, %v715_v27, %v719_v25  ;;  %893 = vrot.lane.b32.xlu0 %v792_v23, %s2599_s20  ;;  %v616_v47 = vrot.slane %v614_v32, 3  ;;  %v307_v48 = vshrl.u32 %v2115_v34, 16  ;;  %v2140_v55 = vcombine.low %v241_v37, %v242_v38 }
  0x90   : > { %v431_v49 = vshrl.u32 %v2131_v36, 16  ;;  %v434_v50 = vshll.u32 %v2131_v36, 16  ;;  %897 = vrot.lane.b32.xlu1 %v816_v31, %s2599_s20  ;;  %v492_v52 = vor.u32 %v490_v30, %v489_v42  ;;  %v582_v53 = vshll.u32 %v2147_v44, 16 }
  0x91   : > { %v334_v54 = vshrl.u32 %v2124_v45, 16  ;;  %v679_v58 = vsel %vm2828_vm3, %v489_v42, %v616_v47  ;;  %v2156_v59 = vcombine.low %v242_v38, %v242_v38  ;;  %v2116_v60 = vcombine.low %v225_v57, %v225_v57 }
  0x92   : > { %v433_v39 = vrot.slane %v431_v49, 7  ;;  %v2938_v61 = vsel %vm2828_vm3, %v331_v28, %v492_v52  ;;  %v825_v62 = vshll.u32 %v679_v58, 16  ;;  %v584_v63 = vrot.slane %v582_v53, 3  ;;  %v243_v52 = vld [vmem:[%s2810_s22 + $0x68] sm:$0xf] }
  0x93   : > { %v494_v0 = vshrl.u32 %v2140_v55, 16  ;;  %881 = vrot.lane.b32.xlu0 %v720_v40, %s2599_s20  ;;  %v818_v1 = vshrl.u32 %v2938_v61, 16  ;;  %v820_v2 = vshll.u32 %v2938_v61, 16  ;;  %v497_v4 = vshll.u32 %v2140_v55, 16  ;;  %v244_v53 = vld [vmem:[%s2810_s22 + $0x6c] sm:$0xf] }
  0x94   : > { %v436_v3 = vor.u32 %v434_v50, %v433_v39  ;;  %v827_v5 = vrot.slane %v825_v62, 1  ;;  %v671_v56 = vsel %vm2828_vm3, %v433_v39, %v584_v63  ;;  %v618_v7 = vshll.u32 %v2156_v59, 16 }
  0x95   : > { %v496_v6 = vrot.slane %v494_v0, 7  ;;  %v822_v9 = vrot.slane %v820_v2, 1  ;;  %v729_v10 = vshll.u32 %v671_v56, 16  ;;  %v310_v11 = vshrl.u32 %v2116_v60, 16 }
  0x96   : > { %v2948_v33 = vsel %vm2828_vm3, %v307_v48, %v436_v3  ;;  %v620_v15 = vrot.slane %v618_v7, 3  ;;  %v2132_v20 = vcombine.low %v225_v57, %v226_v8  ;;  %v2148_v21 = vcombine.low %v226_v8, %v226_v8  ;;  %v227_v3 = vld [vmem:[%s2810_s22 + $0x28] sm:$0xf] }
  0x97   : > { %v722_v12 = vshrl.u32 %v2948_v33, 16  ;;  %v724_v13 = vshll.u32 %v2948_v33, 16  ;;  %v499_v14 = vor.u32 %v497_v4, %v496_v6  ;;  %v823_v16 = vor.u32 %v822_v9, %v818_v1  ;;  %v228_v4 = vld [vmem:[%s2810_s22 + $0x2c] sm:$0xf] }
  0x98   : > { %v731_v19 = vrot.slane %v729_v10, 1  ;;  %v680_v24 = vsel %vm2828_vm3, %v496_v6, %v620_v15  ;;  %v975_v25 = vrot.slane %v2938_v61, 1  ;;  %v438_v31 = vshrl.u32 %v2132_v20, 16 }
  0x99   : > { %v726_v22 = vrot.slane %v724_v13, 1  ;;  %v2954_v23 = vsel %vm2828_vm3, %v334_v54, %v499_v14  ;;  %v828_v26 = vsel %vm684_vm4, %v823_v16, %v827_v5  ;;  %v837_v29 = vshll.u32 %v680_v24, 16  ;;  %v245_v16 = vld [vmem:[%s2810_s22 + $0x70] sm:$0xf] }
  0x9a   : > { %v830_v27 = vshrl.u32 %v2954_v23, 16  ;;  %v832_v28 = vshll.u32 %v2954_v23, 16  ;;  %899 = vrot.lane.b32.xlu1 %v828_v26, %s2599_s20  ;;  %v441_v32 = vshll.u32 %v2132_v20, 16  ;;  %v586_v34 = vshll.u32 %v2148_v21, 16 }
  0x9b   : > { %v727_v30 = vor.u32 %v726_v22, %v722_v12  ;;  %v839_v37 = vrot.slane %v837_v29, 1  ;;  %v976_v38 = vrot.slane %v679_v58, 1  ;;  %v951_v40 = vrot.slane %v2948_v33, 1 }
  0x9c   : > { %v834_v36 = vrot.slane %v832_v28, 1  ;;  %v440_v44 = vrot.slane %v438_v31, 7  ;;  %v588_v45 = vrot.slane %v586_v34, 3  ;;  %v952_v47 = vrot.slane %v671_v56, 1 }
  0x9d   : > { %v732_v42 = vsel %vm684_vm4, %v727_v30, %v731_v19  ;;  %v978_v49 = vrot.slane %v2954_v23, 1  ;;  %v979_v50 = vrot.slane %v680_v24, 1  ;;  %v977_v57 = vsel %vm941_vm2, %v975_v25, %v976_v38  ;;  %v246_v19 = vld [vmem:[%s2810_s22 + $0x74] sm:$0xf] }
  0x9e   : > { %883 = vrot.lane.b32.xlu0 %v732_v42, %s2599_s20  ;;  %v835_v48 = vor.u32 %v834_v36, %v830_v27  ;;  %v443_v54 = vor.u32 %v441_v32, %v440_v44  ;;  %v2971_v55 = vsel %vm2828_vm3, %v440_v44, %v588_v45  ;;  %v2125_v58 = vcombine.low %v243_v52, %v243_v52 }
  0x9f   : > { %v741_v59 = vshll.u32 %v2971_v55, 16  ;;  %v953_v60 = vsel %vm941_vm2, %v951_v40, %v952_v47  ;;  %v980_v62 = vsel %vm941_vm2, %v978_v49, %v979_v50  ;;  %v955_v0 = vrot.slane %v2971_v55, 1  ;;  %v229_v47 = vld [vmem:[%s2810_s22 + $0x30] sm:$0xf] }
  0xa0   : > { %v840_v39 = vsel %vm684_vm4, %v835_v48, %v839_v37  ;;  %v2981_v63 = vsel %vm2828_vm3, %v310_v11, %v443_v54  ;;  %v2141_v1 = vcombine.low %v243_v52, %v244_v53  ;;  %v2157_v2 = vcombine.low %v244_v53, %v244_v53  ;;  %v230_v48 = vld [vmem:[%s2810_s22 + $0x34] sm:$0xf] }
  0xa1   : > { %901 = vrot.lane.b32.xlu1 %v840_v39, %s2599_s20  ;;  %v734_v5 = vshrl.u32 %v2981_v63, 16  ;;  %v736_v56 = vshll.u32 %v2981_v63, 16  ;;  %v743_v6 = vrot.slane %v741_v59, 1  ;;  %v337_v7 = vshrl.u32 %v2125_v58, 16 }
  0xa2   : > { %v501_v8 = vshrl.u32 %v2141_v1, 16  ;;  %v504_v9 = vshll.u32 %v2141_v1, 16  ;;  %v622_v10 = vshll.u32 %v2157_v2, 16  ;;  %v2117_v12 = vcombine.low %v227_v3, %v227_v3 }
  0xa3   : > { %v738_v11 = vrot.slane %v736_v56, 1  ;;  %v954_v13 = vrot.slane %v2981_v63, 1  ;;  %v2133_v14 = vcombine.low %v227_v3, %v228_v4  ;;  %v2149_v15 = vcombine.low %v228_v4, %v228_v4 }
  0xa4   : > { %v503_v20 = vrot.slane %v501_v8, 7  ;;  %v624_v21 = vrot.slane %v622_v10, 3  ;;  %v313_v22 = vshrl.u32 %v2117_v12, 16  ;;  %v2126_v24 = vcombine.low %v245_v16, %v245_v16 }
  0xa5   : > { %1012 = vrot.lane.b32.xlu1 %v977_v57, %s2598_s18  ;;  %v739_v25 = vor.u32 %v738_v11, %v734_v5  ;;  %v445_v26 = vshrl.u32 %v2133_v14, 16  ;;  %v448_v27 = vshll.u32 %v2133_v14, 16  ;;  %v590_v28 = vshll.u32 %v2149_v15, 16 }
  0xa6   : > { %v506_v29 = vor.u32 %v504_v9, %v503_v20  ;;  %v2994_v30 = vsel %vm2828_vm3, %v503_v20, %v624_v21  ;;  %v340_v31 = vshrl.u32 %v2126_v24, 16  ;;  %v2142_v32 = vcombine.low %v245_v16, %v246_v19 }
  0xa7   : > { %v744_v34 = vsel %vm684_vm4, %v739_v25, %v743_v6  ;;  %v849_v36 = vshll.u32 %v2994_v30, 16  ;;  %v447_v37 = vrot.slane %v445_v26, 7  ;;  %v592_v38 = vrot.slane %v590_v28, 3 }
  0xa8   : > { %885 = vrot.lane.b32.xlu0 %v744_v34, %s2599_s20  ;;  %v3002_v40 = vsel %vm2828_vm3, %v337_v7, %v506_v29  ;;  %v508_v42 = vshrl.u32 %v2142_v32, 16  ;;  %v511_v44 = vshll.u32 %v2142_v32, 16  ;;  %v2158_v45 = vcombine.low %v246_v19, %v246_v19  ;;  %v232_v32 = vld [vmem:[%s2810_s22 + $0x3c] sm:$0xf] }
  0xa9   : > { %1014 = vrot.lane.b32.xlu1 %v980_v62, %s2598_s18  ;;  %v842_v49 = vshrl.u32 %v3002_v40, 16  ;;  %v844_v50 = vshll.u32 %v3002_v40, 16  ;;  %v851_v52 = vrot.slane %v849_v36, 1  ;;  %v450_v53 = vor.u32 %v448_v27, %v447_v37 }
  0xaa   : > { %v3010_v54 = vsel %vm2828_vm3, %v447_v37, %v592_v38  ;;  %v510_v55 = vrot.slane %v508_v42, 7  ;;  %v626_v57 = vshll.u32 %v2158_v45, 16  ;;  %v2118_v58 = vcombine.low %v229_v47, %v229_v47 }
  0xab   : > { %v846_v39 = vrot.slane %v844_v50, 1  ;;  %v3014_v59 = vsel %vm2828_vm3, %v313_v22, %v450_v53  ;;  %v753_v62 = vshll.u32 %v3010_v54, 16  ;;  %v2134_v1 = vcombine.low %v229_v47, %v230_v48  ;;  %v247_v47 = vld [vmem:[%s2810_s22 + $0x78] sm:$0xf] }
  0xac   : > { %996 = vrot.lane.b32.xlu0 %v953_v60, %s2598_s18  ;;  %v746_v2 = vshrl.u32 %v3014_v59, 16  ;;  %v748_v3 = vshll.u32 %v3014_v59, 16  ;;  %v513_v4 = vor.u32 %v511_v44, %v510_v55  ;;  %v628_v5 = vrot.slane %v626_v57, 3 }
  0xad   : > { %v956_v56 = vsel %vm941_vm2, %v954_v13, %v955_v0  ;;  %v847_v6 = vor.u32 %v846_v39, %v842_v49  ;;  %v755_v7 = vrot.slane %v753_v62, 1  ;;  %v452_v8 = vshrl.u32 %v2134_v1, 16 }
  0xae   : > { %v750_v9 = vrot.slane %v748_v3, 1  ;;  %v3023_v10 = vsel %vm2828_vm3, %v340_v31, %v513_v4  ;;  %v682_v12 = vsel %vm2828_vm3, %v510_v55, %v628_v5  ;;  %v455_v60 = vshll.u32 %v2134_v1, 16  ;;  %v231_v31 = vld [vmem:[%s2810_s22 + $0x38] sm:$0xf] }
  0xaf   : > { %v852_v11 = vsel %vm684_vm4, %v847_v6, %v851_v52  ;;  %v854_v14 = vshrl.u32 %v3023_v10, 16  ;;  %v856_v15 = vshll.u32 %v3023_v10, 16  ;;  %v861_v0 = vshll.u32 %v682_v12, 16 }
  0xb0   : > { %998 = vrot.lane.b32.xlu0 %v956_v56, %s2598_s18  ;;  %903 = vrot.lane.b32.xlu1 %v852_v11, %s2599_s20  ;;  %v751_v13 = vor.u32 %v750_v9, %v746_v2  ;;  %v316_v16 = vshrl.u32 %v2118_v58, 16  ;;  %v454_v19 = vrot.slane %v452_v8, 7  ;;  %v2150_v20 = vcombine.low %v230_v48, %v230_v48  ;;  %v248_v48 = vld [vmem:[%s2810_s22 + $0x7c] sm:$0xf] }
  0xb1   : > { %v858_v21 = vrot.slane %v856_v15, 1  ;;  %v863_v22 = vrot.slane %v861_v0, 1  ;;  %v981_v24 = vrot.slane %v3002_v40, 1  ;;  %v982_v25 = vrot.slane %v2994_v30, 1 }
  0xb2   : > { %v756_v26 = vsel %vm684_vm4, %v751_v13, %v755_v7  ;;  %v457_v27 = vor.u32 %v455_v60, %v454_v19  ;;  %v594_v28 = vshll.u32 %v2150_v20, 16  ;;  %v957_v37 = vrot.slane %v3014_v59, 1 }
  0xb3   : > { %v859_v29 = vor.u32 %v858_v21, %v854_v14  ;;  %v958_v30 = vrot.slane %v3010_v54, 1  ;;  %v983_v45 = vsel %vm941_vm2, %v981_v24, %v982_v25  ;;  %v984_v50 = vrot.slane %v3023_v10, 1 }
  0xb4   : > { %887 = vrot.lane.b32.xlu0 %v756_v26, %s2599_s20  ;;  %v596_v34 = vrot.slane %v594_v28, 3  ;;  %v3040_v36 = vsel %vm2828_vm3, %v316_v16, %v457_v27  ;;  %v2119_v52 = vcombine.low %v231_v31, %v231_v31  ;;  %v2135_v53 = vcombine.low %v231_v31, %v232_v32 }
  0xb5   : > { %v864_v38 = vsel %vm684_vm4, %v859_v29, %v863_v22  ;;  %v758_v42 = vshrl.u32 %v3040_v36, 16  ;;  %v760_v44 = vshll.u32 %v3040_v36, 16  ;;  %v985_v57 = vrot.slane %v682_v12, 1 }
  0xb6   : > { %905 = vrot.lane.b32.xlu1 %v864_v38, %s2599_s20  ;;  %v674_v49 = vsel %vm2828_vm3, %v454_v19, %v596_v34  ;;  %v2151_v58 = vcombine.low %v232_v32, %v232_v32  ;;  %v459_v39 = vshrl.u32 %v2135_v53, 16  ;;  %v462_v62 = vshll.u32 %v2135_v53, 16 }
  0xb7   : > { %v762_v54 = vrot.slane %v760_v44, 1  ;;  %v765_v55 = vshll.u32 %v674_v49, 16  ;;  %v2127_v1 = vcombine.low %v247_v47, %v247_v47  ;;  %v2143_v2 = vcombine.low %v247_v47, %v248_v48 }
  0xb8   : > { %v598_v5 = vshll.u32 %v2151_v58, 16  ;;  %v319_v56 = vshrl.u32 %v2119_v52, 16  ;;  %v461_v6 = vrot.slane %v459_v39, 7  ;;  %v986_v60 = vsel %vm941_vm2, %v984_v50, %v985_v57 }
  0xb9   : > { %v763_v3 = vor.u32 %v762_v54, %v758_v42  ;;  %v767_v4 = vrot.slane %v765_v55, 1  ;;  %v515_v7 = vshrl.u32 %v2143_v2, 16  ;;  %v518_v8 = vshll.u32 %v2143_v2, 16 }
  0xba   : > { %1016 = vrot.lane.b32.xlu1 %v983_v45, %s2598_s18  ;;  %v600_v11 = vrot.slane %v598_v5, 3  ;;  %v2159_v12 = vcombine.low %v248_v48, %v248_v48  ;;  %v959_v14 = vsel %vm941_vm2, %v957_v37, %v958_v30  ;;  %v464_v15 = vor.u32 %v462_v62, %v461_v6 }
  0xbb   : > { %v768_v9 = vsel %vm684_vm4, %v763_v3, %v767_v4  ;;  %v343_v0 = vshrl.u32 %v2127_v1, 16  ;;  %v517_v13 = vrot.slane %v515_v7, 7  ;;  %v960_v16 = vrot.slane %v3040_v36, 1  ;;  %v2433_v3 = vld [vmem:[#allocation5] sm:$0xff]  }
  0xbc   : > { %889 = vrot.lane.b32.xlu0 %v768_v9, %s2599_s20  ;;  %v961_v19 = vrot.slane %v674_v49, 1  ;;  %v675_v20 = vsel %vm2828_vm3, %v461_v6, %v600_v11  ;;  %v630_v21 = vshll.u32 %v2159_v12, 16  ;;  %v3065_v22 = vsel %vm2828_vm3, %v319_v56, %v464_v15  ;;  %2268 = vmatprep.subr.bf16.mxu0 %v2433_v3  ;;  %v2434_v56 = vld [vmem:[#allocation5 + $0x8] ss:$0 sps:$4 sm:$0x11]  }
  0xbd   : > { %v777_v24 = vshll.u32 %v675_v20, 16  ;;  %v520_v25 = vor.u32 %v518_v8, %v517_v13  ;;  %v770_v26 = vshrl.u32 %v3065_v22, 16  ;;  %v772_v27 = vshll.u32 %v3065_v22, 16  ;;  %2304 = vmatprep.subr.bf16.mxu1 %v2433_v3  ;;  %2269 = vmatpush3.bf16.msra.mxu0 %v2433_v3 }
  0xbe   : > { %1018 = vrot.lane.b32.xlu1 %v986_v60, %s2598_s18  ;;  %v632_v28 = vrot.slane %v630_v21, 3  ;;  %v962_v31 = vsel %vm941_vm2, %v960_v16, %v961_v19  ;;  %v963_v49 = vrot.slane %v3065_v22, 1  ;;  %v964_v50 = vrot.slane %v675_v20, 1  ;;  %2306 = vmatpush3.bf16.msra.mxu1 %v2433_v3 }
  0xbf   : > { %v3072_v29 = vsel %vm2828_vm3, %v343_v0, %v520_v25  ;;  %v774_v32 = vrot.slane %v772_v27, 1  ;;  %v779_v34 = vrot.slane %v777_v24, 1  ;;  %vm1022_vm5 = vcmask 15360   ;;  %2308 = vmatprep.subr.msk.bf16.mxu0 %vm649_vm0, %v2434_v56  ;;  %2309 = vmatprep.subr.msk.bf16.mxu1 %vm649_vm0, %v2434_v56 }
  0xc0   : > { %1000 = vrot.lane.b32.xlu0 %v959_v14, %s2598_s18  ;;  %v683_v37 = vsel %vm2828_vm3, %v517_v13, %v632_v28  ;;  %v866_v30 = vshrl.u32 %v3072_v29, 16  ;;  %v868_v38 = vshll.u32 %v3072_v29, 16  ;;  %v987_v53 = vrot.slane %v3072_v29, 1 }
  0xc1   : > { %v873_v42 = vshll.u32 %v683_v37, 16  ;;  %v775_v44 = vor.u32 %v774_v32, %v770_v26  ;;  %v988_v18 = vrot.slane %v683_v37, 1  ;;  %v965_v55 = vsel %vm941_vm2, %v963_v49, %v964_v50 }
  0xc2   : > { %v870_v45 = vrot.slane %v868_v38, 1  ;;  %vm1055_vm6 = vcmask 31744   ;;  %v1285_v7 = vsel %vm649_vm0, %v2434_v56, 0  ;;  %vm1166_vm7 = vcmask 48128  }
  0xc3   : > { %v875_v47 = vrot.slane %v873_v42, 1  ;;  %v780_v48 = vsel %vm684_vm4, %v775_v44, %v779_v34  ;;  %v989_v57 = vsel %vm941_vm2, %v987_v53, %v988_v18  ;;  %2271 = vmatpush3.bf16.msra.mxu0 %v1285_v7  ;;  %2307 = vmatpush3.bf16.msra.mxu1 %v1285_v7  ;;  %vm1199_vm8 = vcmask 97280  }
  0xc4   : > { %1002 = vrot.lane.b32.xlu0 %v962_v31, %s2598_s18  ;;  %v871_v52 = vor.u32 %v870_v45, %v866_v30  ;;  %vm1250_vm9 = vcmask 146432  }
  0xc6   : > { %v876_v54 = vsel %vm684_vm4, %v871_v52, %v875_v47 }
  0xc7   : > { %907 = vrot.lane.b32.xlu1 %v876_v54, %s2599_s20 }
  0xc8   : > { %891 = vrot.lane.b32.xlu0 %v780_v48, %s2599_s20 }
  0xcb   : > { %1020 = vrot.lane.b32.xlu1 %v989_v57, %s2598_s18 }
  0xcc   : > { %1004 = vrot.lane.b32.xlu0 %v965_v55, %s2598_s18 }
  0xe9   : > { %v1007_v58 = vpop.permute.xlu1 %1006 }
  0xea   : > { %v993_v39 = vpop.permute.xlu0 %992 }
  0xed   : > { %v1009_v62 = vpop.permute.xlu1 %1008 }
  0xf2   : > { %v991_v1 = vpop.permute.xlu0 %990 }
  0xf6   : > { %v1011_v2 = vpop.permute.xlu1 %1010 }
  0xf9   : > { %v995_v4 = vpop.permute.xlu0 %994 }
  0xfa   : > { %v878_v5 = vpop.permute.xlu1 %877 }
  0xfb   : > { %v1024_v60 = vsel %vm1022_vm5, %v2878_v17, %v878_v5 }
  0xfc   : > { %v3105_v15 = vsel %vm1055_vm6, %v1024_v60, %v991_v1 }
  0xfd   : > { %v880_v6 = vpop.permute.xlu0 %879 }
  0xfe   : > { %v1026_v8 = vsel %vm1022_vm5, %v2851_v46, %v880_v6  ;;  %v896_v11 = vpop.permute.xlu1 %895 }
  0xff   : > { %v3096_v9 = vsel %vm1055_vm6, %v1026_v8, %v993_v39  ;;  %v1042_v0 = vsel %vm1022_vm5, %v2857_v51, %v896_v11 }
 0x100   : > { %1104 = vrot.lane.b32.xlu0 %v3096_v9, %s2600_s7  ;;  %v3117_v16 = vsel %vm1055_vm6, %v1042_v0, %v1009_v62 }
 0x101   : > { %v894_v12 = vpop.permute.xlu0 %893 }
 0x102   : > { %v1040_v14 = vsel %vm1022_vm5, %v2845_v41, %v894_v12  ;;  %v898_v13 = vpop.permute.xlu1 %897 }
 0x103   : > { %v3108_v46 = vsel %vm1055_vm6, %v1040_v14, %v1007_v58  ;;  %v1044_v19 = vsel %vm1022_vm5, %v2889_v35, %v898_v13 }
 0x104   : > { %1106 = vrot.lane.b32.xlu0 %v3105_v15, %s2600_s7  ;;  %1120 = vrot.lane.b32.xlu1 %v3108_v46, %s2600_s7 }
 0x105   : > { %v882_v17 = vpop.permute.xlu0 %881 }
 0x106   : > { %v1028_v41 = vsel %vm1022_vm5, %v2895_v43, %v882_v17  ;;  %v3135_v43 = vsel %vm1055_vm6, %v1044_v19, %v1011_v2 }
 0x107   : > { %v3126_v51 = vsel %vm1055_vm6, %v1028_v41, %v995_v4 }
 0x108   : > { %1136 = vrot.lane.b32.xlu0 %v3105_v15, %s2601_s8  ;;  %1122 = vrot.lane.b32.xlu1 %v3117_v16, %s2600_s7 }
 0x10c   : > { %v900_v20 = vpop.permute.xlu1 %899  ;;  %1152 = vrot.lane.b32.xlu1 %v3117_v16, %s2601_s8  ;;  %1138 = vrot.lane.b32.xlu0 %v3126_v51, %s2601_s8 }
 0x10d   : > { %v1046_v35 = vsel %vm1022_vm5, %v2938_v61, %v900_v20 }
 0x110   : > { %1154 = vrot.lane.b32.xlu1 %v3135_v43, %s2601_s8  ;;  %1108 = vrot.lane.b32.xlu0 %v3126_v51, %s2600_s7  ;;  %v884_v24 = vpop.permute.xlu0 %883 }
 0x111   : > { %v1030_v31 = vsel %vm1022_vm5, %v2948_v33, %v884_v24 }
 0x113   : > { %v902_v21 = vpop.permute.xlu1 %901 }
 0x114   : > { %1124 = vrot.lane.b32.xlu1 %v3135_v43, %s2600_s7  ;;  %v1048_v32 = vsel %vm1022_vm5, %v2954_v23, %v902_v21 }
 0x117   : > { %v1013_v25 = vpop.permute.xlu1 %1012 }
 0x118   : > { %v3146_v26 = vsel %vm1055_vm6, %v1046_v35, %v1013_v25 }
 0x119   : > { %1126 = vrot.lane.b32.xlu1 %v3146_v26, %s2600_s7 }
 0x11a   : > { %v886_v27 = vpop.permute.xlu0 %885 }
 0x11b   : > { %v1015_v28 = vpop.permute.xlu1 %1014  ;;  %v1032_v33 = vsel %vm1022_vm5, %v2981_v63, %v886_v27 }
 0x11c   : > { %v3160_v37 = vsel %vm1055_vm6, %v1048_v32, %v1015_v28 }
 0x11d   : > { %1156 = vrot.lane.b32.xlu1 %v3146_v26, %s2601_s8 }
 0x11e   : > { %v997_v34 = vpop.permute.xlu0 %996 }
 0x11f   : > { %v3157_v61 = vsel %vm1055_vm6, %v1030_v31, %v997_v34 }
 0x120   : > { %1110 = vrot.lane.b32.xlu0 %v3157_v61, %s2600_s7 }
 0x121   : > { %1158 = vrot.lane.b32.xlu1 %v3160_v37, %s2601_s8 }
 0x122   : > { %v999_v30 = vpop.permute.xlu0 %998  ;;  %v904_v38 = vpop.permute.xlu1 %903 }
 0x123   : > { %v3173_v23 = vsel %vm1055_vm6, %v1032_v33, %v999_v30  ;;  %v1050_v45 = vsel %vm1022_vm5, %v3002_v40, %v904_v38 }
 0x124   : > { %1140 = vrot.lane.b32.xlu0 %v3157_v61, %s2601_s8 }
 0x125   : > { %1128 = vrot.lane.b32.xlu1 %v3160_v37, %s2600_s7 }
 0x126   : > { %v888_v42 = vpop.permute.xlu0 %887 }
 0x127   : > { %v1034_v63 = vsel %vm1022_vm5, %v3014_v59, %v888_v42 }
 0x128   : > { %1142 = vrot.lane.b32.xlu0 %v3173_v23, %s2601_s8  ;;  %v906_v44 = vpop.permute.xlu1 %905 }
 0x129   : > { %v1052_v53 = vsel %vm1022_vm5, %v3023_v10, %v906_v44 }
 0x12c   : > { %1112 = vrot.lane.b32.xlu0 %v3173_v23, %s2600_s7  ;;  %v1017_v47 = vpop.permute.xlu1 %1016 }
 0x12d   : > { %v3182_v48 = vsel %vm1055_vm6, %v1050_v45, %v1017_v47 }
 0x12e   : > { %v890_v49 = vpop.permute.xlu0 %889  ;;  %1130 = vrot.lane.b32.xlu1 %v3182_v48, %s2600_s7 }
 0x12f   : > { %v1036_v59 = vsel %vm1022_vm5, %v3040_v36, %v890_v49 }
 0x130   : > { %v1019_v52 = vpop.permute.xlu1 %1018 }
 0x131   : > { %v3198_v18 = vsel %vm1055_vm6, %v1052_v53, %v1019_v52 }
 0x132   : > { %v1001_v50 = vpop.permute.xlu0 %1000  ;;  %1160 = vrot.lane.b32.xlu1 %v3182_v48, %s2601_s8 }
 0x133   : > { %v3191_v40 = vsel %vm1055_vm6, %v1034_v63, %v1001_v50 }
 0x134   : > { %1114 = vrot.lane.b32.xlu0 %v3191_v40, %s2600_s7 }
 0x136   : > { %v1003_v54 = vpop.permute.xlu0 %1002  ;;  %1162 = vrot.lane.b32.xlu1 %v3198_v18, %s2601_s8 }
 0x137   : > { %v3209_v10 = vsel %vm1055_vm6, %v1036_v59, %v1003_v54 }
 0x138   : > { %1144 = vrot.lane.b32.xlu0 %v3191_v40, %s2601_s8 }
 0x139   : > { %v908_v57 = vpop.permute.xlu1 %907 }
 0x13a   : > { %v892_v55 = vpop.permute.xlu0 %891  ;;  %1132 = vrot.lane.b32.xlu1 %v3198_v18, %s2600_s7  ;;  %v1054_v58 = vsel %vm1022_vm5, %v3072_v29, %v908_v57 }
 0x13b   : > { %v1038_v62 = vsel %vm1022_vm5, %v3065_v22, %v892_v55 }
 0x13c   : > { %1146 = vrot.lane.b32.xlu0 %v3209_v10, %s2601_s8 }
 0x13d   : > { %v1021_v39 = vpop.permute.xlu1 %1020 }
 0x13e   : > { %v1005_v1 = vpop.permute.xlu0 %1004  ;;  %v1087_v36 = vsel %vm1055_vm6, %v1054_v58, %v1021_v39 }
 0x13f   : > { %1134 = vrot.lane.b32.xlu1 %v1087_v36, %s2600_s7  ;;  %v1071_v2 = vsel %vm1055_vm6, %v1038_v62, %v1005_v1 }
 0x140   : > { %1116 = vrot.lane.b32.xlu0 %v3209_v10, %s2600_s7 }
 0x143   : > { %1164 = vrot.lane.b32.xlu1 %v1087_v36, %s2601_s8 }
 0x144   : > { %1118 = vrot.lane.b32.xlu0 %v1071_v2, %s2600_s7 }
 0x148   : > { %1148 = vrot.lane.b32.xlu0 %v1071_v2, %s2601_s8 }
 0x14c   : > { %1150 = vrot.lane.b32.xlu0 %v3108_v46, %s2601_s8 }
 0x172   : > { %v1105_v22 = vpop.permute.xlu0 %1104 }
 0x173   : > { %v1168_v4 = vsel %vm1166_vm7, %v3105_v15, %v1105_v22 }
 0x176   : > { %v1121_v29 = vpop.permute.xlu1 %1120  ;;  %v1107_v3 = vpop.permute.xlu0 %1106 }
 0x177   : > { %v1184_v7 = vsel %vm1166_vm7, %v1071_v2, %v1121_v29  ;;  %v1170_v8 = vsel %vm1166_vm7, %v3096_v9, %v1107_v3  ;;  %v3290_v29 = vld [vmem:[#allocation7] ss:$0 sm:$0xff] }
 0x17a   : > { %v1123_v5 = vpop.permute.xlu1 %1122  ;;  %v1137_v56 = vpop.permute.xlu0 %1136 }
 0x17b   : > { %v1201_v6 = vsel %vm1199_vm8, %v1168_v4, %v1137_v56  ;;  %v1186_v0 = vsel %vm1166_vm7, %v3108_v46, %v1123_v5 }
 0x17c   : > { %2272 = vmatprep.mubr.msk.bf16.mxu0 %vm1250_vm9, %v1201_v6 }
 0x17e   : > { %v1153_v60 = vpop.permute.xlu1 %1152  ;;  %v1139_v11 = vpop.permute.xlu0 %1138 }
 0x17f   : > { %v1203_v12 = vsel %vm1199_vm8, %v1170_v8, %v1139_v11  ;;  %v1217_v14 = vsel %vm1199_vm8, %v1184_v7, %v1153_v60 }
 0x180   : > { %2273 = vmatmul.mubr.msk.bf16.vlgmr.msra.gmra.mrb[0].mxu0 %vm1250_vm9, %v1203_v12  ;;  %2288 = vmatprep.mubr.msk.bf16.mxu1 %vm1250_vm9, %v1217_v14 }
 0x182   : > { %v1155_v17 = vpop.permute.xlu1 %1154  ;;  %v1109_v19 = vpop.permute.xlu0 %1108 }
 0x183   : > { %v1219_v13 = vsel %vm1199_vm8, %v1186_v0, %v1155_v17  ;;  %v1172_v28 = vsel %vm1166_vm7, %v3105_v15, %v1109_v19 }
 0x184   : > { %2289 = vmatmul.mubr.msk.bf16.vlgmr.msra.gmra.mrb[0].mxu1 %vm1250_vm9, %v1219_v13 }
 0x186   : > { %v1125_v41 = vpop.permute.xlu1 %1124 }
 0x187   : > { %v1188_v20 = vsel %vm1166_vm7, %v3117_v16, %v1125_v41 }
 0x18b   : > { %v1127_v9 = vpop.permute.xlu1 %1126 }
 0x18c   : > { %v1190_v46 = vsel %vm1166_vm7, %v3135_v43, %v1127_v9 }
 0x18f   : > { %v1157_v21 = vpop.permute.xlu1 %1156 }
 0x190   : > { %v1221_v24 = vsel %vm1199_vm8, %v1188_v20, %v1157_v21 }
 0x191   : > { %2292 = vmatprep.mubr.msk.bf16.mxu1 %vm1250_vm9, %v1221_v24 }
 0x192   : > { %v1111_v35 = vpop.permute.xlu0 %1110 }
 0x193   : > { %v1159_v25 = vpop.permute.xlu1 %1158  ;;  %v1174_v32 = vsel %vm1166_vm7, %v3126_v51, %v1111_v35 }
 0x194   : > { %v1223_v27 = vsel %vm1199_vm8, %v1190_v46, %v1159_v25 }
 0x195   : > { %2293 = vmatmul.mubr.msk.bf16.gmra.mrb[4].mxu1 %vm1250_vm9, %v1223_v27 }
 0x196   : > { %v1141_v31 = vpop.permute.xlu0 %1140 }
 0x197   : > { %v1205_v16 = vsel %vm1199_vm8, %v1172_v28, %v1141_v31  ;;  %v1129_v30 = vpop.permute.xlu1 %1128 }
 0x198   : > { %2276 = vmatprep.mubr.msk.bf16.mxu0 %vm1250_vm9, %v1205_v16  ;;  %v1192_v42 = vsel %vm1166_vm7, %v3146_v26, %v1129_v30 }
 0x19a   : > { %v1143_v34 = vpop.permute.xlu0 %1142 }
 0x19b   : > { %v1207_v43 = vsel %vm1199_vm8, %v1174_v32, %v1143_v34 }
 0x19c   : > { %2277 = vmatmul.mubr.msk.bf16.gmra.mrb[4].mxu0 %vm1250_vm9, %v1207_v43 }
 0x19e   : > { %v1113_v38 = vpop.permute.xlu0 %1112 }
 0x19f   : > { %v1176_v63 = vsel %vm1166_vm7, %v3157_v61, %v1113_v38 }
 0x1a0   : > { %v1131_v33 = vpop.permute.xlu1 %1130 }
 0x1a1   : > { %v1194_v51 = vsel %vm1166_vm7, %v3160_v37, %v1131_v33 }
 0x1a4   : > { %v1161_v15 = vpop.permute.xlu1 %1160 }
 0x1a5   : > { %v1225_v44 = vsel %vm1199_vm8, %v1192_v42, %v1161_v15 }
 0x1a6   : > { %v1115_v45 = vpop.permute.xlu0 %1114  ;;  %2296 = vmatprep.mubr.msk.bf16.mxu1 %vm1250_vm9, %v1225_v44 }
 0x1a7   : > { %v1178_v53 = vsel %vm1166_vm7, %v3173_v23, %v1115_v45 }
 0x1a8   : > { %v1163_v47 = vpop.permute.xlu1 %1162 }
 0x1a9   : > { %v1227_v49 = vsel %vm1199_vm8, %v1194_v51, %v1163_v47 }
 0x1aa   : > { %v1145_v50 = vpop.permute.xlu0 %1144  ;;  %2297 = vmatmul.mubr.msk.bf16.gmra.mrb[8].mxu1 %vm1250_vm9, %v1227_v49 }
 0x1ab   : > { %v1209_v26 = vsel %vm1199_vm8, %v1176_v63, %v1145_v50 }
 0x1ac   : > { %2280 = vmatprep.mubr.msk.bf16.mxu0 %vm1250_vm9, %v1209_v26  ;;  %v1133_v52 = vpop.permute.xlu1 %1132 }
 0x1ad   : > { %v1196_v58 = vsel %vm1166_vm7, %v3182_v48, %v1133_v52 }
 0x1ae   : > { %v1147_v54 = vpop.permute.xlu0 %1146 }
 0x1af   : > { %v1211_v37 = vsel %vm1199_vm8, %v1178_v53, %v1147_v54 }
 0x1b0   : > { %2281 = vmatmul.mubr.msk.bf16.gmra.mrb[8].mxu0 %vm1250_vm9, %v1211_v37 }
 0x1b1   : > { %v1135_v55 = vpop.permute.xlu1 %1134 }
 0x1b2   : > { %v1117_v59 = vpop.permute.xlu0 %1116  ;;  %v1198_v61 = vsel %vm1166_vm7, %v3198_v18, %v1135_v55 }
 0x1b3   : > { %v1230_v23 = vsel %vm1199_vm8, %v1198_v61, %v1163_v47  ;;  %v1180_v1 = vsel %vm1166_vm7, %v3191_v40, %v1117_v59 }
 0x1b5   : > { %v1165_v39 = vpop.permute.xlu1 %1164 }
 0x1b6   : > { %v1119_v57 = vpop.permute.xlu0 %1118  ;;  %v1229_v62 = vsel %vm1199_vm8, %v1196_v58, %v1165_v39 }
 0x1b7   : > { %2300 = vmatprep.mubr.msk.bf16.mxu1 %vm1250_vm9, %v1229_v62  ;;  %v1182_v48 = vsel %vm1166_vm7, %v3209_v10, %v1119_v57 }
 0x1b8   : > { %2301 = vmatmul.mubr.msk.bf16.gmra.mrb[12].mxu1 %vm1250_vm9, %v1230_v23 }
 0x1ba   : > { %v1149_v36 = vpop.permute.xlu0 %1148 }
 0x1bb   : > { %v1213_v2 = vsel %vm1199_vm8, %v1180_v1, %v1149_v36 }
 0x1bc   : > { %2284 = vmatprep.mubr.msk.bf16.mxu0 %vm1250_vm9, %v1213_v2 }
 0x1be   : > { %v1151_v18 = vpop.permute.xlu0 %1150 }
 0x1bf   : > { %v1215_v22 = vsel %vm1199_vm8, %v1182_v48, %v1151_v18 }
 0x1c0   : > { %2285 = vmatmul.mubr.msk.bf16.gmra.mrb[12].mxu0 %vm1250_vm9, %v1215_v22 }
 0x253   : > { %v2274_v3 = vpop.f32.mrb[0].mxu0 }
 0x254   : > { %v1330_v40 = vadd.f32 %v2274_v3, %v3290_v29  ;;  %v1321_v4 = vpop.f32.mrb[1].mxu0 }
 0x255   : > { %v2275_v5 = vpop.f32.mrb[2].mxu0  ;;  %v1322_v8 = vadd.f32 %v3290_v29, %v1321_v4 }
 0x256   : > { %v1482_v56 = vmul.f32 0.01, %v1330_v40  ;;  %v1333_v6 = vadd.f32 %v2275_v5, %v3290_v29  ;;  %v1324_v7 = vpop.f32.mrb[3].mxu0  ;;  %vm1450_vm10 = vcmp.ge.f32.partialorder %v1330_v40, 0.0 }
 0x257   : > { %v2290_v10 = vpop.f32.mrb[0].mxu1  ;;  %v1325_v0 = vadd.f32 %v3290_v29, %v1324_v7  ;;  %v1480_v20 = vmul.f32 0.01, %v1322_v8  ;;  %vm1448_vm14 = vcmp.ge.f32.partialorder %v1322_v8, 0.0 }
 0x258   : > { %v1483_v60 = vmul.f32 0.01, %v1333_v6  ;;  %v1394_v11 = vadd.f32 %v2290_v10, %v3290_v29  ;;  %v1385_v12 = vpop.f32.mrb[1].mxu1  ;;  %v3296_v14 = vsel %vm1450_vm10, %v1330_v40, %v1482_v56  ;;  %vm1451_vm11 = vcmp.ge.f32.partialorder %v1333_v6, 0.0 }
 0x259   : > { %v2291_v17 = vpop.f32.mrb[2].mxu1  ;;  %1580 = vrot.lane.b32.xlu1 %v3296_v14, %s2602_s26  ;;  %v1386_v21 = vadd.f32 %v3290_v29, %v1385_v12  ;;  %v1481_v46 = vmul.f32 0.01, %v1325_v0  ;;  %vm1449_vm15 = vcmp.ge.f32.partialorder %v1325_v0, 0.0  ;;  %v3316_v31 = vsel %vm1448_vm14, %v1322_v8, %v1480_v20 }
 0x25a   : > { %v1498_v13 = vmul.f32 0.01, %v1394_v11  ;;  %v1397_v41 = vadd.f32 %v2291_v17, %v3290_v29  ;;  %v1388_v9 = vpop.f32.mrb[3].mxu1  ;;  %v3302_v19 = vsel %vm1451_vm11, %v1333_v6, %v1483_v60  ;;  %vm1466_vm12 = vcmp.ge.f32.partialorder %v1394_v11, 0.0 }
 0x25b   : > { %1582 = vrot.lane.b32.xlu0 %v3302_v19, %s2602_s26  ;;  %v1389_v25 = vadd.f32 %v3290_v29, %v1388_v9  ;;  %v1496_v28 = vmul.f32 0.01, %v1386_v21  ;;  %vm1464_vm0 = vcmp.ge.f32.partialorder %v1386_v21, 0.0  ;;  %v3320_v32 = vsel %vm1449_vm15, %v1325_v0, %v1481_v46 }
 0x25c   : > { %v1499_v24 = vmul.f32 0.01, %v1397_v41  ;;  %v3307_v35 = vsel %vm1466_vm12, %v1394_v11, %v1498_v13  ;;  %vm1467_vm13 = vcmp.ge.f32.partialorder %v1397_v41, 0.0 }
 0x25d   : > { %1612 = vrot.lane.b32.xlu1 %v3307_v35, %s2602_s26  ;;  %v1497_v16 = vmul.f32 0.01, %v1389_v25  ;;  %vm1465_vm1 = vcmp.ge.f32.partialorder %v1389_v25, 0.0  ;;  %v3324_v34 = vsel %vm1464_vm0, %v1386_v21, %v1496_v28 }
 0x25e   : > { %v3312_v27 = vsel %vm1467_vm13, %v1397_v41, %v1499_v24 }
 0x25f   : > { %1614 = vrot.lane.b32.xlu0 %v3312_v27, %s2602_s26  ;;  %v3328_v30 = vsel %vm1465_vm1, %v1389_v25, %v1497_v16 }
 0x261   : > { %1576 = vrot.lane.b32.xlu1 %v3316_v31, %s2602_s26 }
 0x263   : > { %1578 = vrot.lane.b32.xlu0 %v3320_v32, %s2602_s26 }
 0x265   : > { %1608 = vrot.lane.b32.xlu1 %v3324_v34, %s2602_s26 }
 0x267   : > { %1610 = vrot.lane.b32.xlu0 %v3328_v30, %s2602_s26 }
 0x268   : > { %v2294_v43 = vpop.f32.mrb[4].mxu1 }
 0x269   : > { %v1401_v38 = vpop.f32.mrb[5].mxu1  ;;  %v1410_v15 = vadd.f32 %v2294_v43, %v3290_v29 }
 0x26a   : > { %v2295_v33 = vpop.f32.mrb[6].mxu1  ;;  %v1402_v39 = vadd.f32 %v3290_v29, %v1401_v38 }
 0x26b   : > { %v1404_v42 = vpop.f32.mrb[7].mxu1  ;;  %v1413_v45 = vadd.f32 %v2295_v33, %v3290_v29  ;;  %v1502_v52 = vmul.f32 0.01, %v1410_v15  ;;  %vm1470_vm3 = vcmp.ge.f32.partialorder %v1410_v15, 0.0 }
 0x26c   : > { %v1405_v1 = vadd.f32 %v3290_v29, %v1404_v42  ;;  %v1500_v36 = vmul.f32 0.01, %v1402_v39  ;;  %vm1468_vm8 = vcmp.ge.f32.partialorder %v1402_v39, 0.0 }
 0x26d   : > { %v1503_v53 = vmul.f32 0.01, %v1413_v45  ;;  %vm1471_vm5 = vcmp.ge.f32.partialorder %v1413_v45, 0.0  ;;  %v3344_v61 = vsel %vm1470_vm3, %v1410_v15, %v1502_v52 }
 0x26e   : > { %v1501_v18 = vmul.f32 0.01, %v1405_v1  ;;  %vm1469_vm9 = vcmp.ge.f32.partialorder %v1405_v1, 0.0  ;;  %v3364_v4 = vsel %vm1468_vm8, %v1402_v39, %v1500_v36 }
 0x26f   : > { %v2278_v44 = vpop.f32.mrb[4].mxu0  ;;  %v3349_v62 = vsel %vm1471_vm5, %v1413_v45, %v1503_v53 }
 0x270   : > { %v1346_v51 = vadd.f32 %v2278_v44, %v3290_v29  ;;  %v1337_v47 = vpop.f32.mrb[5].mxu0  ;;  %v3369_v6 = vsel %vm1469_vm9, %v1405_v1, %v1501_v18 }
 0x271   : > { %v2279_v49 = vpop.f32.mrb[6].mxu0  ;;  %v1338_v54 = vadd.f32 %v3290_v29, %v1337_v47 }
 0x272   : > { %v1486_v63 = vmul.f32 0.01, %v1346_v51  ;;  %v1349_v50 = vadd.f32 %v2279_v49, %v3290_v29  ;;  %v1340_v26 = vpop.f32.mrb[7].mxu0  ;;  %vm1454_vm2 = vcmp.ge.f32.partialorder %v1346_v51, 0.0 }
 0x273   : > { %v1341_v55 = vadd.f32 %v3290_v29, %v1340_v26  ;;  %v1484_v58 = vmul.f32 0.01, %v1338_v54  ;;  %vm1452_vm6 = vcmp.ge.f32.partialorder %v1338_v54, 0.0 }
 0x274   : > { %v1487_v37 = vmul.f32 0.01, %v1349_v50  ;;  %v3337_v59 = vsel %vm1454_vm2, %v1346_v51, %v1486_v63  ;;  %vm1455_vm4 = vcmp.ge.f32.partialorder %v1349_v50, 0.0 }
 0x275   : > { %1588 = vrot.lane.b32.xlu1 %v3337_v59, %s2602_s26  ;;  %v1485_v23 = vmul.f32 0.01, %v1341_v55  ;;  %vm1453_vm7 = vcmp.ge.f32.partialorder %v1341_v55, 0.0  ;;  %v3356_v2 = vsel %vm1452_vm6, %v1338_v54, %v1484_v58 }
 0x276   : > { %v3342_v57 = vsel %vm1455_vm4, %v1349_v50, %v1487_v37 }
 0x277   : > { %1590 = vrot.lane.b32.xlu0 %v3342_v57, %s2602_s26  ;;  %v3360_v22 = vsel %vm1453_vm7, %v1341_v55, %v1485_v23 }
 0x279   : > { %1620 = vrot.lane.b32.xlu1 %v3344_v61, %s2602_s26 }
 0x27b   : > { %1622 = vrot.lane.b32.xlu0 %v3349_v62, %s2602_s26 }
 0x27d   : > { %1584 = vrot.lane.b32.xlu1 %v3356_v2, %s2602_s26  ;;  %v2298_v48 = vpop.f32.mrb[8].mxu1 }
 0x27e   : > { %v1417_v3 = vpop.f32.mrb[9].mxu1  ;;  %v1426_v56 = vadd.f32 %v2298_v48, %v3290_v29 }
 0x27f   : > { %1586 = vrot.lane.b32.xlu0 %v3360_v22, %s2602_s26  ;;  %v2299_v40 = vpop.f32.mrb[10].mxu1  ;;  %v1418_v16 = vadd.f32 %v3290_v29, %v1417_v3 }
 0x280   : > { %v1420_v5 = vpop.f32.mrb[11].mxu1  ;;  %v1429_v8 = vadd.f32 %v2299_v40, %v3290_v29  ;;  %v1506_v13 = vmul.f32 0.01, %v1426_v56  ;;  %vm1474_vm11 = vcmp.ge.f32.partialorder %v1426_v56, 0.0 }
 0x281   : > { %1616 = vrot.lane.b32.xlu1 %v3364_v4, %s2602_s26  ;;  %v1421_v42 = vadd.f32 %v3290_v29, %v1420_v5  ;;  %v1504_v45 = vmul.f32 0.01, %v1418_v16  ;;  %vm1472_vm0 = vcmp.ge.f32.partialorder %v1418_v16, 0.0 }
 0x282   : > { %v1507_v41 = vmul.f32 0.01, %v1429_v8  ;;  %vm1475_vm13 = vcmp.ge.f32.partialorder %v1429_v8, 0.0  ;;  %v3384_v25 = vsel %vm1474_vm11, %v1426_v56, %v1506_v13  ;;  %vm1960_vm11 = vcmask 125952  }
 0x283   : > { %v2282_v7 = vpop.f32.mrb[8].mxu0  ;;  %1618 = vrot.lane.b32.xlu0 %v3369_v6, %s2602_s26  ;;  %v1505_v49 = vmul.f32 0.01, %v1421_v42  ;;  %vm1473_vm1 = vcmp.ge.f32.partialorder %v1421_v42, 0.0  ;;  %v3405_v53 = vsel %vm1472_vm0, %v1418_v16, %v1504_v45 }
 0x284   : > { %v1362_v10 = vadd.f32 %v2282_v7, %v3290_v29  ;;  %v1353_v60 = vpop.f32.mrb[9].mxu0  ;;  %v3389_v43 = vsel %vm1475_vm13, %v1429_v8, %v1507_v41 }
 0x285   : > { %v2283_v11 = vpop.f32.mrb[10].mxu0  ;;  %v1354_v9 = vadd.f32 %v3290_v29, %v1353_v60  ;;  %v3411_v23 = vsel %vm1473_vm1, %v1421_v42, %v1505_v49 }
 0x286   : > { %v1490_v12 = vmul.f32 0.01, %v1362_v10  ;;  %v1365_v0 = vadd.f32 %v2283_v11, %v3290_v29  ;;  %v1356_v17 = vpop.f32.mrb[11].mxu0  ;;  %vm1458_vm10 = vcmp.ge.f32.partialorder %v1362_v10, 0.0 }
 0x287   : > { %v1357_v24 = vadd.f32 %v3290_v29, %v1356_v17  ;;  %v1488_v28 = vmul.f32 0.01, %v1354_v9  ;;  %vm1456_vm14 = vcmp.ge.f32.partialorder %v1354_v9, 0.0 }
 0x288   : > { %v1491_v20 = vmul.f32 0.01, %v1365_v0  ;;  %v3377_v21 = vsel %vm1458_vm10, %v1362_v10, %v1490_v12  ;;  %vm1459_vm12 = vcmp.ge.f32.partialorder %v1365_v0, 0.0 }
 0x289   : > { %1596 = vrot.lane.b32.xlu1 %v3377_v21, %s2602_s26  ;;  %v1489_v33 = vmul.f32 0.01, %v1357_v24  ;;  %vm1457_vm15 = vcmp.ge.f32.partialorder %v1357_v24, 0.0  ;;  %v3396_v51 = vsel %vm1456_vm14, %v1354_v9, %v1488_v28 }
 0x28a   : > { %v3382_v46 = vsel %vm1459_vm12, %v1365_v0, %v1491_v20 }
 0x28b   : > { %1598 = vrot.lane.b32.xlu0 %v3382_v46, %s2602_s26  ;;  %v2302_v38 = vpop.f32.mrb[12].mxu1  ;;  %v3400_v63 = vsel %vm1457_vm15, %v1357_v24, %v1489_v33 }
 0x28c   : > { %v1433_v15 = vpop.f32.mrb[13].mxu1  ;;  %v1442_v7 = vadd.f32 %v2302_v38, %v3290_v29 }
 0x28d   : > { %1628 = vrot.lane.b32.xlu1 %v3384_v25, %s2602_s26  ;;  %v2303_v44 = vpop.f32.mrb[14].mxu1  ;;  %v1434_v1 = vadd.f32 %v3290_v29, %v1433_v15 }
 0x28e   : > { %v1436_v47 = vpop.f32.mrb[15].mxu1  ;;  %v1445_v60 = vadd.f32 %v2303_v44, %v3290_v29  ;;  %v1510_v0 = vmul.f32 0.01, %v1442_v7  ;;  %vm1478_vm8 = vcmp.ge.f32.partialorder %v1442_v7, 0.0 }
 0x28f   : > { %1630 = vrot.lane.b32.xlu0 %v3389_v43, %s2602_s26  ;;  %v1437_v5 = vadd.f32 %v3290_v29, %v1436_v47  ;;  %v1508_v8 = vmul.f32 0.01, %v1434_v1  ;;  %vm1476_vm6 = vcmp.ge.f32.partialorder %v1434_v1, 0.0 }
 0x290   : > { %v1511_v13 = vmul.f32 0.01, %v1445_v60  ;;  %vm1479_vm9 = vcmp.ge.f32.partialorder %v1445_v60, 0.0 }
 0x291   : > { %1592 = vrot.lane.b32.xlu1 %v3396_v51, %s2602_s26  ;;  %v1509_v11 = vmul.f32 0.01, %v1437_v5  ;;  %vm1477_vm7 = vcmp.ge.f32.partialorder %v1437_v5, 0.0  ;;  %v3436_v17 = vsel %vm1476_vm6, %v1434_v1, %v1508_v8 }
 0x292   : > { %v3448_v9 = vsel %vm1479_vm9, %v1445_v60, %v1511_v13 }
 0x293   : > { %1594 = vrot.lane.b32.xlu0 %v3400_v63, %s2602_s26  ;;  %v2286_v50 = vpop.f32.mrb[12].mxu0  ;;  %v3440_v41 = vsel %vm1477_vm7, %v1437_v5, %v1509_v11 }
 0x294   : > { %v1378_v26 = vadd.f32 %v2286_v50, %v3290_v29  ;;  %v1369_v52 = vpop.f32.mrb[13].mxu0 }
 0x295   : > { %v1370_v54 = vadd.f32 %v3290_v29, %v1369_v52  ;;  %1624 = vrot.lane.b32.xlu1 %v3405_v53, %s2602_s26  ;;  %v2287_v37 = vpop.f32.mrb[14].mxu0 }
 0x296   : > { %v1494_v55 = vmul.f32 0.01, %v1378_v26  ;;  %v1381_v58 = vadd.f32 %v2287_v37, %v3290_v29  ;;  %v1372_v39 = vpop.f32.mrb[15].mxu0  ;;  %vm1462_vm2 = vcmp.ge.f32.partialorder %v1378_v26, 0.0 }
 0x297   : > { %v1373_v36 = vadd.f32 %v3290_v29, %v1372_v39  ;;  %1626 = vrot.lane.b32.xlu0 %v3411_v23, %s2602_s26  ;;  %v1492_v48 = vmul.f32 0.01, %v1370_v54  ;;  %vm1460_vm4 = vcmp.ge.f32.partialorder %v1370_v54, 0.0  ;;  %v3444_v29 = vsel %vm1478_vm8, %v1442_v7, %v1510_v0 }
 0x298   : > { %v1495_v18 = vmul.f32 0.01, %v1381_v58  ;;  %v3417_v3 = vsel %vm1462_vm2, %v1378_v26, %v1494_v55  ;;  %vm1463_vm3 = vcmp.ge.f32.partialorder %v1381_v58, 0.0 }
 0x299   : > { %1604 = vrot.lane.b32.xlu1 %v3417_v3, %s2602_s26  ;;  %v1493_v40 = vmul.f32 0.01, %v1373_v36  ;;  %vm1461_vm5 = vcmp.ge.f32.partialorder %v1373_v36, 0.0  ;;  %v3427_v10 = vsel %vm1460_vm4, %v1370_v54, %v1492_v48 }
 0x29a   : > { %v3422_v56 = vsel %vm1463_vm3, %v1381_v58, %v1495_v18 }
 0x29b   : > { %1606 = vrot.lane.b32.xlu0 %v3422_v56, %s2602_s26  ;;  %v3432_v12 = vsel %vm1461_vm5, %v1373_v36, %v1493_v40 }
 0x29d   : > { %1600 = vrot.lane.b32.xlu1 %v3427_v10, %s2602_s26 }
 0x29f   : > { %1602 = vrot.lane.b32.xlu0 %v3432_v12, %s2602_s26 }
 0x2a1   : > { %1632 = vrot.lane.b32.xlu1 %v3436_v17, %s2602_s26 }
 0x2a3   : > { %1634 = vrot.lane.b32.xlu0 %v3440_v41, %s2602_s26 }
 0x2a5   : > { %1636 = vrot.lane.b32.xlu1 %v3444_v29, %s2602_s26 }
 0x2a7   : > { %1638 = vrot.lane.b32.xlu0 %v3448_v9, %s2602_s26 }
 0x2cb   : > { %v1581_v20 = vpop.permute.xlu1 %1580 }
 0x2cc   : > { %v1674_v24 = vmul.f32 %v1581_v20, %v3296_v14 }
 0x2cd   : > { %v1583_v28 = vpop.permute.xlu0 %1582 }
 0x2ce   : > { %v1706_v16 = vadd.f32 %v1674_v24, %v1581_v20  ;;  %v1675_v38 = vmul.f32 %v1583_v28, %v3302_v19 }
 0x2cf   : > { %v1613_v33 = vpop.permute.xlu1 %1612 }
 0x2d0   : > { %vm1738_vm10 = vcmp.ge.f32.partialorder %v1706_v16, 0.0  ;;  %v1770_v42 = vmul.f32 0.01, %v1706_v16  ;;  %v1707_v15 = vadd.f32 %v1675_v38, %v1583_v28  ;;  %v1690_v44 = vmul.f32 %v1613_v33, %v3307_v35 }
 0x2d1   : > { %v1615_v45 = vpop.permute.xlu0 %1614 }
 0x2d2   : > { %v1802_v47 = vsel %vm1738_vm10, %v1706_v16, %v1770_v42  ;;  %vm1739_vm12 = vcmp.ge.f32.partialorder %v1707_v15, 0.0  ;;  %v1771_v49 = vmul.f32 0.01, %v1707_v15  ;;  %v1722_v50 = vadd.f32 %v1690_v44, %v1613_v33 }
 0x2d3   : > { %v2219_v26 = vpack.c.bf16 %v1802_v47, %v1802_v47  ;;  %v1691_v14 = vmul.f32 %v1615_v45, %v3312_v27  ;;  %v1577_v52 = vpop.permute.xlu1 %1576 }
 0x2d4   : > { %v1803_v54 = vsel %vm1739_vm12, %v1707_v15, %v1771_v49  ;;  %vm1754_vm13 = vcmp.ge.f32.partialorder %v1722_v50, 0.0  ;;  %v1786_v19 = vmul.f32 0.01, %v1722_v50  ;;  %v1672_v37 = vmul.f32 %v1577_v52, %v3316_v31 }
 0x2d5   : > { %1963 = vst.msk [vmem:[%s3459_s28 + $0x8] sm:$0xf] %vm1960_vm11, %v2219_v26  ;;  %v2220_v35 = vpack.c.bf16 %v1803_v54, %v1803_v54  ;;  %v1723_v55 = vadd.f32 %v1691_v14, %v1615_v45  ;;  %v1579_v58 = vpop.permute.xlu0 %1578 }
 0x2d6   : > { %v1818_v39 = vsel %vm1754_vm13, %v1722_v50, %v1786_v19  ;;  %v1704_v1 = vadd.f32 %v1672_v37, %v1577_v52  ;;  %v1673_v27 = vmul.f32 %v1579_v58, %v3320_v32 }
 0x2d7   : > { %1964 = vst.msk [vmem:[%s3459_s28 + $0xc] sm:$0xf] %vm1960_vm11, %v2220_v35  ;;  %v2235_v36 = vpack.c.bf16 %v1818_v39, %v1818_v39  ;;  %vm1755_vm14 = vcmp.ge.f32.partialorder %v1723_v55, 0.0  ;;  %v1787_v31 = vmul.f32 0.01, %v1723_v55  ;;  %v1609_v48 = vpop.permute.xlu1 %1608 }
 0x2d8   : > { %vm1736_vm15 = vcmp.ge.f32.partialorder %v1704_v1, 0.0  ;;  %v1768_v18 = vmul.f32 0.01, %v1704_v1  ;;  %v1705_v40 = vadd.f32 %v1673_v27, %v1579_v58  ;;  %v1688_v5 = vmul.f32 %v1609_v48, %v3324_v34 }
 0x2d9   : > { %1979 = vst.msk [vmem:[%s3459_s28 + $0x48] sm:$0xf] %vm1960_vm11, %v2235_v36  ;;  %v1819_v7 = vsel %vm1755_vm14, %v1723_v55, %v1787_v31  ;;  %v1611_v8 = vpop.permute.xlu0 %1610 }
 0x2da   : > { %v2236_v60 = vpack.c.bf16 %v1819_v7, %v1819_v7  ;;  %v1800_v32 = vsel %vm1736_vm15, %v1704_v1, %v1768_v18  ;;  %vm1737_vm0 = vcmp.ge.f32.partialorder %v1705_v40, 0.0  ;;  %v1769_v11 = vmul.f32 0.01, %v1705_v40 }
 0x2db   : > { %v2217_v0 = vpack.c.bf16 %v1800_v32, %v1800_v32  ;;  %v1720_v13 = vadd.f32 %v1688_v5, %v1609_v48  ;;  %v1689_v20 = vmul.f32 %v1611_v8, %v3328_v30 }
 0x2dc   : > { %1980 = vst.msk [vmem:[%s3459_s28 + $0x4c] sm:$0xf] %vm1960_vm11, %v2236_v60  ;;  %v1801_v24 = vsel %vm1737_vm0, %v1705_v40, %v1769_v11 }
 0x2dd   : > { %1961 = vst.msk [vmem:[%s3459_s28] sm:$0xf] %vm1960_vm11, %v2217_v0  ;;  %v2218_v34 = vpack.c.bf16 %v1801_v24, %v1801_v24  ;;  %vm1752_vm1 = vcmp.ge.f32.partialorder %v1720_v13, 0.0  ;;  %v1784_v28 = vmul.f32 0.01, %v1720_v13  ;;  %v1721_v16 = vadd.f32 %v1689_v20, %v1611_v8 }
 0x2df   : > { %1962 = vst.msk [vmem:[%s3459_s28 + $0x4] sm:$0xf] %vm1960_vm11, %v2218_v34  ;;  %v1816_v38 = vsel %vm1752_vm1, %v1720_v13, %v1784_v28  ;;  %vm1753_vm2 = vcmp.ge.f32.partialorder %v1721_v16, 0.0  ;;  %v1785_v33 = vmul.f32 0.01, %v1721_v16 }
 0x2e0   : > { %v2233_v42 = vpack.c.bf16 %v1816_v38, %v1816_v38 }
 0x2e1   : > { %v1817_v15 = vsel %vm1753_vm2, %v1721_v16, %v1785_v33 }
 0x2e2   : > { %1977 = vst.msk [vmem:[%s3459_s28 + $0x40] sm:$0xf] %vm1960_vm11, %v2233_v42  ;;  %v2234_v30 = vpack.c.bf16 %v1817_v15, %v1817_v15 }
 0x2e4   : > { %1978 = vst.msk [vmem:[%s3459_s28 + $0x44] sm:$0xf] %vm1960_vm11, %v2234_v30 }
 0x2e7   : > { %v1589_v44 = vpop.permute.xlu1 %1588 }
 0x2e8   : > { %v1678_v45 = vmul.f32 %v1589_v44, %v3337_v59 }
 0x2e9   : > { %v1591_v47 = vpop.permute.xlu0 %1590 }
 0x2ea   : > { %v1710_v49 = vadd.f32 %v1678_v45, %v1589_v44  ;;  %v1679_v50 = vmul.f32 %v1591_v47, %v3342_v57 }
 0x2eb   : > { %v1621_v26 = vpop.permute.xlu1 %1620 }
 0x2ec   : > { %vm1742_vm3 = vcmp.ge.f32.partialorder %v1710_v49, 0.0  ;;  %v1774_v14 = vmul.f32 0.01, %v1710_v49  ;;  %v1711_v52 = vadd.f32 %v1679_v50, %v1591_v47  ;;  %v1694_v54 = vmul.f32 %v1621_v26, %v3344_v61 }
 0x2ed   : > { %v1623_v19 = vpop.permute.xlu0 %1622 }
 0x2ee   : > { %v1806_v37 = vsel %vm1742_vm3, %v1710_v49, %v1774_v14  ;;  %vm1743_vm4 = vcmp.ge.f32.partialorder %v1711_v52, 0.0  ;;  %v1775_v35 = vmul.f32 0.01, %v1711_v52  ;;  %v1726_v55 = vadd.f32 %v1694_v54, %v1621_v26 }
 0x2ef   : > { %v2223_v58 = vpack.c.bf16 %v1806_v37, %v1806_v37  ;;  %v1695_v59 = vmul.f32 %v1623_v19, %v3349_v62  ;;  %v1585_v39 = vpop.permute.xlu1 %1584 }
 0x2f0   : > { %v1807_v1 = vsel %vm1743_vm4, %v1711_v52, %v1775_v35  ;;  %vm1758_vm5 = vcmp.ge.f32.partialorder %v1726_v55, 0.0  ;;  %v1790_v57 = vmul.f32 0.01, %v1726_v55  ;;  %v1676_v27 = vmul.f32 %v1585_v39, %v3356_v2 }
 0x2f1   : > { %1967 = vst.msk [vmem:[%s3459_s28 + $0x18] sm:$0xf] %vm1960_vm11, %v2223_v58  ;;  %v2224_v36 = vpack.c.bf16 %v1807_v1, %v1807_v1  ;;  %v1727_v61 = vadd.f32 %v1695_v59, %v1623_v19  ;;  %v1587_v31 = vpop.permute.xlu0 %1586 }
 0x2f2   : > { %v1822_v48 = vsel %vm1758_vm5, %v1726_v55, %v1790_v57  ;;  %v1708_v18 = vadd.f32 %v1676_v27, %v1585_v39  ;;  %v1677_v40 = vmul.f32 %v1587_v31, %v3360_v22 }
 0x2f3   : > { %1968 = vst.msk [vmem:[%s3459_s28 + $0x1c] sm:$0xf] %vm1960_vm11, %v2224_v36  ;;  %v2239_v5 = vpack.c.bf16 %v1822_v48, %v1822_v48  ;;  %vm1759_vm6 = vcmp.ge.f32.partialorder %v1727_v61, 0.0  ;;  %v1791_v62 = vmul.f32 0.01, %v1727_v61  ;;  %v1617_v7 = vpop.permute.xlu1 %1616 }
 0x2f4   : > { %vm1740_vm7 = vcmp.ge.f32.partialorder %v1708_v18, 0.0  ;;  %v1772_v2 = vmul.f32 0.01, %v1708_v18  ;;  %v1709_v8 = vadd.f32 %v1677_v40, %v1587_v31  ;;  %v1692_v60 = vmul.f32 %v1617_v7, %v3364_v4 }
 0x2f5   : > { %1983 = vst.msk [vmem:[%s3459_s28 + $0x58] sm:$0xf] %vm1960_vm11, %v2239_v5  ;;  %v1823_v32 = vsel %vm1759_vm6, %v1727_v61, %v1791_v62  ;;  %v1619_v11 = vpop.permute.xlu0 %1618 }
 0x2f6   : > { %v2240_v0 = vpack.c.bf16 %v1823_v32, %v1823_v32  ;;  %v1804_v22 = vsel %vm1740_vm7, %v1708_v18, %v1772_v2  ;;  %vm1741_vm8 = vcmp.ge.f32.partialorder %v1709_v8, 0.0  ;;  %v1773_v13 = vmul.f32 0.01, %v1709_v8 }
 0x2f7   : > { %v2221_v20 = vpack.c.bf16 %v1804_v22, %v1804_v22  ;;  %v1724_v24 = vadd.f32 %v1692_v60, %v1617_v7  ;;  %v1693_v34 = vmul.f32 %v1619_v11, %v3369_v6 }
 0x2f8   : > { %1984 = vst.msk [vmem:[%s3459_s28 + $0x5c] sm:$0xf] %vm1960_vm11, %v2240_v0  ;;  %v1805_v28 = vsel %vm1741_vm8, %v1709_v8, %v1773_v13 }
 0x2f9   : > { %1965 = vst.msk [vmem:[%s3459_s28 + $0x10] sm:$0xf] %vm1960_vm11, %v2221_v20  ;;  %v2222_v4 = vpack.c.bf16 %v1805_v28, %v1805_v28  ;;  %vm1756_vm9 = vcmp.ge.f32.partialorder %v1724_v24, 0.0  ;;  %v1788_v16 = vmul.f32 0.01, %v1724_v24  ;;  %v1725_v38 = vadd.f32 %v1693_v34, %v1619_v11 }
 0x2fb   : > { %1966 = vst.msk [vmem:[%s3459_s28 + $0x14] sm:$0xf] %vm1960_vm11, %v2222_v4  ;;  %v1820_v33 = vsel %vm1756_vm9, %v1724_v24, %v1788_v16  ;;  %vm1757_vm10 = vcmp.ge.f32.partialorder %v1725_v38, 0.0  ;;  %v1789_v42 = vmul.f32 0.01, %v1725_v38  ;;  %v1597_v15 = vpop.permute.xlu1 %1596 }
 0x2fc   : > { %v2237_v30 = vpack.c.bf16 %v1820_v33, %v1820_v33  ;;  %v1682_v6 = vmul.f32 %v1597_v15, %v3377_v21 }
 0x2fd   : > { %v1821_v44 = vsel %vm1757_vm10, %v1725_v38, %v1789_v42  ;;  %v1599_v45 = vpop.permute.xlu0 %1598 }
 0x2fe   : > { %1981 = vst.msk [vmem:[%s3459_s28 + $0x50] sm:$0xf] %vm1960_vm11, %v2237_v30  ;;  %v2238_v47 = vpack.c.bf16 %v1821_v44, %v1821_v44  ;;  %v1714_v49 = vadd.f32 %v1682_v6, %v1597_v15  ;;  %v1683_v50 = vmul.f32 %v1599_v45, %v3382_v46 }
 0x2ff   : > { %v1629_v26 = vpop.permute.xlu1 %1628 }
 0x300   : > { %1982 = vst.msk [vmem:[%s3459_s28 + $0x54] sm:$0xf] %vm1960_vm11, %v2238_v47  ;;  %vm1746_vm12 = vcmp.ge.f32.partialorder %v1714_v49, 0.0  ;;  %v1778_v14 = vmul.f32 0.01, %v1714_v49  ;;  %v1715_v52 = vadd.f32 %v1683_v50, %v1599_v45  ;;  %v1698_v54 = vmul.f32 %v1629_v26, %v3384_v25 }
 0x301   : > { %v1631_v19 = vpop.permute.xlu0 %1630 }
 0x302   : > { %v1810_v37 = vsel %vm1746_vm12, %v1714_v49, %v1778_v14  ;;  %vm1747_vm13 = vcmp.ge.f32.partialorder %v1715_v52, 0.0  ;;  %v1779_v21 = vmul.f32 0.01, %v1715_v52  ;;  %v1730_v35 = vadd.f32 %v1698_v54, %v1629_v26 }
 0x303   : > { %v2227_v55 = vpack.c.bf16 %v1810_v37, %v1810_v37  ;;  %v1699_v58 = vmul.f32 %v1631_v19, %v3389_v43  ;;  %v1593_v59 = vpop.permute.xlu1 %1592 }
 0x304   : > { %v1811_v46 = vsel %vm1747_vm13, %v1715_v52, %v1779_v21  ;;  %vm1762_vm14 = vcmp.ge.f32.partialorder %v1730_v35, 0.0  ;;  %v1794_v39 = vmul.f32 0.01, %v1730_v35  ;;  %v1680_v1 = vmul.f32 %v1593_v59, %v3396_v51 }
 0x305   : > { %1971 = vst.msk [vmem:[%s3459_s28 + $0x28] sm:$0xf] %vm1960_vm11, %v2227_v55  ;;  %v2228_v57 = vpack.c.bf16 %v1811_v46, %v1811_v46  ;;  %v1731_v25 = vadd.f32 %v1699_v58, %v1631_v19  ;;  %v1595_v27 = vpop.permute.xlu0 %1594 }
 0x306   : > { %v1826_v36 = vsel %vm1762_vm14, %v1730_v35, %v1794_v39  ;;  %v1712_v61 = vadd.f32 %v1680_v1, %v1593_v59  ;;  %v1681_v31 = vmul.f32 %v1595_v27, %v3400_v63 }
 0x307   : > { %1972 = vst.msk [vmem:[%s3459_s28 + $0x2c] sm:$0xf] %vm1960_vm11, %v2228_v57  ;;  %v2243_v48 = vpack.c.bf16 %v1826_v36, %v1826_v36  ;;  %vm1763_vm15 = vcmp.ge.f32.partialorder %v1731_v25, 0.0  ;;  %v1795_v43 = vmul.f32 0.01, %v1731_v25  ;;  %v1625_v18 = vpop.permute.xlu1 %1624 }
 0x308   : > { %vm1744_vm0 = vcmp.ge.f32.partialorder %v1712_v61, 0.0  ;;  %v1776_v40 = vmul.f32 0.01, %v1712_v61  ;;  %v1713_v51 = vadd.f32 %v1681_v31, %v1595_v27  ;;  %v1696_v5 = vmul.f32 %v1625_v18, %v3405_v53 }
 0x309   : > { %1987 = vst.msk [vmem:[%s3459_s28 + $0x68] sm:$0xf] %vm1960_vm11, %v2243_v48  ;;  %v1827_v62 = vsel %vm1763_vm15, %v1731_v25, %v1795_v43  ;;  %v1627_v7 = vpop.permute.xlu0 %1626 }
 0x30a   : > { %v2244_v2 = vpack.c.bf16 %v1827_v62, %v1827_v62  ;;  %v1808_v8 = vsel %vm1744_vm0, %v1712_v61, %v1776_v40  ;;  %vm1745_vm1 = vcmp.ge.f32.partialorder %v1713_v51, 0.0  ;;  %v1777_v63 = vmul.f32 0.01, %v1713_v51 }
 0x30b   : > { %v2225_v60 = vpack.c.bf16 %v1808_v8, %v1808_v8  ;;  %v1728_v32 = vadd.f32 %v1696_v5, %v1625_v18  ;;  %v1697_v11 = vmul.f32 %v1627_v7, %v3411_v23  ;;  %v1605_v0 = vpop.permute.xlu1 %1604 }
 0x30c   : > { %1988 = vst.msk [vmem:[%s3459_s28 + $0x6c] sm:$0xf] %vm1960_vm11, %v2244_v2  ;;  %v1809_v22 = vsel %vm1745_vm1, %v1713_v51, %v1777_v63  ;;  %v1686_v13 = vmul.f32 %v1605_v0, %v3417_v3 }
 0x30d   : > { %1969 = vst.msk [vmem:[%s3459_s28 + $0x20] sm:$0xf] %vm1960_vm11, %v2225_v60  ;;  %v2226_v53 = vpack.c.bf16 %v1809_v22, %v1809_v22  ;;  %vm1760_vm2 = vcmp.ge.f32.partialorder %v1728_v32, 0.0  ;;  %v1792_v20 = vmul.f32 0.01, %v1728_v32  ;;  %v1729_v24 = vadd.f32 %v1697_v11, %v1627_v7  ;;  %v1607_v34 = vpop.permute.xlu0 %1606 }
 0x30e   : > { %v1718_v28 = vadd.f32 %v1686_v13, %v1605_v0  ;;  %v1687_v4 = vmul.f32 %v1607_v34, %v3422_v56 }
 0x30f   : > { %1970 = vst.msk [vmem:[%s3459_s28 + $0x24] sm:$0xf] %vm1960_vm11, %v2226_v53  ;;  %v1824_v23 = vsel %vm1760_vm2, %v1728_v32, %v1792_v20  ;;  %vm1761_vm3 = vcmp.ge.f32.partialorder %v1729_v24, 0.0  ;;  %v1793_v16 = vmul.f32 0.01, %v1729_v24  ;;  %v1601_v38 = vpop.permute.xlu1 %1600 }
 0x310   : > { %v2241_v33 = vpack.c.bf16 %v1824_v23, %v1824_v23  ;;  %vm1750_vm4 = vcmp.ge.f32.partialorder %v1718_v28, 0.0  ;;  %v1782_v3 = vmul.f32 0.01, %v1718_v28  ;;  %v1719_v42 = vadd.f32 %v1687_v4, %v1607_v34 }
 0x311   : > { %v1825_v15 = vsel %vm1761_vm3, %v1729_v24, %v1793_v16  ;;  %v1684_v30 = vmul.f32 %v1601_v38, %v3427_v10  ;;  %v1603_v6 = vpop.permute.xlu0 %1602 }
 0x312   : > { %1985 = vst.msk [vmem:[%s3459_s28 + $0x60] sm:$0xf] %vm1960_vm11, %v2241_v33  ;;  %v2242_v44 = vpack.c.bf16 %v1825_v15, %v1825_v15  ;;  %v1814_v56 = vsel %vm1750_vm4, %v1718_v28, %v1782_v3  ;;  %vm1751_vm5 = vcmp.ge.f32.partialorder %v1719_v42, 0.0  ;;  %v1783_v45 = vmul.f32 0.01, %v1719_v42 }
 0x313   : > { %v2231_v47 = vpack.c.bf16 %v1814_v56, %v1814_v56  ;;  %v1716_v49 = vadd.f32 %v1684_v30, %v1601_v38  ;;  %v1685_v50 = vmul.f32 %v1603_v6, %v3432_v12  ;;  %v1633_v26 = vpop.permute.xlu1 %1632 }
 0x314   : > { %1986 = vst.msk [vmem:[%s3459_s28 + $0x64] sm:$0xf] %vm1960_vm11, %v2242_v44  ;;  %v1815_v14 = vsel %vm1751_vm5, %v1719_v42, %v1783_v45  ;;  %v1700_v52 = vmul.f32 %v1633_v26, %v3436_v17 }
 0x315   : > { %1975 = vst.msk [vmem:[%s3459_s28 + $0x38] sm:$0xf] %vm1960_vm11, %v2231_v47  ;;  %v2232_v10 = vpack.c.bf16 %v1815_v14, %v1815_v14  ;;  %vm1748_vm6 = vcmp.ge.f32.partialorder %v1716_v49, 0.0  ;;  %v1780_v54 = vmul.f32 0.01, %v1716_v49  ;;  %v1717_v19 = vadd.f32 %v1685_v50, %v1603_v6  ;;  %v1635_v37 = vpop.permute.xlu0 %1634 }
 0x316   : > { %v1732_v21 = vadd.f32 %v1700_v52, %v1633_v26  ;;  %v1701_v35 = vmul.f32 %v1635_v37, %v3440_v41 }
 0x317   : > { %1976 = vst.msk [vmem:[%s3459_s28 + $0x3c] sm:$0xf] %vm1960_vm11, %v2232_v10  ;;  %v1812_v12 = vsel %vm1748_vm6, %v1716_v49, %v1780_v54  ;;  %vm1749_vm7 = vcmp.ge.f32.partialorder %v1717_v19, 0.0  ;;  %v1781_v55 = vmul.f32 0.01, %v1717_v19  ;;  %v1637_v58 = vpop.permute.xlu1 %1636 }
 0x318   : > { %v2229_v59 = vpack.c.bf16 %v1812_v12, %v1812_v12  ;;  %vm1764_vm8 = vcmp.ge.f32.partialorder %v1732_v21, 0.0  ;;  %v1796_v17 = vmul.f32 0.01, %v1732_v21  ;;  %v1733_v46 = vadd.f32 %v1701_v35, %v1635_v37 }
 0x319   : > { %v1813_v39 = vsel %vm1749_vm7, %v1717_v19, %v1781_v55  ;;  %v1702_v1 = vmul.f32 %v1637_v58, %v3444_v29  ;;  %v1639_v57 = vpop.permute.xlu0 %1638 }
 0x31a   : > { %1973 = vst.msk [vmem:[%s3459_s28 + $0x30] sm:$0xf] %vm1960_vm11, %v2229_v59  ;;  %v2230_v41 = vpack.c.bf16 %v1813_v39, %v1813_v39  ;;  %v1828_v25 = vsel %vm1764_vm8, %v1732_v21, %v1796_v17  ;;  %vm1765_vm9 = vcmp.ge.f32.partialorder %v1733_v46, 0.0  ;;  %v1797_v27 = vmul.f32 0.01, %v1733_v46 }
 0x31b   : > { %v2245_v36 = vpack.c.bf16 %v1828_v25, %v1828_v25  ;;  %v1734_v61 = vadd.f32 %v1702_v1, %v1637_v58  ;;  %v1703_v31 = vmul.f32 %v1639_v57, %v3448_v9 }
 0x31c   : > { %1974 = vst.msk [vmem:[%s3459_s28 + $0x34] sm:$0xf] %vm1960_vm11, %v2230_v41  ;;  %v1829_v48 = vsel %vm1765_vm9, %v1733_v46, %v1797_v27 }
 0x31d   : > { %1989 = vst.msk [vmem:[%s3459_s28 + $0x70] sm:$0xf] %vm1960_vm11, %v2245_v36  ;;  %v2246_v29 = vpack.c.bf16 %v1829_v48, %v1829_v48  ;;  %vm1766_vm10 = vcmp.ge.f32.partialorder %v1734_v61, 0.0  ;;  %v1798_v43 = vmul.f32 0.01, %v1734_v61  ;;  %v1735_v18 = vadd.f32 %v1703_v31, %v1639_v57 }
 0x31f   : > { %1990 = vst.msk [vmem:[%s3459_s28 + $0x74] sm:$0xf] %vm1960_vm11, %v2246_v29  ;;  %v1830_v40 = vsel %vm1766_vm10, %v1734_v61, %v1798_v43  ;;  %vm1767_vm12 = vcmp.ge.f32.partialorder %v1735_v18, 0.0  ;;  %v1799_v51 = vmul.f32 0.01, %v1735_v18 }
 0x320   : > { %v2247_v9 = vpack.c.bf16 %v1830_v40, %v1830_v40 }
 0x321   : > { %v1831_v5 = vsel %vm1767_vm12, %v1735_v18, %v1799_v51 }
 0x322   : > { %1991 = vst.msk [vmem:[%s3459_s28 + $0x78] sm:$0xf] %vm1960_vm11, %v2247_v9  ;;  %v2248_v62 = vpack.c.bf16 %v1831_v5, %v1831_v5 }
 0x324   : > { %1992 = vst.msk [vmem:[%s3459_s28 + $0x7c] sm:$0xf] %vm1960_vm11, %v2248_v62 }
 0x325   : > { %2534 = shalt.err (!%p2531_p1)
}
 0x326   : > { %s2535_s23 = scalar_lea.hbm %s3553_s11, 2048  ;;  %s2539_s7 = scalar_lea.hbm %s3607_s3, 4096 }
 0x327   : > { %p2536_p13 = scmp.ne.s32.totalorder %s3553_s11, %s2535_s23  ;;  %p2540_p4 = scmp.lt.u32.totalorder %s3553_s11, %s3607_s3 }
 0x328   : > { %p2541_p5 = scmp.lt.u32.totalorder %s2539_s7, %s2535_s23  ;;  %p2543_p11 = scmp.lt.u32.totalorder %s2535_s23, %s3553_s11 }
 0x329   : > { %p2537_p6 = pnand %p2536_p13, %p3623_p0 }
 0x32a   : > { %p2542_p8 = por %p2541_p5, %p2540_p4 }
 0x32b   : > { %p2538_p10 = pneg %p2537_p6 }
 0x32c   : > { %p2544_p2 = por %p2543_p11, %p2542_p8 }
 0x32e   : > { %p2545_p3 = pnand %p2544_p2, %p2538_p10 }
 0x330   : > { %2548 = shalt.err (!%p2545_p3)
}
 0x331   : > { %s2604_s28 = smov 64  }
 0x332   : > { %2320 = dma.vmem_to_hbm [thread:$0]  (%p3623_p0), %s3557_s6, 2048, %s3553_s11, %s1994_s16, %s2604_s28, %s2604_s28, %s2598_s18  }
 0x333 PF: > { %s2022_s29 = sand.u32 1, %s2579_s12   ;;  %p3624_p7 = scmp.ne.s32.totalorder %s3612_s19, 0 }
 0x334   : > { %p3625_p9 = scmp.ge.s32.totalorder %s2591_s15, 2  ;;  %s2023_s17 = scalar_lea.sflag [#allocation4], %s2022_s29 }
 0x336   : > { %p2334_p12 = pnand %p3625_p9, %p3624_p7 }
 0x338   : > { %2574 = dma.done.wait (!%p2334_p12), %s2023_s17, 2048  }
 0x339   : > { %2576 = vsyncadd (!%p2334_p12), %s2023_s17, 4294965248  ;;  %p17_p1 = scmp.ge.s32.totalorder %s2739_s5, 4   ;;  %s3626_s12 = smov %s2583_s13 }
 0x33a   : > { %s3627_s13 = smov %s2587_s14  ;;  %s3628_s14 = smov %s2755_s10 }
 0x33b   : > { %s3629_s15 = smov %s2739_s5  ;;  %19 = sbr.rel (!%p17_p1) target bundleno = 6 (0x6), region = 85 }
 0x342   :  { %2028 = vsyncpa [#allocation3], 1 }
 0x343   :  { %2030 = vsyncpa [#allocation3 + $0x1], 1 }
 0x344   :  { %2031 = vsyncpa [#allocation6], 1 }
 0x345   :  { %2032 = vsyncpa [#allocation4], 1 }
 0x346   :  { %2034 = vsyncpa [#allocation4 + $0x1], 1 }

// kernel: encode_pallas.5
= control target key start
LH: loop header
LB: loop body
LE: loop exit
PB: predicated region body
PF: predicated region fallthrough
CT: control target
= control target key end

     0   :  { %8 = vsyncpa [#allocation3], 0  ;;  %s3619_s0 = inlined_call_operand.hbm [shape: bf16[2,16,16,16], index: 0, kind: input, shape index: {}]   ;;  %s3620_s1 = inlined_call_operand.hbm [shape: bf16[144,64], index: 1, kind: input, shape index: {}]   ;;  %s3621_s2 = inlined_call_operand.hbm [shape: f32[1,64], index: 2, kind: input, shape index: {}]   ;;  %s3622_s3 = inlined_call_operand.hbm [shape: bf16[2,16,16,32], index: 3, kind: output, shape index: {}]  }
   0x1   :  { %10 = vsyncpa [#allocation3 + $0x1], 0 }
   0x2   :  { %11 = vsyncpa [#allocation6], 0 }
   0x3   :  { %12 = vsyncpa [#allocation4], 0 }
   0x4   :  { %14 = vsyncpa [#allocation4 + $0x1], 0  ;;  %s2668_s12 = smov 0   ;;  %s2670_s13 = smov 0  }
   0x5   :  { %s2672_s14 = smov 0   ;;  %s2674_s15 = smov 0  }
   0x6 LB: > { %s2689_s16 = sadd.s32 4294967295, %s2633_s15   ;;  %s2168_s17 = sadd.s32 4294967294, %s2633_s15   ;;  %s2633_s15 = sphi %s2674_s15, %s3644_s15   ;;  %s2629_s14 = sphi %s2672_s14, %s3643_s14   ;;  %s2625_s13 = sphi %s2670_s13, %s3642_s13   ;;  %s2621_s12 = sphi %s2668_s12, %s3641_s12  }
   0x7   : > { %p40_p0 = scmp.ne.s32.totalorder %s2625_s13, %s2621_s12  ;;  %p3623_p1 = scmp.eq.s32.totalorder %s2689_s16, 0 }
   0x8   : > { %p112_p3 = scmp.eq.s32.totalorder %s2168_s17, 1  ;;  %p2169_p5 = scmp.ge.s32.totalorder %s2633_s15, 1 }
   0x9   : > { %p2698_p4 = por %p3623_p1, %p40_p0  ;;  %p119_p7 = scmp.lt.s32.totalorder %s2633_s15, 3 }
   0xa   : > { %p2703_p6 = por %p112_p3, %p40_p0  ;;  %s2635_s21 = smov [#allocation5]  }
   0xb   : > { %s3626_s18 = scalar_select %p2698_p4, 1, 0 }
   0xc   : > { %s3627_s19 = scalar_select %p2703_p6, 1, 0 }
   0xd   : > { %p2708_p8 = pnand %p2169_p5, %p119_p7  ;;  %s131_s22 = sshll.u32 %s2635_s21, 4  ;;  %s2712_s22 = int_to_ptr.vmem [resolvable:$true] %s131_s22 }
   0xe   : > { %s2636_s24 = smov [#allocation7]   ;;  %s2477_s28 = scalar_lea.hbm %s3620_s1, 1152 }
   0xf   : > { %p2356_p9 = pneg %p2708_p8  ;;  %s145_s25 = sshll.u32 %s2636_s24, 4  ;;  %s2723_s25 = int_to_ptr.vmem [resolvable:$true] %s145_s25 }
  0x10   : > { %p2478_p12 = scmp.ne.s32.totalorder %s3620_s1, %s2477_s28  ;;  %p2484_p5 = scmp.lt.u32.totalorder %s2477_s28, %s3620_s1 }
  0x11   : > { %p2719_p11 = pnand %p2356_p9, %p3623_p1 }
  0x13   : > { %p2479_p13 = pneg %p2719_p11 }
  0x15   : > { %p2480_p0 = pnand %p2479_p13, %p2478_p12 }
  0x17   : > { %p2481_p3 = pneg %p2480_p0 }
  0x19   : > { %p2486_p7 = pnand %p2484_p5, %p2481_p3 }
  0x1b   : > { %2489 = shalt.err (!%p2486_p7)
}
  0x1c   : > { %s2490_s6 = scalar_lea.vmem %s2712_s22, 1152  ;;  %p2498_p2 = scmp.lt.s32.totalorder %s2712_s22, %s2712_s22 }
  0x1d   : > { %p2491_p9 = scmp.ne.s32.totalorder %s2712_s22, %s2490_s6  ;;  %p2499_p12 = scmp.lt.s32.totalorder %s2490_s6, %s2490_s6 }
  0x1f   : > { %p2493_p10 = pnand %p2491_p9, %p2479_p13  ;;  %p2500_p0 = por %p2499_p12, %p2498_p2 }
  0x21   : > { %p2494_p1 = pneg %p2493_p10 }
  0x23   : > { %p2501_p6 = pnand %p2500_p0, %p2494_p1 }
  0x25   : > { %2504 = shalt.err (!%p2501_p6)
}
  0x26   : > { %s2637_s7 = smov 64   ;;  %s2638_s8 = smov 4  }
  0x27   : > { %2359 = dma.hbm_to_vmem [thread:$0]  (!%p2719_p11), %s3620_s1, 1152, %s2712_s22, [#allocation6], %s2637_s7, %s2637_s7, %s2638_s8  }
  0x28   : > { %s2505_s21 = scalar_lea.hbm %s3621_s2, 16 }
  0x29   : > { %p2506_p1 = scmp.ne.s32.totalorder %s3621_s2, %s2505_s21  ;;  %p2512_p10 = scmp.lt.u32.totalorder %s2505_s21, %s3621_s2 }
  0x2b   : > { %p2508_p2 = pnand %p2506_p1, %p2479_p13 }
  0x2d   : > { %p2509_p6 = pneg %p2508_p2 }
  0x2f   : > { %p2514_p3 = pnand %p2512_p10, %p2509_p6 }
  0x31   : > { %2517 = shalt.err (!%p2514_p3)
}
  0x32   : > { %s2518_s22 = scalar_lea.vmem %s2723_s25, 16  ;;  %s2525_s29 = scalar_lea.vmem %s2723_s25, 32 }
  0x33   : > { %p2519_p5 = scmp.ne.s32.totalorder %s2723_s25, %s2518_s22  ;;  %p2526_p12 = scmp.lt.s32.totalorder %s2723_s25, %s2723_s25 }
  0x34   : > { %p2527_p0 = scmp.lt.s32.totalorder %s2525_s29, %s2518_s22 }
  0x35   : > { %p2521_p7 = pnand %p2519_p5, %p2479_p13 }
  0x36   : > { %p2528_p1 = por %p2527_p0, %p2526_p12 }
  0x37   : > { %p2522_p9 = pneg %p2521_p7 }
  0x39   : > { %p2529_p2 = pnand %p2528_p1, %p2522_p9 }
  0x3b   : > { %2532 = shalt.err (!%p2529_p2)
}
  0x3c   : > { %2362 = dma.hbm_to_vmem [thread:$0]  (!%p2719_p11), %s3621_s2, 16, %s2723_s25, [#allocation6]  }
  0x3d   : > { %s2782_s5 = sadd.s32 1, %s2633_s15   ;;  %s27_s23 = sadd.s32 1, %s2629_s14 }
  0x3e   : > { %s24_s6 = ssub.s32 %s2633_s15, %s2782_s5  ;;  %p34_p13 = scmp.ne.s32.totalorder %s2629_s14, %s2625_s13 }
  0x3f   : > { %p25_p6 = scmp.eq.s32.totalorder %s24_s6, 0  ;;  %p35_p10 = scmp.eq.s32.totalorder %s2633_s15, 0 }
  0x40   : > { %p3630_p3 = scmp.eq.s32.totalorder %s2689_s16, 1  ;;  %p2373_p7 = scmp.lt.s32.totalorder %s2633_s15, 2 }
  0x41   : > { %s2798_s10 = scalar_select %p25_p6, %s2629_s14, %s27_s23  }
  0x42   : > { %p2792_p5 = por %p3630_p3, %p34_p13  ;;  %p36_p9 = por %p35_p10, %p34_p13 }
  0x43   : > { %s156_s11 = sand.u32 1, %s2629_s14   ;;  %s2292_s25 = sshll.u32 %s2633_s15, 11 }
  0x44   : > { %s3631_s9 = scalar_select %p2792_p5, 1, 0 }
  0x45   : > { %s2173_s17 = sshll.u32 %s156_s11, 7  ;;  %s2805_s26 = scalar_lea.hbm %s3619_s0, %s2292_s25 }
  0x46   : > { %s160_s27 = scalar_lea.vmem [#allocation2], %s2173_s17  ;;  %p2809_p11 = pnand %p2373_p7, %p36_p9 }
  0x47   : > { %s167_s28 = sshll.u32 %s160_s27, 4  ;;  %s2813_s29 = scalar_lea.sflag [#allocation3], %s156_s11  ;;  %s2807_s28 = int_to_ptr.vmem [resolvable:$true] %s167_s28 }
  0x48   : > { %s2533_s30 = scalar_lea.hbm %s2805_s26, 2048  ;;  %p2535_p0 = pneg %p2809_p11 }
  0x49   : > { %p2534_p12 = scmp.ne.s32.totalorder %s2805_s26, %s2533_s30  ;;  %s2538_s6 = scalar_lea.hbm %s3619_s0, 4096 }
  0x4a   : > { %p2539_p13 = scmp.lt.u32.totalorder %s2805_s26, %s3619_s0  ;;  %p2540_p6 = scmp.lt.u32.totalorder %s2538_s6, %s2533_s30 }
  0x4b   : > { %p2536_p1 = pnand %p2535_p0, %p2534_p12  ;;  %p2542_p3 = scmp.lt.u32.totalorder %s2533_s30, %s2805_s26 }
  0x4c   : > { %p2541_p10 = por %p2540_p6, %p2539_p13 }
  0x4d   : > { %p2537_p2 = pneg %p2536_p1 }
  0x4e   : > { %p2543_p7 = por %p2542_p3, %p2541_p10 }
  0x50   : > { %p2544_p9 = pnand %p2543_p7, %p2537_p2 }
  0x52   : > { %2547 = shalt.err (!%p2544_p9)
}
  0x53   : > { %s2548_s11 = scalar_lea.vmem %s2807_s28, 2048  ;;  %s2639_s21 = smov [#allocation2]  }
  0x54   : > { %p2549_p12 = scmp.ne.s32.totalorder %s2807_s28, %s2548_s11  ;;  %s2553_s24 = sshll.u32 %s2639_s21, 4  ;;  %s2554_s24 = int_to_ptr.vmem [resolvable:$false] %s2553_s24 }
  0x55   : > { %s2555_s27 = scalar_lea.vmem %s2554_s24, 4096  ;;  %p2556_p4 = scmp.lt.s32.totalorder %s2807_s28, %s2554_s24 }
  0x56   : > { %p2551_p1 = pnand %p2549_p12, %p2535_p0  ;;  %p2557_p13 = scmp.lt.s32.totalorder %s2555_s27, %s2548_s11 }
  0x58   : > { %p2552_p5 = pneg %p2551_p1  ;;  %p2558_p6 = por %p2557_p13, %p2556_p4 }
  0x5a   : > { %p2559_p10 = pnand %p2558_p6, %p2552_p5 }
  0x5c   : > { %2562 = shalt.err (!%p2559_p10)
}
  0x5d   : > { %2366 = dma.hbm_to_vmem [thread:$0]  (!%p2809_p11), %s2805_s26, 2048, %s2807_s28, %s2813_s29, %s2637_s7, %s2637_s7, %s2638_s8  }
  0x5e   : > { %179 = sbr.rel (%p2708_p8) target bundleno = 803 (0x323), region = 32  ;;  %s2847_s30 = sand.u32 (!%p2708_p8), 1, %s2625_s13  }
  0x5f   : > { %s2177_s4 = sshll.u32 (!%p2708_p8), %s2847_s30, 7  ;;  %s182_s23 = scalar_lea.sflag (!%p2708_p8), [#allocation3], %s2847_s30 }
  0x60   : > { %s2853_s22 = scalar_lea.vmem (!%p2708_p8), [#allocation2], %s2177_s4  ;;  %p3633_p4 = scmp.ne.s32.totalorder (!%p2708_p8), %s3626_s18, 0 }
  0x65   : > { %2608 = dma.done.wait (%p3633_p4), %s182_s23, 2048  }
  0x66   : > { %2610 = vsyncadd (%p3633_p4), %s182_s23, 4294965248  ;;  %p3634_p5 = scmp.eq.s32.totalorder %s2689_s16, 0 }
  0x68   : > { %2612 = dma.done.wait (%p3634_p5), [#allocation6], 1168   ;;  %p3635_p8 = pmov %p3634_p5 }
  0x69   : > { %vm649_vm0 = vcmask 1040384   ;;  %vm650_vm1 = vsmask.f32 256  ;;  %v217_v0 = vld [vmem:[%s2853_s22] sm:$0xf]  ;;  %vm941_vm2 = vcmask 1046528  }
  0x6a   : > { %2614 = vsyncadd (%p3635_p8), [#allocation6], 4294966128  ;;  %v218_v1 = vld [vmem:[%s2853_s22 + $0x4] sm:$0xf]  ;;  %v233_v2 = vld [vmem:[%s2853_s22 + $0x40] sm:$0xf]  ;;  %v2182_v3 = vcombine.low %v217_v0, %v217_v0 }
  0x6b   : > { %v2198_v4 = vcombine.low %v217_v0, %v218_v1  ;;  %v2214_v5 = vcombine.low %v218_v1, %v218_v1  ;;  %v234_v6 = vld [vmem:[%s2853_s22 + $0x44] sm:$0xf]  ;;  %v2189_v7 = vcombine.low %v233_v2, %v233_v2  ;;  %v219_v8 = vld [vmem:[%s2853_s22 + $0x8] sm:$0xf]  ;;  %v220_v9 = vld [vmem:[%s2853_s22 + $0xc] sm:$0xf] }
  0x6c   : > { %v2205_v10 = vcombine.low %v233_v2, %v234_v6  ;;  %v2221_v11 = vcombine.low %v234_v6, %v234_v6  ;;  %v2181_v12 = vcombine.low %v219_v8, %v219_v8  ;;  %v2197_v13 = vcombine.low %v219_v8, %v220_v9  ;;  %vm2871_vm3 = vmand %vm649_vm0, %vm650_vm1  ;;  %v235_v31 = vld [vmem:[%s2853_s22 + $0x48] sm:$0xf]  ;;  %v236_v56 = vld [vmem:[%s2853_s22 + $0x4c] sm:$0xf]  ;;  %s2640_s18 = smov 32   ;;  %s2641_s20 = smov 16  }
  0x6d   : > { %v301_v14 = vshrl.u32 %v2182_v3, 16  ;;  %v417_v15 = vshrl.u32 %v2198_v4, 16  ;;  %v420_v16 = vshll.u32 %v2198_v4, 16  ;;  %v574_v17 = vshll.u32 %v2214_v5, 16  ;;  %s2643_s7 = smov 48   ;;  %s2644_s8 = smov 96  }
  0x6e   : > { %v322_v19 = vshrl.u32 %v2189_v7, 16  ;;  %v466_v20 = vshrl.u32 %v2205_v10, 16  ;;  %v469_v21 = vshll.u32 %v2205_v10, 16  ;;  %v602_v22 = vshll.u32 %v2221_v11, 16  ;;  %v222_v10 = vld [vmem:[%s2853_s22 + $0x14] sm:$0xf] }
  0x6f   : > { %v419_v23 = vrot.slane %v417_v15, 7  ;;  %v576_v24 = vrot.slane %v574_v17, 3  ;;  %vm684_vm4 = vsmask.f32 7424  ;;  %v298_v25 = vshrl.u32 %v2181_v12, 16  ;;  %s3472_s26 = scalar_lea.vmem [#allocation8], %s2177_s4 }
  0x70   : > { %v410_v26 = vshrl.u32 %v2197_v13, 16  ;;  %v468_v27 = vrot.slane %v466_v20, 7  ;;  %v604_v28 = vrot.slane %v602_v22, 3  ;;  %v413_v29 = vshll.u32 %v2197_v13, 16  ;;  %v237_v20 = vld [vmem:[%s2853_s22 + $0x50] sm:$0xf] }
  0x71   : > { %v2213_v30 = vcombine.low %v220_v9, %v220_v9  ;;  %v422_v32 = vor.u32 %v420_v16, %v419_v23  ;;  %v669_v33 = vsel %vm2871_vm3, %v419_v23, %v576_v24  ;;  %v2190_v35 = vcombine.low %v235_v31, %v235_v31  ;;  %v221_v9 = vld [vmem:[%s2853_s22 + $0x10] sm:$0xf]  ;;  %s2325_s28 = sshll.u32 %s2689_s16, 11  ;;  %s2076_s29 = sshll.u32 %s3472_s26, 4  ;;  %s3571_s29 = int_to_ptr.vmem [resolvable:$true] %s2076_s29 }
  0x72   : > { %v412_v34 = vrot.slane %v410_v26, 7  ;;  %v946_v36 = vrot.slane %v669_v33, 1  ;;  %v471_v37 = vor.u32 %v469_v21, %v468_v27  ;;  %v676_v38 = vsel %vm2871_vm3, %v468_v27, %v604_v28  ;;  %v238_v21 = vld [vmem:[%s2853_s22 + $0x54] sm:$0xf]  ;;  %s3569_s25 = scalar_lea.hbm %s3622_s3, %s2325_s28  ;;  %s2063_s16 = scalar_lea.sflag [#allocation4], %s2847_s30 }
  0x73   : > { %v705_v39 = vshll.u32 %v669_v33, 16  ;;  %v2882_v40 = vsel %vm2871_vm3, %v301_v14, %v422_v32  ;;  %v967_v41 = vrot.slane %v676_v38, 1  ;;  %v570_v43 = vshll.u32 %v2213_v30, 16  ;;  %s2563_s11 = scalar_lea.vmem %s3571_s29, 2048  ;;  %p3638_p0 = scmp.ne.s32.totalorder %s3631_s9, 0 }
  0x74   : > { %v415_v42 = vor.u32 %v413_v29, %v412_v34  ;;  %v945_v44 = vrot.slane %v2882_v40, 1  ;;  %v2887_v45 = vsel %vm2871_vm3, %v322_v19, %v471_v37  ;;  %v698_v46 = vshrl.u32 %v2882_v40, 16  ;;  %p2564_p11 = scmp.ne.s32.totalorder %s3571_s29, %s2563_s11  ;;  %s2645_s21 = smov [#allocation8]  }
  0x75   : > { %v700_v47 = vshll.u32 %v2882_v40, 16  ;;  %v966_v48 = vrot.slane %v2887_v45, 1  ;;  %v707_v49 = vrot.slane %v705_v39, 1  ;;  %v572_v50 = vrot.slane %v570_v43, 3  ;;  %v224_v39 = vld [vmem:[%s2853_s22 + $0x1c] sm:$0xf] }
  0x76   : > { %v2894_v51 = vsel %vm2871_vm3, %v298_v25, %v415_v42  ;;  %v947_v52 = vsel %vm941_vm2, %v945_v44, %v946_v36  ;;  %v782_v59 = vshrl.u32 %v2887_v45, 16  ;;  %v784_v60 = vshll.u32 %v2887_v45, 16  ;;  %p2565_p2 = pnand %p2564_p11, %p3638_p0  ;;  %s2567_s24 = sshll.u32 %s2645_s21, 4  ;;  %s2568_s24 = int_to_ptr.vmem [resolvable:$false] %s2567_s24 }
  0x77   : > { %v702_v53 = vrot.slane %v700_v47, 1  ;;  %v686_v54 = vshrl.u32 %v2894_v51, 16  ;;  %v688_v55 = vshll.u32 %v2894_v51, 16  ;;  %992 = vrot.lane.b32.xlu0 %v947_v52, %s2640_s18  ;;  %v968_v57 = vsel %vm941_vm2, %v966_v48, %v967_v41  ;;  %s2569_s27 = scalar_lea.vmem %s2568_s24, 4096  ;;  %p2570_p7 = scmp.lt.s32.totalorder %s3571_s29, %s2568_s24 }
  0x78   : > { %v668_v58 = vsel %vm2871_vm3, %v412_v34, %v572_v50  ;;  %1006 = vrot.lane.b32.xlu1 %v968_v57, %s2640_s18  ;;  %v789_v0 = vshll.u32 %v676_v38, 16  ;;  %v786_v1 = vrot.slane %v784_v60, 1  ;;  %v325_v2 = vshrl.u32 %v2190_v35, 16  ;;  %v223_v38 = vld [vmem:[%s2853_s22 + $0x18] sm:$0xf]  ;;  %p2566_p3 = pneg %p2565_p2  ;;  %p2571_p9 = scmp.lt.s32.totalorder %s2569_s27, %s2563_s11 }
  0x79   : > { %v703_v61 = vor.u32 %v702_v53, %v698_v46  ;;  %v690_v62 = vrot.slane %v688_v55, 1  ;;  %v693_v63 = vshll.u32 %v668_v58, 16  ;;  %v2206_v3 = vcombine.low %v235_v31, %v236_v56 }
  0x7a   : > { %v2222_v4 = vcombine.low %v236_v56, %v236_v56  ;;  %v791_v8 = vrot.slane %v789_v0, 1  ;;  %v787_v11 = vor.u32 %v786_v1, %v782_v59  ;;  %v942_v16 = vrot.slane %v2894_v51, 1  ;;  %p2572_p12 = por %p2571_p9, %p2570_p7 }
  0x7b   : > { %v708_v5 = vsel %vm684_vm4, %v703_v61, %v707_v49  ;;  %v691_v6 = vor.u32 %v690_v62, %v686_v54  ;;  %v695_v7 = vrot.slane %v693_v63, 1  ;;  %v473_v12 = vshrl.u32 %v2206_v3, 16 }
  0x7c   : > { %879 = vrot.lane.b32.xlu0 %v708_v5, %s2641_s20  ;;  %v476_v13 = vshll.u32 %v2206_v3, 16  ;;  %v606_v14 = vshll.u32 %v2222_v4, 16  ;;  %v943_v17 = vrot.slane %v668_v58, 1  ;;  %v2183_v19 = vcombine.low %v221_v9, %v221_v9  ;;  %p2573_p1 = pnand %p2572_p12, %p2566_p3 }
  0x7d   : > { %v696_v15 = vsel %vm684_vm4, %v691_v6, %v695_v7  ;;  %v792_v22 = vsel %vm684_vm4, %v787_v11, %v791_v8  ;;  %v475_v23 = vrot.slane %v473_v12, 7  ;;  %v2199_v25 = vcombine.low %v221_v9, %v222_v10 }
  0x7e   : > { %877 = vrot.lane.b32.xlu1 %v696_v15, %s2641_s20  ;;  %v608_v24 = vrot.slane %v606_v14, 3  ;;  %v944_v26 = vsel %vm941_vm2, %v942_v16, %v943_v17  ;;  %v304_v27 = vshrl.u32 %v2183_v19, 16  ;;  %v2215_v28 = vcombine.low %v222_v10, %v222_v10 }
  0x7f   : > { %v2191_v29 = vcombine.low %v237_v20, %v237_v20  ;;  %v478_v30 = vor.u32 %v476_v13, %v475_v23  ;;  %v424_v32 = vshrl.u32 %v2199_v25, 16  ;;  %v427_v33 = vshll.u32 %v2199_v25, 16  ;;  %v240_v25 = vld [vmem:[%s2853_s22 + $0x5c] sm:$0xf] }
  0x80   : > { %893 = vrot.lane.b32.xlu0 %v792_v22, %s2641_s20  ;;  %v677_v31 = vsel %vm2871_vm3, %v475_v23, %v608_v24  ;;  %v578_v36 = vshll.u32 %v2215_v28, 16  ;;  %v2207_v43 = vcombine.low %v237_v20, %v238_v21  ;;  %v2223_v44 = vcombine.low %v238_v21, %v238_v21  ;;  %v239_v20 = vld [vmem:[%s2853_s22 + $0x58] sm:$0xf] }
  0x81   : > { %v801_v34 = vshll.u32 %v677_v31, 16  ;;  %v970_v35 = vrot.slane %v677_v31, 1  ;;  %v328_v37 = vshrl.u32 %v2191_v29, 16  ;;  %v2925_v41 = vsel %vm2871_vm3, %v325_v2, %v478_v30  ;;  %v225_v30 = vld [vmem:[%s2853_s22 + $0x20] sm:$0xf] }
  0x82   : > { %v426_v42 = vrot.slane %v424_v32, 7  ;;  %v794_v46 = vshrl.u32 %v2925_v41, 16  ;;  %v796_v47 = vshll.u32 %v2925_v41, 16  ;;  %v969_v49 = vrot.slane %v2925_v41, 1  ;;  %v226_v31 = vld [vmem:[%s2853_s22 + $0x24] sm:$0xf] }
  0x83   : > { %v803_v48 = vrot.slane %v801_v34, 1  ;;  %v580_v52 = vrot.slane %v578_v36, 3  ;;  %v480_v53 = vshrl.u32 %v2207_v43, 16  ;;  %v483_v54 = vshll.u32 %v2207_v43, 16 }
  0x84   : > { %990 = vrot.lane.b32.xlu0 %v944_v26, %s2640_s18  ;;  %v429_v50 = vor.u32 %v427_v33, %v426_v42  ;;  %v798_v55 = vrot.slane %v796_v47, 1  ;;  %v971_v56 = vsel %vm941_vm2, %v969_v49, %v970_v35  ;;  %v610_v57 = vshll.u32 %v2223_v44, 16 }
  0x85   : > { %v2184_v58 = vcombine.low %v223_v38, %v223_v38  ;;  %v670_v60 = vsel %vm2871_vm3, %v426_v42, %v580_v52  ;;  %v482_v61 = vrot.slane %v480_v53, 7  ;;  %v2200_v62 = vcombine.low %v223_v38, %v224_v39 }
  0x86   : > { %v2934_v59 = vsel %vm2871_vm3, %v304_v27, %v429_v50  ;;  %v799_v63 = vor.u32 %v798_v55, %v794_v46  ;;  %v717_v2 = vshll.u32 %v670_v60, 16  ;;  %v612_v4 = vrot.slane %v610_v57, 3 }
  0x87   : > { %v710_v0 = vshrl.u32 %v2934_v59, 16  ;;  %v712_v1 = vshll.u32 %v2934_v59, 16  ;;  %v485_v3 = vor.u32 %v483_v54, %v482_v61  ;;  %v948_v5 = vrot.slane %v2934_v59, 1 }
  0x88   : > { %v949_v6 = vrot.slane %v670_v60, 1  ;;  %v804_v7 = vsel %vm684_vm4, %v799_v63, %v803_v48  ;;  %v719_v9 = vrot.slane %v717_v2, 1  ;;  %v307_v10 = vshrl.u32 %v2184_v58, 16 }
  0x89   : > { %v714_v8 = vrot.slane %v712_v1, 1  ;;  %895 = vrot.lane.b32.xlu1 %v804_v7, %s2641_s20  ;;  %v2945_v11 = vsel %vm2871_vm3, %v328_v37, %v485_v3  ;;  %v678_v12 = vsel %vm2871_vm3, %v482_v61, %v612_v4  ;;  %v431_v14 = vshrl.u32 %v2200_v62, 16  ;;  %v241_v4 = vld [vmem:[%s2853_s22 + $0x60] sm:$0xf] }
  0x8a   : > { %v950_v13 = vsel %vm941_vm2, %v948_v5, %v949_v6  ;;  %v806_v16 = vshrl.u32 %v2945_v11, 16  ;;  %v808_v17 = vshll.u32 %v2945_v11, 16  ;;  %v813_v19 = vshll.u32 %v678_v12, 16  ;;  %v242_v5 = vld [vmem:[%s2853_s22 + $0x64] sm:$0xf] }
  0x8b   : > { %v715_v15 = vor.u32 %v714_v8, %v710_v0  ;;  %v972_v21 = vrot.slane %v2945_v11, 1  ;;  %v973_v22 = vrot.slane %v678_v12, 1  ;;  %v433_v23 = vrot.slane %v431_v14, 7 }
  0x8c   : > { %v434_v24 = vshll.u32 %v2200_v62, 16  ;;  %v810_v27 = vrot.slane %v808_v17, 1  ;;  %v815_v28 = vrot.slane %v813_v19, 1  ;;  %v2216_v29 = vcombine.low %v224_v39, %v224_v39 }
  0x8d   : > { %v720_v26 = vsel %vm684_vm4, %v715_v15, %v719_v9  ;;  %1008 = vrot.lane.b32.xlu1 %v971_v56, %s2640_s18  ;;  %v974_v32 = vsel %vm941_vm2, %v972_v21, %v973_v22  ;;  %v2192_v34 = vcombine.low %v239_v20, %v239_v20  ;;  %v2208_v37 = vcombine.low %v239_v20, %v240_v25 }
  0x8e   : > { %881 = vrot.lane.b32.xlu0 %v720_v26, %s2641_s20  ;;  %v436_v33 = vor.u32 %v434_v24, %v433_v23  ;;  %v811_v35 = vor.u32 %v810_v27, %v806_v16  ;;  %v582_v36 = vshll.u32 %v2216_v29, 16  ;;  %v2224_v38 = vcombine.low %v240_v25, %v240_v25 }
  0x8f   : > { %v331_v43 = vshrl.u32 %v2192_v34, 16  ;;  %v2185_v39 = vcombine.low %v225_v30, %v225_v30  ;;  %v2201_v44 = vcombine.low %v225_v30, %v226_v31  ;;  %v487_v50 = vshrl.u32 %v2208_v37, 16 }
  0x90   : > { %v2963_v42 = vsel %vm2871_vm3, %v307_v10, %v436_v33  ;;  %v816_v46 = vsel %vm684_vm4, %v811_v35, %v815_v28  ;;  %v584_v47 = vrot.slane %v582_v36, 3  ;;  %v490_v52 = vshll.u32 %v2208_v37, 16  ;;  %v227_v36 = vld [vmem:[%s2853_s22 + $0x28] sm:$0xf]  ;;  %v228_v37 = vld [vmem:[%s2853_s22 + $0x2c] sm:$0xf] }
  0x91   : > { %v722_v48 = vshrl.u32 %v2963_v42, 16  ;;  %v724_v49 = vshll.u32 %v2963_v42, 16  ;;  %897 = vrot.lane.b32.xlu1 %v816_v46, %s2641_s20  ;;  %v614_v53 = vshll.u32 %v2224_v38, 16  ;;  %v951_v54 = vrot.slane %v2963_v42, 1 }
  0x92   : > { %994 = vrot.lane.b32.xlu0 %v950_v13, %s2640_s18  ;;  %v671_v55 = vsel %vm2871_vm3, %v433_v23, %v584_v47  ;;  %v310_v57 = vshrl.u32 %v2185_v39, 16  ;;  %v438_v58 = vshrl.u32 %v2201_v44, 16  ;;  %v489_v61 = vrot.slane %v487_v50, 7 }
  0x93   : > { %v726_v56 = vrot.slane %v724_v49, 1  ;;  %v729_v60 = vshll.u32 %v671_v55, 16  ;;  %v616_v62 = vrot.slane %v614_v53, 3  ;;  %v952_v63 = vrot.slane %v671_v55, 1 }
  0x94   : > { %v440_v1 = vrot.slane %v438_v58, 7  ;;  %v441_v2 = vshll.u32 %v2201_v44, 16  ;;  %v2217_v3 = vcombine.low %v226_v31, %v226_v31  ;;  %v492_v7 = vor.u32 %v490_v52, %v489_v61 }
  0x95   : > { %v727_v0 = vor.u32 %v726_v56, %v722_v48  ;;  %1010 = vrot.lane.b32.xlu1 %v974_v32, %s2640_s18  ;;  %v731_v6 = vrot.slane %v729_v60, 1  ;;  %v679_v8 = vsel %vm2871_vm3, %v489_v61, %v616_v62  ;;  %v953_v9 = vsel %vm941_vm2, %v951_v54, %v952_v63  ;;  %v243_v60 = vld [vmem:[%s2853_s22 + $0x68] sm:$0xf] }
  0x96   : > { %v825_v10 = vshll.u32 %v679_v8, 16  ;;  %v976_v12 = vrot.slane %v679_v8, 1  ;;  %v443_v13 = vor.u32 %v441_v2, %v440_v1  ;;  %v586_v14 = vshll.u32 %v2217_v3, 16 }
  0x97   : > { %v732_v15 = vsel %vm684_vm4, %v727_v0, %v731_v6  ;;  %v2982_v16 = vsel %vm2871_vm3, %v331_v43, %v492_v7  ;;  %v2193_v17 = vcombine.low %v241_v4, %v241_v4  ;;  %v2209_v19 = vcombine.low %v241_v4, %v242_v5 }
  0x98   : > { %883 = vrot.lane.b32.xlu0 %v732_v15, %s2641_s20  ;;  %v818_v20 = vshrl.u32 %v2982_v16, 16  ;;  %v820_v21 = vshll.u32 %v2982_v16, 16  ;;  %v827_v22 = vrot.slane %v825_v10, 1  ;;  %v975_v23 = vrot.slane %v2982_v16, 1  ;;  %v229_v15 = vld [vmem:[%s2853_s22 + $0x30] sm:$0xf] }
  0x99   : > { %v588_v24 = vrot.slane %v586_v14, 3  ;;  %v2990_v25 = vsel %vm2871_vm3, %v310_v57, %v443_v13  ;;  %v334_v26 = vshrl.u32 %v2193_v17, 16  ;;  %v494_v27 = vshrl.u32 %v2209_v19, 16  ;;  %v230_v17 = vld [vmem:[%s2853_s22 + $0x34] sm:$0xf] }
  0x9a   : > { %v822_v28 = vrot.slane %v820_v21, 1  ;;  %v977_v29 = vsel %vm941_vm2, %v975_v23, %v976_v12  ;;  %v734_v30 = vshrl.u32 %v2990_v25, 16  ;;  %v736_v31 = vshll.u32 %v2990_v25, 16 }
  0x9b   : > { %v672_v32 = vsel %vm2871_vm3, %v440_v1, %v588_v24  ;;  %v496_v33 = vrot.slane %v494_v27, 7  ;;  %v497_v34 = vshll.u32 %v2209_v19, 16  ;;  %v2225_v35 = vcombine.low %v242_v5, %v242_v5  ;;  %v244_v1 = vld [vmem:[%s2853_s22 + $0x6c] sm:$0xf] }
  0x9c   : > { %v823_v38 = vor.u32 %v822_v28, %v818_v20  ;;  %996 = vrot.lane.b32.xlu0 %v953_v9, %s2640_s18  ;;  %v738_v43 = vrot.slane %v736_v31, 1  ;;  %v741_v39 = vshll.u32 %v672_v32, 16  ;;  %v954_v44 = vrot.slane %v2990_v25, 1 }
  0x9d   : > { %v499_v46 = vor.u32 %v497_v34, %v496_v33  ;;  %v618_v47 = vshll.u32 %v2225_v35, 16  ;;  %v955_v48 = vrot.slane %v672_v32, 1  ;;  %v2186_v49 = vcombine.low %v227_v36, %v227_v36 }
  0x9e   : > { %v828_v50 = vsel %vm684_vm4, %v823_v38, %v827_v22  ;;  %v739_v52 = vor.u32 %v738_v43, %v734_v30  ;;  %v743_v53 = vrot.slane %v741_v39, 1  ;;  %v2202_v54 = vcombine.low %v227_v36, %v228_v37 }
  0x9f   : > { %899 = vrot.lane.b32.xlu1 %v828_v50, %s2641_s20  ;;  %v620_v55 = vrot.slane %v618_v47, 3  ;;  %v3005_v56 = vsel %vm2871_vm3, %v334_v26, %v499_v46  ;;  %v956_v57 = vsel %vm941_vm2, %v954_v44, %v955_v48  ;;  %v313_v58 = vshrl.u32 %v2186_v49, 16 }
  0xa0   : > { %v744_v61 = vsel %vm684_vm4, %v739_v52, %v743_v53  ;;  %v830_v62 = vshrl.u32 %v3005_v56, 16  ;;  %v832_v63 = vshll.u32 %v3005_v56, 16  ;;  %v978_v0 = vrot.slane %v3005_v56, 1 }
  0xa1   : > { %885 = vrot.lane.b32.xlu0 %v744_v61, %s2641_s20  ;;  %v680_v2 = vsel %vm2871_vm3, %v496_v33, %v620_v55  ;;  %v445_v3 = vshrl.u32 %v2202_v54, 16  ;;  %v448_v4 = vshll.u32 %v2202_v54, 16  ;;  %v2218_v5 = vcombine.low %v228_v37, %v228_v37 }
  0xa2   : > { %v834_v6 = vrot.slane %v832_v63, 1  ;;  %v837_v7 = vshll.u32 %v680_v2, 16  ;;  %v979_v8 = vrot.slane %v680_v2, 1  ;;  %v2194_v9 = vcombine.low %v243_v60, %v243_v60 }
  0xa3   : > { %1012 = vrot.lane.b32.xlu1 %v977_v29, %s2640_s18  ;;  %v447_v10 = vrot.slane %v445_v3, 7  ;;  %v590_v12 = vshll.u32 %v2218_v5, 16  ;;  %v2210_v13 = vcombine.low %v243_v60, %v244_v1  ;;  %v2226_v14 = vcombine.low %v244_v1, %v244_v1  ;;  %v232_v5 = vld [vmem:[%s2853_s22 + $0x3c] sm:$0xf] }
  0xa4   : > { %v835_v19 = vor.u32 %v834_v6, %v830_v62  ;;  %v839_v20 = vrot.slane %v837_v7, 1  ;;  %v980_v21 = vsel %vm941_vm2, %v978_v0, %v979_v8  ;;  %v337_v28 = vshrl.u32 %v2194_v9, 16  ;;  %v231_v0 = vld [vmem:[%s2853_s22 + $0x38] sm:$0xf] }
  0xa5   : > { %998 = vrot.lane.b32.xlu0 %v956_v57, %s2640_s18  ;;  %v450_v22 = vor.u32 %v448_v4, %v447_v10  ;;  %v592_v23 = vrot.slane %v590_v12, 3  ;;  %v501_v24 = vshrl.u32 %v2210_v13, 16  ;;  %v504_v26 = vshll.u32 %v2210_v13, 16  ;;  %v245_v57 = vld [vmem:[%s2853_s22 + $0x70] sm:$0xf] }
  0xa6   : > { %v840_v27 = vsel %vm684_vm4, %v835_v19, %v839_v20  ;;  %v622_v29 = vshll.u32 %v2226_v14, 16  ;;  %v2203_v30 = vcombine.low %v229_v15, %v230_v17  ;;  %v2187_v34 = vcombine.low %v229_v15, %v229_v15 }
  0xa7   : > { %901 = vrot.lane.b32.xlu1 %v840_v27, %s2641_s20  ;;  %v3026_v31 = vsel %vm2871_vm3, %v313_v58, %v450_v22  ;;  %v673_v32 = vsel %vm2871_vm3, %v447_v10, %v592_v23  ;;  %v503_v33 = vrot.slane %v501_v24, 7  ;;  %v2219_v46 = vcombine.low %v230_v17, %v230_v17  ;;  %v246_v58 = vld [vmem:[%s2853_s22 + $0x74] sm:$0xf] }
  0xa8   : > { %v746_v35 = vshrl.u32 %v3026_v31, 16  ;;  %v748_v36 = vshll.u32 %v3026_v31, 16  ;;  %v753_v37 = vshll.u32 %v673_v32, 16  ;;  %v624_v38 = vrot.slane %v622_v29, 3 }
  0xa9   : > { %v506_v43 = vor.u32 %v504_v26, %v503_v33  ;;  %v957_v39 = vrot.slane %v3026_v31, 1  ;;  %v958_v44 = vrot.slane %v673_v32, 1  ;;  %v452_v50 = vshrl.u32 %v2203_v30, 16 }
  0xaa   : > { %v750_v47 = vrot.slane %v748_v36, 1  ;;  %v755_v48 = vrot.slane %v753_v37, 1  ;;  %v681_v49 = vsel %vm2871_vm3, %v503_v33, %v624_v38  ;;  %v316_v55 = vshrl.u32 %v2187_v34, 16 }
  0xab   : > { %1014 = vrot.lane.b32.xlu1 %v980_v21, %s2640_s18  ;;  %v3038_v52 = vsel %vm2871_vm3, %v337_v28, %v506_v43  ;;  %v849_v53 = vshll.u32 %v681_v49, 16  ;;  %v959_v54 = vsel %vm941_vm2, %v957_v39, %v958_v44  ;;  %v982_v63 = vrot.slane %v681_v49, 1  ;;  %v248_v39 = vld [vmem:[%s2853_s22 + $0x7c] sm:$0xf] }
  0xac   : > { %v751_v60 = vor.u32 %v750_v47, %v746_v35  ;;  %v842_v61 = vshrl.u32 %v3038_v52, 16  ;;  %v844_v62 = vshll.u32 %v3038_v52, 16  ;;  %v981_v1 = vrot.slane %v3038_v52, 1  ;;  %v247_v35 = vld [vmem:[%s2853_s22 + $0x78] sm:$0xf] }
  0xad   : > { %v454_v2 = vrot.slane %v452_v50, 7  ;;  %v455_v3 = vshll.u32 %v2203_v30, 16  ;;  %v594_v4 = vshll.u32 %v2219_v46, 16  ;;  %v851_v8 = vrot.slane %v849_v53, 1 }
  0xae   : > { %v756_v6 = vsel %vm684_vm4, %v751_v60, %v755_v48  ;;  %v846_v7 = vrot.slane %v844_v62, 1  ;;  %v2195_v9 = vcombine.low %v245_v57, %v245_v57  ;;  %v2211_v13 = vcombine.low %v245_v57, %v246_v58 }
  0xaf   : > { %887 = vrot.lane.b32.xlu0 %v756_v6, %s2641_s20  ;;  %v457_v10 = vor.u32 %v455_v3, %v454_v2  ;;  %v596_v12 = vrot.slane %v594_v4, 3  ;;  %v2227_v14 = vcombine.low %v246_v58, %v246_v58  ;;  %v2188_v19 = vcombine.low %v231_v0, %v231_v0 }
  0xb0   : > { %v847_v15 = vor.u32 %v846_v7, %v842_v61  ;;  %v340_v17 = vshrl.u32 %v2195_v9, 16  ;;  %v2204_v20 = vcombine.low %v231_v0, %v232_v5  ;;  %v508_v23 = vshrl.u32 %v2211_v13, 16 }
  0xb1   : > { %v3052_v21 = vsel %vm2871_vm3, %v316_v55, %v457_v10  ;;  %v674_v22 = vsel %vm2871_vm3, %v454_v2, %v596_v12  ;;  %v511_v24 = vshll.u32 %v2211_v13, 16  ;;  %v626_v32 = vshll.u32 %v2227_v14, 16 }
  0xb2   : > { %v852_v26 = vsel %vm684_vm4, %v847_v15, %v851_v8  ;;  %v758_v27 = vshrl.u32 %v3052_v21, 16  ;;  %v760_v28 = vshll.u32 %v3052_v21, 16  ;;  %v765_v29 = vshll.u32 %v674_v22, 16 }
  0xb3   : > { %903 = vrot.lane.b32.xlu1 %v852_v26, %s2641_s20  ;;  %1000 = vrot.lane.b32.xlu0 %v959_v54, %s2640_s18  ;;  %v510_v30 = vrot.slane %v508_v23, 7  ;;  %v960_v33 = vrot.slane %v3052_v21, 1  ;;  %v961_v34 = vrot.slane %v674_v22, 1  ;;  %v983_v36 = vsel %vm941_vm2, %v981_v1, %v982_v63 }
  0xb4   : > { %v762_v37 = vrot.slane %v760_v28, 1  ;;  %v767_v38 = vrot.slane %v765_v29, 1  ;;  %v459_v43 = vshrl.u32 %v2204_v20, 16  ;;  %v628_v46 = vrot.slane %v626_v32, 3 }
  0xb5   : > { %v513_v44 = vor.u32 %v511_v24, %v510_v30  ;;  %v319_v47 = vshrl.u32 %v2188_v19, 16  ;;  %v462_v48 = vshll.u32 %v2204_v20, 16  ;;  %v962_v50 = vsel %vm941_vm2, %v960_v33, %v961_v34 }
  0xb6   : > { %v763_v49 = vor.u32 %v762_v37, %v758_v27  ;;  %v461_v53 = vrot.slane %v459_v43, 7  ;;  %v2220_v54 = vcombine.low %v232_v5, %v232_v5  ;;  %v682_v57 = vsel %vm2871_vm3, %v510_v30, %v628_v46 }
  0xb7   : > { %1016 = vrot.lane.b32.xlu1 %v983_v36, %s2640_s18  ;;  %v3069_v55 = vsel %vm2871_vm3, %v340_v17, %v513_v44  ;;  %v2196_v58 = vcombine.low %v247_v35, %v247_v35  ;;  %v2212_v60 = vcombine.low %v247_v35, %v248_v39  ;;  %v861_v0 = vshll.u32 %v682_v57, 16 }
  0xb8   : > { %v768_v61 = vsel %vm684_vm4, %v763_v49, %v767_v38  ;;  %v854_v62 = vshrl.u32 %v3069_v55, 16  ;;  %v856_v63 = vshll.u32 %v3069_v55, 16  ;;  %v984_v1 = vrot.slane %v3069_v55, 1 }
  0xb9   : > { %889 = vrot.lane.b32.xlu0 %v768_v61, %s2641_s20  ;;  %v464_v2 = vor.u32 %v462_v48, %v461_v53  ;;  %v598_v3 = vshll.u32 %v2220_v54, 16  ;;  %v2228_v4 = vcombine.low %v248_v39, %v248_v39  ;;  %v863_v6 = vrot.slane %v861_v0, 1  ;;  %v2468_v48 = vld [vmem:[#allocation5] sm:$0xff]   ;;  %v2469_v54 = vld [vmem:[#allocation5 + $0x8] sm:$0xff]   ;;  %v2471_v61 = vld [vmem:[#allocation5 + $0x18] sm:$0xff]  }
  0xba   : > { %v858_v5 = vrot.slane %v856_v63, 1  ;;  %v985_v7 = vrot.slane %v682_v57, 1  ;;  %v515_v8 = vshrl.u32 %v2212_v60, 16  ;;  %v343_v12 = vshrl.u32 %v2196_v58, 16  ;;  %v2473_v63 = vld [vmem:[#allocation5 + $0x28] sm:$0xff]   ;;  %v2474_v0 = vld [vmem:[#allocation5 + $0x30] sm:$0xff]  }
  0xbb   : > { %v600_v9 = vrot.slane %v598_v3, 3  ;;  %v3080_v10 = vsel %vm2871_vm3, %v319_v47, %v464_v2  ;;  %v518_v13 = vshll.u32 %v2212_v60, 16  ;;  %v630_v22 = vshll.u32 %v2228_v4, 16  ;;  %v2470_v60 = vld [vmem:[#allocation5 + $0x10] sm:$0xff]   ;;  %v2476_v2 = vld [vmem:[#allocation5 + $0x40] sm:$0xff]  }
  0xbc   : > { %v859_v14 = vor.u32 %v858_v5, %v854_v62  ;;  %v770_v15 = vshrl.u32 %v3080_v10, 16  ;;  %v772_v17 = vshll.u32 %v3080_v10, 16  ;;  %v517_v19 = vrot.slane %v515_v8, 7  ;;  %v2472_v62 = vld [vmem:[#allocation5 + $0x20] sm:$0xff]  }
  0xbd   : > { %1002 = vrot.lane.b32.xlu0 %v962_v50, %s2640_s18  ;;  %v675_v20 = vsel %vm2871_vm3, %v461_v53, %v600_v9  ;;  %v986_v28 = vsel %vm941_vm2, %v984_v1, %v985_v7  ;;  %v632_v29 = vrot.slane %v630_v22, 3  ;;  %v963_v30 = vrot.slane %v3080_v10, 1  ;;  %v2475_v1 = vld [vmem:[#allocation5 + $0x38] sm:$0xff]  }
  0xbe   : > { %v864_v23 = vsel %vm684_vm4, %v859_v14, %v863_v6  ;;  %v774_v24 = vrot.slane %v772_v17, 1  ;;  %v777_v26 = vshll.u32 %v675_v20, 16  ;;  %v520_v27 = vor.u32 %v518_v13, %v517_v19 }
  0xbf   : > { %905 = vrot.lane.b32.xlu1 %v864_v23, %s2641_s20  ;;  %v964_v35 = vrot.slane %v675_v20, 1  ;;  %v683_v36 = vsel %vm2871_vm3, %v517_v19, %v632_v29  ;;  %v2642_v53 = vmov 0   ;;  %vm1022_vm5 = vcmask 130048  }
  0xc0   : > { %v775_v32 = vor.u32 %v774_v24, %v770_v15  ;;  %v779_v33 = vrot.slane %v777_v26, 1  ;;  %v3093_v34 = vsel %vm2871_vm3, %v343_v12, %v520_v27  ;;  %v873_v39 = vshll.u32 %v683_v36, 16  ;;  %1356 = vmatprep.subr.bf16.mxu0 %v2642_v53  ;;  %2326 = vmatprep.subr.bf16.mxu1 %v2642_v53 }
  0xc1   : > { %v866_v37 = vshrl.u32 %v3093_v34, 16  ;;  %v868_v38 = vshll.u32 %v3093_v34, 16  ;;  %v965_v47 = vsel %vm941_vm2, %v963_v30, %v964_v35  ;;  %v987_v18 = vrot.slane %v3093_v34, 1  ;;  %1357 = vmatpush1.bf16.msra.mxu0 %v2468_v48  ;;  %2335 = vmatpush1.bf16.msra.mxu1 %v2468_v48 }
  0xc2   : > { %v780_v43 = vsel %vm684_vm4, %v775_v32, %v779_v33  ;;  %v875_v46 = vrot.slane %v873_v39, 1  ;;  %v988_v50 = vrot.slane %v683_v36, 1  ;;  %1358 = vmatprep.subr.bf16.mxu0 %v2642_v53  ;;  %2327 = vmatprep.subr.bf16.mxu1 %v2642_v53  ;;  %vm1055_vm6 = vcmask 261120  }
  0xc3   : > { %1018 = vrot.lane.b32.xlu1 %v986_v28, %s2640_s18  ;;  %891 = vrot.lane.b32.xlu0 %v780_v43, %s2641_s20  ;;  %v870_v44 = vrot.slane %v868_v38, 1  ;;  %vm1166_vm7 = vcmask 392192   ;;  %vm1199_vm8 = vcmask 785408  }
  0xc4   : > { %v989_v58 = vsel %vm941_vm2, %v987_v18, %v988_v50 }
  0xc5   : > { %v871_v49 = vor.u32 %v870_v44, %v866_v37  ;;  %1359 = vmatpush1.bf16.msra.mxu0 %v2469_v54  ;;  %2336 = vmatpush1.bf16.msra.mxu1 %v2469_v54 }
  0xc6   : > { %1360 = vmatprep.subr.bf16.mxu0 %v2642_v53  ;;  %2328 = vmatprep.subr.bf16.mxu1 %v2642_v53 }
  0xc7   : > { %v876_v57 = vsel %vm684_vm4, %v871_v49, %v875_v46  ;;  %1004 = vrot.lane.b32.xlu0 %v965_v47, %s2640_s18 }
  0xc8   : > { %907 = vrot.lane.b32.xlu1 %v876_v57, %s2641_s20 }
  0xc9   : > { %1361 = vmatpush1.bf16.msra.mxu0 %v2470_v60  ;;  %2337 = vmatpush1.bf16.msra.mxu1 %v2470_v60 }
  0xca   : > { %1362 = vmatprep.subr.bf16.mxu0 %v2642_v53  ;;  %2329 = vmatprep.subr.bf16.mxu1 %v2642_v53 }
  0xcc   : > { %1020 = vrot.lane.b32.xlu1 %v989_v58, %s2640_s18 }
  0xcd   : > { %1363 = vmatpush1.bf16.msra.mxu0 %v2471_v61  ;;  %2338 = vmatpush1.bf16.msra.mxu1 %v2471_v61 }
  0xce   : > { %1364 = vmatprep.subr.bf16.mxu0 %v2642_v53  ;;  %2330 = vmatprep.subr.bf16.mxu1 %v2642_v53 }
  0xd1   : > { %1365 = vmatpush1.bf16.msra.mxu0 %v2472_v62  ;;  %2339 = vmatpush1.bf16.msra.mxu1 %v2472_v62 }
  0xd2   : > { %1366 = vmatprep.subr.bf16.mxu0 %v2642_v53  ;;  %2331 = vmatprep.subr.bf16.mxu1 %v2642_v53 }
  0xd5   : > { %1367 = vmatpush1.bf16.msra.mxu0 %v2473_v63  ;;  %2340 = vmatpush1.bf16.msra.mxu1 %v2473_v63 }
  0xd6   : > { %1368 = vmatprep.subr.bf16.mxu0 %v2642_v53  ;;  %2332 = vmatprep.subr.bf16.mxu1 %v2642_v53 }
  0xd9   : > { %1369 = vmatpush1.bf16.msra.mxu0 %v2474_v0  ;;  %2341 = vmatpush1.bf16.msra.mxu1 %v2474_v0 }
  0xda   : > { %1370 = vmatprep.subr.bf16.mxu0 %v2642_v53  ;;  %2333 = vmatprep.subr.bf16.mxu1 %v2642_v53 }
  0xdd   : > { %1371 = vmatpush1.bf16.msra.mxu0 %v2475_v1  ;;  %2342 = vmatpush1.bf16.msra.mxu1 %v2475_v1 }
  0xde   : > { %1372 = vmatprep.subr.bf16.mxu0 %v2642_v53  ;;  %2334 = vmatprep.subr.bf16.mxu1 %v2642_v53 }
  0xe1   : > { %1373 = vmatpush1.bf16.msra.mxu0 %v2476_v2  ;;  %2343 = vmatpush1.bf16.msra.mxu1 %v2476_v2 }
  0xe9   : > { %v993_v3 = vpop.permute.xlu0 %992 }
  0xea   : > { %v1007_v5 = vpop.permute.xlu1 %1006 }
  0xee   : > { %v880_v4 = vpop.permute.xlu0 %879 }
  0xef   : > { %v1026_v6 = vsel %vm1022_vm5, %v2882_v40, %v880_v4 }
  0xf0   : > { %v3112_v7 = vsel %vm1055_vm6, %v1026_v6, %v993_v3  ;;  %v878_v13 = vpop.permute.xlu1 %877 }
  0xf1   : > { %1104 = vrot.lane.b32.xlu0 %v3112_v7, %s2643_s7  ;;  %v1024_v40 = vsel %vm1022_vm5, %v2894_v51, %v878_v13 }
  0xf2   : > { %v894_v8 = vpop.permute.xlu0 %893 }
  0xf3   : > { %v1040_v9 = vsel %vm1022_vm5, %v2887_v45, %v894_v8 }
  0xf4   : > { %v3119_v12 = vsel %vm1055_vm6, %v1040_v9, %v1007_v5 }
  0xf5   : > { %1120 = vrot.lane.b32.xlu1 %v3119_v12, %s2643_s7 }
  0xf6   : > { %v991_v14 = vpop.permute.xlu0 %990 }
  0xf7   : > { %v3126_v15 = vsel %vm1055_vm6, %v1024_v40, %v991_v14 }
  0xf8   : > { %1136 = vrot.lane.b32.xlu0 %v3126_v15, %s2644_s8 }
  0xfb   : > { %v896_v17 = vpop.permute.xlu1 %895 }
  0xfc   : > { %1106 = vrot.lane.b32.xlu0 %v3126_v15, %s2643_s7  ;;  %v1042_v45 = vsel %vm1022_vm5, %v2925_v41, %v896_v17 }
  0xff   : > { %v1009_v19 = vpop.permute.xlu1 %1008 }
 0x100   : > { %v882_v20 = vpop.permute.xlu0 %881  ;;  %v3135_v22 = vsel %vm1055_vm6, %v1042_v45, %v1009_v19 }
 0x101   : > { %1152 = vrot.lane.b32.xlu1 %v3135_v22, %s2644_s8  ;;  %v1028_v51 = vsel %vm1022_vm5, %v2934_v59, %v882_v20 }
 0x103   : > { %v898_v23 = vpop.permute.xlu1 %897 }
 0x104   : > { %v995_v24 = vpop.permute.xlu0 %994  ;;  %v1044_v27 = vsel %vm1022_vm5, %v2945_v11, %v898_v23 }
 0x105   : > { %v3142_v26 = vsel %vm1055_vm6, %v1028_v51, %v995_v24  ;;  %1122 = vrot.lane.b32.xlu1 %v3135_v22, %s2643_s7 }
 0x106   : > { %1138 = vrot.lane.b32.xlu0 %v3142_v26, %s2644_s8 }
 0x107   : > { %v1011_v41 = vpop.permute.xlu1 %1010 }
 0x108   : > { %v3151_v28 = vsel %vm1055_vm6, %v1044_v27, %v1011_v41 }
 0x109   : > { %1154 = vrot.lane.b32.xlu1 %v3151_v28, %s2644_s8 }
 0x10a   : > { %1108 = vrot.lane.b32.xlu0 %v3142_v26, %s2643_s7  ;;  %v884_v59 = vpop.permute.xlu0 %883 }
 0x10b   : > { %v1030_v11 = vsel %vm1022_vm5, %v2963_v42, %v884_v59 }
 0x10d   : > { %1124 = vrot.lane.b32.xlu1 %v3151_v28, %s2643_s7 }
 0x10e   : > { %v997_v29 = vpop.permute.xlu0 %996 }
 0x10f   : > { %v3162_v30 = vsel %vm1055_vm6, %v1030_v11, %v997_v29 }
 0x110   : > { %1140 = vrot.lane.b32.xlu0 %v3162_v30, %s2644_s8 }
 0x111   : > { %v900_v32 = vpop.permute.xlu1 %899 }
 0x112   : > { %v1046_v33 = vsel %vm1022_vm5, %v2982_v16, %v900_v32 }
 0x113   : > { %v886_v35 = vpop.permute.xlu0 %885 }
 0x114   : > { %1110 = vrot.lane.b32.xlu0 %v3162_v30, %s2643_s7  ;;  %v1032_v42 = vsel %vm1022_vm5, %v2990_v25, %v886_v35 }
 0x115   : > { %v1013_v36 = vpop.permute.xlu1 %1012 }
 0x116   : > { %v3171_v37 = vsel %vm1055_vm6, %v1046_v33, %v1013_v36 }
 0x117   : > { %1156 = vrot.lane.b32.xlu1 %v3171_v37, %s2644_s8  ;;  %v999_v38 = vpop.permute.xlu0 %998 }
 0x118   : > { %v3178_v43 = vsel %vm1055_vm6, %v1032_v42, %v999_v38 }
 0x119   : > { %v902_v39 = vpop.permute.xlu1 %901  ;;  %1142 = vrot.lane.b32.xlu0 %v3178_v43, %s2644_s8 }
 0x11a   : > { %v1048_v16 = vsel %vm1022_vm5, %v3005_v56, %v902_v39 }
 0x11b   : > { %1126 = vrot.lane.b32.xlu1 %v3171_v37, %s2643_s7 }
 0x11d   : > { %v1015_v44 = vpop.permute.xlu1 %1014  ;;  %1112 = vrot.lane.b32.xlu0 %v3178_v43, %s2643_s7 }
 0x11e   : > { %v3189_v25 = vsel %vm1055_vm6, %v1048_v16, %v1015_v44 }
 0x11f   : > { %1158 = vrot.lane.b32.xlu1 %v3189_v25, %s2644_s8 }
 0x121   : > { %v888_v46 = vpop.permute.xlu0 %887 }
 0x122   : > { %v1034_v56 = vsel %vm1022_vm5, %v3026_v31, %v888_v46 }
 0x123   : > { %1128 = vrot.lane.b32.xlu1 %v3189_v25, %s2643_s7 }
 0x125   : > { %v904_v47 = vpop.permute.xlu1 %903  ;;  %v1001_v48 = vpop.permute.xlu0 %1000 }
 0x126   : > { %v3198_v49 = vsel %vm1055_vm6, %v1034_v56, %v1001_v48  ;;  %v1050_v18 = vsel %vm1022_vm5, %v3038_v52, %v904_v47 }
 0x127   : > { %1144 = vrot.lane.b32.xlu0 %v3198_v49, %s2644_s8 }
 0x129   : > { %v1017_v50 = vpop.permute.xlu1 %1016 }
 0x12a   : > { %v3205_v53 = vsel %vm1055_vm6, %v1050_v18, %v1017_v50 }
 0x12b   : > { %1160 = vrot.lane.b32.xlu1 %v3205_v53, %s2644_s8  ;;  %v890_v54 = vpop.permute.xlu0 %889  ;;  %1114 = vrot.lane.b32.xlu0 %v3198_v49, %s2643_s7 }
 0x12c   : > { %v1036_v31 = vsel %vm1022_vm5, %v3052_v21, %v890_v54 }
 0x12f   : > { %1130 = vrot.lane.b32.xlu1 %v3205_v53, %s2643_s7  ;;  %v1003_v52 = vpop.permute.xlu0 %1002 }
 0x130   : > { %v3216_v57 = vsel %vm1055_vm6, %v1036_v31, %v1003_v52 }
 0x131   : > { %v906_v58 = vpop.permute.xlu1 %905  ;;  %1146 = vrot.lane.b32.xlu0 %v3216_v57, %s2644_s8 }
 0x132   : > { %v1052_v60 = vsel %vm1022_vm5, %v3069_v55, %v906_v58 }
 0x135   : > { %v1019_v61 = vpop.permute.xlu1 %1018  ;;  %v892_v62 = vpop.permute.xlu0 %891  ;;  %1116 = vrot.lane.b32.xlu0 %v3216_v57, %s2643_s7 }
 0x136   : > { %v3225_v21 = vsel %vm1055_vm6, %v1052_v60, %v1019_v61  ;;  %v1038_v63 = vsel %vm1022_vm5, %v3080_v10, %v892_v62 }
 0x137   : > { %1162 = vrot.lane.b32.xlu1 %v3225_v21, %s2644_s8 }
 0x139   : > { %v1005_v0 = vpop.permute.xlu0 %1004 }
 0x13a   : > { %v908_v1 = vpop.permute.xlu1 %907  ;;  %v1071_v2 = vsel %vm1055_vm6, %v1038_v63, %v1005_v0 }
 0x13b   : > { %1132 = vrot.lane.b32.xlu1 %v3225_v21, %s2643_s7  ;;  %1148 = vrot.lane.b32.xlu0 %v1071_v2, %s2644_s8  ;;  %v1054_v55 = vsel %vm1022_vm5, %v3093_v34, %v908_v1 }
 0x13e   : > { %v1021_v3 = vpop.permute.xlu1 %1020 }
 0x13f   : > { %v1087_v4 = vsel %vm1055_vm6, %v1054_v55, %v1021_v3  ;;  %1118 = vrot.lane.b32.xlu0 %v1071_v2, %s2643_s7 }
 0x140   : > { %1164 = vrot.lane.b32.xlu1 %v1087_v4, %s2644_s8 }
 0x143   : > { %1150 = vrot.lane.b32.xlu0 %v3119_v12, %s2644_s8 }
 0x144   : > { %1134 = vrot.lane.b32.xlu1 %v1087_v4, %s2643_s7 }
 0x163   : > { %v1105_v10 = vpop.permute.xlu0 %1104 }
 0x164   : > { %v1168_v5 = vsel %vm1166_vm7, %v3126_v15, %v1105_v10 }
 0x167   : > { %v1121_v8 = vpop.permute.xlu1 %1120 }
 0x168   : > { %v1184_v13 = vsel %vm1166_vm7, %v1071_v2, %v1121_v8 }
 0x16a   : > { %v1137_v6 = vpop.permute.xlu0 %1136 }
 0x16b   : > { %2239 = vmatprep.mubr.msk.bf16.mxu0 %vm1022_vm5, %v1137_v6  ;;  %v1201_v34 = vsel %vm1199_vm8, %v1168_v5, %v1137_v6  ;;  %v3306_v5 = vld [vmem:[#allocation7] ss:$0 sm:$0xff] }
 0x16c   : > { %1389 = vmatmul.mubr.bf16.vlgmr.msra.gmra.mrb[0].mxu0 %v1201_v34 }
 0x16e   : > { %v1107_v9 = vpop.permute.xlu0 %1106 }
 0x16f   : > { %v1170_v17 = vsel %vm1166_vm7, %v3112_v7, %v1107_v9 }
 0x173   : > { %v1153_v40 = vpop.permute.xlu1 %1152 }
 0x174   : > { %2247 = vmatprep.mubr.msk.bf16.mxu1 %vm1022_vm5, %v1153_v40  ;;  %v1225_v14 = vsel %vm1199_vm8, %v1184_v13, %v1153_v40 }
 0x175   : > { %1453 = vmatmul.mubr.bf16.vlgmr.msra.gmra.mrb[0].mxu1 %v1225_v14 }
 0x177   : > { %v1123_v45 = vpop.permute.xlu1 %1122 }
 0x178   : > { %v1139_v19 = vpop.permute.xlu0 %1138  ;;  %v1186_v51 = vsel %vm1166_vm7, %v3119_v12, %v1123_v45 }
 0x179   : > { %2240 = vmatprep.mubr.msk.bf16.mxu0 %vm1022_vm5, %v1139_v19  ;;  %v1204_v20 = vsel %vm1199_vm8, %v1170_v17, %v1139_v19 }
 0x17a   : > { %1397 = vmatmul.mubr.bf16.gmra.mrb[4].mxu0 %v1204_v20 }
 0x17b   : > { %v1155_v23 = vpop.permute.xlu1 %1154 }
 0x17c   : > { %2248 = vmatprep.mubr.msk.bf16.mxu1 %vm1022_vm5, %v1155_v23  ;;  %v1228_v24 = vsel %vm1199_vm8, %v1186_v51, %v1155_v23  ;;  %v1109_v27 = vpop.permute.xlu0 %1108 }
 0x17d   : > { %1461 = vmatmul.mubr.bf16.gmra.mrb[4].mxu1 %v1228_v24  ;;  %v1172_v7 = vsel %vm1166_vm7, %v3126_v15, %v1109_v27 }
 0x17f   : > { %v1125_v59 = vpop.permute.xlu1 %1124 }
 0x180   : > { %v1188_v12 = vsel %vm1166_vm7, %v3135_v22, %v1125_v59 }
 0x182   : > { %v1141_v41 = vpop.permute.xlu0 %1140 }
 0x183   : > { %2241 = vmatprep.mubr.msk.bf16.mxu0 %vm1022_vm5, %v1141_v41  ;;  %v1207_v11 = vsel %vm1199_vm8, %v1172_v7, %v1141_v41 }
 0x184   : > { %1405 = vmatmul.mubr.bf16.gmra.mrb[8].mxu0 %v1207_v11 }
 0x186   : > { %v1111_v29 = vpop.permute.xlu0 %1110 }
 0x187   : > { %v1174_v15 = vsel %vm1166_vm7, %v3142_v26, %v1111_v29 }
 0x189   : > { %v1157_v32 = vpop.permute.xlu1 %1156 }
 0x18a   : > { %2249 = vmatprep.mubr.msk.bf16.mxu1 %vm1022_vm5, %v1157_v32  ;;  %v1231_v33 = vsel %vm1199_vm8, %v1188_v12, %v1157_v32 }
 0x18b   : > { %1469 = vmatmul.mubr.bf16.gmra.mrb[8].mxu1 %v1231_v33  ;;  %v1143_v35 = vpop.permute.xlu0 %1142 }
 0x18c   : > { %2242 = vmatprep.mubr.msk.bf16.mxu0 %vm1022_vm5, %v1143_v35  ;;  %v1210_v36 = vsel %vm1199_vm8, %v1174_v15, %v1143_v35 }
 0x18d   : > { %v1127_v42 = vpop.permute.xlu1 %1126  ;;  %1413 = vmatmul.mubr.bf16.gmra.mrb[12].mxu0 %v1210_v36 }
 0x18e   : > { %v1190_v38 = vsel %vm1166_vm7, %v3151_v28, %v1127_v42 }
 0x18f   : > { %v1113_v16 = vpop.permute.xlu0 %1112 }
 0x190   : > { %v1176_v26 = vsel %vm1166_vm7, %v3162_v30, %v1113_v16 }
 0x191   : > { %v1159_v22 = vpop.permute.xlu1 %1158 }
 0x192   : > { %2250 = vmatprep.mubr.msk.bf16.mxu1 %vm1022_vm5, %v1159_v22  ;;  %v1234_v39 = vsel %vm1199_vm8, %v1190_v38, %v1159_v22 }
 0x193   : > { %1477 = vmatmul.mubr.bf16.gmra.mrb[12].mxu1 %v1234_v39 }
 0x195   : > { %v1129_v44 = vpop.permute.xlu1 %1128 }
 0x196   : > { %v1192_v28 = vsel %vm1166_vm7, %v3171_v37, %v1129_v44 }
 0x199   : > { %v1145_v46 = vpop.permute.xlu0 %1144 }
 0x19a   : > { %2243 = vmatprep.mubr.msk.bf16.mxu0 %vm1022_vm5, %v1145_v46  ;;  %v1213_v56 = vsel %vm1199_vm8, %v1176_v26, %v1145_v46 }
 0x19b   : > { %1421 = vmatmul.mubr.bf16.gmra.mrb[16].mxu0 %v1213_v56 }
 0x19d   : > { %v1161_v47 = vpop.permute.xlu1 %1160  ;;  %v1115_v48 = vpop.permute.xlu0 %1114 }
 0x19e   : > { %2251 = vmatprep.mubr.msk.bf16.mxu1 %vm1022_vm5, %v1161_v47  ;;  %v1237_v18 = vsel %vm1199_vm8, %v1192_v28, %v1161_v47  ;;  %v1178_v50 = vsel %vm1166_vm7, %v3178_v43, %v1115_v48 }
 0x19f   : > { %1485 = vmatmul.mubr.bf16.gmra.mrb[16].mxu1 %v1237_v18 }
 0x1a1   : > { %v1131_v30 = vpop.permute.xlu1 %1130 }
 0x1a2   : > { %v1194_v37 = vsel %vm1166_vm7, %v3189_v25, %v1131_v30 }
 0x1a3   : > { %v1147_v54 = vpop.permute.xlu0 %1146 }
 0x1a4   : > { %2244 = vmatprep.mubr.msk.bf16.mxu0 %vm1022_vm5, %v1147_v54  ;;  %v1216_v31 = vsel %vm1199_vm8, %v1178_v50, %v1147_v54 }
 0x1a5   : > { %1429 = vmatmul.mubr.bf16.gmra.mrb[20].mxu0 %v1216_v31 }
 0x1a7   : > { %v1117_v52 = vpop.permute.xlu0 %1116 }
 0x1a8   : > { %v1180_v43 = vsel %vm1166_vm7, %v3198_v49, %v1117_v52 }
 0x1a9   : > { %v1163_v58 = vpop.permute.xlu1 %1162 }
 0x1aa   : > { %2252 = vmatprep.mubr.msk.bf16.mxu1 %vm1022_vm5, %v1163_v58  ;;  %v1240_v60 = vsel %vm1199_vm8, %v1194_v37, %v1163_v58 }
 0x1ab   : > { %1493 = vmatmul.mubr.bf16.gmra.mrb[20].mxu1 %v1240_v60 }
 0x1ad   : > { %v1133_v61 = vpop.permute.xlu1 %1132  ;;  %v1149_v62 = vpop.permute.xlu0 %1148 }
 0x1ae   : > { %2245 = vmatprep.mubr.msk.bf16.mxu0 %vm1022_vm5, %v1149_v62  ;;  %v1219_v63 = vsel %vm1199_vm8, %v1180_v43, %v1149_v62  ;;  %v1196_v25 = vsel %vm1166_vm7, %v3205_v53, %v1133_v61 }
 0x1af   : > { %1437 = vmatmul.mubr.bf16.gmra.mrb[24].mxu0 %v1219_v63 }
 0x1b1   : > { %v1119_v0 = vpop.permute.xlu0 %1118 }
 0x1b2   : > { %v1165_v1 = vpop.permute.xlu1 %1164  ;;  %v1182_v49 = vsel %vm1166_vm7, %v3216_v57, %v1119_v0 }
 0x1b3   : > { %2253 = vmatprep.mubr.msk.bf16.mxu1 %vm1022_vm5, %v1165_v1  ;;  %v1243_v2 = vsel %vm1199_vm8, %v1196_v25, %v1165_v1 }
 0x1b4   : > { %1501 = vmatmul.mubr.bf16.gmra.mrb[24].mxu1 %v1243_v2 }
 0x1b5   : > { %2254 = vmatprep.mubr.msk.bf16.mxu1 %vm1022_vm5, %v1163_v58  ;;  %v1151_v55 = vpop.permute.xlu0 %1150 }
 0x1b6   : > { %v1135_v3 = vpop.permute.xlu1 %1134  ;;  %2246 = vmatprep.mubr.msk.bf16.mxu0 %vm1022_vm5, %v1151_v55  ;;  %v1222_v4 = vsel %vm1199_vm8, %v1182_v49, %v1151_v55 }
 0x1b7   : > { %1445 = vmatmul.mubr.bf16.gmra.mrb[28].mxu0 %v1222_v4  ;;  %v1198_v53 = vsel %vm1166_vm7, %v3225_v21, %v1135_v3 }
 0x1b8   : > { %v1245_v10 = vsel %vm1199_vm8, %v1198_v53, %v1163_v58 }
 0x1bc   : > { %1509 = vmatmul.mubr.bf16.gmra.mrb[28].mxu1 %v1245_v10 }
 0x23f   : > { %v1390_v6 = vpop.f32.mrb[0].mxu0 }
 0x240   : > { %v1391_v34 = vadd.f32 %v3306_v5, %v1390_v6  ;;  %v1392_v8 = vpop.f32.mrb[1].mxu0 }
 0x241   : > { %v1393_v57 = vpop.f32.mrb[2].mxu0 }
 0x242   : > { %v1549_v9 = vmul.f32 0.01, %v1391_v34  ;;  %v1394_v13 = vadd.f32 %v3306_v5, %v1393_v57  ;;  %v1395_v40 = vpop.f32.mrb[3].mxu0  ;;  %vm1517_vm9 = vcmp.ge.f32.partialorder %v1391_v34, 0.0 }
 0x244   : > { %v1550_v14 = vmul.f32 0.01, %v1394_v13  ;;  %v3310_v17 = vsel %vm1517_vm9, %v1391_v34, %v1549_v9  ;;  %vm1518_vm10 = vcmp.ge.f32.partialorder %v1394_v13, 0.0 }
 0x245   : > { %1645 = vrot.lane.b32.xlu1 %v3310_v17, %s2644_s8 }
 0x246   : > { %v3314_v21 = vsel %vm1518_vm10, %v1394_v13, %v1550_v14 }
 0x247   : > { %1647 = vrot.lane.b32.xlu0 %v3314_v21, %s2644_s8 }
 0x248   : > { %v1454_v45 = vpop.f32.mrb[0].mxu1 }
 0x249   : > { %v1455_v19 = vadd.f32 %v3306_v5, %v1454_v45  ;;  %v1456_v20 = vpop.f32.mrb[1].mxu1 }
 0x24a   : > { %v1457_v51 = vpop.f32.mrb[2].mxu1 }
 0x24b   : > { %v1565_v23 = vmul.f32 0.01, %v1455_v19  ;;  %v1458_v24 = vadd.f32 %v3306_v5, %v1457_v51  ;;  %v1459_v27 = vpop.f32.mrb[3].mxu1  ;;  %vm1533_vm11 = vcmp.ge.f32.partialorder %v1455_v19, 0.0 }
 0x24d   : > { %v1398_v7 = vpop.f32.mrb[4].mxu0  ;;  %v1566_v41 = vmul.f32 0.01, %v1458_v24  ;;  %v3321_v29 = vsel %vm1533_vm11, %v1455_v19, %v1565_v23  ;;  %vm1534_vm12 = vcmp.ge.f32.partialorder %v1458_v24, 0.0 }
 0x24e   : > { %v1399_v59 = vadd.f32 %v3306_v5, %v1398_v7  ;;  %v1400_v11 = vpop.f32.mrb[5].mxu0  ;;  %1677 = vrot.lane.b32.xlu1 %v3321_v29, %s2644_s8 }
 0x24f   : > { %v1401_v12 = vpop.f32.mrb[6].mxu0  ;;  %v3326_v35 = vsel %vm1534_vm12, %v1458_v24, %v1566_v41 }
 0x250   : > { %v1551_v32 = vmul.f32 0.01, %v1399_v59  ;;  %v1402_v33 = vadd.f32 %v3306_v5, %v1401_v12  ;;  %v1403_v15 = vpop.f32.mrb[7].mxu0  ;;  %vm1519_vm13 = vcmp.ge.f32.partialorder %v1399_v59, 0.0  ;;  %v1462_v36 = vpop.f32.mrb[4].mxu1  ;;  %1679 = vrot.lane.b32.xlu0 %v3326_v35, %s2644_s8 }
 0x251   : > { %v1463_v42 = vadd.f32 %v3306_v5, %v1462_v36  ;;  %v1464_v38 = vpop.f32.mrb[5].mxu1 }
 0x252   : > { %v1552_v22 = vmul.f32 0.01, %v1402_v33  ;;  %v3331_v39 = vsel %vm1519_vm13, %v1399_v59, %v1551_v32  ;;  %vm1520_vm14 = vcmp.ge.f32.partialorder %v1402_v33, 0.0  ;;  %v1465_v16 = vpop.f32.mrb[6].mxu1 }
 0x253   : > { %1649 = vrot.lane.b32.xlu1 %v3331_v39, %s2644_s8  ;;  %v1567_v44 = vmul.f32 0.01, %v1463_v42  ;;  %v1466_v26 = vadd.f32 %v3306_v5, %v1465_v16  ;;  %v1467_v46 = vpop.f32.mrb[7].mxu1  ;;  %vm1535_vm15 = vcmp.ge.f32.partialorder %v1463_v42, 0.0 }
 0x254   : > { %v3336_v56 = vsel %vm1520_vm14, %v1402_v33, %v1552_v22 }
 0x255   : > { %1651 = vrot.lane.b32.xlu0 %v3336_v56, %s2644_s8  ;;  %v1568_v28 = vmul.f32 0.01, %v1466_v26  ;;  %v3340_v47 = vsel %vm1535_vm15, %v1463_v42, %v1567_v44  ;;  %vm1536_vm0 = vcmp.ge.f32.partialorder %v1466_v26, 0.0 }
 0x257   : > { %1681 = vrot.lane.b32.xlu1 %v3340_v47, %s2644_s8  ;;  %v1406_v48 = vpop.f32.mrb[8].mxu0  ;;  %v3344_v18 = vsel %vm1536_vm0, %v1466_v26, %v1568_v28 }
 0x258   : > { %v1407_v50 = vadd.f32 %v3306_v5, %v1406_v48  ;;  %v1408_v30 = vpop.f32.mrb[9].mxu0 }
 0x259   : > { %1683 = vrot.lane.b32.xlu0 %v3344_v18, %s2644_s8  ;;  %v1409_v54 = vpop.f32.mrb[10].mxu0 }
 0x25a   : > { %v1553_v31 = vmul.f32 0.01, %v1407_v50  ;;  %v1410_v52 = vadd.f32 %v3306_v5, %v1409_v54  ;;  %v1411_v37 = vpop.f32.mrb[11].mxu0  ;;  %vm1521_vm1 = vcmp.ge.f32.partialorder %v1407_v50, 0.0 }
 0x25c   : > { %v1554_v58 = vmul.f32 0.01, %v1410_v52  ;;  %v3350_v60 = vsel %vm1521_vm1, %v1407_v50, %v1553_v31  ;;  %vm1522_vm2 = vcmp.ge.f32.partialorder %v1410_v52, 0.0 }
 0x25d   : > { %1653 = vrot.lane.b32.xlu1 %v3350_v60, %s2644_s8 }
 0x25e   : > { %v1470_v43 = vpop.f32.mrb[8].mxu1  ;;  %v3354_v61 = vsel %vm1522_vm2, %v1410_v52, %v1554_v58 }
 0x25f   : > { %v1471_v62 = vadd.f32 %v3306_v5, %v1470_v43  ;;  %v1472_v63 = vpop.f32.mrb[9].mxu1  ;;  %1655 = vrot.lane.b32.xlu0 %v3354_v61, %s2644_s8 }
 0x260   : > { %v1473_v0 = vpop.f32.mrb[10].mxu1  ;;  %v1414_v25 = vpop.f32.mrb[12].mxu0 }
 0x261   : > { %v1569_v1 = vmul.f32 0.01, %v1471_v62  ;;  %v1474_v2 = vadd.f32 %v3306_v5, %v1473_v0  ;;  %v1475_v49 = vpop.f32.mrb[11].mxu1  ;;  %v1415_v55 = vadd.f32 %v3306_v5, %v1414_v25  ;;  %v1416_v3 = vpop.f32.mrb[13].mxu0  ;;  %vm1537_vm3 = vcmp.ge.f32.partialorder %v1471_v62, 0.0 }
 0x262   : > { %v1417_v4 = vpop.f32.mrb[14].mxu0 }
 0x263   : > { %v1570_v53 = vmul.f32 0.01, %v1474_v2  ;;  %v1555_v10 = vmul.f32 0.01, %v1415_v55  ;;  %v3361_v6 = vsel %vm1537_vm3, %v1471_v62, %v1569_v1  ;;  %v1418_v34 = vadd.f32 %v3306_v5, %v1417_v4  ;;  %v1419_v8 = vpop.f32.mrb[15].mxu0 }
 0x264   : > { %1685 = vrot.lane.b32.xlu1 %v3361_v6, %s2644_s8  ;;  %vm1538_vm4 = vcmp.ge.f32.partialorder %v1474_v2, 0.0  ;;  %vm1523_vm5 = vcmp.ge.f32.partialorder %v1415_v55, 0.0 }
 0x265   : > { %v1556_v57 = vmul.f32 0.01, %v1418_v34  ;;  %v3366_v9 = vsel %vm1538_vm4, %v1474_v2, %v1570_v53  ;;  %v3368_v13 = vsel %vm1523_vm5, %v1415_v55, %v1555_v10  ;;  %vm1524_vm6 = vcmp.ge.f32.partialorder %v1418_v34, 0.0 }
 0x266   : > { %v1478_v40 = vpop.f32.mrb[12].mxu1  ;;  %1687 = vrot.lane.b32.xlu0 %v3366_v9, %s2644_s8 }
 0x267   : > { %v1479_v14 = vadd.f32 %v3306_v5, %v1478_v40  ;;  %v1480_v45 = vpop.f32.mrb[13].mxu1  ;;  %v3373_v19 = vsel %vm1524_vm6, %v1418_v34, %v1556_v57 }
 0x268   : > { %v1481_v20 = vpop.f32.mrb[14].mxu1  ;;  %1657 = vrot.lane.b32.xlu1 %v3368_v13, %s2644_s8 }
 0x269   : > { %v1571_v51 = vmul.f32 0.01, %v1479_v14  ;;  %v1482_v23 = vadd.f32 %v3306_v5, %v1481_v20  ;;  %v1483_v24 = vpop.f32.mrb[15].mxu1  ;;  %vm1539_vm7 = vcmp.ge.f32.partialorder %v1479_v14, 0.0 }
 0x26a   : > { %1659 = vrot.lane.b32.xlu0 %v3373_v19, %s2644_s8 }
 0x26b   : > { %v1572_v27 = vmul.f32 0.01, %v1482_v23  ;;  %v3380_v7 = vsel %vm1539_vm7, %v1479_v14, %v1571_v51  ;;  %vm1540_vm8 = vcmp.ge.f32.partialorder %v1482_v23, 0.0 }
 0x26c   : > { %1689 = vrot.lane.b32.xlu1 %v3380_v7, %s2644_s8 }
 0x26d   : > { %v3384_v41 = vsel %vm1540_vm8, %v1482_v23, %v1572_v27 }
 0x26e   : > { %v1422_v59 = vpop.f32.mrb[16].mxu0  ;;  %1691 = vrot.lane.b32.xlu0 %v3384_v41, %s2644_s8 }
 0x26f   : > { %v1423_v11 = vadd.f32 %v3306_v5, %v1422_v59  ;;  %v1424_v12 = vpop.f32.mrb[17].mxu0 }
 0x270   : > { %v1425_v32 = vpop.f32.mrb[18].mxu0 }
 0x271   : > { %v1557_v33 = vmul.f32 0.01, %v1423_v11  ;;  %v1426_v15 = vadd.f32 %v3306_v5, %v1425_v32  ;;  %v1427_v36 = vpop.f32.mrb[19].mxu0  ;;  %vm1525_vm9 = vcmp.ge.f32.partialorder %v1423_v11, 0.0 }
 0x272   : > { %v1486_v42 = vpop.f32.mrb[16].mxu1 }
 0x273   : > { %v1487_v38 = vadd.f32 %v3306_v5, %v1486_v42  ;;  %v1488_v22 = vpop.f32.mrb[17].mxu1  ;;  %v1558_v16 = vmul.f32 0.01, %v1426_v15  ;;  %v3391_v44 = vsel %vm1525_vm9, %v1423_v11, %v1557_v33  ;;  %vm1526_vm10 = vcmp.ge.f32.partialorder %v1426_v15, 0.0 }
 0x274   : > { %v1489_v26 = vpop.f32.mrb[18].mxu1  ;;  %1661 = vrot.lane.b32.xlu1 %v3391_v44, %s2644_s8 }
 0x275   : > { %v1573_v46 = vmul.f32 0.01, %v1487_v38  ;;  %v1490_v28 = vadd.f32 %v3306_v5, %v1489_v26  ;;  %v1491_v48 = vpop.f32.mrb[19].mxu1  ;;  %v3396_v50 = vsel %vm1526_vm10, %v1426_v15, %v1558_v16  ;;  %vm1541_vm11 = vcmp.ge.f32.partialorder %v1487_v38, 0.0 }
 0x276   : > { %1663 = vrot.lane.b32.xlu0 %v3396_v50, %s2644_s8  ;;  %vm2029_vm10 = vcmask 257024  }
 0x277   : > { %v1574_v30 = vmul.f32 0.01, %v1490_v28  ;;  %v3400_v54 = vsel %vm1541_vm11, %v1487_v38, %v1573_v46  ;;  %vm1542_vm12 = vcmp.ge.f32.partialorder %v1490_v28, 0.0 }
 0x278   : > { %v1430_v31 = vpop.f32.mrb[20].mxu0  ;;  %1693 = vrot.lane.b32.xlu1 %v3400_v54, %s2644_s8 }
 0x279   : > { %v1431_v52 = vadd.f32 %v3306_v5, %v1430_v31  ;;  %v1432_v37 = vpop.f32.mrb[21].mxu0  ;;  %v3405_v58 = vsel %vm1542_vm12, %v1490_v28, %v1574_v30 }
 0x27a   : > { %v1433_v43 = vpop.f32.mrb[22].mxu0  ;;  %1695 = vrot.lane.b32.xlu0 %v3405_v58, %s2644_s8 }
 0x27b   : > { %v1559_v62 = vmul.f32 0.01, %v1431_v52  ;;  %v1434_v63 = vadd.f32 %v3306_v5, %v1433_v43  ;;  %v1435_v0 = vpop.f32.mrb[23].mxu0  ;;  %vm1527_vm13 = vcmp.ge.f32.partialorder %v1431_v52, 0.0 }
 0x27d   : > { %v1560_v25 = vmul.f32 0.01, %v1434_v63  ;;  %v3410_v1 = vsel %vm1527_vm13, %v1431_v52, %v1559_v62  ;;  %vm1528_vm14 = vcmp.ge.f32.partialorder %v1434_v63, 0.0 }
 0x27e   : > { %v1494_v2 = vpop.f32.mrb[20].mxu1  ;;  %1665 = vrot.lane.b32.xlu1 %v3410_v1, %s2644_s8 }
 0x27f   : > { %v1495_v49 = vadd.f32 %v3306_v5, %v1494_v2  ;;  %v1496_v55 = vpop.f32.mrb[21].mxu1  ;;  %v3415_v3 = vsel %vm1528_vm14, %v1434_v63, %v1560_v25 }
 0x280   : > { %v1497_v4 = vpop.f32.mrb[22].mxu1  ;;  %1667 = vrot.lane.b32.xlu0 %v3415_v3, %s2644_s8 }
 0x281   : > { %v1575_v53 = vmul.f32 0.01, %v1495_v49  ;;  %v1498_v10 = vadd.f32 %v3306_v5, %v1497_v4  ;;  %v1499_v34 = vpop.f32.mrb[23].mxu1  ;;  %vm1543_vm15 = vcmp.ge.f32.partialorder %v1495_v49, 0.0 }
 0x282   : > { %v1438_v8 = vpop.f32.mrb[24].mxu0 }
 0x283   : > { %v1576_v57 = vmul.f32 0.01, %v1498_v10  ;;  %v1439_v40 = vadd.f32 %v3306_v5, %v1438_v8  ;;  %v1440_v14 = vpop.f32.mrb[25].mxu0  ;;  %v3421_v45 = vsel %vm1543_vm15, %v1495_v49, %v1575_v53  ;;  %vm1544_vm0 = vcmp.ge.f32.partialorder %v1498_v10, 0.0 }
 0x284   : > { %1697 = vrot.lane.b32.xlu1 %v3421_v45, %s2644_s8  ;;  %v1441_v20 = vpop.f32.mrb[26].mxu0 }
 0x285   : > { %v1561_v51 = vmul.f32 0.01, %v1439_v40  ;;  %v1442_v23 = vadd.f32 %v3306_v5, %v1441_v20  ;;  %v1443_v24 = vpop.f32.mrb[27].mxu0  ;;  %v3426_v27 = vsel %vm1544_vm0, %v1498_v10, %v1576_v57  ;;  %vm1529_vm1 = vcmp.ge.f32.partialorder %v1439_v40, 0.0 }
 0x286   : > { %1699 = vrot.lane.b32.xlu0 %v3426_v27, %s2644_s8 }
 0x287   : > { %v1502_v59 = vpop.f32.mrb[24].mxu1  ;;  %v1562_v11 = vmul.f32 0.01, %v1442_v23  ;;  %v3430_v12 = vsel %vm1529_vm1, %v1439_v40, %v1561_v51  ;;  %vm1530_vm2 = vcmp.ge.f32.partialorder %v1442_v23, 0.0 }
 0x288   : > { %v1503_v32 = vadd.f32 %v3306_v5, %v1502_v59  ;;  %v1504_v33 = vpop.f32.mrb[25].mxu1  ;;  %1669 = vrot.lane.b32.xlu1 %v3430_v12, %s2644_s8 }
 0x289   : > { %v1505_v15 = vpop.f32.mrb[26].mxu1  ;;  %v3435_v36 = vsel %vm1530_vm2, %v1442_v23, %v1562_v11 }
 0x28a   : > { %v1577_v42 = vmul.f32 0.01, %v1503_v32  ;;  %v1506_v38 = vadd.f32 %v3306_v5, %v1505_v15  ;;  %v1507_v22 = vpop.f32.mrb[27].mxu1  ;;  %1671 = vrot.lane.b32.xlu0 %v3435_v36, %s2644_s8  ;;  %v1446_v16 = vpop.f32.mrb[28].mxu0  ;;  %vm1545_vm3 = vcmp.ge.f32.partialorder %v1503_v32, 0.0 }
 0x28b   : > { %v1447_v26 = vadd.f32 %v3306_v5, %v1446_v16  ;;  %v1448_v46 = vpop.f32.mrb[29].mxu0 }
 0x28c   : > { %v1578_v28 = vmul.f32 0.01, %v1506_v38  ;;  %v3441_v48 = vsel %vm1545_vm3, %v1503_v32, %v1577_v42  ;;  %v1449_v30 = vpop.f32.mrb[30].mxu0  ;;  %vm1546_vm4 = vcmp.ge.f32.partialorder %v1506_v38, 0.0 }
 0x28d   : > { %v1563_v31 = vmul.f32 0.01, %v1447_v26  ;;  %1701 = vrot.lane.b32.xlu1 %v3441_v48, %s2644_s8  ;;  %v1450_v52 = vadd.f32 %v3306_v5, %v1449_v30  ;;  %v1451_v37 = vpop.f32.mrb[31].mxu0  ;;  %vm1531_vm5 = vcmp.ge.f32.partialorder %v1447_v26, 0.0 }
 0x28e   : > { %v3446_v43 = vsel %vm1546_vm4, %v1506_v38, %v1578_v28 }
 0x28f   : > { %v1510_v62 = vpop.f32.mrb[28].mxu1  ;;  %v1564_v63 = vmul.f32 0.01, %v1450_v52  ;;  %1703 = vrot.lane.b32.xlu0 %v3446_v43, %s2644_s8  ;;  %v3450_v0 = vsel %vm1531_vm5, %v1447_v26, %v1563_v31  ;;  %vm1532_vm6 = vcmp.ge.f32.partialorder %v1450_v52, 0.0 }
 0x290   : > { %v1511_v25 = vadd.f32 %v3306_v5, %v1510_v62  ;;  %v1512_v2 = vpop.f32.mrb[29].mxu1 }
 0x291   : > { %v1513_v49 = vpop.f32.mrb[30].mxu1  ;;  %1673 = vrot.lane.b32.xlu1 %v3450_v0, %s2644_s8  ;;  %v3455_v55 = vsel %vm1532_vm6, %v1450_v52, %v1564_v63 }
 0x292   : > { %v1579_v4 = vmul.f32 0.01, %v1511_v25  ;;  %v1514_v53 = vadd.f32 %v3306_v5, %v1513_v49  ;;  %v1515_v10 = vpop.f32.mrb[31].mxu1  ;;  %vm1547_vm7 = vcmp.ge.f32.partialorder %v1511_v25, 0.0 }
 0x293   : > { %1675 = vrot.lane.b32.xlu0 %v3455_v55, %s2644_s8 }
 0x294   : > { %v1580_v34 = vmul.f32 0.01, %v1514_v53  ;;  %v3460_v8 = vsel %vm1547_vm7, %v1511_v25, %v1579_v4  ;;  %vm1548_vm8 = vcmp.ge.f32.partialorder %v1514_v53, 0.0 }
 0x295   : > { %1705 = vrot.lane.b32.xlu1 %v3460_v8, %s2644_s8 }
 0x296   : > { %v3464_v57 = vsel %vm1548_vm8, %v1514_v53, %v1580_v34 }
 0x297   : > { %1707 = vrot.lane.b32.xlu0 %v3464_v57, %s2644_s8 }
 0x2b7   : > { %v1646_v40 = vpop.permute.xlu1 %1645 }
 0x2b8   : > { %v1741_v5 = vmul.f32 %v1646_v40, %v3310_v17 }
 0x2b9   : > { %v1648_v14 = vpop.permute.xlu0 %1647 }
 0x2ba   : > { %v1773_v20 = vadd.f32 %v1741_v5, %v1646_v40  ;;  %v1742_v51 = vmul.f32 %v1648_v14, %v3314_v21 }
 0x2bc   : > { %vm1805_vm9 = vcmp.ge.f32.partialorder %v1773_v20, 0.0  ;;  %v1837_v23 = vmul.f32 0.01, %v1773_v20  ;;  %v1774_v24 = vadd.f32 %v1742_v51, %v1648_v14 }
 0x2be   : > { %v1869_v59 = vsel %vm1805_vm9, %v1773_v20, %v1837_v23  ;;  %vm1806_vm11 = vcmp.ge.f32.partialorder %v1774_v24, 0.0  ;;  %v1838_v11 = vmul.f32 0.01, %v1774_v24 }
 0x2bf   : > { %v2293_v32 = vpack.c.bf16 %v1869_v59, %v1869_v59 }
 0x2c0   : > { %v1870_v33 = vsel %vm1806_vm11, %v1774_v24, %v1838_v11  ;;  %v1678_v15 = vpop.permute.xlu1 %1677 }
 0x2c1   : > { %2030 = vst.msk [vmem:[%s3472_s26] sm:$0xf] %vm2029_vm10, %v2293_v32  ;;  %v2294_v17 = vpack.c.bf16 %v1870_v33, %v1870_v33  ;;  %v1757_v21 = vmul.f32 %v1678_v15, %v3321_v29 }
 0x2c2   : > { %v1680_v42 = vpop.permute.xlu0 %1679 }
 0x2c3   : > { %2031 = vst.msk [vmem:[%s3472_s26 + $0x4] sm:$0xf] %vm2029_vm10, %v2294_v17  ;;  %v1789_v38 = vadd.f32 %v1757_v21, %v1678_v15  ;;  %v1758_v22 = vmul.f32 %v1680_v42, %v3326_v35 }
 0x2c5   : > { %v1650_v16 = vpop.permute.xlu1 %1649  ;;  %vm1821_vm12 = vcmp.ge.f32.partialorder %v1789_v38, 0.0  ;;  %v1853_v26 = vmul.f32 0.01, %v1789_v38  ;;  %v1790_v46 = vadd.f32 %v1758_v22, %v1680_v42 }
 0x2c6   : > { %v1743_v28 = vmul.f32 %v1650_v16, %v3331_v39 }
 0x2c7   : > { %v1652_v30 = vpop.permute.xlu0 %1651  ;;  %v1885_v31 = vsel %vm1821_vm12, %v1789_v38, %v1853_v26  ;;  %vm1822_vm13 = vcmp.ge.f32.partialorder %v1790_v46, 0.0  ;;  %v1854_v52 = vmul.f32 0.01, %v1790_v46 }
 0x2c8   : > { %v1775_v37 = vadd.f32 %v1743_v28, %v1650_v16  ;;  %v2309_v29 = vpack.c.bf16 %v1885_v31, %v1885_v31  ;;  %v1744_v62 = vmul.f32 %v1652_v30, %v3336_v56 }
 0x2c9   : > { %v1682_v63 = vpop.permute.xlu1 %1681  ;;  %v1886_v25 = vsel %vm1822_vm13, %v1790_v46, %v1854_v52 }
 0x2ca   : > { %vm1807_vm14 = vcmp.ge.f32.partialorder %v1775_v37, 0.0  ;;  %v1839_v35 = vmul.f32 0.01, %v1775_v37  ;;  %v1759_v2 = vmul.f32 %v1682_v63, %v3340_v47  ;;  %2046 = vst.msk [vmem:[%s3472_s26 + $0x40] sm:$0xf] %vm2029_vm10, %v2309_v29  ;;  %v2310_v49 = vpack.c.bf16 %v1886_v25, %v1886_v25 }
 0x2cb   : > { %v1776_v39 = vadd.f32 %v1744_v62, %v1652_v30  ;;  %v1684_v4 = vpop.permute.xlu0 %1683 }
 0x2cc   : > { %v1871_v53 = vsel %vm1807_vm14, %v1775_v37, %v1839_v35  ;;  %v1791_v10 = vadd.f32 %v1759_v2, %v1682_v63  ;;  %v1760_v34 = vmul.f32 %v1684_v4, %v3344_v18  ;;  %2047 = vst.msk [vmem:[%s3472_s26 + $0x44] sm:$0xf] %vm2029_vm10, %v2310_v49 }
 0x2cd   : > { %v2295_v56 = vpack.c.bf16 %v1871_v53, %v1871_v53  ;;  %vm1808_vm15 = vcmp.ge.f32.partialorder %v1776_v39, 0.0  ;;  %v1840_v40 = vmul.f32 0.01, %v1776_v39 }
 0x2ce   : > { %vm1823_vm0 = vcmp.ge.f32.partialorder %v1791_v10, 0.0  ;;  %v1855_v5 = vmul.f32 0.01, %v1791_v10  ;;  %v1792_v14 = vadd.f32 %v1760_v34, %v1684_v4 }
 0x2cf   : > { %2032 = vst.msk [vmem:[%s3472_s26 + $0x8] sm:$0xf] %vm2029_vm10, %v2295_v56  ;;  %v1872_v47 = vsel %vm1808_vm15, %v1776_v39, %v1840_v40  ;;  %v1654_v24 = vpop.permute.xlu1 %1653 }
 0x2d0   : > { %v2296_v20 = vpack.c.bf16 %v1872_v47, %v1872_v47  ;;  %v1887_v51 = vsel %vm1823_vm0, %v1791_v10, %v1855_v5  ;;  %vm1824_vm1 = vcmp.ge.f32.partialorder %v1792_v14, 0.0  ;;  %v1856_v23 = vmul.f32 0.01, %v1792_v14 }
 0x2d1   : > { %v2311_v18 = vpack.c.bf16 %v1887_v51, %v1887_v51  ;;  %v1745_v59 = vmul.f32 %v1654_v24, %v3350_v60  ;;  %v1656_v32 = vpop.permute.xlu0 %1655 }
 0x2d2   : > { %2033 = vst.msk [vmem:[%s3472_s26 + $0xc] sm:$0xf] %vm2029_vm10, %v2296_v20  ;;  %v1888_v11 = vsel %vm1824_vm1, %v1792_v14, %v1856_v23  ;;  %v1746_v15 = vmul.f32 %v1656_v32, %v3354_v61 }
 0x2d3   : > { %2048 = vst.msk [vmem:[%s3472_s26 + $0x48] sm:$0xf] %vm2029_vm10, %v2311_v18  ;;  %v2312_v33 = vpack.c.bf16 %v1888_v11, %v1888_v11  ;;  %v1777_v17 = vadd.f32 %v1745_v59, %v1654_v24 }
 0x2d4   : > { %v1778_v42 = vadd.f32 %v1746_v15, %v1656_v32 }
 0x2d5   : > { %2049 = vst.msk [vmem:[%s3472_s26 + $0x4c] sm:$0xf] %vm2029_vm10, %v2312_v33  ;;  %vm1809_vm2 = vcmp.ge.f32.partialorder %v1777_v17, 0.0  ;;  %v1841_v21 = vmul.f32 0.01, %v1777_v17 }
 0x2d6   : > { %vm1810_vm3 = vcmp.ge.f32.partialorder %v1778_v42, 0.0  ;;  %v1842_v60 = vmul.f32 0.01, %v1778_v42  ;;  %v1686_v22 = vpop.permute.xlu1 %1685 }
 0x2d7   : > { %v1873_v38 = vsel %vm1809_vm2, %v1777_v17, %v1841_v21  ;;  %v1761_v26 = vmul.f32 %v1686_v22, %v3361_v6 }
 0x2d8   : > { %v2297_v16 = vpack.c.bf16 %v1873_v38, %v1873_v38  ;;  %v1874_v46 = vsel %vm1810_vm3, %v1778_v42, %v1842_v60  ;;  %v1688_v28 = vpop.permute.xlu0 %1687 }
 0x2d9   : > { %v2298_v30 = vpack.c.bf16 %v1874_v46, %v1874_v46  ;;  %v1793_v31 = vadd.f32 %v1761_v26, %v1686_v22  ;;  %v1762_v61 = vmul.f32 %v1688_v28, %v3366_v9 }
 0x2da   : > { %2034 = vst.msk [vmem:[%s3472_s26 + $0x10] sm:$0xf] %vm2029_vm10, %v2297_v16  ;;  %v1658_v52 = vpop.permute.xlu1 %1657 }
 0x2db   : > { %2035 = vst.msk [vmem:[%s3472_s26 + $0x14] sm:$0xf] %vm2029_vm10, %v2298_v30  ;;  %vm1825_vm4 = vcmp.ge.f32.partialorder %v1793_v31, 0.0  ;;  %v1857_v37 = vmul.f32 0.01, %v1793_v31  ;;  %v1794_v29 = vadd.f32 %v1762_v61, %v1688_v28  ;;  %v1747_v62 = vmul.f32 %v1658_v52, %v3368_v13 }
 0x2dc   : > { %v1660_v63 = vpop.permute.xlu0 %1659 }
 0x2dd   : > { %v1889_v25 = vsel %vm1825_vm4, %v1793_v31, %v1857_v37  ;;  %vm1826_vm5 = vcmp.ge.f32.partialorder %v1794_v29, 0.0  ;;  %v1858_v6 = vmul.f32 0.01, %v1794_v29  ;;  %v1779_v35 = vadd.f32 %v1747_v62, %v1658_v52 }
 0x2de   : > { %v2313_v2 = vpack.c.bf16 %v1889_v25, %v1889_v25  ;;  %v1748_v49 = vmul.f32 %v1660_v63, %v3373_v19  ;;  %v1690_v39 = vpop.permute.xlu1 %1689 }
 0x2df   : > { %v1890_v9 = vsel %vm1826_vm5, %v1794_v29, %v1858_v6  ;;  %vm1811_vm6 = vcmp.ge.f32.partialorder %v1779_v35, 0.0  ;;  %v1843_v4 = vmul.f32 0.01, %v1779_v35  ;;  %v1763_v53 = vmul.f32 %v1690_v39, %v3380_v7 }
 0x2e0   : > { %2050 = vst.msk [vmem:[%s3472_s26 + $0x50] sm:$0xf] %vm2029_vm10, %v2313_v2  ;;  %v2314_v10 = vpack.c.bf16 %v1890_v9, %v1890_v9  ;;  %v1780_v13 = vadd.f32 %v1748_v49, %v1660_v63  ;;  %v1692_v34 = vpop.permute.xlu0 %1691 }
 0x2e1   : > { %v1875_v56 = vsel %vm1811_vm6, %v1779_v35, %v1843_v4  ;;  %v1795_v40 = vadd.f32 %v1763_v53, %v1690_v39  ;;  %v1764_v5 = vmul.f32 %v1692_v34, %v3384_v41 }
 0x2e2   : > { %2051 = vst.msk [vmem:[%s3472_s26 + $0x54] sm:$0xf] %vm2029_vm10, %v2314_v10  ;;  %v2299_v19 = vpack.c.bf16 %v1875_v56, %v1875_v56  ;;  %vm1812_vm7 = vcmp.ge.f32.partialorder %v1780_v13, 0.0  ;;  %v1844_v14 = vmul.f32 0.01, %v1780_v13 }
 0x2e3   : > { %vm1827_vm8 = vcmp.ge.f32.partialorder %v1795_v40, 0.0  ;;  %v1859_v47 = vmul.f32 0.01, %v1795_v40  ;;  %v1796_v20 = vadd.f32 %v1764_v5, %v1692_v34 }
 0x2e4   : > { %2036 = vst.msk [vmem:[%s3472_s26 + $0x18] sm:$0xf] %vm2029_vm10, %v2299_v19  ;;  %v1876_v7 = vsel %vm1812_vm7, %v1780_v13, %v1844_v14 }
 0x2e5   : > { %v2300_v51 = vpack.c.bf16 %v1876_v7, %v1876_v7  ;;  %v1891_v23 = vsel %vm1827_vm8, %v1795_v40, %v1859_v47  ;;  %vm1828_vm9 = vcmp.ge.f32.partialorder %v1796_v20, 0.0  ;;  %v1860_v24 = vmul.f32 0.01, %v1796_v20 }
 0x2e6   : > { %v2315_v18 = vpack.c.bf16 %v1891_v23, %v1891_v23  ;;  %v1662_v41 = vpop.permute.xlu1 %1661 }
 0x2e7   : > { %2037 = vst.msk [vmem:[%s3472_s26 + $0x1c] sm:$0xf] %vm2029_vm10, %v2300_v51  ;;  %v1892_v59 = vsel %vm1828_vm9, %v1796_v20, %v1860_v24  ;;  %v1749_v11 = vmul.f32 %v1662_v41, %v3391_v44 }
 0x2e8   : > { %2052 = vst.msk [vmem:[%s3472_s26 + $0x58] sm:$0xf] %vm2029_vm10, %v2315_v18  ;;  %v2316_v32 = vpack.c.bf16 %v1892_v59, %v1892_v59  ;;  %v1664_v33 = vpop.permute.xlu0 %1663 }
 0x2e9   : > { %v1781_v17 = vadd.f32 %v1749_v11, %v1662_v41  ;;  %v1750_v15 = vmul.f32 %v1664_v33, %v3396_v50 }
 0x2ea   : > { %2053 = vst.msk [vmem:[%s3472_s26 + $0x5c] sm:$0xf] %vm2029_vm10, %v2316_v32  ;;  %v1694_v21 = vpop.permute.xlu1 %1693 }
 0x2eb   : > { %vm1813_vm11 = vcmp.ge.f32.partialorder %v1781_v17, 0.0  ;;  %v1845_v42 = vmul.f32 0.01, %v1781_v17  ;;  %v1782_v38 = vadd.f32 %v1750_v15, %v1664_v33  ;;  %v1765_v60 = vmul.f32 %v1694_v21, %v3400_v54 }
 0x2ec   : > { %v1696_v22 = vpop.permute.xlu0 %1695 }
 0x2ed   : > { %v1877_v16 = vsel %vm1813_vm11, %v1781_v17, %v1845_v42  ;;  %vm1814_vm12 = vcmp.ge.f32.partialorder %v1782_v38, 0.0  ;;  %v1846_v44 = vmul.f32 0.01, %v1782_v38  ;;  %v1797_v26 = vadd.f32 %v1765_v60, %v1694_v21 }
 0x2ee   : > { %v2301_v46 = vpack.c.bf16 %v1877_v16, %v1877_v16  ;;  %v1766_v28 = vmul.f32 %v1696_v22, %v3405_v58 }
 0x2ef   : > { %v1878_v30 = vsel %vm1814_vm12, %v1782_v38, %v1846_v44  ;;  %vm1829_vm13 = vcmp.ge.f32.partialorder %v1797_v26, 0.0  ;;  %v1861_v50 = vmul.f32 0.01, %v1797_v26 }
 0x2f0   : > { %2038 = vst.msk [vmem:[%s3472_s26 + $0x20] sm:$0xf] %vm2029_vm10, %v2301_v46  ;;  %v2302_v31 = vpack.c.bf16 %v1878_v30, %v1878_v30  ;;  %v1798_v61 = vadd.f32 %v1766_v28, %v1696_v22  ;;  %v1666_v52 = vpop.permute.xlu1 %1665 }
 0x2f1   : > { %v1893_v37 = vsel %vm1829_vm13, %v1797_v26, %v1861_v50  ;;  %v1751_v54 = vmul.f32 %v1666_v52, %v3410_v1 }
 0x2f2   : > { %2039 = vst.msk [vmem:[%s3472_s26 + $0x24] sm:$0xf] %vm2029_vm10, %v2302_v31  ;;  %v2317_v29 = vpack.c.bf16 %v1893_v37, %v1893_v37  ;;  %vm1830_vm14 = vcmp.ge.f32.partialorder %v1798_v61, 0.0  ;;  %v1862_v62 = vmul.f32 0.01, %v1798_v61  ;;  %v1668_v63 = vpop.permute.xlu0 %1667 }
 0x2f3   : > { %v1783_v58 = vadd.f32 %v1751_v54, %v1666_v52  ;;  %v1752_v25 = vmul.f32 %v1668_v63, %v3415_v3 }
 0x2f4   : > { %2054 = vst.msk [vmem:[%s3472_s26 + $0x60] sm:$0xf] %vm2029_vm10, %v2317_v29  ;;  %v1894_v6 = vsel %vm1830_vm14, %v1798_v61, %v1862_v62 }
 0x2f5   : > { %v2318_v35 = vpack.c.bf16 %v1894_v6, %v1894_v6  ;;  %vm1815_vm15 = vcmp.ge.f32.partialorder %v1783_v58, 0.0  ;;  %v1847_v2 = vmul.f32 0.01, %v1783_v58  ;;  %v1784_v49 = vadd.f32 %v1752_v25, %v1668_v63 }
 0x2f6   : > { %v1698_v39 = vpop.permute.xlu1 %1697 }
 0x2f7   : > { %2055 = vst.msk [vmem:[%s3472_s26 + $0x64] sm:$0xf] %vm2029_vm10, %v2318_v35  ;;  %v1879_v1 = vsel %vm1815_vm15, %v1783_v58, %v1847_v2  ;;  %vm1816_vm0 = vcmp.ge.f32.partialorder %v1784_v49, 0.0  ;;  %v1848_v9 = vmul.f32 0.01, %v1784_v49  ;;  %v1767_v4 = vmul.f32 %v1698_v39, %v3421_v45 }
 0x2f8   : > { %v2303_v53 = vpack.c.bf16 %v1879_v1, %v1879_v1  ;;  %v1700_v10 = vpop.permute.xlu0 %1699 }
 0x2f9   : > { %v1880_v3 = vsel %vm1816_vm0, %v1784_v49, %v1848_v9  ;;  %v1799_v13 = vadd.f32 %v1767_v4, %v1698_v39  ;;  %v1768_v34 = vmul.f32 %v1700_v10, %v3426_v27 }
 0x2fa   : > { %2040 = vst.msk [vmem:[%s3472_s26 + $0x28] sm:$0xf] %vm2029_vm10, %v2303_v53  ;;  %v2304_v56 = vpack.c.bf16 %v1880_v3, %v1880_v3  ;;  %v1670_v40 = vpop.permute.xlu1 %1669 }
 0x2fb   : > { %vm1831_vm1 = vcmp.ge.f32.partialorder %v1799_v13, 0.0  ;;  %v1863_v5 = vmul.f32 0.01, %v1799_v13  ;;  %v1800_v19 = vadd.f32 %v1768_v34, %v1700_v10  ;;  %v1753_v14 = vmul.f32 %v1670_v40, %v3430_v12 }
 0x2fc   : > { %2041 = vst.msk [vmem:[%s3472_s26 + $0x2c] sm:$0xf] %vm2029_vm10, %v2304_v56  ;;  %v1672_v47 = vpop.permute.xlu0 %1671 }
 0x2fd   : > { %v1895_v45 = vsel %vm1831_vm1, %v1799_v13, %v1863_v5  ;;  %vm1832_vm2 = vcmp.ge.f32.partialorder %v1800_v19, 0.0  ;;  %v1864_v20 = vmul.f32 0.01, %v1800_v19  ;;  %v1785_v7 = vadd.f32 %v1753_v14, %v1670_v40 }
 0x2fe   : > { %v2319_v51 = vpack.c.bf16 %v1895_v45, %v1895_v45  ;;  %v1754_v27 = vmul.f32 %v1672_v47, %v3435_v36 }
 0x2ff   : > { %v1896_v23 = vsel %vm1832_vm2, %v1800_v19, %v1864_v20  ;;  %vm1817_vm3 = vcmp.ge.f32.partialorder %v1785_v7, 0.0  ;;  %v1849_v24 = vmul.f32 0.01, %v1785_v7  ;;  %v1702_v18 = vpop.permute.xlu1 %1701 }
 0x300   : > { %2056 = vst.msk [vmem:[%s3472_s26 + $0x68] sm:$0xf] %vm2029_vm10, %v2319_v51  ;;  %v2320_v41 = vpack.c.bf16 %v1896_v23, %v1896_v23  ;;  %v1786_v12 = vadd.f32 %v1754_v27, %v1672_v47  ;;  %v1769_v59 = vmul.f32 %v1702_v18, %v3441_v48 }
 0x301   : > { %v1881_v11 = vsel %vm1817_vm3, %v1785_v7, %v1849_v24  ;;  %v1704_v32 = vpop.permute.xlu0 %1703 }
 0x302   : > { %2057 = vst.msk [vmem:[%s3472_s26 + $0x6c] sm:$0xf] %vm2029_vm10, %v2320_v41  ;;  %v2305_v33 = vpack.c.bf16 %v1881_v11, %v1881_v11  ;;  %vm1818_vm4 = vcmp.ge.f32.partialorder %v1786_v12, 0.0  ;;  %v1850_v17 = vmul.f32 0.01, %v1786_v12  ;;  %v1801_v36 = vadd.f32 %v1769_v59, %v1702_v18 }
 0x303   : > { %v1770_v15 = vmul.f32 %v1704_v32, %v3446_v43  ;;  %v1674_v21 = vpop.permute.xlu1 %1673 }
 0x304   : > { %2042 = vst.msk [vmem:[%s3472_s26 + $0x30] sm:$0xf] %vm2029_vm10, %v2305_v33  ;;  %v1882_v42 = vsel %vm1818_vm4, %v1786_v12, %v1850_v17  ;;  %vm1833_vm5 = vcmp.ge.f32.partialorder %v1801_v36, 0.0  ;;  %v1865_v38 = vmul.f32 0.01, %v1801_v36  ;;  %v1755_v60 = vmul.f32 %v1674_v21, %v3450_v0 }
 0x305   : > { %v2306_v48 = vpack.c.bf16 %v1882_v42, %v1882_v42  ;;  %v1802_v22 = vadd.f32 %v1770_v15, %v1704_v32  ;;  %v1676_v16 = vpop.permute.xlu0 %1675 }
 0x306   : > { %v1897_v44 = vsel %vm1833_vm5, %v1801_v36, %v1865_v38  ;;  %v1787_v26 = vadd.f32 %v1755_v60, %v1674_v21  ;;  %v1756_v46 = vmul.f32 %v1676_v16, %v3455_v55 }
 0x307   : > { %2043 = vst.msk [vmem:[%s3472_s26 + $0x34] sm:$0xf] %vm2029_vm10, %v2306_v48  ;;  %v2321_v28 = vpack.c.bf16 %v1897_v44, %v1897_v44  ;;  %vm1834_vm6 = vcmp.ge.f32.partialorder %v1802_v22, 0.0  ;;  %v1866_v43 = vmul.f32 0.01, %v1802_v22  ;;  %v1706_v30 = vpop.permute.xlu1 %1705 }
 0x308   : > { %vm1819_vm7 = vcmp.ge.f32.partialorder %v1787_v26, 0.0  ;;  %v1851_v50 = vmul.f32 0.01, %v1787_v26  ;;  %v1788_v31 = vadd.f32 %v1756_v46, %v1676_v16  ;;  %v1771_v0 = vmul.f32 %v1706_v30, %v3460_v8 }
 0x309   : > { %2058 = vst.msk [vmem:[%s3472_s26 + $0x70] sm:$0xf] %vm2029_vm10, %v2321_v28  ;;  %v1898_v61 = vsel %vm1834_vm6, %v1802_v22, %v1866_v43  ;;  %v1708_v52 = vpop.permute.xlu0 %1707 }
 0x30a   : > { %v2322_v55 = vpack.c.bf16 %v1898_v61, %v1898_v61  ;;  %v1883_v37 = vsel %vm1819_vm7, %v1787_v26, %v1851_v50  ;;  %vm1820_vm8 = vcmp.ge.f32.partialorder %v1788_v31, 0.0  ;;  %v1852_v54 = vmul.f32 0.01, %v1788_v31 }
 0x30b   : > { %v2307_v29 = vpack.c.bf16 %v1883_v37, %v1883_v37  ;;  %v1803_v62 = vadd.f32 %v1771_v0, %v1706_v30  ;;  %v1772_v63 = vmul.f32 %v1708_v52, %v3464_v57 }
 0x30c   : > { %2059 = vst.msk [vmem:[%s3472_s26 + $0x74] sm:$0xf] %vm2029_vm10, %v2322_v55  ;;  %v1884_v58 = vsel %vm1820_vm8, %v1788_v31, %v1852_v54 }
 0x30d   : > { %2044 = vst.msk [vmem:[%s3472_s26 + $0x38] sm:$0xf] %vm2029_vm10, %v2307_v29  ;;  %v2308_v8 = vpack.c.bf16 %v1884_v58, %v1884_v58  ;;  %vm1835_vm9 = vcmp.ge.f32.partialorder %v1803_v62, 0.0  ;;  %v1867_v25 = vmul.f32 0.01, %v1803_v62  ;;  %v1804_v6 = vadd.f32 %v1772_v63, %v1708_v52 }
 0x30f   : > { %2045 = vst.msk [vmem:[%s3472_s26 + $0x3c] sm:$0xf] %vm2029_vm10, %v2308_v8  ;;  %v1899_v35 = vsel %vm1835_vm9, %v1803_v62, %v1867_v25  ;;  %vm1836_vm11 = vcmp.ge.f32.partialorder %v1804_v6, 0.0  ;;  %v1868_v57 = vmul.f32 0.01, %v1804_v6 }
 0x310   : > { %v2323_v2 = vpack.c.bf16 %v1899_v35, %v1899_v35 }
 0x311   : > { %v1900_v49 = vsel %vm1836_vm11, %v1804_v6, %v1868_v57 }
 0x312   : > { %2060 = vst.msk [vmem:[%s3472_s26 + $0x78] sm:$0xf] %vm2029_vm10, %v2323_v2  ;;  %v2324_v39 = vpack.c.bf16 %v1900_v49, %v1900_v49 }
 0x314   : > { %2061 = vst.msk [vmem:[%s3472_s26 + $0x7c] sm:$0xf] %vm2029_vm10, %v2324_v39 }
 0x315   : > { %2576 = shalt.err (!%p2573_p1)
}
 0x316   : > { %s2577_s4 = scalar_lea.hbm %s3569_s25, 2048  ;;  %s2581_s18 = scalar_lea.hbm %s3622_s3, 4096 }
 0x317   : > { %p2578_p13 = scmp.ne.s32.totalorder %s3569_s25, %s2577_s4  ;;  %p2582_p4 = scmp.lt.u32.totalorder %s3569_s25, %s3622_s3 }
 0x318   : > { %p2583_p5 = scmp.lt.u32.totalorder %s2581_s18, %s2577_s4  ;;  %p2585_p11 = scmp.lt.u32.totalorder %s2577_s4, %s3569_s25 }
 0x319   : > { %p2579_p6 = pnand %p2578_p13, %p3638_p0 }
 0x31a   : > { %p2584_p8 = por %p2583_p5, %p2582_p4 }
 0x31b   : > { %p2580_p10 = pneg %p2579_p6 }
 0x31c   : > { %p2586_p2 = por %p2585_p11, %p2584_p8 }
 0x31e   : > { %p2587_p3 = pnand %p2586_p2, %p2580_p10 }
 0x320   : > { %2590 = shalt.err (!%p2587_p3)
}
 0x321   : > { %s2646_s8 = smov 64   ;;  %s2647_s26 = smov 4  }
 0x322   : > { %2354 = dma.vmem_to_hbm [thread:$0]  (%p3638_p0), %s3571_s29, 2048, %s3569_s25, %s2063_s16, %s2646_s8, %s2646_s8, %s2647_s26  }
 0x323 PF: > { %s2091_s28 = sand.u32 1, %s2621_s12   ;;  %p3639_p7 = scmp.ne.s32.totalorder %s3627_s19, 0 }
 0x324   : > { %p3640_p9 = scmp.ge.s32.totalorder %s2633_s15, 2  ;;  %s2092_s6 = scalar_lea.sflag [#allocation4], %s2091_s28 }
 0x326   : > { %p2368_p12 = pnand %p3640_p9, %p3639_p7 }
 0x328   : > { %2616 = dma.done.wait (!%p2368_p12), %s2092_s6, 2048  }
 0x329   : > { %2618 = vsyncadd (!%p2368_p12), %s2092_s6, 4294965248  ;;  %p17_p1 = scmp.ge.s32.totalorder %s2782_s5, 4   ;;  %s3641_s12 = smov %s2625_s13 }
 0x32a   : > { %s3642_s13 = smov %s2629_s14  ;;  %s3643_s14 = smov %s2798_s10 }
 0x32b   : > { %s3644_s15 = smov %s2782_s5  ;;  %19 = sbr.rel (!%p17_p1) target bundleno = 6 (0x6), region = 85 }
 0x332   :  { %2097 = vsyncpa [#allocation3], 1 }
 0x333   :  { %2099 = vsyncpa [#allocation3 + $0x1], 1 }
 0x334   :  { %2100 = vsyncpa [#allocation6], 1 }
 0x335   :  { %2101 = vsyncpa [#allocation4], 1 }
 0x336   :  { %2103 = vsyncpa [#allocation4 + $0x1], 1 }

// kernel: encode_pallas.6
= control target key start
LH: loop header
LB: loop body
LE: loop exit
PB: predicated region body
PF: predicated region fallthrough
CT: control target
= control target key end

     0   :  { %8 = vsyncpa [#allocation3], 0  ;;  %s4102_s0 = inlined_call_operand.hbm [shape: bf16[2,16,16,32], index: 0, kind: input, shape index: {}]   ;;  %s4103_s1 = inlined_call_operand.hbm [shape: bf16[288,128], index: 1, kind: input, shape index: {}]   ;;  %s4104_s2 = inlined_call_operand.hbm [shape: f32[1,128], index: 2, kind: input, shape index: {}]   ;;  %s4105_s3 = inlined_call_operand.hbm [shape: bf16[2,16,16,64], index: 3, kind: output, shape index: {}]  }
   0x1   :  { %10 = vsyncpa [#allocation3 + $0x1], 0 }
   0x2   :  { %11 = vsyncpa [#allocation6], 0 }
   0x3   :  { %12 = vsyncpa [#allocation4], 0 }
   0x4   :  { %14 = vsyncpa [#allocation4 + $0x1], 0  ;;  %s3092_s12 = smov 0   ;;  %s3094_s13 = smov 0  }
   0x5   :  { %s3096_s14 = smov 0   ;;  %s3098_s15 = smov 0  }
   0x6 LB: > { %s3113_s16 = sadd.s32 4294967295, %s3060_s15   ;;  %s2416_s17 = sadd.s32 4294967294, %s3060_s15   ;;  %s3060_s15 = sphi %s3098_s15, %s4127_s15   ;;  %s3056_s14 = sphi %s3096_s14, %s4126_s14   ;;  %s3052_s13 = sphi %s3094_s13, %s4125_s13   ;;  %s3048_s12 = sphi %s3092_s12, %s4124_s12  }
   0x7   : > { %p40_p0 = scmp.ne.s32.totalorder %s3052_s13, %s3048_s12  ;;  %p4106_p1 = scmp.eq.s32.totalorder %s3113_s16, 0 }
   0x8   : > { %p112_p3 = scmp.eq.s32.totalorder %s2416_s17, 1  ;;  %p2417_p5 = scmp.ge.s32.totalorder %s3060_s15, 1 }
   0x9   : > { %p3122_p4 = por %p4106_p1, %p40_p0  ;;  %p119_p7 = scmp.lt.s32.totalorder %s3060_s15, 3 }
   0xa   : > { %p3127_p6 = por %p112_p3, %p40_p0  ;;  %s3062_s21 = smov [#allocation5]  }
   0xb   : > { %s4109_s18 = scalar_select %p3122_p4, 1, 0 }
   0xc   : > { %s4110_s19 = scalar_select %p3127_p6, 1, 0 }
   0xd   : > { %p3132_p8 = pnand %p2417_p5, %p119_p7  ;;  %s131_s22 = sshll.u32 %s3062_s21, 4  ;;  %s3136_s22 = int_to_ptr.vmem [resolvable:$true] %s131_s22 }
   0xe   : > { %s3063_s24 = smov [#allocation7]   ;;  %s2904_s28 = scalar_lea.hbm %s4103_s1, 2304 }
   0xf   : > { %p2777_p9 = pneg %p3132_p8  ;;  %s145_s25 = sshll.u32 %s3063_s24, 4  ;;  %s3147_s25 = int_to_ptr.vmem [resolvable:$true] %s145_s25 }
  0x10   : > { %p2905_p12 = scmp.ne.s32.totalorder %s4103_s1, %s2904_s28  ;;  %p2911_p5 = scmp.lt.u32.totalorder %s2904_s28, %s4103_s1 }
  0x11   : > { %p3143_p11 = pnand %p2777_p9, %p4106_p1 }
  0x13   : > { %p2906_p13 = pneg %p3143_p11 }
  0x15   : > { %p2907_p0 = pnand %p2906_p13, %p2905_p12 }
  0x17   : > { %p2908_p3 = pneg %p2907_p0 }
  0x19   : > { %p2913_p7 = pnand %p2911_p5, %p2908_p3 }
  0x1b   : > { %2916 = shalt.err (!%p2913_p7)
}
  0x1c   : > { %s2917_s6 = scalar_lea.vmem %s3136_s22, 2304  ;;  %p2925_p2 = scmp.lt.s32.totalorder %s3136_s22, %s3136_s22 }
  0x1d   : > { %p2918_p9 = scmp.ne.s32.totalorder %s3136_s22, %s2917_s6  ;;  %p2926_p12 = scmp.lt.s32.totalorder %s2917_s6, %s2917_s6 }
  0x1f   : > { %p2920_p10 = pnand %p2918_p9, %p2906_p13  ;;  %p2927_p0 = por %p2926_p12, %p2925_p2 }
  0x21   : > { %p2921_p1 = pneg %p2920_p10 }
  0x23   : > { %p2928_p6 = pnand %p2927_p0, %p2921_p1 }
  0x25   : > { %2931 = shalt.err (!%p2928_p6)
}
  0x26   : > { %s3064_s7 = smov 64   ;;  %s3065_s8 = smov 4  }
  0x27   : > { %2780 = dma.hbm_to_vmem [thread:$0]  (!%p3143_p11), %s4103_s1, 2304, %s3136_s22, [#allocation6], %s3064_s7, %s3064_s7, %s3065_s8  }
  0x28   : > { %s2932_s21 = scalar_lea.hbm %s4104_s2, 16 }
  0x29   : > { %p2933_p1 = scmp.ne.s32.totalorder %s4104_s2, %s2932_s21  ;;  %p2939_p10 = scmp.lt.u32.totalorder %s2932_s21, %s4104_s2 }
  0x2b   : > { %p2935_p2 = pnand %p2933_p1, %p2906_p13 }
  0x2d   : > { %p2936_p6 = pneg %p2935_p2 }
  0x2f   : > { %p2941_p3 = pnand %p2939_p10, %p2936_p6 }
  0x31   : > { %2944 = shalt.err (!%p2941_p3)
}
  0x32   : > { %s2945_s22 = scalar_lea.vmem %s3147_s25, 16  ;;  %s2952_s29 = scalar_lea.vmem %s3147_s25, 32 }
  0x33   : > { %p2946_p5 = scmp.ne.s32.totalorder %s3147_s25, %s2945_s22  ;;  %p2953_p12 = scmp.lt.s32.totalorder %s3147_s25, %s3147_s25 }
  0x34   : > { %p2954_p0 = scmp.lt.s32.totalorder %s2952_s29, %s2945_s22 }
  0x35   : > { %p2948_p7 = pnand %p2946_p5, %p2906_p13 }
  0x36   : > { %p2955_p1 = por %p2954_p0, %p2953_p12 }
  0x37   : > { %p2949_p9 = pneg %p2948_p7 }
  0x39   : > { %p2956_p2 = pnand %p2955_p1, %p2949_p9 }
  0x3b   : > { %2959 = shalt.err (!%p2956_p2)
}
  0x3c   : > { %2783 = dma.hbm_to_vmem [thread:$0]  (!%p3143_p11), %s4104_s2, 16, %s3147_s25, [#allocation6]  }
  0x3d   : > { %s3206_s5 = sadd.s32 1, %s3060_s15   ;;  %s27_s23 = sadd.s32 1, %s3056_s14 }
  0x3e   : > { %s24_s6 = ssub.s32 %s3060_s15, %s3206_s5  ;;  %p34_p13 = scmp.ne.s32.totalorder %s3056_s14, %s3052_s13 }
  0x3f   : > { %p25_p6 = scmp.eq.s32.totalorder %s24_s6, 0  ;;  %p35_p10 = scmp.eq.s32.totalorder %s3060_s15, 0 }
  0x40   : > { %p4113_p3 = scmp.eq.s32.totalorder %s3113_s16, 1  ;;  %p2794_p7 = scmp.lt.s32.totalorder %s3060_s15, 2 }
  0x41   : > { %s3222_s10 = scalar_select %p25_p6, %s3056_s14, %s27_s23  }
  0x42   : > { %p3216_p5 = por %p4113_p3, %p34_p13  ;;  %p36_p9 = por %p35_p10, %p34_p13 }
  0x43   : > { %s156_s11 = sand.u32 1, %s3056_s14   ;;  %s2549_s25 = sshll.u32 %s3060_s15, 11 }
  0x44   : > { %s4114_s9 = scalar_select %p3216_p5, 1, 0 }
  0x45   : > { %s2421_s17 = sshll.u32 %s156_s11, 7  ;;  %s3229_s26 = scalar_lea.hbm %s4102_s0, %s2549_s25 }
  0x46   : > { %s160_s27 = scalar_lea.vmem [#allocation2], %s2421_s17  ;;  %p3233_p11 = pnand %p2794_p7, %p36_p9 }
  0x47   : > { %s167_s28 = sshll.u32 %s160_s27, 4  ;;  %s3237_s29 = scalar_lea.sflag [#allocation3], %s156_s11  ;;  %s3231_s28 = int_to_ptr.vmem [resolvable:$true] %s167_s28 }
  0x48   : > { %s2960_s30 = scalar_lea.hbm %s3229_s26, 2048  ;;  %p2962_p0 = pneg %p3233_p11 }
  0x49   : > { %p2961_p12 = scmp.ne.s32.totalorder %s3229_s26, %s2960_s30  ;;  %s2965_s6 = scalar_lea.hbm %s4102_s0, 4096 }
  0x4a   : > { %p2966_p13 = scmp.lt.u32.totalorder %s3229_s26, %s4102_s0  ;;  %p2967_p6 = scmp.lt.u32.totalorder %s2965_s6, %s2960_s30 }
  0x4b   : > { %p2963_p1 = pnand %p2962_p0, %p2961_p12  ;;  %p2969_p3 = scmp.lt.u32.totalorder %s2960_s30, %s3229_s26 }
  0x4c   : > { %p2968_p10 = por %p2967_p6, %p2966_p13 }
  0x4d   : > { %p2964_p2 = pneg %p2963_p1 }
  0x4e   : > { %p2970_p7 = por %p2969_p3, %p2968_p10 }
  0x50   : > { %p2971_p9 = pnand %p2970_p7, %p2964_p2 }
  0x52   : > { %2974 = shalt.err (!%p2971_p9)
}
  0x53   : > { %s2975_s11 = scalar_lea.vmem %s3231_s28, 2048  ;;  %s3066_s21 = smov [#allocation2]  }
  0x54   : > { %p2976_p12 = scmp.ne.s32.totalorder %s3231_s28, %s2975_s11  ;;  %s2980_s24 = sshll.u32 %s3066_s21, 4  ;;  %s2981_s24 = int_to_ptr.vmem [resolvable:$false] %s2980_s24 }
  0x55   : > { %s2982_s27 = scalar_lea.vmem %s2981_s24, 4096  ;;  %p2983_p4 = scmp.lt.s32.totalorder %s3231_s28, %s2981_s24 }
  0x56   : > { %p2978_p1 = pnand %p2976_p12, %p2962_p0  ;;  %p2984_p13 = scmp.lt.s32.totalorder %s2982_s27, %s2975_s11 }
  0x58   : > { %p2979_p5 = pneg %p2978_p1  ;;  %p2985_p6 = por %p2984_p13, %p2983_p4 }
  0x5a   : > { %p2986_p10 = pnand %p2985_p6, %p2979_p5 }
  0x5c   : > { %2989 = shalt.err (!%p2986_p10)
}
  0x5d   : > { %2787 = dma.hbm_to_vmem [thread:$0]  (!%p3233_p11), %s3229_s26, 2048, %s3231_s28, %s3237_s29, %s3064_s7, %s3064_s7, %s3065_s8  }
  0x5e   : > { %179 = sbr.rel (%p3132_p8) target bundleno = 835 (0x343), region = 32  ;;  %s3271_s30 = sand.u32 (!%p3132_p8), 1, %s3052_s13  }
  0x5f   : > { %s2425_s4 = sshll.u32 (!%p3132_p8), %s3271_s30, 7  ;;  %s182_s23 = scalar_lea.sflag (!%p3132_p8), [#allocation3], %s3271_s30 }
  0x60   : > { %s3277_s22 = scalar_lea.vmem (!%p3132_p8), [#allocation2], %s2425_s4  ;;  %p4116_p4 = scmp.ne.s32.totalorder (!%p3132_p8), %s4109_s18, 0 }
  0x65   : > { %3035 = dma.done.wait (%p4116_p4), %s182_s23, 2048  }
  0x66   : > { %3037 = vsyncadd (%p4116_p4), %s182_s23, 4294965248  ;;  %p4117_p5 = scmp.eq.s32.totalorder %s3113_s16, 0 }
  0x68   : > { %3039 = dma.done.wait (%p4117_p5), [#allocation6], 2320   ;;  %p4118_p8 = pmov %p4117_p5 }
  0x69   : > { %vm649_vm0 = vcmask 1040384   ;;  %vm650_vm1 = vsmask.f32 256  ;;  %v241_v0 = vld [vmem:[%s3277_s22 + $0x60] sm:$0xf]  ;;  %vm941_vm2 = vcmask 1046528  }
  0x6a   : > { %3041 = vsyncadd (%p4118_p8), [#allocation6], 4294964976  ;;  %v242_v1 = vld [vmem:[%s3277_s22 + $0x64] sm:$0xf]  ;;  %v219_v2 = vld [vmem:[%s3277_s22 + $0x8] sm:$0xf]  ;;  %v2441_v3 = vcombine.low %v241_v0, %v241_v0 }
  0x6b   : > { %v2457_v4 = vcombine.low %v241_v0, %v242_v1  ;;  %v2473_v5 = vcombine.low %v242_v1, %v242_v1  ;;  %v220_v6 = vld [vmem:[%s3277_s22 + $0xc] sm:$0xf]  ;;  %v2429_v7 = vcombine.low %v219_v2, %v219_v2  ;;  %v217_v8 = vld [vmem:[%s3277_s22] sm:$0xf]  ;;  %v218_v9 = vld [vmem:[%s3277_s22 + $0x4] sm:$0xf] }
  0x6c   : > { %v2445_v10 = vcombine.low %v219_v2, %v220_v6  ;;  %v2461_v11 = vcombine.low %v220_v6, %v220_v6  ;;  %v2430_v12 = vcombine.low %v217_v8, %v217_v8  ;;  %v2446_v13 = vcombine.low %v217_v8, %v218_v9  ;;  %vm3295_vm3 = vmand %vm649_vm0, %vm650_vm1  ;;  %v243_v31 = vld [vmem:[%s3277_s22 + $0x68] sm:$0xf]  ;;  %v244_v44 = vld [vmem:[%s3277_s22 + $0x6c] sm:$0xf]  ;;  %s3067_s18 = smov 64   ;;  %s3068_s20 = smov 32  }
  0x6d   : > { %v334_v14 = vshrl.u32 %v2441_v3, 16  ;;  %v494_v15 = vshrl.u32 %v2457_v4, 16  ;;  %v497_v16 = vshll.u32 %v2457_v4, 16  ;;  %v618_v17 = vshll.u32 %v2473_v5, 16  ;;  %v221_v5 = vld [vmem:[%s3277_s22 + $0x10] sm:$0xf] }
  0x6e   : > { %v298_v19 = vshrl.u32 %v2429_v7, 16  ;;  %v410_v20 = vshrl.u32 %v2445_v10, 16  ;;  %v413_v21 = vshll.u32 %v2445_v10, 16  ;;  %v570_v22 = vshll.u32 %v2461_v11, 16  ;;  %v222_v10 = vld [vmem:[%s3277_s22 + $0x14] sm:$0xf] }
  0x6f   : > { %v496_v23 = vrot.slane %v494_v15, 7  ;;  %v620_v24 = vrot.slane %v618_v17, 3  ;;  %v301_v25 = vshrl.u32 %v2430_v12, 16  ;;  %v417_v26 = vshrl.u32 %v2446_v13, 16  ;;  %v2886_v18 = vld [vmem:[#allocation5 + $0x40] sm:$0xff]   ;;  %s3069_s7 = smov 96  }
  0x70   : > { %v412_v27 = vrot.slane %v410_v20, 7  ;;  %v572_v28 = vrot.slane %v570_v22, 3  ;;  %vm684_vm4 = vsmask.f32 7424  ;;  %v420_v29 = vshll.u32 %v2446_v13, 16  ;;  %2583 = vmatprep.subr.bf16.mxu0 %v2886_v18  ;;  %2749 = vmatprep.subr.bf16.mxu1 %v2886_v18  ;;  %s3956_s8 = scalar_lea.vmem [#allocation8], %s2425_s4 }
  0x71   : > { %v2462_v30 = vcombine.low %v218_v9, %v218_v9  ;;  %v499_v32 = vor.u32 %v497_v16, %v496_v23  ;;  %v680_v33 = vsel %vm3295_vm3, %v496_v23, %v620_v24  ;;  %v419_v34 = vrot.slane %v417_v26, 7  ;;  %v245_v24 = vld [vmem:[%s3277_s22 + $0x70] sm:$0xf]  ;;  %s2582_s26 = sshll.u32 %s3113_s16, 11  ;;  %s2324_s28 = sshll.u32 %s3956_s8, 4  ;;  %s4054_s28 = int_to_ptr.vmem [resolvable:$true] %s2324_s28 }
  0x72   : > { %v2442_v35 = vcombine.low %v243_v31, %v243_v31  ;;  %v979_v36 = vrot.slane %v680_v33, 1  ;;  %v415_v37 = vor.u32 %v413_v21, %v412_v27  ;;  %v668_v38 = vsel %vm3295_vm3, %v412_v27, %v572_v28  ;;  %s4050_s17 = scalar_lea.hbm %s4105_s3, %s2582_s26  ;;  %s2311_s16 = scalar_lea.sflag [#allocation4], %s3271_s30 }
  0x73   : > { %v574_v39 = vshll.u32 %v2462_v30, 16  ;;  %v3306_v40 = vsel %vm3295_vm3, %v334_v14, %v499_v32  ;;  %v943_v41 = vrot.slane %v668_v38, 1  ;;  %v693_v42 = vshll.u32 %v668_v38, 16  ;;  %v223_v38 = vld [vmem:[%s3277_s22 + $0x18] sm:$0xf]  ;;  %s2990_s25 = scalar_lea.vmem %s4054_s28, 2048 }
  0x74   : > { %v422_v43 = vor.u32 %v420_v29, %v419_v34  ;;  %v978_v45 = vrot.slane %v3306_v40, 1  ;;  %v3312_v46 = vsel %vm3295_vm3, %v298_v19, %v415_v37  ;;  %v337_v48 = vshrl.u32 %v2442_v35, 16  ;;  %p2991_p11 = scmp.ne.s32.totalorder %s4054_s28, %s2990_s25  ;;  %p4121_p0 = scmp.ne.s32.totalorder %s4114_s9, 0 }
  0x75   : > { %v576_v47 = vrot.slane %v574_v39, 3  ;;  %v942_v49 = vrot.slane %v3312_v46, 1  ;;  %v686_v50 = vshrl.u32 %v3312_v46, 16  ;;  %v688_v51 = vshll.u32 %v3312_v46, 16  ;;  %s3070_s11 = smov [#allocation8]  }
  0x76   : > { %v695_v52 = vrot.slane %v693_v42, 1  ;;  %v980_v53 = vsel %vm941_vm2, %v978_v45, %v979_v36  ;;  %v3320_v54 = vsel %vm3295_vm3, %v301_v25, %v422_v43  ;;  %v2458_v56 = vcombine.low %v243_v31, %v244_v44  ;;  %v246_v25 = vld [vmem:[%s3277_s22 + $0x74] sm:$0xf]  ;;  %p2992_p2 = pnand %p2991_p11, %p4121_p0  ;;  %s2994_s21 = sshll.u32 %s3070_s11, 4  ;;  %s2995_s21 = int_to_ptr.vmem [resolvable:$false] %s2994_s21 }
  0x77   : > { %v669_v55 = vsel %vm3295_vm3, %v419_v34, %v576_v47  ;;  %1014 = vrot.lane.b32.xlu0 %v980_v53, %s3067_s18  ;;  %v944_v57 = vsel %vm941_vm2, %v942_v49, %v943_v41  ;;  %v690_v58 = vrot.slane %v688_v51, 1  ;;  %v945_v59 = vrot.slane %v3320_v54, 1  ;;  %s2996_s24 = scalar_lea.vmem %s2995_s21, 4096  ;;  %p2997_p7 = scmp.lt.s32.totalorder %s4054_s28, %s2995_s21 }
  0x78   : > { %v946_v60 = vrot.slane %v669_v55, 1  ;;  %990 = vrot.lane.b32.xlu1 %v944_v57, %s3067_s18  ;;  %v501_v61 = vshrl.u32 %v2458_v56, 16  ;;  %v504_v62 = vshll.u32 %v2458_v56, 16  ;;  %v2474_v63 = vcombine.low %v244_v44, %v244_v44  ;;  %p2993_p3 = pneg %p2992_p2  ;;  %p2998_p9 = scmp.lt.s32.totalorder %s2996_s24, %s2990_s25 }
  0x79   : > { %v698_v0 = vshrl.u32 %v3320_v54, 16  ;;  %v691_v1 = vor.u32 %v690_v58, %v686_v50  ;;  %v700_v3 = vshll.u32 %v3320_v54, 16  ;;  %v705_v4 = vshll.u32 %v669_v55, 16 }
  0x7a   : > { %v947_v2 = vsel %vm941_vm2, %v945_v59, %v946_v60  ;;  %v503_v6 = vrot.slane %v501_v61, 7  ;;  %v622_v7 = vshll.u32 %v2474_v63, 16  ;;  %v830_v8 = vshrl.u32 %v3306_v40, 16  ;;  %p2999_p12 = por %p2998_p9, %p2997_p7 }
  0x7b   : > { %v832_v9 = vshll.u32 %v3306_v40, 16  ;;  %v696_v11 = vsel %vm684_vm4, %v691_v1, %v695_v52  ;;  %v702_v12 = vrot.slane %v700_v3, 1  ;;  %v707_v13 = vrot.slane %v705_v4, 1  ;;  %v224_v52 = vld [vmem:[%s3277_s22 + $0x1c] sm:$0xf] }
  0x7c   : > { %v837_v14 = vshll.u32 %v680_v33, 16  ;;  %877 = vrot.lane.b32.xlu0 %v696_v11, %s3068_s20  ;;  %992 = vrot.lane.b32.xlu1 %v947_v2, %s3067_s18  ;;  %v506_v15 = vor.u32 %v504_v62, %v503_v6  ;;  %v624_v16 = vrot.slane %v622_v7, 3  ;;  %v2431_v19 = vcombine.low %v221_v5, %v221_v5  ;;  %v247_v3 = vld [vmem:[%s3277_s22 + $0x78] sm:$0xf]  ;;  %p3000_p1 = pnand %p2999_p12, %p2993_p3 }
  0x7d   : > { %v834_v17 = vrot.slane %v832_v9, 1  ;;  %v703_v20 = vor.u32 %v702_v12, %v698_v0  ;;  %v2447_v22 = vcombine.low %v221_v5, %v222_v10  ;;  %v2463_v23 = vcombine.low %v222_v10, %v222_v10 }
  0x7e   : > { %v839_v21 = vrot.slane %v837_v14, 1  ;;  %v3342_v26 = vsel %vm3295_vm3, %v337_v48, %v506_v15  ;;  %v681_v27 = vsel %vm3295_vm3, %v503_v6, %v624_v16  ;;  %v304_v29 = vshrl.u32 %v2431_v19, 16  ;;  %v248_v15 = vld [vmem:[%s3277_s22 + $0x7c] sm:$0xf] }
  0x7f   : > { %v835_v28 = vor.u32 %v834_v17, %v830_v8  ;;  %v842_v30 = vshrl.u32 %v3342_v26, 16  ;;  %v844_v31 = vshll.u32 %v3342_v26, 16  ;;  %v849_v32 = vshll.u32 %v681_v27, 16 }
  0x80   : > { %v708_v33 = vsel %vm684_vm4, %v703_v20, %v707_v13  ;;  %v981_v34 = vrot.slane %v3342_v26, 1  ;;  %v982_v35 = vrot.slane %v681_v27, 1  ;;  %v424_v37 = vshrl.u32 %v2447_v22, 16 }
  0x81   : > { %879 = vrot.lane.b32.xlu0 %v708_v33, %s3068_s20  ;;  %v840_v36 = vsel %vm684_vm4, %v835_v28, %v839_v21  ;;  %v846_v39 = vrot.slane %v844_v31, 1  ;;  %v851_v41 = vrot.slane %v849_v32, 1  ;;  %v427_v42 = vshll.u32 %v2447_v22, 16  ;;  %v225_v22 = vld [vmem:[%s3277_s22 + $0x20] sm:$0xf] }
  0x82   : > { %v578_v43 = vshll.u32 %v2463_v23, 16  ;;  %v983_v44 = vsel %vm941_vm2, %v981_v34, %v982_v35  ;;  %v426_v45 = vrot.slane %v424_v37, 7  ;;  %v2443_v47 = vcombine.low %v245_v24, %v245_v24  ;;  %v226_v23 = vld [vmem:[%s3277_s22 + $0x24] sm:$0xf] }
  0x83   : > { %v2459_v48 = vcombine.low %v245_v24, %v246_v25  ;;  %v847_v49 = vor.u32 %v846_v39, %v842_v30  ;;  %v2475_v51 = vcombine.low %v246_v25, %v246_v25  ;;  %v2432_v53 = vcombine.low %v223_v38, %v223_v38 }
  0x84   : > { %v580_v50 = vrot.slane %v578_v43, 3  ;;  %v429_v55 = vor.u32 %v427_v42, %v426_v45  ;;  %v340_v56 = vshrl.u32 %v2443_v47, 16  ;;  %v2448_v10 = vcombine.low %v223_v38, %v224_v52 }
  0x85   : > { %901 = vrot.lane.b32.xlu0 %v840_v36, %s3068_s20  ;;  %v508_v57 = vshrl.u32 %v2459_v48, 16  ;;  %v511_v58 = vshll.u32 %v2459_v48, 16  ;;  %v852_v59 = vsel %vm684_vm4, %v847_v49, %v851_v41  ;;  %v626_v61 = vshll.u32 %v2475_v51, 16 }
  0x86   : > { %v670_v60 = vsel %vm3295_vm3, %v426_v45, %v580_v50  ;;  %v307_v62 = vshrl.u32 %v2432_v53, 16  ;;  %903 = vrot.lane.b32.xlu1 %v852_v59, %s3068_s20  ;;  %v3362_v63 = vsel %vm3295_vm3, %v304_v29, %v429_v55  ;;  %v2464_v11 = vcombine.low %v224_v52, %v224_v52 }
  0x87   : > { %v717_v0 = vshll.u32 %v670_v60, 16  ;;  %v949_v1 = vrot.slane %v670_v60, 1  ;;  %v510_v2 = vrot.slane %v508_v57, 7  ;;  %v710_v4 = vshrl.u32 %v3362_v63, 16  ;;  %v228_v57 = vld [vmem:[%s3277_s22 + $0x2c] sm:$0xf] }
  0x88   : > { %v712_v5 = vshll.u32 %v3362_v63, 16  ;;  %v948_v6 = vrot.slane %v3362_v63, 1  ;;  %v628_v7 = vrot.slane %v626_v61, 3  ;;  %v2444_v16 = vcombine.low %v247_v3, %v247_v3 }
  0x89   : > { %v719_v8 = vrot.slane %v717_v0, 1  ;;  %v513_v9 = vor.u32 %v511_v58, %v510_v2  ;;  %v431_v21 = vshrl.u32 %v2448_v10, 16  ;;  %v434_v31 = vshll.u32 %v2448_v10, 16 }
  0x8a   : > { %v714_v12 = vrot.slane %v712_v5, 1  ;;  %v950_v13 = vsel %vm941_vm2, %v948_v6, %v949_v1  ;;  %v682_v14 = vsel %vm3295_vm3, %v510_v2, %v628_v7  ;;  %1016 = vrot.lane.b32.xlu1 %v983_v44, %s3067_s18  ;;  %v582_v32 = vshll.u32 %v2464_v11, 16 }
  0x8b   : > { %v3375_v17 = vsel %vm3295_vm3, %v340_v56, %v513_v9  ;;  %v861_v19 = vshll.u32 %v682_v14, 16  ;;  %v985_v20 = vrot.slane %v682_v14, 1  ;;  %v433_v30 = vrot.slane %v431_v21, 7  ;;  %v227_v56 = vld [vmem:[%s3277_s22 + $0x28] sm:$0xf] }
  0x8c   : > { %v715_v24 = vor.u32 %v714_v12, %v710_v4  ;;  %v854_v25 = vshrl.u32 %v3375_v17, 16  ;;  %v856_v27 = vshll.u32 %v3375_v17, 16  ;;  %v984_v28 = vrot.slane %v3375_v17, 1 }
  0x8d   : > { %v863_v29 = vrot.slane %v861_v19, 1  ;;  %v343_v36 = vshrl.u32 %v2444_v16, 16  ;;  %v436_v37 = vor.u32 %v434_v31, %v433_v30  ;;  %v584_v38 = vrot.slane %v582_v32, 3 }
  0x8e   : > { %v720_v33 = vsel %vm684_vm4, %v715_v24, %v719_v8  ;;  %v858_v34 = vrot.slane %v856_v27, 1  ;;  %v986_v35 = vsel %vm941_vm2, %v984_v28, %v985_v20  ;;  %994 = vrot.lane.b32.xlu1 %v950_v13, %s3067_s18  ;;  %v2460_v39 = vcombine.low %v247_v3, %v248_v15 }
  0x8f   : > { %881 = vrot.lane.b32.xlu0 %v720_v33, %s3068_s20  ;;  %v2476_v41 = vcombine.low %v248_v15, %v248_v15  ;;  %v2433_v43 = vcombine.low %v225_v22, %v225_v22  ;;  %v2449_v44 = vcombine.low %v225_v22, %v226_v23  ;;  %v2465_v45 = vcombine.low %v226_v23, %v226_v23 }
  0x90   : > { %v859_v42 = vor.u32 %v858_v34, %v854_v25  ;;  %v3388_v47 = vsel %vm3295_vm3, %v307_v62, %v436_v37  ;;  %v671_v48 = vsel %vm3295_vm3, %v433_v30, %v584_v38  ;;  %v515_v49 = vshrl.u32 %v2460_v39, 16  ;;  %v229_v34 = vld [vmem:[%s3277_s22 + $0x30] sm:$0xf] }
  0x91   : > { %v518_v50 = vshll.u32 %v2460_v39, 16  ;;  %v722_v52 = vshrl.u32 %v3388_v47, 16  ;;  %v724_v53 = vshll.u32 %v3388_v47, 16  ;;  %v729_v55 = vshll.u32 %v671_v48, 16  ;;  %v230_v39 = vld [vmem:[%s3277_s22 + $0x34] sm:$0xf] }
  0x92   : > { %v864_v51 = vsel %vm684_vm4, %v859_v42, %v863_v29  ;;  %1018 = vrot.lane.b32.xlu1 %v986_v35, %s3067_s18  ;;  %v951_v58 = vrot.slane %v3388_v47, 1  ;;  %v952_v59 = vrot.slane %v671_v48, 1  ;;  %v517_v60 = vrot.slane %v515_v49, 7 }
  0x93   : > { %905 = vrot.lane.b32.xlu0 %v864_v51, %s3068_s20  ;;  %v630_v61 = vshll.u32 %v2476_v41, 16  ;;  %v726_v62 = vrot.slane %v724_v53, 1  ;;  %v731_v0 = vrot.slane %v729_v55, 1  ;;  %v310_v1 = vshrl.u32 %v2433_v43, 16 }
  0x94   : > { %v438_v2 = vshrl.u32 %v2449_v44, 16  ;;  %v953_v3 = vsel %vm941_vm2, %v951_v58, %v952_v59  ;;  %v520_v4 = vor.u32 %v518_v50, %v517_v60  ;;  %v441_v6 = vshll.u32 %v2449_v44, 16 }
  0x95   : > { %v632_v5 = vrot.slane %v630_v61, 3  ;;  %v727_v7 = vor.u32 %v726_v62, %v722_v52  ;;  %v586_v9 = vshll.u32 %v2465_v45, 16  ;;  %v2434_v10 = vcombine.low %v227_v56, %v227_v56 }
  0x96   : > { %v440_v8 = vrot.slane %v438_v2, 7  ;;  %996 = vrot.lane.b32.xlu1 %v953_v3, %s3067_s18  ;;  %v3404_v11 = vsel %vm3295_vm3, %v343_v36, %v520_v4  ;;  %v2450_v13 = vcombine.low %v227_v56, %v228_v57  ;;  %v2466_v14 = vcombine.low %v228_v57, %v228_v57  ;;  %v231_v56 = vld [vmem:[%s3277_s22 + $0x38] sm:$0xf]  ;;  %v232_v2 = vld [vmem:[%s3277_s22 + $0x3c] sm:$0xf] }
  0x97   : > { %v683_v12 = vsel %vm3295_vm3, %v517_v60, %v632_v5  ;;  %v732_v15 = vsel %vm684_vm4, %v727_v7, %v731_v0  ;;  %v866_v16 = vshrl.u32 %v3404_v11, 16  ;;  %v868_v19 = vshll.u32 %v3404_v11, 16 }
  0x98   : > { %v873_v20 = vshll.u32 %v683_v12, 16  ;;  %883 = vrot.lane.b32.xlu0 %v732_v15, %s3068_s20  ;;  %v987_v21 = vrot.slane %v3404_v11, 1  ;;  %v988_v22 = vrot.slane %v683_v12, 1  ;;  %v443_v23 = vor.u32 %v441_v6, %v440_v8  ;;  %v233_v12 = vld [vmem:[%s3277_s22 + $0x40] sm:$0xf] }
  0x99   : > { %v588_v24 = vrot.slane %v586_v9, 3  ;;  %v870_v25 = vrot.slane %v868_v19, 1  ;;  %v313_v28 = vshrl.u32 %v2434_v10, 16  ;;  %v445_v29 = vshrl.u32 %v2450_v13, 16  ;;  %v234_v19 = vld [vmem:[%s3277_s22 + $0x44] sm:$0xf] }
  0x9a   : > { %v875_v27 = vrot.slane %v873_v20, 1  ;;  %v989_v30 = vsel %vm941_vm2, %v987_v21, %v988_v22  ;;  %v3416_v31 = vsel %vm3295_vm3, %v310_v1, %v443_v23  ;;  %v448_v33 = vshll.u32 %v2450_v13, 16 }
  0x9b   : > { %v672_v32 = vsel %vm3295_vm3, %v440_v8, %v588_v24  ;;  %v871_v35 = vor.u32 %v870_v25, %v866_v16  ;;  %1020 = vrot.lane.b32.xlu1 %v989_v30, %s3067_s18  ;;  %v734_v36 = vshrl.u32 %v3416_v31, 16  ;;  %v736_v37 = vshll.u32 %v3416_v31, 16 }
  0x9c   : > { %v741_v38 = vshll.u32 %v672_v32, 16  ;;  %v954_v41 = vrot.slane %v3416_v31, 1  ;;  %v955_v42 = vrot.slane %v672_v32, 1  ;;  %v447_v43 = vrot.slane %v445_v29, 7 }
  0x9d   : > { %v590_v44 = vshll.u32 %v2466_v14, 16  ;;  %v876_v45 = vsel %vm684_vm4, %v871_v35, %v875_v27  ;;  %v738_v48 = vrot.slane %v736_v37, 1  ;;  %v2435_v50 = vcombine.low %v229_v34, %v229_v34 }
  0x9e   : > { %v743_v49 = vrot.slane %v741_v38, 1  ;;  %907 = vrot.lane.b32.xlu0 %v876_v45, %s3068_s20  ;;  %v956_v51 = vsel %vm941_vm2, %v954_v41, %v955_v42  ;;  %v450_v52 = vor.u32 %v448_v33, %v447_v43  ;;  %v2451_v55 = vcombine.low %v229_v34, %v230_v39 }
  0x9f   : > { %v592_v53 = vrot.slane %v590_v44, 3  ;;  %v739_v57 = vor.u32 %v738_v48, %v734_v36  ;;  %998 = vrot.lane.b32.xlu1 %v956_v51, %s3067_s18  ;;  %v316_v58 = vshrl.u32 %v2435_v50, 16  ;;  %v2467_v59 = vcombine.low %v230_v39, %v230_v39  ;;  %v240_v50 = vld [vmem:[%s3277_s22 + $0x5c] sm:$0xf] }
  0xa0   : > { %v2436_v60 = vcombine.low %v231_v56, %v231_v56  ;;  %v3433_v61 = vsel %vm3295_vm3, %v313_v28, %v450_v52  ;;  %v452_v0 = vshrl.u32 %v2451_v55, 16  ;;  %v455_v1 = vshll.u32 %v2451_v55, 16 }
  0xa1   : > { %v673_v62 = vsel %vm3295_vm3, %v447_v43, %v592_v53  ;;  %v744_v3 = vsel %vm684_vm4, %v739_v57, %v743_v49  ;;  %v746_v4 = vshrl.u32 %v3433_v61, 16  ;;  %v748_v5 = vshll.u32 %v3433_v61, 16  ;;  %v239_v43 = vld [vmem:[%s3277_s22 + $0x58] sm:$0xf] }
  0xa2   : > { %v753_v6 = vshll.u32 %v673_v62, 16  ;;  %885 = vrot.lane.b32.xlu0 %v744_v3, %s3068_s20  ;;  %v957_v7 = vrot.slane %v3433_v61, 1  ;;  %v958_v8 = vrot.slane %v673_v62, 1  ;;  %v454_v9 = vrot.slane %v452_v0, 7 }
  0xa3   : > { %v594_v10 = vshll.u32 %v2467_v59, 16  ;;  %v750_v13 = vrot.slane %v748_v5, 1  ;;  %v319_v15 = vshrl.u32 %v2436_v60, 16  ;;  %v2452_v16 = vcombine.low %v231_v56, %v232_v2 }
  0xa4   : > { %v755_v14 = vrot.slane %v753_v6, 1  ;;  %v959_v20 = vsel %vm941_vm2, %v957_v7, %v958_v8  ;;  %v457_v21 = vor.u32 %v455_v1, %v454_v9  ;;  %v2468_v23 = vcombine.low %v232_v2, %v232_v2 }
  0xa5   : > { %v596_v22 = vrot.slane %v594_v10, 3  ;;  %v751_v24 = vor.u32 %v750_v13, %v746_v4  ;;  %1000 = vrot.lane.b32.xlu1 %v959_v20, %s3067_s18  ;;  %v459_v25 = vshrl.u32 %v2452_v16, 16  ;;  %v462_v27 = vshll.u32 %v2452_v16, 16  ;;  %v235_v20 = vld [vmem:[%s3277_s22 + $0x48] sm:$0xf] }
  0xa6   : > { %v2437_v28 = vcombine.low %v233_v12, %v233_v12  ;;  %v3449_v29 = vsel %vm3295_vm3, %v316_v58, %v457_v21  ;;  %v598_v32 = vshll.u32 %v2468_v23, 16  ;;  %v2453_v33 = vcombine.low %v233_v12, %v234_v19 }
  0xa7   : > { %v674_v30 = vsel %vm3295_vm3, %v454_v9, %v596_v22  ;;  %v756_v34 = vsel %vm684_vm4, %v751_v24, %v755_v14  ;;  %v758_v35 = vshrl.u32 %v3449_v29, 16  ;;  %v760_v36 = vshll.u32 %v3449_v29, 16 }
  0xa8   : > { %v765_v37 = vshll.u32 %v674_v30, 16  ;;  %887 = vrot.lane.b32.xlu0 %v756_v34, %s3068_s20  ;;  %v960_v38 = vrot.slane %v3449_v29, 1  ;;  %v961_v39 = vrot.slane %v674_v30, 1  ;;  %v461_v41 = vrot.slane %v459_v25, 7  ;;  %v236_v25 = vld [vmem:[%s3277_s22 + $0x4c] sm:$0xf] }
  0xa9   : > { %v600_v42 = vrot.slane %v598_v32, 3  ;;  %v762_v44 = vrot.slane %v760_v36, 1  ;;  %v322_v48 = vshrl.u32 %v2437_v28, 16  ;;  %v466_v49 = vshrl.u32 %v2453_v33, 16 }
  0xaa   : > { %v767_v45 = vrot.slane %v765_v37, 1  ;;  %v962_v51 = vsel %vm941_vm2, %v960_v38, %v961_v39  ;;  %v464_v52 = vor.u32 %v462_v27, %v461_v41  ;;  %v469_v55 = vshll.u32 %v2453_v33, 16 }
  0xab   : > { %v675_v53 = vsel %vm3295_vm3, %v461_v41, %v600_v42  ;;  %v763_v56 = vor.u32 %v762_v44, %v758_v35  ;;  %1002 = vrot.lane.b32.xlu1 %v962_v51, %s3067_s18  ;;  %v468_v59 = vrot.slane %v466_v49, 7  ;;  %v2469_v62 = vcombine.low %v234_v19, %v234_v19  ;;  %v237_v51 = vld [vmem:[%s3277_s22 + $0x50] sm:$0xf] }
  0xac   : > { %v777_v57 = vshll.u32 %v675_v53, 16  ;;  %v964_v58 = vrot.slane %v675_v53, 1  ;;  %v3466_v60 = vsel %vm3295_vm3, %v319_v15, %v464_v52  ;;  %v2440_v0 = vcombine.low %v239_v43, %v239_v43  ;;  %v238_v52 = vld [vmem:[%s3277_s22 + $0x54] sm:$0xf] }
  0xad   : > { %v2456_v1 = vcombine.low %v239_v43, %v240_v50  ;;  %v768_v2 = vsel %vm684_vm4, %v763_v56, %v767_v45  ;;  %v770_v3 = vshrl.u32 %v3466_v60, 16  ;;  %v772_v4 = vshll.u32 %v3466_v60, 16 }
  0xae   : > { %889 = vrot.lane.b32.xlu0 %v768_v2, %s3068_s20  ;;  %v779_v5 = vrot.slane %v777_v57, 1  ;;  %v963_v6 = vrot.slane %v3466_v60, 1  ;;  %v471_v7 = vor.u32 %v469_v55, %v468_v59  ;;  %v602_v8 = vshll.u32 %v2469_v62, 16 }
  0xaf   : > { %v774_v9 = vrot.slane %v772_v4, 1  ;;  %v331_v10 = vshrl.u32 %v2440_v0, 16  ;;  %v487_v12 = vshrl.u32 %v2456_v1, 16  ;;  %v2472_v13 = vcombine.low %v240_v50, %v240_v50 }
  0xb0   : > { %v965_v14 = vsel %vm941_vm2, %v963_v6, %v964_v58  ;;  %v604_v15 = vrot.slane %v602_v8, 3  ;;  %v3476_v16 = vsel %vm3295_vm3, %v322_v48, %v471_v7  ;;  %v490_v19 = vshll.u32 %v2456_v1, 16 }
  0xb1   : > { %v775_v21 = vor.u32 %v774_v9, %v770_v3  ;;  %1004 = vrot.lane.b32.xlu1 %v965_v14, %s3067_s18  ;;  %v782_v22 = vshrl.u32 %v3476_v16, 16  ;;  %v784_v23 = vshll.u32 %v3476_v16, 16  ;;  %v966_v24 = vrot.slane %v3476_v16, 1 }
  0xb2   : > { %v676_v27 = vsel %vm3295_vm3, %v468_v59, %v604_v15  ;;  %v489_v28 = vrot.slane %v487_v12, 7  ;;  %v614_v30 = vshll.u32 %v2472_v13, 16  ;;  %v2438_v32 = vcombine.low %v235_v20, %v235_v20 }
  0xb3   : > { %v780_v33 = vsel %vm684_vm4, %v775_v21, %v779_v5  ;;  %v786_v34 = vrot.slane %v784_v23, 1  ;;  %v789_v35 = vshll.u32 %v676_v27, 16  ;;  %v967_v36 = vrot.slane %v676_v27, 1 }
  0xb4   : > { %891 = vrot.lane.b32.xlu0 %v780_v33, %s3068_s20  ;;  %v492_v37 = vor.u32 %v490_v19, %v489_v28  ;;  %v616_v38 = vrot.slane %v614_v30, 3  ;;  %v2454_v39 = vcombine.low %v235_v20, %v236_v25  ;;  %v2470_v41 = vcombine.low %v236_v25, %v236_v25 }
  0xb5   : > { %v787_v42 = vor.u32 %v786_v34, %v782_v22  ;;  %v791_v43 = vrot.slane %v789_v35, 1  ;;  %v968_v44 = vsel %vm941_vm2, %v966_v24, %v967_v36  ;;  %v325_v58 = vshrl.u32 %v2438_v32, 16 }
  0xb6   : > { %1006 = vrot.lane.b32.xlu1 %v968_v44, %s3067_s18  ;;  %v3492_v45 = vsel %vm3295_vm3, %v331_v10, %v492_v37  ;;  %v679_v48 = vsel %vm3295_vm3, %v489_v28, %v616_v38  ;;  %v473_v49 = vshrl.u32 %v2454_v39, 16  ;;  %v476_v50 = vshll.u32 %v2454_v39, 16 }
  0xb7   : > { %v792_v53 = vsel %vm684_vm4, %v787_v42, %v791_v43  ;;  %v818_v55 = vshrl.u32 %v3492_v45, 16  ;;  %v820_v56 = vshll.u32 %v3492_v45, 16  ;;  %v825_v57 = vshll.u32 %v679_v48, 16 }
  0xb8   : > { %893 = vrot.lane.b32.xlu0 %v792_v53, %s3068_s20  ;;  %v475_v59 = vrot.slane %v473_v49, 7  ;;  %v606_v62 = vshll.u32 %v2470_v41, 16  ;;  %v2455_v2 = vcombine.low %v237_v51, %v238_v52  ;;  %v2439_v5 = vcombine.low %v237_v51, %v237_v51 }
  0xb9   : > { %v822_v0 = vrot.slane %v820_v56, 1  ;;  %v827_v1 = vrot.slane %v825_v57, 1  ;;  %v2471_v6 = vcombine.low %v238_v52, %v238_v52  ;;  %v975_v8 = vrot.slane %v3492_v45, 1  ;;  %v2887_v52 = vld [vmem:[#allocation5] sm:$0xff]   ;;  %v2888_v56 = vld [vmem:[#allocation5 + $0x48] sm:$0xff]  }
  0xba   : > { %v478_v3 = vor.u32 %v476_v50, %v475_v59  ;;  %v608_v4 = vrot.slane %v606_v62, 3  ;;  %v976_v9 = vrot.slane %v679_v48, 1  ;;  %v480_v10 = vshrl.u32 %v2455_v2, 16  ;;  %2584 = vmatpush3.bf16.msra.mxu0 %v2887_v52  ;;  %v2889_v57 = vld [vmem:[#allocation5 + $0x8] sm:$0xff]   ;;  %2757 = vmatpush3.bf16.msra.mxu1 %v2887_v52  ;;  %v2892_v62 = vld [vmem:[#allocation5 + $0x58] sm:$0xff]  }
  0xbb   : > { %v823_v7 = vor.u32 %v822_v0, %v818_v55  ;;  %v483_v14 = vshll.u32 %v2455_v2, 16  ;;  %v610_v15 = vshll.u32 %v2471_v6, 16  ;;  %v328_v23 = vshrl.u32 %v2439_v5, 16  ;;  %2585 = vmatprep.subr.bf16.mxu0 %v2888_v56  ;;  %2750 = vmatprep.subr.bf16.mxu1 %v2888_v56  ;;  %v2893_v0 = vld [vmem:[#allocation5 + $0x18] sm:$0xff]   ;;  %v2895_v2 = vld [vmem:[#allocation5 + $0x20] sm:$0xff]   ;;  %v2898_v5 = vld [vmem:[#allocation5 + $0x70] sm:$0xff]  }
  0xbc   : > { %v3505_v12 = vsel %vm3295_vm3, %v325_v58, %v478_v3  ;;  %v677_v13 = vsel %vm3295_vm3, %v475_v59, %v608_v4  ;;  %v482_v24 = vrot.slane %v480_v10, 7  ;;  %v977_v30 = vsel %vm941_vm2, %v975_v8, %v976_v9  ;;  %v2890_v58 = vld [vmem:[#allocation5 + $0x50] sm:$0xff]   ;;  %v2896_v3 = vld [vmem:[#allocation5 + $0x68] sm:$0xff]   ;;  %v2901_v8 = vld [vmem:[#allocation5 + $0x38] sm:$0xff]  }
  0xbd   : > { %v828_v19 = vsel %vm684_vm4, %v823_v7, %v827_v1  ;;  %v794_v20 = vshrl.u32 %v3505_v12, 16  ;;  %v796_v21 = vshll.u32 %v3505_v12, 16  ;;  %v801_v22 = vshll.u32 %v677_v13, 16  ;;  %v2891_v59 = vld [vmem:[#allocation5 + $0x10] sm:$0xff]   ;;  %v2894_v1 = vld [vmem:[#allocation5 + $0x60] sm:$0xff]   ;;  %v2897_v4 = vld [vmem:[#allocation5 + $0x28] sm:$0xff]  }
  0xbe   : > { %899 = vrot.lane.b32.xlu0 %v828_v19, %s3068_s20  ;;  %v612_v25 = vrot.slane %v610_v15, 3  ;;  %v969_v32 = vrot.slane %v3505_v12, 1  ;;  %v970_v33 = vrot.slane %v677_v13, 1  ;;  %v485_v34 = vor.u32 %v483_v14, %v482_v24  ;;  %2586 = vmatpush3.bf16.msra.mxu0 %v2889_v57  ;;  %v2899_v6 = vld [vmem:[#allocation5 + $0x30] sm:$0xff]   ;;  %v2900_v7 = vld [vmem:[#allocation5 + $0x78] sm:$0xff]  }
  0xbf   : > { %v798_v27 = vrot.slane %v796_v21, 1  ;;  %v803_v28 = vrot.slane %v801_v22, 1  ;;  %2758 = vmatpush3.bf16.msra.mxu1 %v2889_v57  ;;  %2587 = vmatprep.subr.bf16.mxu0 %v2890_v58  ;;  %vm1022_vm5 = vcmask 261120   ;;  %vm1055_vm6 = vcmask 523264   ;;  %v3540_v21 = vld [vmem:[#allocation5 + $0x80] sm:$0xff]  }
  0xc0   : > { %v678_v35 = vsel %vm3295_vm3, %v482_v24, %v612_v25  ;;  %v3520_v38 = vsel %vm3295_vm3, %v328_v23, %v485_v34  ;;  %v971_v43 = vsel %vm941_vm2, %v969_v32, %v970_v33  ;;  %2751 = vmatprep.subr.bf16.mxu1 %v2890_v58  ;;  %vm1166_vm7 = vcmask 785408  }
  0xc1   : > { %v799_v36 = vor.u32 %v798_v27, %v794_v20  ;;  %v813_v37 = vshll.u32 %v678_v35, 16  ;;  %v806_v41 = vshrl.u32 %v3520_v38, 16  ;;  %v808_v42 = vshll.u32 %v3520_v38, 16 }
  0xc2   : > { %1012 = vrot.lane.b32.xlu0 %v977_v30, %s3067_s18  ;;  %v972_v49 = vrot.slane %v3520_v38, 1  ;;  %v973_v50 = vrot.slane %v678_v35, 1  ;;  %2588 = vmatpush3.bf16.msra.mxu0 %v2891_v59 }
  0xc3   : > { %v804_v39 = vsel %vm684_vm4, %v799_v36, %v803_v28  ;;  %v810_v44 = vrot.slane %v808_v42, 1  ;;  %v815_v48 = vrot.slane %v813_v37, 1  ;;  %2759 = vmatpush3.bf16.msra.mxu1 %v2891_v59  ;;  %2589 = vmatprep.subr.bf16.mxu0 %v2892_v62 }
  0xc4   : > { %895 = vrot.lane.b32.xlu1 %v804_v39, %s3068_s20  ;;  %v974_v55 = vsel %vm941_vm2, %v972_v49, %v973_v50  ;;  %2752 = vmatprep.subr.bf16.mxu1 %v2892_v62 }
  0xc5   : > { %v811_v51 = vor.u32 %v810_v44, %v806_v41 }
  0xc6   : > { %2590 = vmatpush3.bf16.msra.mxu0 %v2893_v0 }
  0xc7   : > { %v816_v53 = vsel %vm684_vm4, %v811_v51, %v815_v48  ;;  %2760 = vmatpush3.bf16.msra.mxu1 %v2893_v0  ;;  %2591 = vmatprep.subr.bf16.mxu0 %v2894_v1 }
  0xc8   : > { %1008 = vrot.lane.b32.xlu1 %v971_v43, %s3067_s18  ;;  %897 = vrot.lane.b32.xlu0 %v816_v53, %s3068_s20 }
  0xc9   : > { %2753 = vmatprep.subr.bf16.mxu1 %v2894_v1 }
  0xca   : > { %2592 = vmatpush3.bf16.msra.mxu0 %v2895_v2 }
  0xcb   : > { %2761 = vmatpush3.bf16.msra.mxu1 %v2895_v2  ;;  %2593 = vmatprep.subr.bf16.mxu0 %v2896_v3 }
  0xcc   : > { %1010 = vrot.lane.b32.xlu1 %v974_v55, %s3067_s18  ;;  %2754 = vmatprep.subr.bf16.mxu1 %v2896_v3 }
  0xce   : > { %2594 = vmatpush3.bf16.msra.mxu0 %v2897_v4 }
  0xcf   : > { %2762 = vmatpush3.bf16.msra.mxu1 %v2897_v4  ;;  %2595 = vmatprep.subr.bf16.mxu0 %v2898_v5 }
  0xd0   : > { %2755 = vmatprep.subr.bf16.mxu1 %v2898_v5 }
  0xd2   : > { %2596 = vmatpush3.bf16.msra.mxu0 %v2899_v6 }
  0xd3   : > { %2763 = vmatpush3.bf16.msra.mxu1 %v2899_v6  ;;  %2597 = vmatprep.subr.bf16.mxu0 %v2900_v7 }
  0xd4   : > { %2756 = vmatprep.subr.bf16.mxu1 %v2900_v7 }
  0xd6   : > { %2598 = vmatpush3.bf16.msra.mxu0 %v2901_v8 }
  0xd7   : > { %2764 = vmatpush3.bf16.msra.mxu1 %v2901_v8 }
  0xd8   : > { %2713 = vmatprep.subr.bf16.mxu1 %v3540_v21 }
  0xe9   : > { %v1015_v9 = vpop.permute.xlu0 %1014 }
  0xea   : > { %v991_v10 = vpop.permute.xlu1 %990 }
  0xee   : > { %v878_v13 = vpop.permute.xlu0 %877  ;;  %v993_v19 = vpop.permute.xlu1 %992 }
  0xef   : > { %v1024_v14 = vsel %vm1022_vm5, %v3312_v46, %v878_v13 }
  0xf0   : > { %v3536_v15 = vsel %vm1055_vm6, %v1024_v14, %v991_v10 }
  0xf1   : > { %1136 = vrot.lane.b32.xlu1 %v3536_v15, %s3067_s18 }
  0xf3   : > { %v880_v20 = vpop.permute.xlu0 %879 }
  0xf4   : > { %v1026_v22 = vsel %vm1022_vm5, %v3320_v54, %v880_v20 }
  0xf5   : > { %v3545_v23 = vsel %vm1055_vm6, %v1026_v22, %v993_v19 }
  0xf6   : > { %1104 = vrot.lane.b32.xlu0 %v3545_v23, %s3069_s7 }
  0xf7   : > { %v902_v46 = vpop.permute.xlu0 %901 }
  0xf8   : > { %v1048_v24 = vsel %vm1022_vm5, %v3306_v40, %v902_v46  ;;  %v904_v25 = vpop.permute.xlu1 %903 }
  0xf9   : > { %v3553_v27 = vsel %vm1055_vm6, %v1048_v24, %v1015_v9  ;;  %v1050_v54 = vsel %vm1022_vm5, %v3342_v26, %v904_v25  ;;  %v2903_v25 = vld [vmem:[#allocation5 + $0x88] sm:$0xff]  }
  0xfa   : > { %1128 = vrot.lane.b32.xlu1 %v3553_v27, %s3069_s7 }
  0xfc   : > { %v1017_v28 = vpop.permute.xlu1 %1016 }
  0xfd   : > { %v3560_v30 = vsel %vm1055_vm6, %v1050_v54, %v1017_v28 }
  0xfe   : > { %1160 = vrot.lane.b32.xlu0 %v3560_v30, %s3067_s18 }
 0x100   : > { %v995_v33 = vpop.permute.xlu1 %994 }
 0x101   : > { %v882_v32 = vpop.permute.xlu0 %881 }
 0x102   : > { %v1028_v40 = vsel %vm1022_vm5, %v3362_v63, %v882_v32  ;;  %1106 = vrot.lane.b32.xlu0 %v3536_v15, %s3069_s7 }
 0x103   : > { %v3569_v34 = vsel %vm1055_vm6, %v1028_v40, %v995_v33 }
 0x104   : > { %1138 = vrot.lane.b32.xlu1 %v3569_v34, %s3067_s18  ;;  %v1019_v35 = vpop.permute.xlu1 %1018 }
 0x105   : > { %v906_v26 = vpop.permute.xlu0 %905 }
 0x106   : > { %v1052_v36 = vsel %vm1022_vm5, %v3375_v17, %v906_v26  ;;  %1130 = vrot.lane.b32.xlu0 %v3560_v30, %s3069_s7 }
 0x107   : > { %v3578_v37 = vsel %vm1055_vm6, %v1052_v36, %v1019_v35 }
 0x108   : > { %1162 = vrot.lane.b32.xlu1 %v3578_v37, %s3067_s18  ;;  %v997_v63 = vpop.permute.xlu1 %996 }
 0x10a   : > { %v884_v39 = vpop.permute.xlu0 %883  ;;  %1108 = vrot.lane.b32.xlu0 %v3569_v34, %s3069_s7 }
 0x10b   : > { %v1030_v41 = vsel %vm1022_vm5, %v3388_v47, %v884_v39 }
 0x10c   : > { %v3587_v42 = vsel %vm1055_vm6, %v1030_v41, %v997_v63 }
 0x10d   : > { %1140 = vrot.lane.b32.xlu1 %v3587_v42, %s3067_s18  ;;  %v1021_v17 = vpop.permute.xlu1 %1020 }
 0x10e   : > { %1132 = vrot.lane.b32.xlu0 %v3578_v37, %s3069_s7 }
 0x110   : > { %v908_v43 = vpop.permute.xlu0 %907 }
 0x111   : > { %v1054_v44 = vsel %vm1022_vm5, %v3404_v11, %v908_v43  ;;  %v999_v47 = vpop.permute.xlu1 %998 }
 0x112   : > { %v1087_v48 = vsel %vm1055_vm6, %v1054_v44, %v1021_v17  ;;  %1110 = vrot.lane.b32.xlu0 %v3587_v42, %s3069_s7 }
 0x113   : > { %1164 = vrot.lane.b32.xlu1 %v1087_v48, %s3067_s18 }
 0x114   : > { %v886_v49 = vpop.permute.xlu0 %885 }
 0x115   : > { %v1032_v50 = vsel %vm1022_vm5, %v3416_v31, %v886_v49 }
 0x116   : > { %v3602_v51 = vsel %vm1055_vm6, %v1032_v50, %v999_v47  ;;  %1134 = vrot.lane.b32.xlu0 %v1087_v48, %s3069_s7 }
 0x117   : > { %1142 = vrot.lane.b32.xlu1 %v3602_v51, %s3067_s18  ;;  %v1001_v11 = vpop.permute.xlu1 %1000 }
 0x11a   : > { %v888_v18 = vpop.permute.xlu0 %887 }
 0x11b   : > { %v1034_v52 = vsel %vm1022_vm5, %v3433_v61, %v888_v18  ;;  %1112 = vrot.lane.b32.xlu1 %v3602_v51, %s3069_s7 }
 0x11c   : > { %v3612_v53 = vsel %vm1055_vm6, %v1034_v52, %v1001_v11 }
 0x11d   : > { %1144 = vrot.lane.b32.xlu0 %v3612_v53, %s3067_s18  ;;  %v1003_v31 = vpop.permute.xlu1 %1002 }
 0x11f   : > { %1114 = vrot.lane.b32.xlu1 %v3612_v53, %s3069_s7 }
 0x120   : > { %v890_v55 = vpop.permute.xlu0 %889 }
 0x121   : > { %v1036_v56 = vsel %vm1022_vm5, %v3449_v29, %v890_v55 }
 0x122   : > { %v3621_v57 = vsel %vm1055_vm6, %v1036_v56, %v1003_v31 }
 0x123   : > { %1116 = vrot.lane.b32.xlu1 %v3621_v57, %s3069_s7  ;;  %1146 = vrot.lane.b32.xlu0 %v3621_v57, %s3067_s18  ;;  %v1005_v61 = vpop.permute.xlu1 %1004 }
 0x126   : > { %v892_v58 = vpop.permute.xlu0 %891 }
 0x127   : > { %v1038_v59 = vsel %vm1022_vm5, %v3466_v60, %v892_v58 }
 0x128   : > { %v3630_v62 = vsel %vm1055_vm6, %v1038_v59, %v1005_v61  ;;  %v1007_v1 = vpop.permute.xlu1 %1006 }
 0x129   : > { %1118 = vrot.lane.b32.xlu1 %v3630_v62, %s3069_s7  ;;  %1148 = vrot.lane.b32.xlu0 %v3630_v62, %s3067_s18 }
 0x12a   : > { %v894_v29 = vpop.permute.xlu0 %893 }
 0x12b   : > { %v1040_v0 = vsel %vm1022_vm5, %v3476_v16, %v894_v29 }
 0x12c   : > { %v3639_v2 = vsel %vm1055_vm6, %v1040_v0, %v1007_v1 }
 0x12d   : > { %1120 = vrot.lane.b32.xlu1 %v3639_v2, %s3069_s7  ;;  %1150 = vrot.lane.b32.xlu0 %v3639_v2, %s3067_s18 }
 0x130   : > { %v900_v60 = vpop.permute.xlu0 %899 }
 0x131   : > { %v1046_v9 = vsel %vm1022_vm5, %v3492_v45, %v900_v60 }
 0x134   : > { %v1013_v4 = vpop.permute.xlu0 %1012 }
 0x136   : > { %v896_v3 = vpop.permute.xlu1 %895 }
 0x137   : > { %v1042_v5 = vsel %vm1022_vm5, %v3505_v12, %v896_v3  ;;  %v1079_v12 = vsel %vm1055_vm6, %v1046_v9, %v1013_v4 }
 0x13a   : > { %v1009_v6 = vpop.permute.xlu1 %1008  ;;  %v898_v16 = vpop.permute.xlu0 %897 }
 0x13b   : > { %v3648_v7 = vsel %vm1055_vm6, %v1042_v5, %v1009_v6  ;;  %v1044_v8 = vsel %vm1022_vm5, %v3520_v38, %v898_v16 }
 0x13c   : > { %1152 = vrot.lane.b32.xlu0 %v3648_v7, %s3067_s18 }
 0x13e   : > { %v1011_v10 = vpop.permute.xlu1 %1010 }
 0x13f   : > { %v3657_v13 = vsel %vm1055_vm6, %v1044_v8, %v1011_v10 }
 0x140   : > { %1122 = vrot.lane.b32.xlu0 %v3648_v7, %s3069_s7  ;;  %1154 = vrot.lane.b32.xlu1 %v3657_v13, %s3067_s18 }
 0x144   : > { %1158 = vrot.lane.b32.xlu0 %v3553_v27, %s3067_s18  ;;  %1156 = vrot.lane.b32.xlu1 %v1079_v12, %s3067_s18 }
 0x148   : > { %1126 = vrot.lane.b32.xlu0 %v1079_v12, %s3069_s7  ;;  %1124 = vrot.lane.b32.xlu1 %v3657_v13, %s3069_s7 }
 0x163   : > { %v1137_v45 = vpop.permute.xlu1 %1136 }
 0x168   : > { %v1105_v38 = vpop.permute.xlu0 %1104 }
 0x169   : > { %v1216_v14 = vsel %vm1055_vm6, %v1105_v38, %v1137_v45  ;;  %v1168_v19 = vsel %vm1166_vm7, %v3536_v15, %v1105_v38 }
 0x16a   : > { %1475 = vmatprep.mubr.bf16.mxu0 %v1216_v14 }
 0x16b   : > { %1476 = vmatmul.mubr.bf16.vlgmr.msra.gmra.mrb[0].mxu0 %v1168_v19 }
 0x16c   : > { %v1129_v20 = vpop.permute.xlu1 %1128 }
 0x16d   : > { %v1204_v46 = vsel %vm1166_vm7, %v1079_v12, %v1129_v20 }
 0x170   : > { %v3673_v22 = vpop.permute.xlu0 %1160 }
 0x171   : > { %v1252_v24 = vsel %vm1055_vm6, %v1129_v20, %v3673_v22 }
 0x172   : > { %1571 = vmatprep.mubr.bf16.mxu1 %v1252_v24 }
 0x173   : > { %1572 = vmatmul.mubr.bf16.vlgmr.msra.gmra.mrb[0].mxu1 %v1204_v46 }
 0x174   : > { %2714 = vmatpush3.bf16.msra.mxu1 %v3540_v21  ;;  %v1107_v54 = vpop.permute.xlu0 %1106 }
 0x175   : > { %v1171_v32 = vsel %vm1166_vm7, %v3545_v23, %v1107_v54  ;;  %2715 = vmatprep.subr.bf16.mxu1 %v2903_v25 }
 0x176   : > { %v1139_v28 = vpop.permute.xlu1 %1138 }
 0x177   : > { %v1219_v33 = vsel %vm1055_vm6, %v1107_v54, %v1139_v28 }
 0x178   : > { %1483 = vmatprep.mubr.bf16.mxu0 %v1219_v33  ;;  %v1131_v40 = vpop.permute.xlu0 %1130  ;;  %2716 = vmatpush3.bf16.msra.mxu1 %v2903_v25 }
 0x179   : > { %1484 = vmatmul.mubr.bf16.gmra.mrb[4].mxu0 %v1171_v32  ;;  %v1207_v35 = vsel %vm1166_vm7, %v3553_v27, %v1131_v40 }
 0x17a   : > { %v3682_v26 = vpop.permute.xlu1 %1162 }
 0x17b   : > { %v1255_v21 = vsel %vm1055_vm6, %v1131_v40, %v3682_v26 }
 0x17c   : > { %1579 = vmatprep.mubr.bf16.mxu1 %v1255_v21  ;;  %v1109_v36 = vpop.permute.xlu0 %1108 }
 0x17d   : > { %1580 = vmatmul.mubr.bf16.gmra.mrb[4].mxu1 %v1207_v35  ;;  %v1174_v23 = vsel %vm1166_vm7, %v3536_v15, %v1109_v36 }
 0x17f   : > { %v1141_v63 = vpop.permute.xlu1 %1140 }
 0x180   : > { %v1222_v39 = vsel %vm1055_vm6, %v1109_v36, %v1141_v63  ;;  %v1133_v41 = vpop.permute.xlu0 %1132 }
 0x181   : > { %1491 = vmatprep.mubr.bf16.mxu0 %v1222_v39  ;;  %v1210_v27 = vsel %vm1166_vm7, %v3560_v30, %v1133_v41 }
 0x182   : > { %1492 = vmatmul.mubr.bf16.gmra.mrb[8].mxu0 %v1174_v23 }
 0x184   : > { %v1111_v17 = vpop.permute.xlu0 %1110 }
 0x185   : > { %v3691_v43 = vpop.permute.xlu1 %1164  ;;  %v1177_v15 = vsel %vm1166_vm7, %v3569_v34, %v1111_v17 }
 0x186   : > { %v1258_v44 = vsel %vm1055_vm6, %v1133_v41, %v3691_v43 }
 0x187   : > { %1587 = vmatprep.mubr.bf16.mxu1 %v1258_v44 }
 0x188   : > { %1588 = vmatmul.mubr.bf16.gmra.mrb[8].mxu1 %v1210_v27  ;;  %v1135_v48 = vpop.permute.xlu0 %1134 }
 0x189   : > { %v1143_v47 = vpop.permute.xlu1 %1142  ;;  %v1260_v49 = vsel %vm1055_vm6, %v1135_v48, %v3682_v26  ;;  %v1213_v30 = vsel %vm1166_vm7, %v3578_v37, %v1135_v48 }
 0x18a   : > { %v1225_v50 = vsel %vm1055_vm6, %v1111_v17, %v1143_v47  ;;  %1595 = vmatprep.mubr.bf16.mxu1 %v1260_v49 }
 0x18b   : > { %1499 = vmatprep.mubr.bf16.mxu0 %v1225_v50 }
 0x18c   : > { %1500 = vmatmul.mubr.bf16.gmra.mrb[12].mxu0 %v1177_v15 }
 0x18d   : > { %v1113_v11 = vpop.permute.xlu1 %1112 }
 0x18e   : > { %v1180_v34 = vsel %vm1166_vm7, %v3587_v42, %v1113_v11 }
 0x18f   : > { %v1145_v18 = vpop.permute.xlu0 %1144 }
 0x190   : > { %1596 = vmatmul.mubr.bf16.gmra.mrb[12].mxu1 %v1213_v30  ;;  %v1228_v52 = vsel %vm1055_vm6, %v1113_v11, %v1145_v18 }
 0x191   : > { %2717 = vmatprep.mubr.msk.bf16.mxu1 %vm1022_vm5, %v1137_v45  ;;  %1507 = vmatprep.mubr.bf16.mxu0 %v1228_v52  ;;  %v1115_v31 = vpop.permute.xlu1 %1114 }
 0x192   : > { %v1183_v58 = vsel %vm1166_vm7, %v3602_v51, %v1115_v31 }
 0x194   : > { %1508 = vmatmul.mubr.bf16.gmra.mrb[16].mxu0 %v1180_v34 }
 0x195   : > { %v1147_v55 = vpop.permute.xlu0 %1146  ;;  %v1117_v37 = vpop.permute.xlu1 %1116 }
 0x196   : > { %v1231_v56 = vsel %vm1055_vm6, %v1115_v31, %v1147_v55  ;;  %v1186_v1 = vsel %vm1166_vm7, %v3612_v53, %v1117_v37 }
 0x197   : > { %1515 = vmatprep.mubr.bf16.mxu0 %v1231_v56 }
 0x198   : > { %2718 = vmatmul.mubr.msk.bf16.vlgmr.msra.gmra.mrb[16].mxu1 %vm1022_vm5, %v1139_v28 }
 0x199   : > { %2721 = vmatprep.mubr.msk.bf16.mxu1 %vm1022_vm5, %v1141_v63 }
 0x19b   : > { %v1149_v61 = vpop.permute.xlu0 %1148  ;;  %v1119_v42 = vpop.permute.xlu1 %1118 }
 0x19c   : > { %1516 = vmatmul.mubr.bf16.gmra.mrb[20].mxu0 %v1183_v58  ;;  %v1234_v59 = vsel %vm1055_vm6, %v1117_v37, %v1149_v61  ;;  %v1189_v51 = vsel %vm1166_vm7, %v3621_v57, %v1119_v42 }
 0x19d   : > { %1523 = vmatprep.mubr.bf16.mxu0 %v1234_v59 }
 0x19f   : > { %v1151_v29 = vpop.permute.xlu0 %1150  ;;  %v1121_v60 = vpop.permute.xlu1 %1120 }
 0x1a0   : > { %2722 = vmatmul.mubr.msk.bf16.gmra.mrb[20].mxu1 %vm1022_vm5, %v1143_v47  ;;  %v1237_v0 = vsel %vm1055_vm6, %v1119_v42, %v1151_v29  ;;  %v1192_v6 = vsel %vm1166_vm7, %v3630_v62, %v1121_v60 }
 0x1a1   : > { %2725 = vmatprep.mubr.msk.bf16.mxu1 %vm1022_vm5, %v1145_v18 }
 0x1a4   : > { %1524 = vmatmul.mubr.bf16.gmra.mrb[24].mxu0 %v1186_v1 }
 0x1a5   : > { %1531 = vmatprep.mubr.bf16.mxu0 %v1237_v0 }
 0x1a8   : > { %2726 = vmatmul.mubr.msk.bf16.gmra.mrb[24].mxu1 %vm1022_vm5, %v1147_v55 }
 0x1a9   : > { %2729 = vmatprep.mubr.msk.bf16.mxu1 %vm1022_vm5, %v1149_v61 }
 0x1ac   : > { %1532 = vmatmul.mubr.bf16.gmra.mrb[28].mxu0 %v1189_v51 }
 0x1ae   : > { %v1153_v3 = vpop.permute.xlu0 %1152 }
 0x1af   : > { %v1240_v4 = vsel %vm1055_vm6, %v1121_v60, %v1153_v3 }
 0x1b0   : > { %1539 = vmatprep.mubr.bf16.mxu0 %v1240_v4  ;;  %2730 = vmatmul.mubr.msk.bf16.gmra.mrb[28].mxu1 %vm1022_vm5, %v1151_v29  ;;  %v3766_v4 = vld [vmem:[#allocation7] ss:$0 sm:$0xff] }
 0x1b1   : > { %2733 = vmatprep.mubr.msk.bf16.mxu1 %vm1022_vm5, %v1153_v3 }
 0x1b2   : > { %v1155_v53 = vpop.permute.xlu1 %1154  ;;  %v1123_v5 = vpop.permute.xlu0 %1122 }
 0x1b3   : > { %v1243_v16 = vsel %vm1055_vm6, %v1123_v5, %v1155_v53  ;;  %v1195_v10 = vsel %vm1166_vm7, %v3639_v2, %v1123_v5 }
 0x1b4   : > { %1540 = vmatmul.mubr.bf16.gmra.mrb[32].mxu0 %v1192_v6 }
 0x1b5   : > { %1547 = vmatprep.mubr.bf16.mxu0 %v1243_v16 }
 0x1b6   : > { %v1157_v57 = vpop.permute.xlu1 %1156  ;;  %v1159_v8 = vpop.permute.xlu0 %1158 }
 0x1b8   : > { %2734 = vmatmul.mubr.msk.bf16.gmra.mrb[32].mxu1 %vm1022_vm5, %v1155_v53 }
 0x1b9   : > { %2737 = vmatprep.mubr.msk.bf16.mxu1 %vm1022_vm5, %v1157_v57 }
 0x1ba   : > { %v1125_v9 = vpop.permute.xlu1 %1124  ;;  %v1127_v62 = vpop.permute.xlu0 %1126 }
 0x1bb   : > { %v1246_v12 = vsel %vm1055_vm6, %v1125_v9, %v1157_v57  ;;  %v1198_v45 = vsel %vm1166_vm7, %v3648_v7, %v1125_v9  ;;  %v1249_v38 = vsel %vm1055_vm6, %v1127_v62, %v1159_v8  ;;  %v1201_v2 = vsel %vm1166_vm7, %v3657_v13, %v1127_v62 }
 0x1bc   : > { %1548 = vmatmul.mubr.bf16.gmra.mrb[36].mxu0 %v1195_v10 }
 0x1bd   : > { %1555 = vmatprep.mubr.bf16.mxu0 %v1246_v12 }
 0x1c0   : > { %2738 = vmatmul.mubr.msk.bf16.gmra.mrb[36].mxu1 %vm1022_vm5, %v1159_v8 }
 0x1c1   : > { %2741 = vmatprep.mubr.msk.bf16.mxu1 %vm1022_vm5, %v3673_v22 }
 0x1c4   : > { %1556 = vmatmul.mubr.bf16.gmra.mrb[40].mxu0 %v1198_v45 }
 0x1c5   : > { %1563 = vmatprep.mubr.bf16.mxu0 %v1249_v38 }
 0x1c8   : > { %2742 = vmatmul.mubr.msk.bf16.gmra.mrb[40].mxu1 %vm1022_vm5, %v3682_v26 }
 0x1c9   : > { %2745 = vmatprep.mubr.msk.bf16.mxu1 %vm1022_vm5, %v3691_v43 }
 0x1cc   : > { %1564 = vmatmul.mubr.bf16.gmra.mrb[44].mxu0 %v1201_v2 }
 0x1d0   : > { %2746 = vmatmul.mubr.msk.bf16.gmra.mrb[44].mxu1 %vm1022_vm5, %v3682_v26 }
 0x23e   : > { %v2599_v14 = vpop.f32.mrb[0].mxu0 }
 0x23f   : > { %v2600_v19 = vpop.f32.mrb[1].mxu0 }
 0x240   : > { %v2601_v7 = vadd.f32 %v2600_v19, %v2599_v14  ;;  %v2602_v20 = vpop.f32.mrb[2].mxu0 }
 0x241   : > { %v2603_v22 = vpop.f32.mrb[3].mxu0 }
 0x242   : > { %v2604_v46 = vadd.f32 %v2603_v22, %v2602_v20  ;;  %v1478_v9 = vadd.f32 %v2601_v7, %v3766_v4 }
 0x244   : > { %v1481_v2 = vadd.f32 %v2604_v46, %v3766_v4 }
 0x246   : > { %v2671_v24 = vpop.f32.mrb[0].mxu1 }
 0x247   : > { %v2672_v25 = vpop.f32.mrb[1].mxu1 }
 0x248   : > { %v3748_v54 = vadd.f32 %v2672_v25, %v2671_v24  ;;  %v2674_v28 = vpop.f32.mrb[2].mxu1 }
 0x249   : > { %v2675_v32 = vpop.f32.mrb[3].mxu1 }
 0x24a   : > { %v3750_v33 = vadd.f32 %v2675_v32, %v2674_v28 }
 0x24c   : > { %v2605_v40 = vpop.f32.mrb[4].mxu0 }
 0x24d   : > { %v2606_v13 = vpop.f32.mrb[5].mxu0 }
 0x24e   : > { %v2607_v35 = vadd.f32 %v2606_v13, %v2605_v40  ;;  %v2608_v21 = vpop.f32.mrb[6].mxu0 }
 0x24f   : > { %v2609_v36 = vpop.f32.mrb[7].mxu0 }
 0x250   : > { %v2610_v26 = vadd.f32 %v2609_v36, %v2608_v21  ;;  %v2677_v63 = vpop.f32.mrb[4].mxu1  ;;  %v1486_v16 = vadd.f32 %v2607_v35, %v3766_v4 }
 0x251   : > { %v2678_v23 = vpop.f32.mrb[5].mxu1 }
 0x252   : > { %v3752_v39 = vadd.f32 %v2678_v23, %v2677_v63  ;;  %v2680_v41 = vpop.f32.mrb[6].mxu1  ;;  %v1489_v62 = vadd.f32 %v2610_v26, %v3766_v4 }
 0x253   : > { %v2681_v17 = vpop.f32.mrb[7].mxu1 }
 0x254   : > { %v3754_v43 = vadd.f32 %v2681_v17, %v2680_v41 }
 0x255   : > { %v2611_v27 = vpop.f32.mrb[8].mxu0 }
 0x256   : > { %v2612_v44 = vpop.f32.mrb[9].mxu0 }
 0x257   : > { %v2613_v48 = vadd.f32 %v2612_v44, %v2611_v27  ;;  %v2614_v47 = vpop.f32.mrb[10].mxu0 }
 0x258   : > { %v2615_v15 = vpop.f32.mrb[11].mxu0 }
 0x259   : > { %v3756_v49 = vadd.f32 %v2615_v15, %v2614_v47  ;;  %v1494_v23 = vadd.f32 %v2613_v48, %v3766_v4 }
 0x25b   : > { %v2683_v50 = vpop.f32.mrb[8].mxu1 }
 0x25c   : > { %v2684_v30 = vpop.f32.mrb[9].mxu1 }
 0x25d   : > { %v3758_v11 = vadd.f32 %v2684_v30, %v2683_v50  ;;  %v2686_v18 = vpop.f32.mrb[10].mxu1  ;;  %v1497_v50 = vadd.f32 %v3756_v49, %v3766_v4 }
 0x25e   : > { %v2687_v52 = vpop.f32.mrb[11].mxu1 }
 0x25f   : > { %v3760_v34 = vadd.f32 %v2687_v52, %v2686_v18  ;;  %v2617_v31 = vpop.f32.mrb[12].mxu0 }
 0x260   : > { %v2618_v55 = vpop.f32.mrb[13].mxu0 }
 0x261   : > { %v2619_v56 = vadd.f32 %v2618_v55, %v2617_v31  ;;  %v2620_v37 = vpop.f32.mrb[14].mxu0 }
 0x262   : > { %v2621_v61 = vpop.f32.mrb[15].mxu0 }
 0x263   : > { %v2622_v58 = vadd.f32 %v2621_v61, %v2620_v37  ;;  %v2689_v59 = vpop.f32.mrb[12].mxu1  ;;  %v1502_v36 = vadd.f32 %v2619_v56, %v3766_v4 }
 0x264   : > { %v2690_v42 = vpop.f32.mrb[13].mxu1 }
 0x265   : > { %v3762_v29 = vadd.f32 %v2690_v42, %v2689_v59  ;;  %v2692_v0 = vpop.f32.mrb[14].mxu1  ;;  %v1505_v27 = vadd.f32 %v2622_v58, %v3766_v4 }
 0x266   : > { %v2693_v1 = vpop.f32.mrb[15].mxu1 }
 0x267   : > { %v3764_v51 = vadd.f32 %v2693_v1, %v2692_v0  ;;  %v2623_v60 = vpop.f32.mrb[16].mxu0 }
 0x268   : > { %v2624_v3 = vpop.f32.mrb[17].mxu0 }
 0x269   : > { %v3768_v53 = vadd.f32 %v2624_v3, %v2623_v60  ;;  %v2626_v5 = vpop.f32.mrb[18].mxu0 }
 0x26a   : > { %v2627_v6 = vpop.f32.mrb[19].mxu0 }
 0x26b   : > { %v3771_v57 = vadd.f32 %v2627_v6, %v2626_v5  ;;  %v2719_v8 = vpop.f32.mrb[16].mxu1  ;;  %v1510_v6 = vadd.f32 %v3768_v53, %v3766_v4 }
 0x26c   : > { %v1647_v10 = vadd.f32 %v2719_v8, %v1486_v16  ;;  %v1638_v12 = vpop.f32.mrb[17].mxu1 }
 0x26d   : > { %v1639_v45 = vadd.f32 %v1638_v12, %v1478_v9  ;;  %v2720_v38 = vpop.f32.mrb[18].mxu1 }
 0x26e   : > { %v1799_v14 = vmul.f32 0.01, %v1647_v10  ;;  %v1650_v19 = vadd.f32 %v2720_v38, %v1489_v62  ;;  %v1641_v20 = vpop.f32.mrb[19].mxu1  ;;  %vm1767_vm8 = vcmp.ge.f32.partialorder %v1647_v10, 0.0 }
 0x26f   : > { %v1642_v22 = vadd.f32 %v1641_v20, %v1481_v2  ;;  %v2629_v24 = vpop.f32.mrb[20].mxu0  ;;  %v1797_v25 = vmul.f32 0.01, %v1639_v45  ;;  %vm1765_vm10 = vcmp.ge.f32.partialorder %v1639_v45, 0.0 }
 0x270   : > { %v1800_v28 = vmul.f32 0.01, %v1650_v19  ;;  %v2630_v32 = vpop.f32.mrb[21].mxu0  ;;  %v3776_v40 = vsel %vm1767_vm8, %v1647_v10, %v1799_v14  ;;  %vm1768_vm9 = vcmp.ge.f32.partialorder %v1650_v19, 0.0 }
 0x271   : > { %v2631_v7 = vadd.f32 %v2630_v32, %v2629_v24  ;;  %1897 = vrot.lane.b32.xlu1 %v3776_v40, %s3067_s18  ;;  %v2632_v13 = vpop.f32.mrb[22].mxu0  ;;  %v1798_v35 = vmul.f32 0.01, %v1642_v22  ;;  %vm1766_vm11 = vcmp.ge.f32.partialorder %v1642_v22, 0.0  ;;  %v3787_v44 = vsel %vm1765_vm10, %v1639_v45, %v1797_v25 }
 0x272   : > { %v2633_v46 = vpop.f32.mrb[23].mxu0  ;;  %v3780_v21 = vsel %vm1768_vm9, %v1650_v19, %v1800_v28  ;;  %v1513_v45 = vadd.f32 %v3771_v57, %v3766_v4 }
 0x273   : > { %v2634_v26 = vadd.f32 %v2633_v46, %v2632_v13  ;;  %1899 = vrot.lane.b32.xlu0 %v3780_v21, %s3067_s18  ;;  %v2723_v63 = vpop.f32.mrb[20].mxu1  ;;  %v3793_v31 = vsel %vm1766_vm11, %v1642_v22, %v1798_v35  ;;  %v1518_v60 = vadd.f32 %v2631_v7, %v3766_v4 }
 0x274   : > { %v1663_v41 = vadd.f32 %v2723_v63, %v1502_v36  ;;  %v1654_v17 = vpop.f32.mrb[21].mxu1 }
 0x275   : > { %v1655_v47 = vadd.f32 %v1654_v17, %v1494_v23  ;;  %v2724_v15 = vpop.f32.mrb[22].mxu1  ;;  %1893 = vrot.lane.b32.xlu1 %v3787_v44, %s3067_s18  ;;  %v1521_v10 = vadd.f32 %v2634_v26, %v3766_v4 }
 0x276   : > { %v1803_v30 = vmul.f32 0.01, %v1663_v41  ;;  %v1666_v18 = vadd.f32 %v2724_v15, %v1505_v27  ;;  %v1657_v52 = vpop.f32.mrb[23].mxu1  ;;  %vm1771_vm12 = vcmp.ge.f32.partialorder %v1663_v41, 0.0 }
 0x277   : > { %v1658_v48 = vadd.f32 %v1657_v52, %v1497_v50  ;;  %1895 = vrot.lane.b32.xlu0 %v3793_v31, %s3067_s18  ;;  %v2635_v55 = vpop.f32.mrb[24].mxu0  ;;  %v1801_v56 = vmul.f32 0.01, %v1655_v47  ;;  %vm1769_vm14 = vcmp.ge.f32.partialorder %v1655_v47, 0.0 }
 0x278   : > { %v1804_v37 = vmul.f32 0.01, %v1666_v18  ;;  %v2636_v61 = vpop.f32.mrb[25].mxu0  ;;  %v3797_v58 = vsel %vm1771_vm12, %v1663_v41, %v1803_v30  ;;  %vm1772_vm13 = vcmp.ge.f32.partialorder %v1666_v18, 0.0 }
 0x279   : > { %v2637_v59 = vadd.f32 %v2636_v61, %v2635_v55  ;;  %1905 = vrot.lane.b32.xlu1 %v3797_v58, %s3067_s18  ;;  %v2638_v49 = vpop.f32.mrb[26].mxu0  ;;  %v1802_v42 = vmul.f32 0.01, %v1658_v48  ;;  %vm1770_vm15 = vcmp.ge.f32.partialorder %v1658_v48, 0.0  ;;  %v3808_v9 = vsel %vm1769_vm14, %v1655_v47, %v1801_v56 }
 0x27a   : > { %v2639_v0 = vpop.f32.mrb[27].mxu0  ;;  %v3801_v1 = vsel %vm1772_vm13, %v1666_v18, %v1804_v37 }
 0x27b   : > { %v2640_v3 = vadd.f32 %v2639_v0, %v2638_v49  ;;  %1907 = vrot.lane.b32.xlu0 %v3801_v1, %s3067_s18  ;;  %v2727_v5 = vpop.f32.mrb[24].mxu1  ;;  %v3815_v19 = vsel %vm1770_vm15, %v1658_v48, %v1802_v42  ;;  %v1526_v63 = vadd.f32 %v2637_v59, %v3766_v4 }
 0x27c   : > { %v1679_v16 = vadd.f32 %v2727_v5, %v1518_v60  ;;  %v1670_v8 = vpop.f32.mrb[25].mxu1 }
 0x27d   : > { %v1671_v12 = vadd.f32 %v1670_v8, %v1510_v6  ;;  %1901 = vrot.lane.b32.xlu1 %v3808_v9, %s3067_s18  ;;  %v2728_v62 = vpop.f32.mrb[26].mxu1  ;;  %v1529_v50 = vadd.f32 %v2640_v3, %v3766_v4 }
 0x27e   : > { %v1807_v38 = vmul.f32 0.01, %v1679_v16  ;;  %v1682_v2 = vadd.f32 %v2728_v62, %v1521_v10  ;;  %v1673_v14 = vpop.f32.mrb[27].mxu1  ;;  %vm1775_vm0 = vcmp.ge.f32.partialorder %v1679_v16, 0.0 }
 0x27f   : > { %v1674_v53 = vadd.f32 %v1673_v14, %v1513_v45  ;;  %1903 = vrot.lane.b32.xlu0 %v3815_v19, %s3067_s18  ;;  %v2641_v20 = vpop.f32.mrb[28].mxu0  ;;  %v1805_v22 = vmul.f32 0.01, %v1671_v12  ;;  %vm1773_vm2 = vcmp.ge.f32.partialorder %v1671_v12, 0.0 }
 0x280   : > { %v1808_v24 = vmul.f32 0.01, %v1682_v2  ;;  %v2642_v25 = vpop.f32.mrb[29].mxu0  ;;  %v3819_v28 = vsel %vm1775_vm0, %v1679_v16, %v1807_v38  ;;  %vm1776_vm1 = vcmp.ge.f32.partialorder %v1682_v2, 0.0 }
 0x281   : > { %v2643_v32 = vadd.f32 %v2642_v25, %v2641_v20  ;;  %1913 = vrot.lane.b32.xlu1 %v3819_v28, %s3067_s18  ;;  %v2644_v57 = vpop.f32.mrb[30].mxu0  ;;  %v1806_v7 = vmul.f32 0.01, %v1674_v53  ;;  %vm1774_vm3 = vcmp.ge.f32.partialorder %v1674_v53, 0.0  ;;  %v3829_v41 = vsel %vm1773_vm2, %v1671_v12, %v1805_v22 }
 0x282   : > { %v2645_v13 = vpop.f32.mrb[31].mxu0  ;;  %v3823_v35 = vsel %vm1776_vm1, %v1682_v2, %v1808_v24 }
 0x283   : > { %v2646_v46 = vadd.f32 %v2645_v13, %v2644_v57  ;;  %1915 = vrot.lane.b32.xlu0 %v3823_v35, %s3067_s18  ;;  %v1534_v36 = vadd.f32 %v2643_v32, %v3766_v4  ;;  %v2731_v26 = vpop.f32.mrb[28].mxu1  ;;  %v3835_v18 = vsel %vm1774_vm3, %v1674_v53, %v1806_v7 }
 0x284   : > { %v1686_v23 = vpop.f32.mrb[29].mxu1 }
 0x285   : > { %v1695_v17 = vadd.f32 %v2731_v26, %v1534_v36  ;;  %v1687_v27 = vadd.f32 %v1686_v23, %v1526_v63  ;;  %1909 = vrot.lane.b32.xlu1 %v3829_v41, %s3067_s18  ;;  %v1537_v47 = vadd.f32 %v2646_v46, %v3766_v4  ;;  %v2732_v15 = vpop.f32.mrb[30].mxu1 }
 0x286   : > { %v1689_v30 = vpop.f32.mrb[31].mxu1 }
 0x287   : > { %v1809_v52 = vmul.f32 0.01, %v1687_v27  ;;  %v1698_v48 = vadd.f32 %v2732_v15, %v1537_v47  ;;  %v1690_v55 = vadd.f32 %v1689_v30, %v1529_v50  ;;  %1911 = vrot.lane.b32.xlu0 %v3835_v18, %s3067_s18  ;;  %v2647_v56 = vpop.f32.mrb[32].mxu0  ;;  %vm1777_vm4 = vcmp.ge.f32.partialorder %v1687_v27, 0.0 }
 0x288   : > { %v2648_v37 = vpop.f32.mrb[33].mxu0  ;;  %v1811_v61 = vmul.f32 0.01, %v1695_v17  ;;  %vm1779_vm6 = vcmp.ge.f32.partialorder %v1695_v17, 0.0 }
 0x289   : > { %v1810_v59 = vmul.f32 0.01, %v1690_v55  ;;  %v2649_v49 = vadd.f32 %v2648_v37, %v2647_v56  ;;  %v2650_v42 = vpop.f32.mrb[34].mxu0  ;;  %v3839_v0 = vsel %vm1777_vm4, %v1687_v27, %v1809_v52  ;;  %vm1778_vm5 = vcmp.ge.f32.partialorder %v1690_v55, 0.0 }
 0x28a   : > { %1917 = vrot.lane.b32.xlu1 %v3839_v0, %s3067_s18  ;;  %v2651_v60 = vpop.f32.mrb[35].mxu0  ;;  %v1812_v3 = vmul.f32 0.01, %v1698_v48  ;;  %vm1780_vm7 = vcmp.ge.f32.partialorder %v1698_v48, 0.0  ;;  %v3848_v45 = vsel %vm1779_vm6, %v1695_v17, %v1811_v61 }
 0x28b   : > { %v2652_v5 = vadd.f32 %v2651_v60, %v2650_v42  ;;  %v2735_v6 = vpop.f32.mrb[32].mxu1  ;;  %v3843_v16 = vsel %vm1778_vm5, %v1690_v55, %v1810_v59  ;;  %v1542_v8 = vadd.f32 %v2649_v49, %v3766_v4  ;;  %v1582_v49 = vadd.f32 %v3752_v39, %v3766_v4 }
 0x28c   : > { %1919 = vrot.lane.b32.xlu0 %v3843_v16, %s3067_s18  ;;  %v1702_v10 = vpop.f32.mrb[33].mxu1  ;;  %v3853_v22 = vsel %vm1780_vm7, %v1698_v48, %v1812_v3 }
 0x28d   : > { %v1703_v12 = vadd.f32 %v1702_v10, %v1542_v8  ;;  %v2736_v62 = vpop.f32.mrb[34].mxu1  ;;  %v1545_v38 = vadd.f32 %v2652_v5, %v3766_v4 }
 0x28e   : > { %1921 = vrot.lane.b32.xlu1 %v3848_v45, %s3067_s18  ;;  %v1705_v2 = vpop.f32.mrb[35].mxu1 }
 0x28f   : > { %v1813_v14 = vmul.f32 0.01, %v1703_v12  ;;  %v1706_v53 = vadd.f32 %v1705_v2, %v1545_v38  ;;  %v2653_v20 = vpop.f32.mrb[36].mxu0  ;;  %vm1781_vm8 = vcmp.ge.f32.partialorder %v1703_v12, 0.0 }
 0x290   : > { %1923 = vrot.lane.b32.xlu0 %v3853_v22, %s3067_s18  ;;  %v2654_v24 = vpop.f32.mrb[37].mxu0 }
 0x291   : > { %v1814_v25 = vmul.f32 0.01, %v1706_v53  ;;  %v2655_v32 = vadd.f32 %v2654_v24, %v2653_v20  ;;  %v2656_v57 = vpop.f32.mrb[38].mxu0  ;;  %v3857_v7 = vsel %vm1781_vm8, %v1703_v12, %v1813_v14  ;;  %vm1782_vm9 = vcmp.ge.f32.partialorder %v1706_v53, 0.0 }
 0x292   : > { %1925 = vrot.lane.b32.xlu1 %v3857_v7, %s3067_s18  ;;  %v2657_v13 = vpop.f32.mrb[39].mxu0  ;;  %v1585_v12 = vadd.f32 %v3754_v43, %v3766_v4  ;;  %v1577_v14 = vadd.f32 %v3750_v33, %v3766_v4 }
 0x293   : > { %v1550_v46 = vadd.f32 %v2655_v32, %v3766_v4  ;;  %v2658_v36 = vadd.f32 %v2657_v13, %v2656_v57  ;;  %v3862_v26 = vpop.f32.mrb[36].mxu1  ;;  %v3864_v63 = vsel %vm1782_vm9, %v1706_v53, %v1814_v25  ;;  %vm2277_vm9 = vcmask 519168  }
 0x294   : > { %1927 = vrot.lane.b32.xlu0 %v3864_v63, %s3067_s18  ;;  %v1718_v23 = vpop.f32.mrb[37].mxu1 }
 0x295   : > { %v1711_v17 = vadd.f32 %v2735_v6, %v1550_v46  ;;  %v1553_v27 = vadd.f32 %v2658_v36, %v3766_v4  ;;  %v3869_v47 = vpop.f32.mrb[38].mxu1  ;;  %v1574_v6 = vadd.f32 %v3748_v54, %v3766_v4 }
 0x296   : > { %v1721_v15 = vpop.f32.mrb[39].mxu1 }
 0x297   : > { %v1714_v50 = vadd.f32 %v2736_v62, %v1553_v27  ;;  %v2659_v30 = vpop.f32.mrb[40].mxu0  ;;  %vm1783_vm10 = vcmp.ge.f32.partialorder %v1711_v17, 0.0  ;;  %v1815_v52 = vmul.f32 0.01, %v1711_v17 }
 0x298   : > { %v2660_v48 = vpop.f32.mrb[41].mxu0 }
 0x299   : > { %v2661_v55 = vadd.f32 %v2660_v48, %v2659_v30  ;;  %v2662_v56 = vpop.f32.mrb[42].mxu0  ;;  %v3871_v37 = vsel %vm1783_vm10, %v1711_v17, %v1815_v52  ;;  %vm1784_vm11 = vcmp.ge.f32.partialorder %v1714_v50, 0.0  ;;  %v1816_v61 = vmul.f32 0.01, %v1714_v50 }
 0x29a   : > { %v2663_v59 = vpop.f32.mrb[43].mxu0  ;;  %1929 = vrot.lane.b32.xlu1 %v3871_v37, %s3067_s18 }
 0x29b   : > { %v1558_v42 = vadd.f32 %v2661_v55, %v3766_v4  ;;  %v2664_v60 = vadd.f32 %v2663_v59, %v2662_v56  ;;  %v2743_v3 = vpop.f32.mrb[40].mxu1  ;;  %v3878_v5 = vsel %vm1784_vm11, %v1714_v50, %v1816_v61  ;;  %v1590_v50 = vadd.f32 %v3758_v11, %v3766_v4 }
 0x29c   : > { %v1743_v8 = vadd.f32 %v2743_v3, %v1582_v49  ;;  %1931 = vrot.lane.b32.xlu0 %v3878_v5, %s3067_s18  ;;  %v1734_v10 = vpop.f32.mrb[41].mxu1  ;;  %v1593_v55 = vadd.f32 %v3760_v34, %v3766_v4  ;;  %v1601_v59 = vadd.f32 %v3764_v51, %v3766_v4 }
 0x29d   : > { %v1719_v62 = vadd.f32 %v1718_v23, %v1558_v42  ;;  %v1561_v39 = vadd.f32 %v2664_v60, %v3766_v4  ;;  %v1735_v38 = vadd.f32 %v1734_v10, %v1574_v6  ;;  %v2744_v2 = vpop.f32.mrb[42].mxu1 }
 0x29e   : > { %v1823_v53 = vmul.f32 0.01, %v1743_v8  ;;  %v1746_v20 = vadd.f32 %v2744_v2, %v1585_v12  ;;  %v1737_v24 = vpop.f32.mrb[43].mxu1  ;;  %vm1791_vm12 = vcmp.ge.f32.partialorder %v1743_v8, 0.0 }
 0x29f   : > { %v1722_v54 = vadd.f32 %v1721_v15, %v1561_v39  ;;  %v1738_v25 = vadd.f32 %v1737_v24, %v1577_v14  ;;  %v2665_v32 = vpop.f32.mrb[44].mxu0  ;;  %v1821_v57 = vmul.f32 0.01, %v1735_v38  ;;  %vm1789_vm14 = vcmp.ge.f32.partialorder %v1735_v38, 0.0 }
 0x2a0   : > { %v1824_v13 = vmul.f32 0.01, %v1746_v20  ;;  %v2666_v46 = vpop.f32.mrb[45].mxu0  ;;  %v3889_v36 = vsel %vm1791_vm12, %v1743_v8, %v1823_v53  ;;  %vm1792_vm13 = vcmp.ge.f32.partialorder %v1746_v20, 0.0  ;;  %v1598_v15 = vadd.f32 %v3762_v29, %v3766_v4 }
 0x2a1   : > { %v2667_v43 = vadd.f32 %v2666_v46, %v2665_v32  ;;  %1945 = vrot.lane.b32.xlu1 %v3889_v36, %s3067_s18  ;;  %v2668_v23 = vpop.f32.mrb[46].mxu0  ;;  %v1822_v33 = vmul.f32 0.01, %v1738_v25  ;;  %vm1790_vm15 = vcmp.ge.f32.partialorder %v1738_v25, 0.0  ;;  %v3906_v29 = vsel %vm1789_vm14, %v1735_v38, %v1821_v57 }
 0x2a2   : > { %v2669_v17 = vpop.f32.mrb[47].mxu0  ;;  %v3893_v27 = vsel %vm1792_vm13, %v1746_v20, %v1824_v13  ;;  %v1817_v49 = vmul.f32 0.01, %v1719_v62  ;;  %vm1785_vm0 = vcmp.ge.f32.partialorder %v1719_v62, 0.0  ;;  %v1818_v10 = vmul.f32 0.01, %v1722_v54 }
 0x2a3   : > { %v1566_v30 = vadd.f32 %v2667_v43, %v3766_v4  ;;  %v2670_v52 = vadd.f32 %v2669_v17, %v2668_v23  ;;  %1947 = vrot.lane.b32.xlu0 %v3893_v27, %s3067_s18  ;;  %v2747_v48 = vpop.f32.mrb[44].mxu1  ;;  %v3912_v8 = vsel %vm1790_vm15, %v1738_v25, %v1822_v33  ;;  %vm1786_vm1 = vcmp.ge.f32.partialorder %v1722_v54, 0.0 }
 0x2a4   : > { %v1759_v56 = vadd.f32 %v2747_v48, %v1598_v15  ;;  %v1750_v61 = vpop.f32.mrb[45].mxu1  ;;  %v3921_v38 = vsel %vm1786_vm1, %v1722_v54, %v1818_v10 }
 0x2a5   : > { %v1727_v11 = vadd.f32 %v3862_v26, %v1566_v30  ;;  %v1569_v42 = vadd.f32 %v2670_v52, %v3766_v4  ;;  %v1751_v60 = vadd.f32 %v1750_v61, %v1590_v50  ;;  %v2748_v3 = vpop.f32.mrb[46].mxu1  ;;  %1941 = vrot.lane.b32.xlu1 %v3906_v29, %s3067_s18  ;;  %v3917_v4 = vsel %vm1785_vm0, %v1719_v62, %v1817_v49 }
 0x2a6   : > { %v1762_v34 = vadd.f32 %v2748_v3, %v1601_v59  ;;  %v1753_v6 = vpop.f32.mrb[47].mxu1  ;;  %v1827_v53 = vmul.f32 0.01, %v1759_v56  ;;  %vm1795_vm6 = vcmp.ge.f32.partialorder %v1759_v56, 0.0 }
 0x2a7   : > { %v1730_v51 = vadd.f32 %v3869_v47, %v1569_v42  ;;  %v1754_v12 = vadd.f32 %v1753_v6, %v1593_v55  ;;  %1943 = vrot.lane.b32.xlu0 %v3912_v8, %s3067_s18  ;;  %v1825_v26 = vmul.f32 0.01, %v1751_v60  ;;  %vm1793_vm2 = vcmp.ge.f32.partialorder %v1751_v60, 0.0 }
 0x2a8   : > { %v1819_v2 = vmul.f32 0.01, %v1727_v11  ;;  %vm1787_vm4 = vcmp.ge.f32.partialorder %v1727_v11, 0.0  ;;  %v1828_v24 = vmul.f32 0.01, %v1762_v34  ;;  %vm1796_vm7 = vcmp.ge.f32.partialorder %v1762_v34, 0.0 }
 0x2a9   : > { %1933 = vrot.lane.b32.xlu1 %v3917_v4, %s3067_s18  ;;  %v1826_v39 = vmul.f32 0.01, %v1754_v12  ;;  %vm1794_vm3 = vcmp.ge.f32.partialorder %v1754_v12, 0.0  ;;  %v3925_v47 = vsel %vm1793_vm2, %v1751_v60, %v1825_v26  ;;  %v1820_v14 = vmul.f32 0.01, %v1730_v51 }
 0x2aa   : > { %vm1788_vm5 = vcmp.ge.f32.partialorder %v1730_v51, 0.0  ;;  %v3933_v20 = vsel %vm1787_vm4, %v1727_v11, %v1819_v2  ;;  %v3941_v25 = vsel %vm1795_vm6, %v1759_v56, %v1827_v53  ;;  %v3945_v32 = vsel %vm1796_vm7, %v1762_v34, %v1828_v24 }
 0x2ab   : > { %1935 = vrot.lane.b32.xlu0 %v3921_v38, %s3067_s18  ;;  %v3929_v62 = vsel %vm1794_vm3, %v1754_v12, %v1826_v39  ;;  %v3937_v54 = vsel %vm1788_vm5, %v1730_v51, %v1820_v14 }
 0x2ad   : > { %1949 = vrot.lane.b32.xlu1 %v3925_v47, %s3067_s18 }
 0x2af   : > { %1951 = vrot.lane.b32.xlu0 %v3929_v62, %s3067_s18 }
 0x2b1   : > { %1937 = vrot.lane.b32.xlu1 %v3933_v20, %s3067_s18 }
 0x2b3   : > { %1939 = vrot.lane.b32.xlu0 %v3937_v54, %s3067_s18 }
 0x2b5   : > { %1953 = vrot.lane.b32.xlu1 %v3941_v25, %s3067_s18 }
 0x2b7   : > { %1955 = vrot.lane.b32.xlu0 %v3945_v32, %s3067_s18 }
 0x2e3   : > { %v1898_v57 = vpop.permute.xlu1 %1897 }
 0x2e4   : > { %v1991_v13 = vmul.f32 %v1898_v57, %v3776_v40 }
 0x2e5   : > { %v1900_v46 = vpop.permute.xlu0 %1899 }
 0x2e6   : > { %v2023_v43 = vadd.f32 %v1991_v13, %v1898_v57  ;;  %v1992_v23 = vmul.f32 %v1900_v46, %v3780_v21 }
 0x2e7   : > { %v1894_v33 = vpop.permute.xlu1 %1893 }
 0x2e8   : > { %vm2055_vm8 = vcmp.ge.f32.partialorder %v2023_v43, 0.0  ;;  %v2087_v17 = vmul.f32 0.01, %v2023_v43  ;;  %v2024_v15 = vadd.f32 %v1992_v23, %v1900_v46  ;;  %v1989_v50 = vmul.f32 %v1894_v33, %v3787_v44 }
 0x2e9   : > { %v1896_v30 = vpop.permute.xlu0 %1895 }
 0x2ea   : > { %v2119_v52 = vsel %vm2055_vm8, %v2023_v43, %v2087_v17  ;;  %vm2056_vm10 = vcmp.ge.f32.partialorder %v2024_v15, 0.0  ;;  %v2088_v48 = vmul.f32 0.01, %v2024_v15  ;;  %v2021_v55 = vadd.f32 %v1989_v50, %v1894_v33 }
 0x2eb   : > { %v2552_v56 = vpack.c.bf16 %v2119_v52, %v2119_v52  ;;  %v1990_v40 = vmul.f32 %v1896_v30, %v3793_v31  ;;  %v1906_v61 = vpop.permute.xlu1 %1905 }
 0x2ec   : > { %v2120_v59 = vsel %vm2056_vm10, %v2024_v15, %v2088_v48  ;;  %vm2053_vm11 = vcmp.ge.f32.partialorder %v2021_v55, 0.0  ;;  %v2085_v21 = vmul.f32 0.01, %v2021_v55  ;;  %v1995_v49 = vmul.f32 %v1906_v61, %v3797_v58 }
 0x2ed   : > { %2280 = vst.msk [vmem:[%s3956_s8 + $0x8] sm:$0xf] %vm2277_vm9, %v2552_v56  ;;  %v2553_v44 = vpack.c.bf16 %v2120_v59, %v2120_v59  ;;  %v2022_v11 = vadd.f32 %v1990_v40, %v1896_v30  ;;  %v1908_v42 = vpop.permute.xlu0 %1907 }
 0x2ee   : > { %v2117_v60 = vsel %vm2053_vm11, %v2021_v55, %v2085_v21  ;;  %v2027_v3 = vadd.f32 %v1995_v49, %v1906_v61  ;;  %v1996_v31 = vmul.f32 %v1908_v42, %v3801_v1 }
 0x2ef   : > { %2281 = vst.msk [vmem:[%s3956_s8 + $0xc] sm:$0xf] %vm2277_vm9, %v2553_v44  ;;  %v2550_v34 = vpack.c.bf16 %v2117_v60, %v2117_v60  ;;  %vm2054_vm12 = vcmp.ge.f32.partialorder %v2022_v11, 0.0  ;;  %v2086_v58 = vmul.f32 0.01, %v2022_v11  ;;  %v1902_v6 = vpop.permute.xlu1 %1901 }
 0x2f0   : > { %vm2059_vm13 = vcmp.ge.f32.partialorder %v2027_v3, 0.0  ;;  %v2091_v10 = vmul.f32 0.01, %v2027_v3  ;;  %v2028_v51 = vadd.f32 %v1996_v31, %v1908_v42  ;;  %v1993_v12 = vmul.f32 %v1902_v6, %v3808_v9 }
 0x2f1   : > { %2278 = vst.msk [vmem:[%s3956_s8] sm:$0xf] %vm2277_vm9, %v2550_v34  ;;  %v2118_v26 = vsel %vm2054_vm12, %v2022_v11, %v2086_v58  ;;  %v1904_v39 = vpop.permute.xlu0 %1903 }
 0x2f2   : > { %v2551_v2 = vpack.c.bf16 %v2118_v26, %v2118_v26  ;;  %v2123_v14 = vsel %vm2059_vm13, %v2027_v3, %v2091_v10  ;;  %vm2060_vm14 = vcmp.ge.f32.partialorder %v2028_v51, 0.0  ;;  %v2092_v1 = vmul.f32 0.01, %v2028_v51 }
 0x2f3   : > { %v2556_v53 = vpack.c.bf16 %v2123_v14, %v2123_v14  ;;  %v2025_v24 = vadd.f32 %v1993_v12, %v1902_v6  ;;  %v1994_v57 = vmul.f32 %v1904_v39, %v3815_v19  ;;  %v1914_v13 = vpop.permute.xlu1 %1913 }
 0x2f4   : > { %2279 = vst.msk [vmem:[%s3956_s8 + $0x4] sm:$0xf] %vm2277_vm9, %v2551_v2  ;;  %v2124_v46 = vsel %vm2060_vm14, %v2028_v51, %v2092_v1  ;;  %v1999_v43 = vmul.f32 %v1914_v13, %v3819_v28 }
 0x2f5   : > { %2284 = vst.msk [vmem:[%s3956_s8 + $0x18] sm:$0xf] %vm2277_vm9, %v2556_v53  ;;  %v2557_v9 = vpack.c.bf16 %v2124_v46, %v2124_v46  ;;  %vm2057_vm15 = vcmp.ge.f32.partialorder %v2025_v24, 0.0  ;;  %v2089_v23 = vmul.f32 0.01, %v2025_v24  ;;  %v2026_v33 = vadd.f32 %v1994_v57, %v1904_v39  ;;  %v1916_v17 = vpop.permute.xlu0 %1915 }
 0x2f6   : > { %v2031_v15 = vadd.f32 %v1999_v43, %v1914_v13  ;;  %v2000_v50 = vmul.f32 %v1916_v17, %v3823_v35 }
 0x2f7   : > { %2285 = vst.msk [vmem:[%s3956_s8 + $0x1c] sm:$0xf] %vm2277_vm9, %v2557_v9  ;;  %v2121_v19 = vsel %vm2057_vm15, %v2025_v24, %v2089_v23  ;;  %vm2058_vm0 = vcmp.ge.f32.partialorder %v2026_v33, 0.0  ;;  %v2090_v30 = vmul.f32 0.01, %v2026_v33  ;;  %v1910_v52 = vpop.permute.xlu1 %1909 }
 0x2f8   : > { %v2554_v48 = vpack.c.bf16 %v2121_v19, %v2121_v19  ;;  %vm2063_vm1 = vcmp.ge.f32.partialorder %v2031_v15, 0.0  ;;  %v2095_v28 = vmul.f32 0.01, %v2031_v15  ;;  %v2032_v55 = vadd.f32 %v2000_v50, %v1916_v17 }
 0x2f9   : > { %v2122_v56 = vsel %vm2058_vm0, %v2026_v33, %v2090_v30  ;;  %v1997_v40 = vmul.f32 %v1910_v52, %v3829_v41  ;;  %v1912_v61 = vpop.permute.xlu0 %1911 }
 0x2fa   : > { %2282 = vst.msk [vmem:[%s3956_s8 + $0x10] sm:$0xf] %vm2277_vm9, %v2554_v48  ;;  %v2555_v59 = vpack.c.bf16 %v2122_v56, %v2122_v56  ;;  %v2127_v35 = vsel %vm2063_vm1, %v2031_v15, %v2095_v28  ;;  %vm2064_vm2 = vcmp.ge.f32.partialorder %v2032_v55, 0.0  ;;  %v2096_v21 = vmul.f32 0.01, %v2032_v55 }
 0x2fb   : > { %v2560_v49 = vpack.c.bf16 %v2127_v35, %v2127_v35  ;;  %v2029_v44 = vadd.f32 %v1997_v40, %v1910_v52  ;;  %v1998_v11 = vmul.f32 %v1912_v61, %v3835_v18 }
 0x2fc   : > { %2283 = vst.msk [vmem:[%s3956_s8 + $0x14] sm:$0xf] %vm2277_vm9, %v2555_v59  ;;  %v2128_v42 = vsel %vm2064_vm2, %v2032_v55, %v2096_v21  ;;  %v1918_v60 = vpop.permute.xlu1 %1917 }
 0x2fd   : > { %2288 = vst.msk [vmem:[%s3956_s8 + $0x28] sm:$0xf] %vm2277_vm9, %v2560_v49  ;;  %v2561_v3 = vpack.c.bf16 %v2128_v42, %v2128_v42  ;;  %vm2061_vm3 = vcmp.ge.f32.partialorder %v2029_v44, 0.0  ;;  %v2093_v41 = vmul.f32 0.01, %v2029_v44  ;;  %v2030_v31 = vadd.f32 %v1998_v11, %v1912_v61 }
 0x2fe   : > { %v2001_v34 = vmul.f32 %v1918_v60, %v3839_v0  ;;  %v1920_v58 = vpop.permute.xlu0 %1919 }
 0x2ff   : > { %2289 = vst.msk [vmem:[%s3956_s8 + $0x2c] sm:$0xf] %vm2277_vm9, %v2561_v3  ;;  %v2125_v6 = vsel %vm2061_vm3, %v2029_v44, %v2093_v41  ;;  %vm2062_vm4 = vcmp.ge.f32.partialorder %v2030_v31, 0.0  ;;  %v2094_v10 = vmul.f32 0.01, %v2030_v31  ;;  %v2002_v18 = vmul.f32 %v1920_v58, %v3843_v16 }
 0x300   : > { %v2558_v51 = vpack.c.bf16 %v2125_v6, %v2125_v6  ;;  %v2033_v12 = vadd.f32 %v2001_v34, %v1918_v60  ;;  %v1922_v26 = vpop.permute.xlu1 %1921 }
 0x301   : > { %v2126_v39 = vsel %vm2062_vm4, %v2030_v31, %v2094_v10  ;;  %v2034_v2 = vadd.f32 %v2002_v18, %v1920_v58  ;;  %v2003_v14 = vmul.f32 %v1922_v26, %v3848_v45 }
 0x302   : > { %2286 = vst.msk [vmem:[%s3956_s8 + $0x20] sm:$0xf] %vm2277_vm9, %v2558_v51  ;;  %v2559_v1 = vpack.c.bf16 %v2126_v39, %v2126_v39  ;;  %vm2065_vm5 = vcmp.ge.f32.partialorder %v2033_v12, 0.0  ;;  %v2097_v0 = vmul.f32 0.01, %v2033_v12  ;;  %v1924_v53 = vpop.permute.xlu0 %1923 }
 0x303   : > { %vm2066_vm6 = vcmp.ge.f32.partialorder %v2034_v2, 0.0  ;;  %v2098_v24 = vmul.f32 0.01, %v2034_v2  ;;  %v2035_v57 = vadd.f32 %v2003_v14, %v1922_v26  ;;  %v2004_v16 = vmul.f32 %v1924_v53, %v3853_v22 }
 0x304   : > { %2287 = vst.msk [vmem:[%s3956_s8 + $0x24] sm:$0xf] %vm2277_vm9, %v2559_v1  ;;  %v2129_v13 = vsel %vm2065_vm5, %v2033_v12, %v2097_v0  ;;  %v1926_v46 = vpop.permute.xlu1 %1925 }
 0x305   : > { %v2562_v43 = vpack.c.bf16 %v2129_v13, %v2129_v13  ;;  %v2130_v9 = vsel %vm2066_vm6, %v2034_v2, %v2098_v24  ;;  %vm2067_vm7 = vcmp.ge.f32.partialorder %v2035_v57, 0.0  ;;  %v2099_v45 = vmul.f32 0.01, %v2035_v57 }
 0x306   : > { %v2563_v23 = vpack.c.bf16 %v2130_v9, %v2130_v9  ;;  %v2036_v33 = vadd.f32 %v2004_v16, %v1924_v53  ;;  %v2005_v17 = vmul.f32 %v1926_v46, %v3857_v7  ;;  %v1928_v15 = vpop.permute.xlu0 %1927 }
 0x307   : > { %2290 = vst.msk [vmem:[%s3956_s8 + $0x30] sm:$0xf] %vm2277_vm9, %v2562_v43  ;;  %v2131_v50 = vsel %vm2067_vm7, %v2035_v57, %v2099_v45  ;;  %v2006_v19 = vmul.f32 %v1928_v15, %v3864_v63 }
 0x308   : > { %2291 = vst.msk [vmem:[%s3956_s8 + $0x34] sm:$0xf] %vm2277_vm9, %v2563_v23  ;;  %v2564_v22 = vpack.c.bf16 %v2131_v50, %v2131_v50  ;;  %vm2068_vm8 = vcmp.ge.f32.partialorder %v2036_v33, 0.0  ;;  %v2100_v30 = vmul.f32 0.01, %v2036_v33  ;;  %v2037_v52 = vadd.f32 %v2005_v17, %v1926_v46 }
 0x309   : > { %v2038_v48 = vadd.f32 %v2006_v19, %v1928_v15 }
 0x30a   : > { %2292 = vst.msk [vmem:[%s3956_s8 + $0x38] sm:$0xf] %vm2277_vm9, %v2564_v22  ;;  %v2132_v28 = vsel %vm2068_vm8, %v2036_v33, %v2100_v30  ;;  %vm2069_vm10 = vcmp.ge.f32.partialorder %v2037_v52, 0.0  ;;  %v2101_v7 = vmul.f32 0.01, %v2037_v52 }
 0x30b   : > { %v2565_v55 = vpack.c.bf16 %v2132_v28, %v2132_v28  ;;  %vm2070_vm11 = vcmp.ge.f32.partialorder %v2038_v48, 0.0  ;;  %v2102_v56 = vmul.f32 0.01, %v2038_v48 }
 0x30c   : > { %v2133_v40 = vsel %vm2069_vm10, %v2037_v52, %v2101_v7  ;;  %v1930_v63 = vpop.permute.xlu1 %1929 }
 0x30d   : > { %2293 = vst.msk [vmem:[%s3956_s8 + $0x3c] sm:$0xf] %vm2277_vm9, %v2565_v55  ;;  %v2566_v61 = vpack.c.bf16 %v2133_v40, %v2133_v40  ;;  %v2134_v59 = vsel %vm2070_vm11, %v2038_v48, %v2102_v56  ;;  %v2007_v35 = vmul.f32 %v1930_v63, %v3871_v37 }
 0x30e   : > { %v2567_v21 = vpack.c.bf16 %v2134_v59, %v2134_v59  ;;  %v1932_v49 = vpop.permute.xlu0 %1931 }
 0x30f   : > { %2294 = vst.msk [vmem:[%s3956_s8 + $0x40] sm:$0xf] %vm2277_vm9, %v2566_v61  ;;  %v2039_v44 = vadd.f32 %v2007_v35, %v1930_v63  ;;  %v2008_v11 = vmul.f32 %v1932_v49, %v3878_v5 }
 0x310   : > { %2295 = vst.msk [vmem:[%s3956_s8 + $0x44] sm:$0xf] %vm2277_vm9, %v2567_v21 }
 0x311   : > { %vm2071_vm12 = vcmp.ge.f32.partialorder %v2039_v44, 0.0  ;;  %v2103_v42 = vmul.f32 0.01, %v2039_v44  ;;  %v2040_v60 = vadd.f32 %v2008_v11, %v1932_v49 }
 0x313   : > { %v2135_v3 = vsel %vm2071_vm12, %v2039_v44, %v2103_v42  ;;  %vm2072_vm13 = vcmp.ge.f32.partialorder %v2040_v60, 0.0  ;;  %v2104_v41 = vmul.f32 0.01, %v2040_v60  ;;  %v1946_v31 = vpop.permute.xlu1 %1945 }
 0x314   : > { %v2568_v34 = vpack.c.bf16 %v2135_v3, %v2135_v3  ;;  %v2015_v37 = vmul.f32 %v1946_v31, %v3889_v36 }
 0x315   : > { %v2136_v58 = vsel %vm2072_vm13, %v2040_v60, %v2104_v41  ;;  %v1948_v6 = vpop.permute.xlu0 %1947 }
 0x316   : > { %2296 = vst.msk [vmem:[%s3956_s8 + $0x48] sm:$0xf] %vm2277_vm9, %v2568_v34  ;;  %v2569_v10 = vpack.c.bf16 %v2136_v58, %v2136_v58  ;;  %v2047_v18 = vadd.f32 %v2015_v37, %v1946_v31  ;;  %v2016_v5 = vmul.f32 %v1948_v6, %v3893_v27 }
 0x317   : > { %v1942_v51 = vpop.permute.xlu1 %1941 }
 0x318   : > { %2297 = vst.msk [vmem:[%s3956_s8 + $0x4c] sm:$0xf] %vm2277_vm9, %v2569_v10  ;;  %vm2079_vm14 = vcmp.ge.f32.partialorder %v2047_v18, 0.0  ;;  %v2111_v12 = vmul.f32 0.01, %v2047_v18  ;;  %v2048_v26 = vadd.f32 %v2016_v5, %v1948_v6  ;;  %v2013_v39 = vmul.f32 %v1942_v51, %v3906_v29 }
 0x319   : > { %v1944_v2 = vpop.permute.xlu0 %1943 }
 0x31a   : > { %v2143_v14 = vsel %vm2079_vm14, %v2047_v18, %v2111_v12  ;;  %vm2080_vm15 = vcmp.ge.f32.partialorder %v2048_v26, 0.0  ;;  %v2112_v36 = vmul.f32 0.01, %v2048_v26  ;;  %v2045_v1 = vadd.f32 %v2013_v39, %v1942_v51 }
 0x31b   : > { %v2576_v0 = vpack.c.bf16 %v2143_v14, %v2143_v14  ;;  %v2014_v53 = vmul.f32 %v1944_v2, %v3912_v8  ;;  %v1934_v24 = vpop.permute.xlu1 %1933 }
 0x31c   : > { %v2144_v27 = vsel %vm2080_vm15, %v2048_v26, %v2112_v36  ;;  %vm2077_vm0 = vcmp.ge.f32.partialorder %v2045_v1, 0.0  ;;  %v2109_v57 = vmul.f32 0.01, %v2045_v1  ;;  %v2009_v16 = vmul.f32 %v1934_v24, %v3917_v4 }
 0x31d   : > { %2304 = vst.msk [vmem:[%s3956_s8 + $0x68] sm:$0xf] %vm2277_vm9, %v2576_v0  ;;  %v2577_v13 = vpack.c.bf16 %v2144_v27, %v2144_v27  ;;  %v2046_v29 = vadd.f32 %v2014_v53, %v1944_v2  ;;  %v1936_v46 = vpop.permute.xlu0 %1935 }
 0x31e   : > { %v2141_v43 = vsel %vm2077_vm0, %v2045_v1, %v2109_v57  ;;  %v2041_v9 = vadd.f32 %v2009_v16, %v1934_v24  ;;  %v2010_v45 = vmul.f32 %v1936_v46, %v3921_v38 }
 0x31f   : > { %2305 = vst.msk [vmem:[%s3956_s8 + $0x6c] sm:$0xf] %vm2277_vm9, %v2577_v13  ;;  %v2574_v23 = vpack.c.bf16 %v2141_v43, %v2141_v43  ;;  %vm2078_vm1 = vcmp.ge.f32.partialorder %v2046_v29, 0.0  ;;  %v2110_v8 = vmul.f32 0.01, %v2046_v29  ;;  %v1950_v33 = vpop.permute.xlu1 %1949 }
 0x320   : > { %vm2073_vm2 = vcmp.ge.f32.partialorder %v2041_v9, 0.0  ;;  %v2105_v17 = vmul.f32 0.01, %v2041_v9  ;;  %v2042_v4 = vadd.f32 %v2010_v45, %v1936_v46  ;;  %v2017_v15 = vmul.f32 %v1950_v33, %v3925_v47 }
 0x321   : > { %2302 = vst.msk [vmem:[%s3956_s8 + $0x60] sm:$0xf] %vm2277_vm9, %v2574_v23  ;;  %v2142_v50 = vsel %vm2078_vm1, %v2046_v29, %v2110_v8  ;;  %v1952_v19 = vpop.permute.xlu0 %1951 }
 0x322   : > { %v2575_v22 = vpack.c.bf16 %v2142_v50, %v2142_v50  ;;  %v2137_v30 = vsel %vm2073_vm2, %v2041_v9, %v2105_v17  ;;  %vm2074_vm3 = vcmp.ge.f32.partialorder %v2042_v4, 0.0  ;;  %v2106_v38 = vmul.f32 0.01, %v2042_v4 }
 0x323   : > { %v2570_v52 = vpack.c.bf16 %v2137_v30, %v2137_v30  ;;  %v2049_v48 = vadd.f32 %v2017_v15, %v1950_v33  ;;  %v2018_v28 = vmul.f32 %v1952_v19, %v3929_v62  ;;  %v1938_v7 = vpop.permute.xlu1 %1937 }
 0x324   : > { %2303 = vst.msk [vmem:[%s3956_s8 + $0x64] sm:$0xf] %vm2277_vm9, %v2575_v22  ;;  %v2138_v55 = vsel %vm2074_vm3, %v2042_v4, %v2106_v38  ;;  %v2011_v56 = vmul.f32 %v1938_v7, %v3933_v20 }
 0x325   : > { %2298 = vst.msk [vmem:[%s3956_s8 + $0x50] sm:$0xf] %vm2277_vm9, %v2570_v52  ;;  %v2571_v47 = vpack.c.bf16 %v2138_v55, %v2138_v55  ;;  %vm2081_vm4 = vcmp.ge.f32.partialorder %v2049_v48, 0.0  ;;  %v2113_v40 = vmul.f32 0.01, %v2049_v48  ;;  %v2050_v63 = vadd.f32 %v2018_v28, %v1952_v19  ;;  %v1940_v61 = vpop.permute.xlu0 %1939 }
 0x326   : > { %v2043_v59 = vadd.f32 %v2011_v56, %v1938_v7  ;;  %v2012_v35 = vmul.f32 %v1940_v61, %v3937_v54 }
 0x327   : > { %2299 = vst.msk [vmem:[%s3956_s8 + $0x54] sm:$0xf] %vm2277_vm9, %v2571_v47  ;;  %v2145_v62 = vsel %vm2081_vm4, %v2049_v48, %v2113_v40  ;;  %vm2082_vm5 = vcmp.ge.f32.partialorder %v2050_v63, 0.0  ;;  %v2114_v21 = vmul.f32 0.01, %v2050_v63  ;;  %v1954_v49 = vpop.permute.xlu1 %1953 }
 0x328   : > { %v2578_v44 = vpack.c.bf16 %v2145_v62, %v2145_v62  ;;  %vm2075_vm6 = vcmp.ge.f32.partialorder %v2043_v59, 0.0  ;;  %v2107_v20 = vmul.f32 0.01, %v2043_v59  ;;  %v2044_v11 = vadd.f32 %v2012_v35, %v1940_v61 }
 0x329   : > { %v2146_v42 = vsel %vm2082_vm5, %v2050_v63, %v2114_v21  ;;  %v2019_v60 = vmul.f32 %v1954_v49, %v3941_v25  ;;  %v1956_v3 = vpop.permute.xlu0 %1955 }
 0x32a   : > { %2306 = vst.msk [vmem:[%s3956_s8 + $0x70] sm:$0xf] %vm2277_vm9, %v2578_v44  ;;  %v2579_v54 = vpack.c.bf16 %v2146_v42, %v2146_v42  ;;  %v2139_v41 = vsel %vm2075_vm6, %v2043_v59, %v2107_v20  ;;  %vm2076_vm7 = vcmp.ge.f32.partialorder %v2044_v11, 0.0  ;;  %v2108_v31 = vmul.f32 0.01, %v2044_v11 }
 0x32b   : > { %v2572_v34 = vpack.c.bf16 %v2139_v41, %v2139_v41  ;;  %v2051_v37 = vadd.f32 %v2019_v60, %v1954_v49  ;;  %v2020_v58 = vmul.f32 %v1956_v3, %v3945_v32 }
 0x32c   : > { %2307 = vst.msk [vmem:[%s3956_s8 + $0x74] sm:$0xf] %vm2277_vm9, %v2579_v54  ;;  %v2140_v6 = vsel %vm2076_vm7, %v2044_v11, %v2108_v31 }
 0x32d   : > { %2300 = vst.msk [vmem:[%s3956_s8 + $0x58] sm:$0xf] %vm2277_vm9, %v2572_v34  ;;  %v2573_v25 = vpack.c.bf16 %v2140_v6, %v2140_v6  ;;  %vm2083_vm8 = vcmp.ge.f32.partialorder %v2051_v37, 0.0  ;;  %v2115_v10 = vmul.f32 0.01, %v2051_v37  ;;  %v2052_v18 = vadd.f32 %v2020_v58, %v1956_v3 }
 0x32f   : > { %2301 = vst.msk [vmem:[%s3956_s8 + $0x5c] sm:$0xf] %vm2277_vm9, %v2573_v25  ;;  %v2147_v5 = vsel %vm2083_vm8, %v2051_v37, %v2115_v10  ;;  %vm2084_vm10 = vcmp.ge.f32.partialorder %v2052_v18, 0.0  ;;  %v2116_v51 = vmul.f32 0.01, %v2052_v18 }
 0x330   : > { %v2580_v32 = vpack.c.bf16 %v2147_v5, %v2147_v5 }
 0x331   : > { %v2148_v12 = vsel %vm2084_vm10, %v2052_v18, %v2116_v51 }
 0x332   : > { %2308 = vst.msk [vmem:[%s3956_s8 + $0x78] sm:$0xf] %vm2277_vm9, %v2580_v32  ;;  %v2581_v26 = vpack.c.bf16 %v2148_v12, %v2148_v12 }
 0x334   : > { %2309 = vst.msk [vmem:[%s3956_s8 + $0x7c] sm:$0xf] %vm2277_vm9, %v2581_v26 }
 0x335   : > { %3003 = shalt.err (!%p3000_p1)
}
 0x336   : > { %s3004_s27 = scalar_lea.hbm %s4050_s17, 2048  ;;  %s3008_s22 = scalar_lea.hbm %s4105_s3, 4096 }
 0x337   : > { %p3005_p13 = scmp.ne.s32.totalorder %s4050_s17, %s3004_s27  ;;  %p3009_p4 = scmp.lt.u32.totalorder %s4050_s17, %s4105_s3 }
 0x338   : > { %p3010_p5 = scmp.lt.u32.totalorder %s3008_s22, %s3004_s27  ;;  %p3012_p11 = scmp.lt.u32.totalorder %s3004_s27, %s4050_s17 }
 0x339   : > { %p3006_p6 = pnand %p3005_p13, %p4121_p0 }
 0x33a   : > { %p3011_p8 = por %p3010_p5, %p3009_p4 }
 0x33b   : > { %p3007_p10 = pneg %p3006_p6 }
 0x33c   : > { %p3013_p2 = por %p3012_p11, %p3011_p8 }
 0x33e   : > { %p3014_p3 = pnand %p3013_p2, %p3007_p10 }
 0x340   : > { %3017 = shalt.err (!%p3014_p3)
}
 0x341   : > { %s3071_s8 = smov 4  }
 0x342   : > { %2775 = dma.vmem_to_hbm [thread:$0]  (%p4121_p0), %s4054_s28, 2048, %s4050_s17, %s2311_s16, %s3067_s18, %s3067_s18, %s3071_s8  }
 0x343 PF: > { %s2339_s26 = sand.u32 1, %s3048_s12   ;;  %p4122_p7 = scmp.ne.s32.totalorder %s4110_s19, 0 }
 0x344   : > { %p4123_p9 = scmp.ge.s32.totalorder %s3060_s15, 2  ;;  %s2340_s29 = scalar_lea.sflag [#allocation4], %s2339_s26 }
 0x346   : > { %p2789_p12 = pnand %p4123_p9, %p4122_p7 }
 0x348   : > { %3043 = dma.done.wait (!%p2789_p12), %s2340_s29, 2048  }
 0x349   : > { %3045 = vsyncadd (!%p2789_p12), %s2340_s29, 4294965248  ;;  %p17_p1 = scmp.ge.s32.totalorder %s3206_s5, 4   ;;  %s4124_s12 = smov %s3052_s13 }
 0x34a   : > { %s4125_s13 = smov %s3056_s14  ;;  %s4126_s14 = smov %s3222_s10 }
 0x34b   : > { %s4127_s15 = smov %s3206_s5  ;;  %19 = sbr.rel (!%p17_p1) target bundleno = 6 (0x6), region = 85 }
 0x352   :  { %2345 = vsyncpa [#allocation3], 1 }
 0x353   :  { %2347 = vsyncpa [#allocation3 + $0x1], 1 }
 0x354   :  { %2348 = vsyncpa [#allocation6], 1 }
 0x355   :  { %2349 = vsyncpa [#allocation4], 1 }
 0x356   :  { %2351 = vsyncpa [#allocation4 + $0x1], 1 }

// kernel: encode_pallas.7
= control target key start
LH: loop header
LB: loop body
LE: loop exit
PB: predicated region body
PF: predicated region fallthrough
CT: control target
= control target key end

     0   :  { %8 = vsyncpa [#allocation3], 0  ;;  %s5085_s0 = inlined_call_operand.hbm [shape: bf16[2,16,16,64], index: 0, kind: input, shape index: {}]   ;;  %s5086_s1 = inlined_call_operand.hbm [shape: bf16[576,256], index: 1, kind: input, shape index: {}]   ;;  %s5087_s2 = inlined_call_operand.hbm [shape: f32[1,256], index: 2, kind: input, shape index: {}]   ;;  %s5088_s3 = inlined_call_operand.hbm [shape: bf16[2,16,16,128], index: 3, kind: output, shape index: {}]  }
   0x1   :  { %10 = vsyncpa [#allocation3 + $0x1], 0 }
   0x2   :  { %11 = vsyncpa [#allocation6], 0 }
   0x3   :  { %12 = vsyncpa [#allocation4], 0 }
   0x4   :  { %14 = vsyncpa [#allocation4 + $0x1], 0  ;;  %s3845_s12 = smov 0   ;;  %s3847_s13 = smov 0  }
   0x5   :  { %s3849_s14 = smov 0   ;;  %s3851_s15 = smov 0  }
   0x6 LB: > { %s3866_s16 = sadd.s32 4294967295, %s3812_s15   ;;  %s2887_s17 = sadd.s32 4294967294, %s3812_s15   ;;  %s3812_s15 = sphi %s3851_s15, %s5179_s15   ;;  %s3808_s14 = sphi %s3849_s14, %s5178_s14   ;;  %s3804_s13 = sphi %s3847_s13, %s5177_s13   ;;  %s3800_s12 = sphi %s3845_s12, %s5176_s12  }
   0x7   : > { %p40_p0 = scmp.ne.s32.totalorder %s3804_s13, %s3800_s12  ;;  %p5089_p1 = scmp.eq.s32.totalorder %s3866_s16, 0 }
   0x8   : > { %p112_p3 = scmp.eq.s32.totalorder %s2887_s17, 1  ;;  %p2888_p5 = scmp.ge.s32.totalorder %s3812_s15, 1 }
   0x9   : > { %p3875_p4 = por %p5089_p1, %p40_p0  ;;  %p119_p7 = scmp.lt.s32.totalorder %s3812_s15, 3 }
   0xa   : > { %p3880_p6 = por %p112_p3, %p40_p0  ;;  %s3814_s21 = smov [#allocation5]  }
   0xb   : > { %s5115_s18 = scalar_select %p3875_p4, 1, 0 }
   0xc   : > { %s5116_s19 = scalar_select %p3880_p6, 1, 0 }
   0xd   : > { %p3885_p8 = pnand %p2888_p5, %p119_p7  ;;  %s131_s22 = sshll.u32 %s3814_s21, 4  ;;  %s3889_s22 = int_to_ptr.vmem [resolvable:$true] %s131_s22 }
   0xe   : > { %s3815_s24 = smov [#allocation7]   ;;  %s3656_s28 = scalar_lea.hbm %s5086_s1, 9216 }
   0xf   : > { %p3438_p9 = pneg %p3885_p8  ;;  %s145_s25 = sshll.u32 %s3815_s24, 4  ;;  %s3900_s25 = int_to_ptr.vmem [resolvable:$true] %s145_s25 }
  0x10   : > { %p3657_p12 = scmp.ne.s32.totalorder %s5086_s1, %s3656_s28  ;;  %p3663_p5 = scmp.lt.u32.totalorder %s3656_s28, %s5086_s1 }
  0x11   : > { %p3896_p11 = pnand %p3438_p9, %p5089_p1 }
  0x13   : > { %p3658_p13 = pneg %p3896_p11 }
  0x15   : > { %p3659_p0 = pnand %p3658_p13, %p3657_p12 }
  0x17   : > { %p3660_p3 = pneg %p3659_p0 }
  0x19   : > { %p3665_p7 = pnand %p3663_p5, %p3660_p3 }
  0x1b   : > { %3668 = shalt.err (!%p3665_p7)
}
  0x1c   : > { %s3669_s6 = scalar_lea.vmem %s3889_s22, 9216  ;;  %p3677_p2 = scmp.lt.s32.totalorder %s3889_s22, %s3889_s22 }
  0x1d   : > { %p3670_p9 = scmp.ne.s32.totalorder %s3889_s22, %s3669_s6  ;;  %p3678_p12 = scmp.lt.s32.totalorder %s3669_s6, %s3669_s6 }
  0x1f   : > { %p3672_p10 = pnand %p3670_p9, %p3658_p13  ;;  %p3679_p0 = por %p3678_p12, %p3677_p2 }
  0x21   : > { %p3673_p1 = pneg %p3672_p10 }
  0x23   : > { %p3680_p6 = pnand %p3679_p0, %p3673_p1 }
  0x25   : > { %3683 = shalt.err (!%p3680_p6)
}
  0x26   : > { %s3816_s7 = smov 128   ;;  %s3817_s8 = smov 8  }
  0x27   : > { %3441 = dma.hbm_to_vmem [thread:$0]  (!%p3896_p11), %s5086_s1, 9216, %s3889_s22, [#allocation6], %s3816_s7, %s3816_s7, %s3817_s8  }
  0x28   : > { %s3684_s21 = scalar_lea.hbm %s5087_s2, 32 }
  0x29   : > { %p3685_p2 = scmp.ne.s32.totalorder %s5087_s2, %s3684_s21  ;;  %p3691_p10 = scmp.lt.u32.totalorder %s3684_s21, %s5087_s2 }
  0x2b   : > { %p3687_p1 = pnand %p3685_p2, %p3658_p13 }
  0x2d   : > { %p3688_p6 = pneg %p3687_p1 }
  0x2f   : > { %p3693_p3 = pnand %p3691_p10, %p3688_p6 }
  0x31   : > { %3696 = shalt.err (!%p3693_p3)
}
  0x32   : > { %s3697_s22 = scalar_lea.vmem %s3900_s25, 32  ;;  %p3705_p12 = scmp.lt.s32.totalorder %s3900_s25, %s3900_s25 }
  0x33   : > { %p3698_p5 = scmp.ne.s32.totalorder %s3900_s25, %s3697_s22  ;;  %p3706_p0 = scmp.lt.s32.totalorder %s3697_s22, %s3697_s22 }
  0x35   : > { %p3700_p7 = pnand %p3698_p5, %p3658_p13  ;;  %p3707_p2 = por %p3706_p0, %p3705_p12 }
  0x37   : > { %p3701_p9 = pneg %p3700_p7 }
  0x39   : > { %p3708_p1 = pnand %p3707_p2, %p3701_p9 }
  0x3b   : > { %3711 = shalt.err (!%p3708_p1)
}
  0x3c   : > { %3444 = dma.hbm_to_vmem [thread:$0]  (!%p3896_p11), %s5087_s2, 32, %s3900_s25, [#allocation6]  }
  0x3d   : > { %s3955_s4 = sadd.s32 1, %s3812_s15   ;;  %s27_s23 = sadd.s32 1, %s3808_s14 }
  0x3e   : > { %s24_s5 = ssub.s32 %s3812_s15, %s3955_s4  ;;  %p34_p13 = scmp.ne.s32.totalorder %s3808_s14, %s3804_s13 }
  0x3f   : > { %p25_p6 = scmp.eq.s32.totalorder %s24_s5, 0  ;;  %p35_p10 = scmp.eq.s32.totalorder %s3812_s15, 0 }
  0x40   : > { %p5119_p3 = scmp.eq.s32.totalorder %s3866_s16, 1  ;;  %p3455_p7 = scmp.lt.s32.totalorder %s3812_s15, 2 }
  0x41   : > { %s3971_s7 = scalar_select %p25_p6, %s3808_s14, %s27_s23  }
  0x42   : > { %p3965_p5 = por %p5119_p3, %p34_p13  ;;  %p36_p9 = por %p35_p10, %p34_p13 }
  0x43   : > { %s156_s8 = sand.u32 1, %s3808_s14   ;;  %s3073_s25 = sshll.u32 %s3812_s15, 11 }
  0x44   : > { %s5120_s6 = scalar_select %p3965_p5, 1, 0 }
  0x45   : > { %s2892_s9 = sshll.u32 %s156_s8, 7  ;;  %s3978_s17 = scalar_lea.hbm %s5085_s0, %s3073_s25 }
  0x46   : > { %s160_s21 = scalar_lea.vmem [#allocation2], %s2892_s9  ;;  %p3982_p11 = pnand %p3455_p7, %p36_p9 }
  0x47   : > { %s167_s24 = sshll.u32 %s160_s21, 4  ;;  %s3986_s27 = scalar_lea.sflag [#allocation3], %s156_s8  ;;  %s3980_s24 = int_to_ptr.vmem [resolvable:$true] %s167_s24 }
  0x48   : > { %s3712_s28 = scalar_lea.hbm %s3978_s17, 2048  ;;  %p3714_p0 = pneg %p3982_p11 }
  0x49   : > { %p3713_p12 = scmp.ne.s32.totalorder %s3978_s17, %s3712_s28  ;;  %s3717_s30 = scalar_lea.hbm %s5085_s0, 4096 }
  0x4a   : > { %p3718_p13 = scmp.lt.u32.totalorder %s3978_s17, %s5085_s0  ;;  %p3719_p6 = scmp.lt.u32.totalorder %s3717_s30, %s3712_s28 }
  0x4b   : > { %p3715_p2 = pnand %p3714_p0, %p3713_p12  ;;  %p3721_p3 = scmp.lt.u32.totalorder %s3712_s28, %s3978_s17 }
  0x4c   : > { %p3720_p10 = por %p3719_p6, %p3718_p13 }
  0x4d   : > { %p3716_p1 = pneg %p3715_p2 }
  0x4e   : > { %p3722_p7 = por %p3721_p3, %p3720_p10 }
  0x50   : > { %p3723_p9 = pnand %p3722_p7, %p3716_p1 }
  0x52   : > { %3726 = shalt.err (!%p3723_p9)
}
  0x53   : > { %s3727_s8 = scalar_lea.vmem %s3980_s24, 2048  ;;  %s3818_s9 = smov [#allocation2]  }
  0x54   : > { %p3728_p12 = scmp.ne.s32.totalorder %s3980_s24, %s3727_s8  ;;  %s3732_s25 = sshll.u32 %s3818_s9, 4  ;;  %s3733_s25 = int_to_ptr.vmem [resolvable:$false] %s3732_s25 }
  0x55   : > { %s3734_s10 = scalar_lea.vmem %s3733_s25, 4096  ;;  %p3735_p4 = scmp.lt.s32.totalorder %s3980_s24, %s3733_s25 }
  0x56   : > { %p3730_p2 = pnand %p3728_p12, %p3714_p0  ;;  %p3736_p13 = scmp.lt.s32.totalorder %s3734_s10, %s3727_s8 }
  0x58   : > { %p3731_p5 = pneg %p3730_p2  ;;  %p3737_p6 = por %p3736_p13, %p3735_p4 }
  0x5a   : > { %p3738_p10 = pnand %p3737_p6, %p3731_p5 }
  0x5c   : > { %3741 = shalt.err (!%p3738_p10)
}
  0x5d   : > { %s3819_s11 = smov 64   ;;  %s3820_s21 = smov 4  }
  0x5e   : > { %3448 = dma.hbm_to_vmem [thread:$0]  (!%p3982_p11), %s3978_s17, 2048, %s3980_s24, %s3986_s27, %s3819_s11, %s3819_s11, %s3820_s21  }
  0x5f   : > { %179 = sbr.rel (%p3885_p8) target bundleno = 847 (0x34f), region = 32 }
  0x66   : > { %s4017_s28 = sand.u32 1, %s3804_s13   ;;  %p5122_p4 = scmp.ne.s32.totalorder %s5115_s18, 0 }
  0x67   : > { %s2896_s22 = sshll.u32 %s4017_s28, 7  ;;  %s182_s29 = scalar_lea.sflag [#allocation3], %s4017_s28 }
  0x68   : > { %s4023_s30 = scalar_lea.vmem [#allocation2], %s2896_s22 }
  0x69   : > { %3787 = dma.done.wait (%p5122_p4), %s182_s29, 2048  }
  0x6a   : > { %3789 = vsyncadd (%p5122_p4), %s182_s29, 4294965248  ;;  %p5123_p5 = scmp.eq.s32.totalorder %s3866_s16, 0 }
  0x6c   : > { %3791 = dma.done.wait (%p5123_p5), [#allocation6], 9248   ;;  %p5124_p8 = pmov %p5123_p5 }
  0x6d   : > { %vm649_vm0 = vcmask 1040384   ;;  %vm650_vm1 = vsmask.f32 256  ;;  %v217_v0 = vld [vmem:[%s4023_s30] sm:$0xf]  ;;  %s3821_s18 = smov 64  }
  0x6e   : > { %3793 = vsyncadd (%p5124_p8), [#allocation6], 4294958048  ;;  %v218_v1 = vld [vmem:[%s4023_s30 + $0x4] sm:$0xf]  ;;  %v219_v2 = vld [vmem:[%s4023_s30 + $0x8] sm:$0xf]  ;;  %v2901_v3 = vcombine.low %v217_v0, %v217_v0 }
  0x6f   : > { %v2917_v4 = vcombine.low %v217_v0, %v218_v1  ;;  %v2933_v5 = vcombine.low %v218_v1, %v218_v1  ;;  %v220_v6 = vld [vmem:[%s4023_s30 + $0xc] sm:$0xf]  ;;  %v2900_v7 = vcombine.low %v219_v2, %v219_v2  ;;  %v221_v8 = vld [vmem:[%s4023_s30 + $0x10] sm:$0xf]  ;;  %v222_v9 = vld [vmem:[%s4023_s30 + $0x14] sm:$0xf] }
  0x70   : > { %v2916_v10 = vcombine.low %v219_v2, %v220_v6  ;;  %v2932_v11 = vcombine.low %v220_v6, %v220_v6  ;;  %v2902_v12 = vcombine.low %v221_v8, %v221_v8  ;;  %v2918_v13 = vcombine.low %v221_v8, %v222_v9  ;;  %vm4041_vm3 = vmand %vm649_vm0, %vm650_vm1  ;;  %v223_v31 = vld [vmem:[%s4023_s30 + $0x18] sm:$0xf]  ;;  %v224_v43 = vld [vmem:[%s4023_s30 + $0x1c] sm:$0xf]  ;;  %s4853_s20 = scalar_lea.vmem [#allocation8], %s2896_s22  ;;  %s3106_s17 = sshll.u32 %s3866_s16, 11 }
  0x71   : > { %v301_v14 = vshrl.u32 %v2901_v3, 16  ;;  %v417_v15 = vshrl.u32 %v2917_v4, 16  ;;  %v420_v16 = vshll.u32 %v2917_v4, 16  ;;  %v574_v17 = vshll.u32 %v2933_v5, 16  ;;  %v225_v57 = vld [vmem:[%s4023_s30 + $0x20] sm:$0xf]  ;;  %s5036_s23 = scalar_lea.hbm %s5088_s3, %s3106_s17 }
  0x72   : > { %v298_v18 = vshrl.u32 %v2900_v7, 16  ;;  %v410_v19 = vshrl.u32 %v2916_v10, 16  ;;  %v413_v20 = vshll.u32 %v2916_v10, 16  ;;  %v570_v21 = vshll.u32 %v2932_v11, 16  ;;  %v226_v62 = vld [vmem:[%s4023_s30 + $0x24] sm:$0xf] }
  0x73   : > { %v419_v22 = vrot.slane %v417_v15, 7  ;;  %v576_v23 = vrot.slane %v574_v17, 3  ;;  %vm684_vm2 = vsmask.f32 7424  ;;  %v304_v24 = vshrl.u32 %v2902_v12, 16  ;;  %s2795_s24 = sshll.u32 %s4853_s20, 4  ;;  %s5038_s24 = int_to_ptr.vmem [resolvable:$true] %s2795_s24 }
  0x74   : > { %v424_v25 = vshrl.u32 %v2918_v13, 16  ;;  %v412_v27 = vrot.slane %v410_v19, 7  ;;  %v572_v28 = vrot.slane %v570_v21, 3  ;;  %v427_v29 = vshll.u32 %v2918_v13, 16  ;;  %v227_v11 = vld [vmem:[%s4023_s30 + $0x28] sm:$0xf] }
  0x75   : > { %v2934_v30 = vcombine.low %v222_v9, %v222_v9  ;;  %v422_v32 = vor.u32 %v420_v16, %v419_v22  ;;  %v4048_v33 = vsel %vm4041_vm3, %v419_v22, %v576_v23  ;;  %v2903_v35 = vcombine.low %v223_v31, %v223_v31  ;;  %v228_v12 = vld [vmem:[%s4023_s30 + $0x2c] sm:$0xf]  ;;  %s2782_s5 = scalar_lea.sflag [#allocation4], %s4017_s28  ;;  %s3742_s8 = scalar_lea.vmem %s5038_s24, 2048 }
  0x76   : > { %v426_v34 = vrot.slane %v424_v25, 7  ;;  %v705_v36 = vshll.u32 %v4048_v33, 16  ;;  %v415_v37 = vor.u32 %v413_v20, %v412_v27  ;;  %v4053_v38 = vsel %vm4041_vm3, %v412_v27, %v572_v28  ;;  %p3743_p11 = scmp.ne.s32.totalorder %s5038_s24, %s3742_s8  ;;  %p5173_p0 = scmp.ne.s32.totalorder %s5120_s6, 0 }
  0x77   : > { %v578_v39 = vshll.u32 %v2934_v30, 16  ;;  %v4057_v40 = vsel %vm4041_vm3, %v301_v14, %v422_v32  ;;  %v693_v41 = vshll.u32 %v4053_v38, 16  ;;  %v307_v44 = vshrl.u32 %v2903_v35, 16  ;;  %v229_v30 = vld [vmem:[%s4023_s30 + $0x30] sm:$0xf]  ;;  %s3823_s16 = smov [#allocation8]  }
  0x78   : > { %v429_v42 = vor.u32 %v427_v29, %v426_v34  ;;  %v698_v45 = vshrl.u32 %v4057_v40, 16  ;;  %v700_v46 = vshll.u32 %v4057_v40, 16  ;;  %v707_v47 = vrot.slane %v705_v36, 1  ;;  %v230_v36 = vld [vmem:[%s4023_s30 + $0x34] sm:$0xf]  ;;  %p3744_p1 = pnand %p3743_p11, %p5173_p0  ;;  %s3746_s9 = sshll.u32 %s3823_s16, 4  ;;  %s3747_s9 = int_to_ptr.vmem [resolvable:$false] %s3746_s9 }
  0x79   : > { %v4065_v48 = vsel %vm4041_vm3, %v298_v18, %v415_v37  ;;  %v695_v51 = vrot.slane %v693_v41, 1  ;;  %v580_v52 = vrot.slane %v578_v39, 3  ;;  %v2919_v55 = vcombine.low %v223_v31, %v224_v43  ;;  %s3748_s25 = scalar_lea.vmem %s3747_s9, 4096  ;;  %p3749_p7 = scmp.lt.s32.totalorder %s5038_s24, %s3747_s9 }
  0x7a   : > { %v686_v49 = vshrl.u32 %v4065_v48, 16  ;;  %v688_v50 = vshll.u32 %v4065_v48, 16  ;;  %v702_v53 = vrot.slane %v700_v46, 1  ;;  %v4071_v54 = vsel %vm4041_vm3, %v304_v24, %v429_v42  ;;  %p3745_p3 = pneg %p3744_p1  ;;  %p3750_p9 = scmp.lt.s32.totalorder %s3748_s25, %s3742_s8 }
  0x7b   : > { %v2935_v56 = vcombine.low %v224_v43, %v224_v43  ;;  %v4076_v59 = vsel %vm4041_vm3, %v426_v34, %v580_v52  ;;  %v710_v60 = vshrl.u32 %v4071_v54, 16  ;;  %v712_v61 = vshll.u32 %v4071_v54, 16 }
  0x7c   : > { %v690_v58 = vrot.slane %v688_v50, 1  ;;  %v703_v63 = vor.u32 %v702_v53, %v698_v45  ;;  %v717_v0 = vshll.u32 %v4076_v59, 16  ;;  %v431_v1 = vshrl.u32 %v2919_v55, 16  ;;  %p3751_p12 = por %p3750_p9, %p3749_p7 }
  0x7d   : > { %v434_v2 = vshll.u32 %v2919_v55, 16  ;;  %v714_v4 = vrot.slane %v712_v61, 1  ;;  %v582_v5 = vshll.u32 %v2935_v56, 16  ;;  %v2904_v6 = vcombine.low %v225_v57, %v225_v57 }
  0x7e   : > { %v691_v3 = vor.u32 %v690_v58, %v686_v49  ;;  %v708_v7 = vsel %vm684_vm2, %v703_v63, %v707_v47  ;;  %v719_v8 = vrot.slane %v717_v0, 1  ;;  %v433_v9 = vrot.slane %v431_v1, 7  ;;  %v232_v58 = vld [vmem:[%s4023_s30 + $0x3c] sm:$0xf]  ;;  %p3752_p2 = pnand %p3751_p12, %p3745_p3 }
  0x7f   : > { %v2920_v10 = vcombine.low %v225_v57, %v226_v62  ;;  %879 = vrot.lane.b32.xlu0 %v708_v7, %s3821_s18  ;;  %v715_v14 = vor.u32 %v714_v4, %v710_v60  ;;  %v584_v15 = vrot.slane %v582_v5, 3  ;;  %v310_v16 = vshrl.u32 %v2904_v6, 16  ;;  %v231_v57 = vld [vmem:[%s4023_s30 + $0x38] sm:$0xf] }
  0x80   : > { %v696_v13 = vsel %vm684_vm2, %v691_v3, %v695_v51  ;;  %v436_v17 = vor.u32 %v434_v2, %v433_v9  ;;  %v2936_v20 = vcombine.low %v226_v62, %v226_v62  ;;  %v2905_v23 = vcombine.low %v227_v11, %v227_v11 }
  0x81   : > { %v438_v18 = vshrl.u32 %v2920_v10, 16  ;;  %v441_v19 = vshll.u32 %v2920_v10, 16  ;;  %v720_v21 = vsel %vm684_vm2, %v715_v14, %v719_v8  ;;  %v4090_v22 = vsel %vm4041_vm3, %v433_v9, %v584_v15 }
  0x82   : > { %v2921_v24 = vcombine.low %v227_v11, %v228_v12  ;;  %881 = vrot.lane.b32.xlu1 %v720_v21, %s3821_s18  ;;  %v4095_v25 = vsel %vm4041_vm3, %v307_v44, %v436_v17  ;;  %v729_v27 = vshll.u32 %v4090_v22, 16  ;;  %v586_v29 = vshll.u32 %v2936_v20, 16 }
  0x83   : > { %v440_v28 = vrot.slane %v438_v18, 7  ;;  %877 = vrot.lane.b32.xlu0 %v696_v13, %s3821_s18  ;;  %v722_v31 = vshrl.u32 %v4095_v25, 16  ;;  %v724_v32 = vshll.u32 %v4095_v25, 16  ;;  %v313_v34 = vshrl.u32 %v2905_v23, 16 }
  0x84   : > { %v445_v35 = vshrl.u32 %v2921_v24, 16  ;;  %v731_v37 = vrot.slane %v729_v27, 1  ;;  %v588_v41 = vrot.slane %v586_v29, 3  ;;  %v448_v42 = vshll.u32 %v2921_v24, 16 }
  0x85   : > { %v443_v39 = vor.u32 %v441_v19, %v440_v28  ;;  %v726_v43 = vrot.slane %v724_v32, 1  ;;  %v2937_v45 = vcombine.low %v228_v12, %v228_v12  ;;  %v2906_v46 = vcombine.low %v229_v30, %v229_v30 }
  0x86   : > { %v447_v44 = vrot.slane %v445_v35, 7  ;;  %v4109_v49 = vsel %vm4041_vm3, %v440_v28, %v588_v41  ;;  %v2922_v50 = vcombine.low %v229_v30, %v230_v36  ;;  %v2938_v51 = vcombine.low %v230_v36, %v230_v36 }
  0x87   : > { %v4105_v47 = vsel %vm4041_vm3, %v310_v16, %v443_v39  ;;  %v727_v52 = vor.u32 %v726_v43, %v722_v31  ;;  %v741_v56 = vshll.u32 %v4109_v49, 16  ;;  %v590_v61 = vshll.u32 %v2937_v45, 16 }
  0x88   : > { %v734_v53 = vshrl.u32 %v4105_v47, 16  ;;  %v736_v55 = vshll.u32 %v4105_v47, 16  ;;  %v450_v60 = vor.u32 %v448_v42, %v447_v44  ;;  %v316_v62 = vshrl.u32 %v2906_v46, 16 }
  0x89   : > { %v452_v63 = vshrl.u32 %v2922_v50, 16  ;;  %v732_v0 = vsel %vm684_vm2, %v727_v52, %v731_v37  ;;  %v743_v2 = vrot.slane %v741_v56, 1  ;;  %v455_v3 = vshll.u32 %v2922_v50, 16 }
  0x8a   : > { %v738_v1 = vrot.slane %v736_v55, 1  ;;  %883 = vrot.lane.b32.xlu1 %v732_v0, %s3821_s18  ;;  %v592_v4 = vrot.slane %v590_v61, 3  ;;  %v4120_v5 = vsel %vm4041_vm3, %v313_v34, %v450_v60  ;;  %v594_v7 = vshll.u32 %v2938_v51, 16  ;;  %v4168_v0 = vld [vmem:[#allocation5 + $0x100] ss:$8 sps:$4 sm:$0xff]  }
  0x8b   : > { %v454_v6 = vrot.slane %v452_v63, 7  ;;  %v746_v9 = vshrl.u32 %v4120_v5, 16  ;;  %v748_v10 = vshll.u32 %v4120_v5, 16  ;;  %v2907_v11 = vcombine.low %v231_v57, %v231_v57  ;;  %v3550_v63 = vld [vmem:[#allocation5 + $0x4] ss:$8 sps:$4 sm:$0xff]  }
  0x8c   : > { %v739_v8 = vor.u32 %v738_v1, %v734_v53  ;;  %v4126_v12 = vsel %vm4041_vm3, %v447_v44, %v592_v4  ;;  %v596_v14 = vrot.slane %v594_v7, 3  ;;  %v2923_v15 = vcombine.low %v231_v57, %v232_v58  ;;  %1690 = vmatprep.subr.bf16.mxu1 %v3550_v63  ;;  %v4172_v1 = vld [vmem:[#allocation5 + $0x114] ss:$8 sps:$4 sm:$0xff]   ;;  %v3559_v4 = vld [vmem:[#allocation5 + $0x10] ss:$8 sps:$4 sm:$0xff]  }
  0x8d   : > { %v457_v13 = vor.u32 %v455_v3, %v454_v6  ;;  %v750_v17 = vrot.slane %v748_v10, 1  ;;  %v753_v18 = vshll.u32 %v4126_v12, 16  ;;  %v319_v31 = vshrl.u32 %v2907_v11, 16  ;;  %v4174_v3 = vld [vmem:[#allocation5 + $0x110] ss:$8 sps:$4 sm:$0xff]  }
  0x8e   : > { %v744_v16 = vsel %vm684_vm2, %v739_v8, %v743_v2  ;;  %v4137_v20 = vsel %vm4041_vm3, %v454_v6, %v596_v14  ;;  %v459_v21 = vshrl.u32 %v2923_v15, 16  ;;  %v462_v23 = vshll.u32 %v2923_v15, 16  ;;  %v3556_v2 = vld [vmem:[#allocation5 + $0x14] ss:$8 sps:$4 sm:$0xff]   ;;  %v4177_v6 = vld [vmem:[#allocation5 + $0x124] ss:$8 sps:$4 sm:$0xff]  }
  0x8f   : > { %885 = vrot.lane.b32.xlu0 %v744_v16, %s3821_s18  ;;  %v4133_v19 = vsel %vm4041_vm3, %v316_v62, %v457_v13  ;;  %v751_v24 = vor.u32 %v750_v17, %v746_v9  ;;  %v755_v27 = vrot.slane %v753_v18, 1  ;;  %v765_v30 = vshll.u32 %v4137_v20, 16  ;;  %v4164_v62 = vld [vmem:[#allocation5 + $0x104] ss:$8 sps:$4 sm:$0xff]   ;;  %v4180_v8 = vld [vmem:[#allocation5 + $0x120] ss:$8 sps:$4 sm:$0xff]  }
  0x90   : > { %v758_v28 = vshrl.u32 %v4133_v19, 16  ;;  %v760_v29 = vshll.u32 %v4133_v19, 16  ;;  %v461_v32 = vrot.slane %v459_v21, 7  ;;  %v2939_v34 = vcombine.low %v232_v58, %v232_v58  ;;  %1883 = vmatprep.subr.bf16.mxu0 %v4164_v62  ;;  %v3562_v7 = vld [vmem:[#allocation5 + $0x24] ss:$8 sps:$4 sm:$0xff]  }
  0x91   : > { %v756_v35 = vsel %vm684_vm2, %v751_v24, %v755_v27  ;;  %v767_v37 = vrot.slane %v765_v30, 1  ;;  %v945_v57 = vrot.slane %v4057_v40, 1  ;;  %v946_v58 = vrot.slane %v4048_v33, 1  ;;  %v3553_v33 = vld [vmem:[#allocation5] ss:$8 sps:$4 sm:$0xff]   ;;  %1884 = vmatpush1.bf16.msra.mxu0 %v4168_v0 }
  0x92   : > { %v762_v36 = vrot.slane %v760_v29, 1  ;;  %887 = vrot.lane.b32.xlu1 %v756_v35, %s3821_s18  ;;  %v464_v39 = vor.u32 %v462_v23, %v461_v32  ;;  %v598_v41 = vshll.u32 %v2939_v34, 16  ;;  %vm941_vm4 = vcmask 1046528   ;;  %1691 = vmatpush1.bf16.msra.mxu1 %v3553_v33  ;;  %v3565_v9 = vld [vmem:[#allocation5 + $0x20] ss:$8 sps:$4 sm:$0xff]  }
  0x93   : > { %v4162_v61 = vsel %vm941_vm4, %v945_v57, %v946_v58  ;;  %1885 = vmatprep.subr.bf16.mxu0 %v4172_v1  ;;  %1692 = vmatprep.subr.bf16.mxu1 %v3556_v2  ;;  %v4183_v10 = vld [vmem:[#allocation5 + $0x134] ss:$8 sps:$4 sm:$0xff]   ;;  %v4186_v13 = vld [vmem:[#allocation5 + $0x130] ss:$8 sps:$4 sm:$0xff]   ;;  %v4189_v15 = vld [vmem:[#allocation5 + $0x144] ss:$8 sps:$4 sm:$0xff]  }
  0x94   : > { %v763_v42 = vor.u32 %v762_v36, %v758_v28  ;;  %v600_v43 = vrot.slane %v598_v41, 3  ;;  %v4146_v44 = vsel %vm4041_vm3, %v319_v31, %v464_v39  ;;  %v3568_v11 = vld [vmem:[#allocation5 + $0x34] ss:$8 sps:$4 sm:$0xff]   ;;  %v3571_v14 = vld [vmem:[#allocation5 + $0x30] ss:$8 sps:$4 sm:$0xff]   ;;  %vm990_vm5 = vcmask 523264  }
  0x95   : > { %v770_v46 = vshrl.u32 %v4146_v44, 16  ;;  %v772_v50 = vshll.u32 %v4146_v44, 16  ;;  %1886 = vmatpush1.bf16.msra.mxu0 %v4174_v3  ;;  %v3574_v16 = vld [vmem:[#allocation5 + $0x44] ss:$8 sps:$4 sm:$0xff]   ;;  %v4192_v17 = vld [vmem:[#allocation5 + $0x140] ss:$8 sps:$4 sm:$0xff]  }
  0x96   : > { %v768_v45 = vsel %vm684_vm2, %v763_v42, %v767_v37  ;;  %v4154_v51 = vsel %vm4041_vm3, %v461_v32, %v600_v43  ;;  %1693 = vmatpush1.bf16.msra.mxu1 %v3559_v4  ;;  %1887 = vmatprep.subr.bf16.mxu0 %v4177_v6  ;;  %v3577_v18 = vld [vmem:[#allocation5 + $0x40] ss:$8 sps:$4 sm:$0xff]   ;;  %v4195_v21 = vld [vmem:[#allocation5 + $0x154] ss:$8 sps:$4 sm:$0xff]   ;;  %v4198_v24 = vld [vmem:[#allocation5 + $0x150] ss:$8 sps:$4 sm:$0xff]  }
  0x97   : > { %889 = vrot.lane.b32.xlu0 %v768_v45, %s3821_s18  ;;  %v774_v52 = vrot.slane %v772_v50, 1  ;;  %v777_v53 = vshll.u32 %v4154_v51, 16  ;;  %1694 = vmatprep.subr.bf16.mxu1 %v3562_v7  ;;  %v3580_v23 = vld [vmem:[#allocation5 + $0x54] ss:$8 sps:$4 sm:$0xff]   ;;  %v3583_v27 = vld [vmem:[#allocation5 + $0x50] ss:$8 sps:$4 sm:$0xff]  }
  0x98   : > { %v4201_v28 = vld [vmem:[#allocation5 + $0x164] ss:$8 sps:$4 sm:$0xff]   ;;  %v4204_v30 = vld [vmem:[#allocation5 + $0x160] ss:$8 sps:$4 sm:$0xff]   ;;  %v4207_v32 = vld [vmem:[#allocation5 + $0x174] ss:$8 sps:$4 sm:$0xff]  }
  0x99   : > { %v775_v55 = vor.u32 %v774_v52, %v770_v46  ;;  %v779_v56 = vrot.slane %v777_v53, 1  ;;  %1888 = vmatpush1.bf16.msra.mxu0 %v4180_v8  ;;  %v3586_v29 = vld [vmem:[#allocation5 + $0x64] ss:$8 sps:$4 sm:$0xff]   ;;  %5127 = vst [vmem:[#allocation12_spill] sm:$0xff] %v4204_v30  ;;  %v3589_v31 = vld [vmem:[#allocation5 + $0x60] ss:$8 sps:$4 sm:$0xff]  }
  0x9a   : > { %1695 = vmatpush1.bf16.msra.mxu1 %v3565_v9  ;;  %1889 = vmatprep.subr.bf16.mxu0 %v4183_v10  ;;  %5128 = vst [vmem:[#allocation13_spill] sm:$0xff] %v4207_v32  ;;  %v3592_v34 = vld [vmem:[#allocation5 + $0x74] ss:$8 sps:$4 sm:$0xff]   ;;  %v4210_v35 = vld [vmem:[#allocation5 + $0x170] ss:$8 sps:$4 sm:$0xff]  }
  0x9b   : > { %v780_v60 = vsel %vm684_vm2, %v775_v55, %v779_v56  ;;  %1696 = vmatprep.subr.bf16.mxu1 %v3568_v11  ;;  %5129 = vst [vmem:[#allocation14_spill] sm:$0xff] %v4210_v35  ;;  %v3595_v36 = vld [vmem:[#allocation5 + $0x70] ss:$8 sps:$4 sm:$0xff]   ;;  %v4213_v37 = vld [vmem:[#allocation5 + $0x184] ss:$8 sps:$4 sm:$0xff]  }
  0x9c   : > { %891 = vrot.lane.b32.xlu1 %v780_v60, %s3821_s18  ;;  %5130 = vst [vmem:[#allocation15_spill] sm:$0xff] %v4213_v37  ;;  %v3598_v39 = vld [vmem:[#allocation5 + $0x84] ss:$8 sps:$4 sm:$0xff]   ;;  %v4216_v41 = vld [vmem:[#allocation5 + $0x180] ss:$8 sps:$4 sm:$0xff]  }
  0x9d   : > { %1890 = vmatpush1.bf16.msra.mxu0 %v4186_v13  ;;  %5131 = vst [vmem:[#allocation16_spill] sm:$0xff] %v4216_v41  ;;  %v3601_v42 = vld [vmem:[#allocation5 + $0x80] ss:$8 sps:$4 sm:$0xff]   ;;  %v4219_v43 = vld [vmem:[#allocation5 + $0x194] ss:$8 sps:$4 sm:$0xff]  }
  0x9e   : > { %1697 = vmatpush1.bf16.msra.mxu1 %v3571_v14  ;;  %1891 = vmatprep.subr.bf16.mxu0 %v4189_v15  ;;  %5132 = vst [vmem:[#allocation17_spill] sm:$0xff] %v4219_v43  ;;  %v3604_v45 = vld [vmem:[#allocation5 + $0x94] ss:$8 sps:$4 sm:$0xff]   ;;  %v4222_v46 = vld [vmem:[#allocation5 + $0x190] ss:$8 sps:$4 sm:$0xff]  }
  0x9f   : > { %1698 = vmatprep.subr.bf16.mxu1 %v3574_v16  ;;  %5133 = vst [vmem:[#allocation18_spill] sm:$0xff] %v4222_v46  ;;  %v3607_v50 = vld [vmem:[#allocation5 + $0x90] ss:$8 sps:$4 sm:$0xff]   ;;  %v4225_v52 = vld [vmem:[#allocation5 + $0x1a4] ss:$8 sps:$4 sm:$0xff]  }
  0xa0   : > { %1057 = vrot.lane.b32.xlu1 %v4162_v61, %s3821_s18  ;;  %5134 = vst [vmem:[#allocation19_spill] sm:$0xff] %v4225_v52  ;;  %v3610_v53 = vld [vmem:[#allocation5 + $0xa4] ss:$8 sps:$4 sm:$0xff]   ;;  %v4228_v55 = vld [vmem:[#allocation5 + $0x1a0] ss:$8 sps:$4 sm:$0xff]  }
  0xa1   : > { %1892 = vmatpush1.bf16.msra.mxu0 %v4192_v17  ;;  %5135 = vst [vmem:[#allocation20_spill] sm:$0xff] %v4228_v55  ;;  %v3613_v56 = vld [vmem:[#allocation5 + $0xa0] ss:$8 sps:$4 sm:$0xff]   ;;  %v4231_v57 = vld [vmem:[#allocation5 + $0x1b4] ss:$8 sps:$4 sm:$0xff]  }
  0xa2   : > { %1699 = vmatpush1.bf16.msra.mxu1 %v3577_v18  ;;  %1893 = vmatprep.subr.bf16.mxu0 %v4195_v21  ;;  %5136 = vst [vmem:[#allocation21_spill] sm:$0xff] %v4231_v57  ;;  %v3616_v58 = vld [vmem:[#allocation5 + $0xb4] ss:$8 sps:$4 sm:$0xff]   ;;  %v4234_v60 = vld [vmem:[#allocation5 + $0x1b0] ss:$8 sps:$4 sm:$0xff]  }
  0xa3   : > { %1700 = vmatprep.subr.bf16.mxu1 %v3580_v23  ;;  %5137 = vst [vmem:[#allocation22_spill] sm:$0xff] %v4234_v60  ;;  %v3619_v63 = vld [vmem:[#allocation5 + $0xb0] ss:$8 sps:$4 sm:$0xff]   ;;  %v4237_v33 = vld [vmem:[#allocation5 + $0x1c4] ss:$8 sps:$4 sm:$0xff]  }
  0xa4   : > { %5138 = vst [vmem:[#allocation23_spill] sm:$0xff] %v4237_v33  ;;  %v3622_v2 = vld [vmem:[#allocation5 + $0xc4] ss:$8 sps:$4 sm:$0xff]   ;;  %v4240_v4 = vld [vmem:[#allocation5 + $0x1c0] ss:$8 sps:$4 sm:$0xff]  }
  0xa5   : > { %1894 = vmatpush1.bf16.msra.mxu0 %v4198_v24  ;;  %5139 = vst [vmem:[#allocation24_spill] sm:$0xff] %v4240_v4  ;;  %v3625_v7 = vld [vmem:[#allocation5 + $0xc0] ss:$8 sps:$4 sm:$0xff]   ;;  %v4243_v9 = vld [vmem:[#allocation5 + $0x1d4] ss:$8 sps:$4 sm:$0xff]  }
  0xa6   : > { %1701 = vmatpush1.bf16.msra.mxu1 %v3583_v27  ;;  %1895 = vmatprep.subr.bf16.mxu0 %v4201_v28  ;;  %5140 = vst [vmem:[#allocation25_spill] sm:$0xff] %v4243_v9  ;;  %v233_v11 = vld [vmem:[%s4023_s30 + $0x40] sm:$0xf]  ;;  %v234_v14 = vld [vmem:[%s4023_s30 + $0x44] sm:$0xf] }
  0xa7   : > { %1702 = vmatprep.subr.bf16.mxu1 %v3586_v29  ;;  %v3628_v16 = vld [vmem:[#allocation5 + $0xd4] ss:$8 sps:$4 sm:$0xff]   ;;  %v4248_v18 = vld [vmem:[#allocation5 + $0x1d0] ss:$8 sps:$4 sm:$0xff]   ;;  %v2924_v23 = vcombine.low %v233_v11, %v234_v14  ;;  %v4251_v29 = vld [vmem:[#allocation5 + $0x1e4] ss:$8 sps:$4 sm:$0xff]  }
  0xa8   : > { %5141 = vst [vmem:[#allocation26_spill] sm:$0xff] %v4248_v18  ;;  %v3631_v27 = vld [vmem:[#allocation5 + $0xd0] ss:$8 sps:$4 sm:$0xff]   ;;  %5142 = vst [vmem:[#allocation27_spill] sm:$0xff] %v4251_v29 }
  0xa9   : > { %1896 = vmatpush1.bf16.msra.mxu0 %v4204_v30 }
  0xaa   : > { %1703 = vmatpush1.bf16.msra.mxu1 %v3589_v31  ;;  %1897 = vmatprep.subr.bf16.mxu0 %v4207_v32  ;;  %v3634_v31 = vld [vmem:[#allocation5 + $0xe4] ss:$8 sps:$4 sm:$0xff]  }
  0xab   : > { %1704 = vmatprep.subr.bf16.mxu1 %v3592_v34  ;;  %v235_v34 = vld [vmem:[%s4023_s30 + $0x48] sm:$0xf] }
  0xad   : > { %1898 = vmatpush1.bf16.msra.mxu0 %v4210_v35  ;;  %v942_v35 = vrot.slane %v4065_v48, 1 }
  0xae   : > { %1705 = vmatpush1.bf16.msra.mxu1 %v3595_v36  ;;  %1899 = vmatprep.subr.bf16.mxu0 %v4213_v37  ;;  %v236_v36 = vld [vmem:[%s4023_s30 + $0x4c] sm:$0xf] }
  0xaf   : > { %1706 = vmatprep.subr.bf16.mxu1 %v3598_v39  ;;  %v4256_v39 = vld [vmem:[#allocation5 + $0x1e0] ss:$8 sps:$4 sm:$0xff]  }
  0xb0   : > { %5143 = vst [vmem:[#allocation28_spill] sm:$0xff] %v4256_v39 }
  0xb1   : > { %1900 = vmatpush1.bf16.msra.mxu0 %v4216_v41 }
  0xb2   : > { %1707 = vmatpush1.bf16.msra.mxu1 %v3601_v42  ;;  %1901 = vmatprep.subr.bf16.mxu0 %v4219_v43  ;;  %v466_v42 = vshrl.u32 %v2924_v23, 16 }
  0xb3   : > { %1708 = vmatprep.subr.bf16.mxu1 %v3604_v45  ;;  %v3637_v45 = vld [vmem:[#allocation5 + $0xe0] ss:$8 sps:$4 sm:$0xff]  }
  0xb5   : > { %1902 = vmatpush1.bf16.msra.mxu0 %v4222_v46 }
  0xb6   : > { %1709 = vmatpush1.bf16.msra.mxu1 %v3607_v50  ;;  %1903 = vmatprep.subr.bf16.mxu0 %v4225_v52  ;;  %v4259_v50 = vld [vmem:[#allocation5 + $0x1f4] ss:$8 sps:$4 sm:$0xff]  }
  0xb7   : > { %1710 = vmatprep.subr.bf16.mxu1 %v3610_v53  ;;  %5144 = vst [vmem:[#allocation29_spill] sm:$0xff] %v4259_v50  ;;  %v3640_v53 = vld [vmem:[#allocation5 + $0xf4] ss:$8 sps:$4 sm:$0xff]  }
  0xb9   : > { %1904 = vmatpush1.bf16.msra.mxu0 %v4228_v55  ;;  %v4281_v55 = vld [vmem:[%s4023_s30 + $0x60] sm:$0xf] }
  0xba   : > { %1711 = vmatpush1.bf16.msra.mxu1 %v3613_v56  ;;  %1905 = vmatprep.subr.bf16.mxu0 %v4231_v57  ;;  %v2925_v56 = vcombine.low %v235_v34, %v236_v36 }
  0xbb   : > { %1712 = vmatprep.subr.bf16.mxu1 %v3616_v58  ;;  %v2940_v58 = vcombine.low %v234_v14, %v234_v14 }
  0xbd   : > { %1906 = vmatpush1.bf16.msra.mxu0 %v4234_v60 }
  0xbe   : > { %1713 = vmatpush1.bf16.msra.mxu1 %v3619_v63  ;;  %1907 = vmatprep.subr.bf16.mxu0 %v4237_v33  ;;  %v4262_v63 = vld [vmem:[#allocation5 + $0x1f0] ss:$8 sps:$4 sm:$0xff]  }
  0xbf   : > { %1714 = vmatprep.subr.bf16.mxu1 %v3622_v2  ;;  %5145 = vst [vmem:[#allocation30_spill] sm:$0xff] %v4262_v63  ;;  %v2908_v2 = vcombine.low %v233_v11, %v233_v11  ;;  %v239_v11 = vld [vmem:[%s4023_s30 + $0x58] sm:$0xf] }
  0xc1   : > { %1908 = vmatpush1.bf16.msra.mxu0 %v4240_v4  ;;  %v2941_v4 = vcombine.low %v236_v36, %v236_v36  ;;  %v322_v14 = vshrl.u32 %v2908_v2, 16 }
  0xc2   : > { %1715 = vmatpush1.bf16.msra.mxu1 %v3625_v7  ;;  %1909 = vmatprep.subr.bf16.mxu0 %v4243_v9  ;;  %v468_v7 = vrot.slane %v466_v42, 7  ;;  %v602_v9 = vshll.u32 %v2940_v58, 16  ;;  %v240_v42 = vld [vmem:[%s4023_s30 + $0x5c] sm:$0xf] }
  0xc3   : > { %1716 = vmatprep.subr.bf16.mxu1 %v3628_v16  ;;  %v469_v16 = vshll.u32 %v2924_v23, 16  ;;  %v2909_v23 = vcombine.low %v235_v34, %v235_v34  ;;  %v606_v57 = vshll.u32 %v2941_v4, 16  ;;  %v2927_v58 = vcombine.low %v239_v11, %v240_v42 }
  0xc4   : > { %v604_v60 = vrot.slane %v602_v9, 3  ;;  %v2943_v46 = vcombine.low %v240_v42, %v240_v42 }
  0xc5   : > { %1910 = vmatpush1.bf16.msra.mxu0 %v4248_v18  ;;  %v238_v18 = vld [vmem:[%s4023_s30 + $0x54] sm:$0xf]  ;;  %v325_v2 = vshrl.u32 %v2909_v23, 16  ;;  %v608_v34 = vrot.slane %v606_v57, 3  ;;  %v490_v52 = vshll.u32 %v2927_v58, 16 }
  0xc6   : > { %1717 = vmatpush1.bf16.msra.mxu1 %v3631_v27  ;;  %1911 = vmatprep.subr.bf16.mxu0 %v4251_v29  ;;  %v3643_v27 = vld [vmem:[#allocation5 + $0xf0] ss:$8 sps:$4 sm:$0xff]   ;;  %v614_v42 = vshll.u32 %v2943_v46, 16 }
  0xc7   : > { %1718 = vmatprep.subr.bf16.mxu1 %v3634_v31  ;;  %v237_v29 = vld [vmem:[%s4023_s30 + $0x50] sm:$0xf]  ;;  %v473_v31 = vshrl.u32 %v2925_v56, 16 }
  0xc8   : > { %v2926_v33 = vcombine.low %v237_v29, %v238_v18 }
  0xc9   : > { %1912 = vmatpush1.bf16.msra.mxu0 %v4256_v39  ;;  %v471_v39 = vor.u32 %v469_v16, %v468_v7 }
  0xca   : > { %1719 = vmatpush1.bf16.msra.mxu1 %v3637_v45  ;;  %1913 = vmatprep.subr.bf16.mxu0 %v4259_v50  ;;  %v475_v45 = vrot.slane %v473_v31, 7  ;;  %v476_v50 = vshll.u32 %v2925_v56, 16  ;;  %v480_v36 = vshrl.u32 %v2926_v33, 16  ;;  %v2942_v56 = vcombine.low %v238_v18, %v238_v18 }
  0xcb   : > { %1720 = vmatprep.subr.bf16.mxu1 %v3640_v53  ;;  %v4273_v53 = vsel %vm4041_vm3, %v322_v14, %v471_v39  ;;  %v483_v4 = vshll.u32 %v2926_v33, 16  ;;  %v487_v31 = vshrl.u32 %v2927_v58, 16  ;;  %v2911_v18 = vcombine.low %v239_v11, %v239_v11 }
  0xcc   : > { %v478_v16 = vor.u32 %v476_v50, %v475_v45  ;;  %v482_v9 = vrot.slane %v480_v36, 7  ;;  %v782_v39 = vshrl.u32 %v4273_v53, 16  ;;  %v242_v50 = vld [vmem:[%s4023_s30 + $0x64] sm:$0xf]  ;;  %v4292_v57 = vsel %vm4041_vm3, %v475_v45, %v608_v34  ;;  %v244_v45 = vld [vmem:[%s4023_s30 + $0x6c] sm:$0xf] }
  0xcd   : > { %1914 = vmatpush1.bf16.msra.mxu0 %v4262_v63  ;;  %v4277_v63 = vsel %vm4041_vm3, %v468_v7, %v604_v60  ;;  %5147 = vst [vmem:[#allocation32_spill] sm:$0xff] %v4292_v57  ;;  %v610_v33 = vshll.u32 %v2942_v56, 16  ;;  %v489_v36 = vrot.slane %v487_v31, 7  ;;  %v2928_v43 = vcombine.low %v4281_v55, %v242_v50 }
  0xce   : > { %1721 = vmatpush1.bf16.msra.mxu1 %v3643_v27  ;;  %v2910_v27 = vcombine.low %v237_v29, %v237_v29  ;;  %5146 = vst [vmem:[#allocation31_spill] sm:$0xff] %v4277_v63  ;;  %v789_v14 = vshll.u32 %v4277_v63, 16  ;;  %v4287_v29 = vsel %vm4041_vm3, %v325_v2, %v478_v16  ;;  %v485_v23 = vor.u32 %v483_v4, %v482_v9  ;;  %v4297_v2 = vld [vmem:[%s4023_s30 + $0x68] sm:$0xf] }
  0xcf   : > { %3202 = vmatprep.subr.bf16.mxu1 %v4164_v62  ;;  %v784_v62 = vshll.u32 %v4273_v53, 16  ;;  %v796_v63 = vshll.u32 %v4287_v29, 16  ;;  %v612_v41 = vrot.slane %v610_v33, 3  ;;  %v331_v34 = vshrl.u32 %v2911_v18, 16 }
  0xd0   : > { %v328_v60 = vshrl.u32 %v2910_v27, 16  ;;  %v791_v27 = vrot.slane %v789_v14, 1  ;;  %v492_v58 = vor.u32 %v490_v52, %v489_v36  ;;  %v794_v56 = vshrl.u32 %v4287_v29, 16 }
  0xd1   : > { %v786_v7 = vrot.slane %v784_v62, 1  ;;  %v801_v62 = vshll.u32 %v4292_v57, 16  ;;  %v798_v4 = vrot.slane %v796_v63, 1  ;;  %v494_v31 = vshrl.u32 %v2928_v43, 16 }
  0xd2   : > { %v4303_v11 = vsel %vm4041_vm3, %v328_v60, %v485_v23  ;;  %v2929_v14 = vcombine.low %v4297_v2, %v244_v45  ;;  %v4315_v46 = vsel %vm4041_vm3, %v482_v9, %v612_v41  ;;  %v4323_v33 = vsel %vm4041_vm3, %v331_v34, %v492_v58  ;;  %v4328_v23 = vld [vmem:[%s4023_s30 + $0x70] sm:$0xf]  ;;  %v4336_v34 = vld [vmem:[%s4023_s30 + $0x74] sm:$0xf] }
  0xd3   : > { %v787_v16 = vor.u32 %v786_v7, %v782_v39  ;;  %v943_v39 = vrot.slane %v4053_v38, 1  ;;  %v803_v60 = vrot.slane %v801_v62, 1  ;;  %5148 = vst [vmem:[#allocation33_spill] sm:$0xff] %v4315_v46  ;;  %v808_v52 = vshll.u32 %v4303_v11, 16 }
  0xd4   : > { %v616_v38 = vrot.slane %v614_v42, 3  ;;  %v2912_v18 = vcombine.low %v4281_v55, %v4281_v55  ;;  %v496_v41 = vrot.slane %v494_v31, 7  ;;  %v497_v9 = vshll.u32 %v2928_v43, 16 }
  0xd5   : > { %v792_v63 = vsel %vm684_vm2, %v787_v16, %v791_v27  ;;  %v4331_v57 = vsel %vm941_vm4, %v942_v35, %v943_v39  ;;  %v948_v16 = vrot.slane %v4071_v54, 1  ;;  %v813_v27 = vshll.u32 %v4315_v46, 16 }
  0xd6   : > { %v501_v42 = vshrl.u32 %v2929_v14, 16  ;;  %v806_v55 = vshrl.u32 %v4303_v11, 16  ;;  %v810_v43 = vrot.slane %v808_v52, 1  ;;  %v820_v58 = vshll.u32 %v4323_v33, 16 }
  0xd7   : > { %v2945_v31 = vcombine.low %v244_v45, %v244_v45  ;;  %v334_v52 = vshrl.u32 %v2912_v18, 16  ;;  %v815_v46 = vrot.slane %v813_v27, 1  ;;  %v504_v30 = vshll.u32 %v2929_v14, 16 }
  0xd8   : > { %v503_v32 = vrot.slane %v501_v42, 7  ;;  %v818_v45 = vshrl.u32 %v4323_v33, 16 }
  0xf1   : > { %v880_v37 = vpop.permute.xlu0 %879 }
  0xf2   : > { %v4311_v7 = vsel %vm990_vm5, %v4057_v40, %v880_v37  ;;  %v2944_v40 = vcombine.low %v242_v50, %v242_v50  ;;  %v799_v37 = vor.u32 %v798_v4, %v794_v56  ;;  %v949_v56 = vrot.slane %v4076_v59, 1 }
  0xf3   : > { %1055 = vrot.lane.b32.xlu0 %v4311_v7, %s3821_s18  ;;  %v4350_v4 = vsel %vm4041_vm3, %v489_v36, %v616_v38  ;;  %v2913_v59 = vcombine.low %v4297_v2, %v4297_v2  ;;  %v4359_v36 = vld [vmem:[%s4023_s30 + $0x78] sm:$0xf]  ;;  %v811_v38 = vor.u32 %v810_v43, %v806_v55  ;;  %v951_v43 = vrot.slane %v4095_v25, 1 }
  0xf4   : > { %v882_v35 = vpop.permute.xlu1 %881  ;;  %5149 = vst [vmem:[#allocation34_spill] sm:$0xff] %v4350_v4  ;;  %v804_v39 = vsel %vm684_vm2, %v799_v37, %v803_v60  ;;  %v825_v60 = vshll.u32 %v4350_v4, 16  ;;  %v4364_v37 = vld [vmem:[%s4023_s30 + $0x7c] sm:$0xf]  ;;  %v4374_v14 = vsel %vm941_vm4, %v948_v16, %v949_v56  ;;  %v506_v4 = vor.u32 %v504_v30, %v503_v32 }
  0xf5   : > { %v878_v62 = vpop.permute.xlu0 %877  ;;  %v4371_v2 = vsel %vm990_vm5, %v4071_v54, %v882_v35  ;;  %v952_v54 = vrot.slane %v4090_v22, 1 }
  0xf6   : > { %v4340_v50 = vsel %vm990_vm5, %v4065_v48, %v878_v62  ;;  %v618_v48 = vshll.u32 %v2944_v40, 16  ;;  %v2930_v62 = vcombine.low %v4328_v23, %v4336_v34  ;;  %v822_v40 = vrot.slane %v820_v58, 1 }
  0xf7   : > { %893 = vrot.lane.b32.xlu0 %v792_v63, %s3821_s18  ;;  %1059 = vrot.lane.b32.xlu1 %v4340_v50, %s3821_s18  ;;  %v499_v63 = vor.u32 %v497_v9, %v496_v41  ;;  %v622_v9 = vshll.u32 %v2945_v31, 16  ;;  %v337_v58 = vshrl.u32 %v2913_v59, 16  ;;  %v816_v31 = vsel %vm684_vm2, %v811_v38, %v815_v46 }
  0xf8   : > { %1915 = vmatprep.mubr.bf16.mxu0 %v4340_v50  ;;  %v620_v18 = vrot.slane %v618_v48, 3  ;;  %v508_v42 = vshrl.u32 %v2930_v62, 16  ;;  %v2931_v48 = vcombine.low %v4359_v36, %v4364_v37  ;;  %v823_v35 = vor.u32 %v822_v40, %v818_v45 }
  0xf9   : > { %v4378_v27 = vsel %vm4041_vm3, %v334_v52, %v499_v63  ;;  %v827_v16 = vrot.slane %v825_v60, 1  ;;  %v2914_v46 = vcombine.low %v4328_v23, %v4328_v23  ;;  %v511_v63 = vshll.u32 %v2930_v62, 16 }
  0xfa   : > { %v4391_v56 = vsel %vm4041_vm3, %v496_v41, %v620_v18  ;;  %v832_v30 = vshll.u32 %v4378_v27, 16  ;;  %v510_v52 = vrot.slane %v508_v42, 7  ;;  %v2946_v59 = vcombine.low %v4336_v34, %v4336_v34 }
  0xfb   : > { %1061 = vrot.lane.b32.xlu0 %v4331_v57, %s3821_s18  ;;  %895 = vrot.lane.b32.xlu1 %v804_v39, %s3821_s18  ;;  %v624_v39 = vrot.slane %v622_v9, 3  ;;  %v4404_v38 = vsel %vm4041_vm3, %v337_v58, %v506_v4  ;;  %v515_v41 = vshrl.u32 %v2931_v48, 16  ;;  %v4407_v45 = vsel %vm941_vm4, %v951_v43, %v952_v54 }
  0xfc   : > { %v884_v55 = vpop.permute.xlu1 %883  ;;  %v954_v40 = vrot.slane %v4105_v47, 1  ;;  %v955_v23 = vrot.slane %v4109_v49, 1  ;;  %v828_v34 = vsel %vm684_vm2, %v823_v35, %v827_v16  ;;  %v830_v4 = vshrl.u32 %v4378_v27, 16 }
  0xfd   : > { %v4398_v22 = vsel %vm990_vm5, %v4095_v25, %v884_v55  ;;  %v837_v25 = vshll.u32 %v4391_v56, 16  ;;  %v834_v62 = vrot.slane %v832_v30, 1  ;;  %v4419_v60 = vsel %vm4041_vm3, %v503_v32, %v624_v39 }
  0xfe   : > { %v844_v18 = vshll.u32 %v4404_v38, 16  ;;  %v340_v9 = vshrl.u32 %v2914_v46, 16  ;;  %v513_v49 = vor.u32 %v511_v63, %v510_v52  ;;  %v626_v42 = vshll.u32 %v2946_v59, 16 }
  0xff   : > { %1063 = vrot.lane.b32.xlu0 %v4371_v2, %s3821_s18  ;;  %1065 = vrot.lane.b32.xlu1 %v4374_v14, %s3821_s18  ;;  %v2915_v43 = vcombine.low %v4359_v36, %v4359_v36  ;;  %v517_v58 = vrot.slane %v515_v41, 7  ;;  %v2947_v54 = vcombine.low %v4364_v37, %v4364_v37  ;;  %v4427_v35 = vsel %vm941_vm4, %v954_v40, %v955_v23 }
 0x100   : > { %v835_v32 = vor.u32 %v834_v62, %v830_v4  ;;  %v839_v16 = vrot.slane %v837_v25, 1  ;;  %v842_v30 = vshrl.u32 %v4404_v38, 16  ;;  %v849_v39 = vshll.u32 %v4419_v60, 16 }
 0x101   : > { %v886_v55 = vpop.permute.xlu0 %885  ;;  %v628_v37 = vrot.slane %v626_v42, 3  ;;  %v4440_v46 = vsel %vm4041_vm3, %v340_v9, %v513_v49  ;;  %v343_v59 = vshrl.u32 %v2915_v43, 16  ;;  %v630_v40 = vshll.u32 %v2947_v54, 16 }
 0x102   : > { %v4436_v36 = vsel %vm990_vm5, %v4105_v47, %v886_v55  ;;  %v840_v23 = vsel %vm684_vm2, %v835_v32, %v839_v16  ;;  %v957_v47 = vrot.slane %v4120_v5, 1  ;;  %v958_v25 = vrot.slane %v4126_v12, 1 }
 0x103   : > { %897 = vrot.lane.b32.xlu0 %v816_v31, %s3821_s18  ;;  %1067 = vrot.lane.b32.xlu1 %v4398_v22, %s3821_s18  ;;  %v518_v31 = vshll.u32 %v2931_v48, 16  ;;  %v846_v48 = vrot.slane %v844_v18, 1  ;;  %v851_v18 = vrot.slane %v849_v39, 1  ;;  %v4456_v9 = vsel %vm4041_vm3, %v510_v52, %v628_v37  ;;  %v3646_v37 = vld [vmem:[#allocation5 + $0x204] ss:$8 sps:$4 sm:$0xff]  }
 0x104   : > { %v888_v63 = vpop.permute.xlu1 %887  ;;  %v632_v49 = vrot.slane %v630_v40, 3  ;;  %v960_v55 = vrot.slane %v4133_v19, 1  ;;  %v854_v12 = vshrl.u32 %v4440_v46, 16  ;;  %v861_v52 = vshll.u32 %v4456_v9, 16  ;;  %2076 = vmatprep.subr.bf16.mxu0 %v3646_v37 }
 0x105   : > { %v520_v41 = vor.u32 %v518_v31, %v517_v58  ;;  %v4452_v4 = vsel %vm990_vm5, %v4120_v5, %v888_v63  ;;  %v847_v62 = vor.u32 %v846_v48, %v842_v30  ;;  %v961_v5 = vrot.slane %v4137_v20, 1 }
 0x106   : > { %v4471_v54 = vsel %vm941_vm4, %v957_v47, %v958_v25  ;;  %v4476_v30 = vsel %vm4041_vm3, %v517_v58, %v632_v49  ;;  %v863_v48 = vrot.slane %v861_v52, 1  ;;  %v963_v40 = vrot.slane %v4146_v44, 1  ;;  %v3644_v49 = vld [vmem:[#allocation5 + $0x200] ss:$8 sps:$4 sm:$0xff]  }
 0x107   : > { %1069 = vrot.lane.b32.xlu0 %v4407_v45, %s3821_s18  ;;  %899 = vrot.lane.b32.xlu1 %v828_v34, %s3821_s18  ;;  %v856_v34 = vshll.u32 %v4440_v46, 16  ;;  %v4460_v42 = vsel %vm4041_vm3, %v343_v59, %v520_v41  ;;  %v852_v31 = vsel %vm684_vm2, %v847_v62, %v851_v18  ;;  %v4482_v20 = vsel %vm941_vm4, %v960_v55, %v961_v5 }
 0x108   : > { %v868_v32 = vshll.u32 %v4460_v42, 16  ;;  %v866_v59 = vshrl.u32 %v4460_v42, 16  ;;  %v873_v58 = vshll.u32 %v4476_v30, 16 }
 0x109   : > { %v858_v43 = vrot.slane %v856_v34, 1  ;;  %v890_v16 = vpop.permute.xlu0 %889 }
 0x10a   : > { %v4486_v63 = vsel %vm990_vm5, %v4133_v19, %v890_v16  ;;  %v870_v26 = vrot.slane %v868_v32, 1  ;;  %v875_v34 = vrot.slane %v873_v58, 1  ;;  %v3653_v58 = vld [vmem:[#allocation5 + $0x230] ss:$8 sps:$4 sm:$0xff]  }
 0x10b   : > { %1073 = vrot.lane.b32.xlu1 %v4427_v35, %s3821_s18  ;;  %1071 = vrot.lane.b32.xlu0 %v4436_v36, %s3821_s18  ;;  %v859_v39 = vor.u32 %v858_v43, %v854_v12  ;;  %v3649_v12 = vld [vmem:[#allocation5 + $0x214] ss:$8 sps:$4 sm:$0xff]  }
 0x10c   : > { %v871_v25 = vor.u32 %v870_v26, %v866_v59  ;;  %v3650_v59 = vld [vmem:[#allocation5 + $0x220] ss:$8 sps:$4 sm:$0xff]  }
 0x10d   : > { %v864_v47 = vsel %vm684_vm2, %v859_v39, %v863_v48  ;;  %v3652_v39 = vld [vmem:[#allocation5 + $0x224] ss:$8 sps:$4 sm:$0xff]  }
 0x10e   : > { %v892_v41 = vpop.permute.xlu1 %891  ;;  %v876_v62 = vsel %vm684_vm2, %v871_v25, %v875_v34 }
 0x10f   : > { %1075 = vrot.lane.b32.xlu1 %v4452_v4, %s3821_s18  ;;  %901 = vrot.lane.b32.xlu0 %v840_v23, %s3821_s18  ;;  %v964_v23 = vrot.slane %v4154_v51, 1  ;;  %v4498_v19 = vsel %vm990_vm5, %v4146_v44, %v892_v41 }
 0x111   : > { %v4506_v18 = vsel %vm941_vm4, %v963_v40, %v964_v23 }
 0x112   : > { %v1058_v44 = vpop.permute.xlu1 %1057 }
 0x113   : > { %903 = vrot.lane.b32.xlu1 %v852_v31, %s3821_s18  ;;  %1077 = vrot.lane.b32.xlu0 %v4471_v54, %s3821_s18  ;;  %v3647_v31 = vld [vmem:[#allocation5 + $0x210] ss:$8 sps:$4 sm:$0xff]  }
 0x117   : > { %1081 = vrot.lane.b32.xlu1 %v4482_v20, %s3821_s18  ;;  %1079 = vrot.lane.b32.xlu0 %v4486_v63, %s3821_s18 }
 0x11b   : > { %1083 = vrot.lane.b32.xlu1 %v4498_v19, %s3821_s18  ;;  %905 = vrot.lane.b32.xlu0 %v864_v47, %s3821_s18 }
 0x11f   : > { %907 = vrot.lane.b32.xlu1 %v876_v62, %s3821_s18  ;;  %1085 = vrot.lane.b32.xlu0 %v4506_v18, %s3821_s18  ;;  %v5150_v62 = vld [vmem:[#allocation12_spill] sm:$0xff] }
 0x165   : > { %v1056_v51 = vpop.permute.xlu0 %1055 }
 0x166   : > { %v1154_v55 = vsel %vm990_vm5, %v4331_v57, %v1056_v51  ;;  %v1120_v5 = vsel %vm990_vm5, %v1056_v51, %v1058_v44 }
 0x167   : > { %1722 = vmatprep.mubr.bf16.mxu1 %v1154_v55  ;;  %1916 = vmatmul.mubr.bf16.vlgmr.msra.gmra.mrb[0].mxu0 %v1120_v5 }
 0x168   : > { %1723 = vmatmul.mubr.bf16.vlgmr.msra.gmra.mrb[0].mxu1 %v4340_v50  ;;  %1925 = vmatprep.mubr.bf16.mxu0 %v4371_v2 }
 0x169   : > { %v1060_v43 = vpop.permute.xlu1 %1059  ;;  %v894_v52 = vpop.permute.xlu0 %893  ;;  %2077 = vmatpush1.bf16.msra.mxu0 %v3644_v49  ;;  %3218 = vmatpush1.bf16.msra.mxu1 %v4168_v0  ;;  %v5152_v49 = vld [vmem:[#allocation14_spill] sm:$0xff] }
 0x16a   : > { %v4519_v32 = vsel %vm990_vm5, %v4273_v53, %v894_v52  ;;  %v1158_v16 = vsel %vm990_vm5, %v4162_v61, %v1060_v43  ;;  %2078 = vmatprep.subr.bf16.mxu0 %v3649_v12  ;;  %3203 = vmatprep.subr.bf16.mxu1 %v4172_v1  ;;  %v3655_v61 = vld [vmem:[#allocation5 + $0x234] ss:$8 sps:$4 sm:$0xff]  }
 0x16b   : > { %1087 = vrot.lane.b32.xlu0 %v4519_v32, %s3821_s18  ;;  %1732 = vmatprep.mubr.bf16.mxu1 %v1158_v16  ;;  %v5153_v12 = vld [vmem:[#allocation15_spill] sm:$0xff]  ;;  %v5155_v16 = vld [vmem:[#allocation17_spill] sm:$0xff] }
 0x16d   : > { %v896_v48 = vpop.permute.xlu1 %895  ;;  %v1062_v37 = vpop.permute.xlu0 %1061  ;;  %2079 = vmatpush1.bf16.msra.mxu0 %v3647_v31  ;;  %3219 = vmatpush1.bf16.msra.mxu1 %v4174_v3  ;;  %v5154_v31 = vld [vmem:[#allocation16_spill] sm:$0xff] }
 0x16e   : > { %v1121_v0 = vsel %vm990_vm5, %v1060_v43, %v1062_v37  ;;  %v4530_v26 = vsel %vm990_vm5, %v4287_v29, %v896_v48  ;;  %2080 = vmatprep.subr.bf16.mxu0 %v3652_v39  ;;  %3204 = vmatprep.subr.bf16.mxu1 %v4177_v6  ;;  %v966_v48 = vrot.slane %v4273_v53, 1  ;;  %v5156_v37 = vld [vmem:[#allocation31_spill] sm:$0xff] }
 0x16f   : > { %1926 = vmatmul.mubr.bf16.gmra.mrb[4].mxu0 %v1121_v0  ;;  %1091 = vrot.lane.b32.xlu1 %v4530_v26, %s3821_s18 }
 0x170   : > { %1733 = vmatmul.mubr.bf16.gmra.mrb[4].mxu1 %v4311_v7  ;;  %1935 = vmatprep.mubr.bf16.mxu0 %v4398_v22 }
 0x171   : > { %v1066_v1 = vpop.permute.xlu1 %1065  ;;  %v1064_v3 = vpop.permute.xlu0 %1063  ;;  %2081 = vmatpush1.bf16.msra.mxu0 %v3650_v59  ;;  %3220 = vmatpush1.bf16.msra.mxu1 %v4180_v8  ;;  %v967_v59 = vrot.slane %v5156_v37, 1  ;;  %v5171_v37 = vld [vmem:[#allocation29_spill] sm:$0xff] }
 0x172   : > { %v1161_v41 = vsel %vm990_vm5, %v4331_v57, %v1064_v3  ;;  %2082 = vmatprep.subr.bf16.mxu0 %v3655_v61  ;;  %3205 = vmatprep.subr.bf16.mxu1 %v4183_v10  ;;  %v1122_v6 = vsel %vm990_vm5, %v1064_v3, %v1066_v1  ;;  %v5157_v1 = vld [vmem:[#allocation18_spill] sm:$0xff] }
 0x173   : > { %1742 = vmatprep.mubr.bf16.mxu1 %v1161_v41  ;;  %v4608_v53 = vsel %vm941_vm4, %v966_v48, %v967_v59  ;;  %v969_v41 = vrot.slane %v4287_v29, 1  ;;  %v5170_v48 = vld [vmem:[#allocation28_spill] sm:$0xff]  ;;  %v5172_v59 = vld [vmem:[#allocation30_spill] sm:$0xff] }
 0x175   : > { %v1068_v40 = vpop.permute.xlu1 %1067  ;;  %v898_v23 = vpop.permute.xlu0 %897  ;;  %2083 = vmatpush1.bf16.msra.mxu0 %v3653_v58  ;;  %3221 = vmatpush1.bf16.msra.mxu1 %v4186_v13  ;;  %v5158_v58 = vld [vmem:[#allocation19_spill] sm:$0xff] }
 0x176   : > { %v4545_v7 = vsel %vm990_vm5, %v4303_v11, %v898_v23  ;;  %v1165_v8 = vsel %vm990_vm5, %v4374_v14, %v1068_v40  ;;  %3206 = vmatprep.subr.bf16.mxu1 %v4189_v15 }
 0x177   : > { %1936 = vmatmul.mubr.bf16.gmra.mrb[8].mxu0 %v1122_v6  ;;  %1095 = vrot.lane.b32.xlu0 %v4545_v7, %s3821_s18  ;;  %v5159_v6 = vld [vmem:[#allocation32_spill] sm:$0xff] }
 0x178   : > { %1743 = vmatmul.mubr.bf16.gmra.mrb[8].mxu1 %v4340_v50  ;;  %1945 = vmatprep.mubr.bf16.mxu0 %v4436_v36 }
 0x179   : > { %v900_v10 = vpop.permute.xlu1 %899  ;;  %v1070_v47 = vpop.permute.xlu0 %1069  ;;  %1752 = vmatprep.mubr.bf16.mxu1 %v1165_v8  ;;  %3222 = vmatpush1.bf16.msra.mxu1 %v4192_v17  ;;  %v972_v8 = vrot.slane %v4303_v11, 1 }
 0x17a   : > { %v4557_v13 = vsel %vm990_vm5, %v4323_v33, %v900_v10  ;;  %3207 = vmatprep.subr.bf16.mxu1 %v4195_v21  ;;  %v1123_v15 = vsel %vm990_vm5, %v1068_v40, %v1070_v47  ;;  %v970_v40 = vrot.slane %v5159_v6, 1  ;;  %v5160_v10 = vld [vmem:[#allocation33_spill] sm:$0xff] }
 0x17b   : > { %1099 = vrot.lane.b32.xlu1 %v4557_v13, %s3821_s18  ;;  %v973_v47 = vrot.slane %v5160_v10, 1 }
 0x17c   : > { %v4625_v29 = vsel %vm941_vm4, %v969_v41, %v970_v40 }
 0x17d   : > { %v1074_v25 = vpop.permute.xlu1 %1073  ;;  %v1072_v50 = vpop.permute.xlu0 %1071  ;;  %3223 = vmatpush1.bf16.msra.mxu1 %v4198_v24  ;;  %v5151_v24 = vld [vmem:[#allocation13_spill] sm:$0xff] }
 0x17e   : > { %v1169_v34 = vsel %vm990_vm5, %v4407_v45, %v1072_v50  ;;  %3208 = vmatprep.subr.bf16.mxu1 %v4201_v28  ;;  %v1124_v28 = vsel %vm990_vm5, %v1072_v50, %v1074_v25  ;;  %v5162_v25 = vld [vmem:[#allocation21_spill] sm:$0xff]  ;;  %v975_v50 = vrot.slane %v4323_v33, 1 }
 0x17f   : > { %1946 = vmatmul.mubr.bf16.gmra.mrb[12].mxu0 %v1123_v15  ;;  %v5161_v15 = vld [vmem:[#allocation20_spill] sm:$0xff] }
 0x180   : > { %1753 = vmatmul.mubr.bf16.gmra.mrb[12].mxu1 %v4371_v2  ;;  %1955 = vmatprep.mubr.bf16.mxu0 %v4452_v4 }
 0x181   : > { %v1076_v17 = vpop.permute.xlu1 %1075  ;;  %v902_v21 = vpop.permute.xlu0 %901  ;;  %1762 = vmatprep.mubr.bf16.mxu1 %v1169_v34  ;;  %3224 = vmatpush1.bf16.msra.mxu1 %v5150_v62  ;;  %v5163_v34 = vld [vmem:[#allocation34_spill] sm:$0xff]  ;;  %v978_v62 = vrot.slane %v4378_v27, 1 }
 0x182   : > { %v4572_v44 = vsel %vm990_vm5, %v4378_v27, %v902_v21  ;;  %3209 = vmatprep.subr.bf16.mxu1 %v5151_v24  ;;  %v1173_v5 = vsel %vm990_vm5, %v4427_v35, %v1076_v17  ;;  %v4631_v21 = vsel %vm941_vm4, %v972_v8, %v973_v47  ;;  %v979_v24 = vrot.slane %v4391_v56, 1 }
 0x183   : > { %1103 = vrot.lane.b32.xlu0 %v4572_v44, %s3821_s18  ;;  %v981_v27 = vrot.slane %v4404_v38, 1  ;;  %v982_v56 = vrot.slane %v4419_v60, 1 }
 0x185   : > { %v904_v51 = vpop.permute.xlu1 %903  ;;  %v1078_v2 = vpop.permute.xlu0 %1077  ;;  %3225 = vmatpush1.bf16.msra.mxu1 %v5152_v49  ;;  %v4651_v49 = vsel %vm941_vm4, %v978_v62, %v979_v24 }
 0x186   : > { %v4581_v55 = vsel %vm990_vm5, %v4404_v38, %v904_v51  ;;  %3210 = vmatprep.subr.bf16.mxu1 %v5153_v12  ;;  %v1125_v39 = vsel %vm990_vm5, %v1076_v17, %v1078_v2  ;;  %v976_v17 = vrot.slane %v5163_v34, 1  ;;  %v5165_v2 = vld [vmem:[#allocation23_spill] sm:$0xff]  ;;  %v984_v12 = vrot.slane %v4440_v46, 1 }
 0x187   : > { %1956 = vmatmul.mubr.bf16.gmra.mrb[16].mxu0 %v1124_v28  ;;  %1107 = vrot.lane.b32.xlu1 %v4581_v55, %s3821_s18  ;;  %v5164_v28 = vld [vmem:[#allocation22_spill] sm:$0xff]  ;;  %v4662_v38 = vsel %vm941_vm4, %v981_v27, %v982_v56 }
 0x188   : > { %1763 = vmatmul.mubr.bf16.gmra.mrb[16].mxu1 %v4398_v22  ;;  %1965 = vmatprep.mubr.bf16.mxu0 %v4486_v63  ;;  %v4645_v33 = vsel %vm941_vm4, %v975_v50, %v976_v17 }
 0x189   : > { %v1082_v43 = vpop.permute.xlu1 %1081  ;;  %v1080_v52 = vpop.permute.xlu0 %1079  ;;  %1772 = vmatprep.mubr.bf16.mxu1 %v1173_v5  ;;  %3226 = vmatpush1.bf16.msra.mxu1 %v5154_v31  ;;  %v987_v31 = vrot.slane %v4460_v42, 1 }
 0x18a   : > { %3211 = vmatprep.subr.bf16.mxu1 %v5155_v16  ;;  %v1177_v3 = vsel %vm990_vm5, %v4471_v54, %v1080_v52  ;;  %v1126_v11 = vsel %vm990_vm5, %v1080_v52, %v1082_v43  ;;  %v985_v43 = vrot.slane %v4456_v9, 1  ;;  %v5166_v52 = vld [vmem:[#allocation24_spill] sm:$0xff]  ;;  %v5168_v16 = vld [vmem:[#allocation26_spill] sm:$0xff] }
 0x18c   : > { %v4668_v9 = vsel %vm941_vm4, %v984_v12, %v985_v43 }
 0x18d   : > { %v1084_v0 = vpop.permute.xlu1 %1083  ;;  %v906_v61 = vpop.permute.xlu0 %905  ;;  %3227 = vmatpush1.bf16.msra.mxu1 %v5157_v1 }
 0x18e   : > { %v4598_v22 = vsel %vm990_vm5, %v4440_v46, %v906_v61  ;;  %3212 = vmatprep.subr.bf16.mxu1 %v5158_v58  ;;  %v1181_v51 = vsel %vm990_vm5, %v4482_v20, %v1084_v0  ;;  %v988_v46 = vrot.slane %v4476_v30, 1  ;;  %v5169_v30 = vld [vmem:[#allocation27_spill] sm:$0xff] }
 0x18f   : > { %1966 = vmatmul.mubr.bf16.gmra.mrb[20].mxu0 %v1125_v39  ;;  %1111 = vrot.lane.b32.xlu0 %v4598_v22, %s3821_s18 }
 0x190   : > { %1773 = vmatmul.mubr.bf16.gmra.mrb[20].mxu1 %v4436_v36  ;;  %1975 = vmatprep.mubr.bf16.mxu0 %v4498_v19  ;;  %v4677_v39 = vsel %vm941_vm4, %v987_v31, %v988_v46 }
 0x191   : > { %v908_v23 = vpop.permute.xlu1 %907  ;;  %1782 = vmatprep.mubr.bf16.mxu1 %v1177_v3  ;;  %3228 = vmatpush1.bf16.msra.mxu1 %v5161_v15  ;;  %v1086_v5 = vpop.permute.xlu0 %1085 }
 0x192   : > { %v4617_v36 = vsel %vm990_vm5, %v4460_v42, %v908_v23  ;;  %3213 = vmatprep.subr.bf16.mxu1 %v5162_v25  ;;  %v1127_v60 = vsel %vm990_vm5, %v1084_v0, %v1086_v5  ;;  %v3822_v42 = vmov 0  }
 0x193   : > { %1115 = vrot.lane.b32.xlu1 %v4617_v36, %s3821_s18  ;;  %1089 = vrot.lane.b32.xlu0 %v4608_v53, %s3821_s18 }
 0x195   : > { %3229 = vmatpush1.bf16.msra.mxu1 %v5164_v28 }
 0x196   : > { %3214 = vmatprep.subr.bf16.mxu1 %v5165_v2 }
 0x197   : > { %1093 = vrot.lane.b32.xlu1 %v4625_v29, %s3821_s18  ;;  %1976 = vmatmul.mubr.bf16.gmra.mrb[24].mxu0 %v1126_v11 }
 0x198   : > { %1097 = vrot.lane.b32.xlu0 %v4631_v21, %s3821_s18  ;;  %1783 = vmatmul.mubr.bf16.gmra.mrb[24].mxu1 %v4452_v4  ;;  %v5167_v4 = vld [vmem:[#allocation25_spill] sm:$0xff] }
 0x199   : > { %1985 = vmatprep.mubr.bf16.mxu0 %v4519_v32  ;;  %1792 = vmatprep.mubr.bf16.mxu1 %v1181_v51 }
 0x19a   : > { %3230 = vmatpush1.bf16.msra.mxu1 %v5166_v52 }
 0x19b   : > { %1101 = vrot.lane.b32.xlu1 %v4645_v33, %s3821_s18  ;;  %3215 = vmatprep.subr.bf16.mxu1 %v5167_v4 }
 0x19c   : > { %1105 = vrot.lane.b32.xlu0 %v4651_v49, %s3821_s18 }
 0x19e   : > { %3231 = vmatpush1.bf16.msra.mxu1 %v5168_v16 }
 0x19f   : > { %1109 = vrot.lane.b32.xlu1 %v4662_v38, %s3821_s18  ;;  %1986 = vmatmul.mubr.bf16.gmra.mrb[28].mxu0 %v1127_v60 }
 0x1a0   : > { %1113 = vrot.lane.b32.xlu0 %v4668_v9, %s3821_s18  ;;  %1793 = vmatmul.mubr.bf16.gmra.mrb[28].mxu1 %v4486_v63 }
 0x1a1   : > { %2108 = vmatprep.mubr.bf16.mxu0 %v3822_v42  ;;  %3216 = vmatprep.subr.bf16.mxu1 %v5169_v30 }
 0x1a2   : > { %3232 = vmatpush1.bf16.msra.mxu1 %v5170_v48 }
 0x1a3   : > { %1117 = vrot.lane.b32.xlu1 %v4677_v39, %s3821_s18  ;;  %3217 = vmatprep.subr.bf16.mxu1 %v5171_v37 }
 0x1a6   : > { %3233 = vmatpush1.bf16.msra.mxu1 %v5172_v59  ;;  %v1287_v59 = vld [vmem:[#allocation7] sm:$0x3] }
 0x1a7   : > { %3020 = vmatmul.mubr.msk.bf16.vlgmr.msra.gmra.mrb[0].mxu0 %vm990_vm5, %v4331_v57 }
 0x1a8   : > { %2118 = vmatprep.mubr.bf16.mxu0 %v3822_v42 }
 0x1af   : > { %3021 = vmatmul.mubr.msk.bf16.gmra.mrb[4].mxu0 %vm990_vm5, %v4374_v14 }
 0x1b0   : > { %2128 = vmatprep.mubr.bf16.mxu0 %v3822_v42 }
 0x1b7   : > { %3022 = vmatmul.mubr.msk.bf16.gmra.mrb[8].mxu0 %vm990_vm5, %v4407_v45 }
 0x1b8   : > { %2138 = vmatprep.mubr.bf16.mxu0 %v3822_v42 }
 0x1bf   : > { %3023 = vmatmul.mubr.msk.bf16.gmra.mrb[12].mxu0 %vm990_vm5, %v4427_v35 }
 0x1c0   : > { %2148 = vmatprep.mubr.bf16.mxu0 %v3822_v42 }
 0x1c7   : > { %3024 = vmatmul.mubr.msk.bf16.gmra.mrb[16].mxu0 %vm990_vm5, %v4471_v54 }
 0x1c8   : > { %2158 = vmatprep.mubr.bf16.mxu0 %v3822_v42 }
 0x1cf   : > { %3025 = vmatmul.mubr.msk.bf16.gmra.mrb[20].mxu0 %vm990_vm5, %v4482_v20 }
 0x1d0   : > { %2168 = vmatprep.mubr.bf16.mxu0 %v3822_v42 }
 0x1d7   : > { %3026 = vmatmul.mubr.msk.bf16.gmra.mrb[24].mxu0 %vm990_vm5, %v4506_v18 }
 0x1d8   : > { %2178 = vmatprep.mubr.bf16.mxu0 %v3822_v42 }
 0x1dd   : > { %v1088_v57 = vpop.permute.xlu0 %1087 }
 0x1de   : > { %v1185_v14 = vsel %vm990_vm5, %v4506_v18, %v1088_v57 }
 0x1df   : > { %1802 = vmatprep.mubr.bf16.mxu1 %v1185_v14  ;;  %3027 = vmatmul.mubr.msk.bf16.gmra.mrb[28].mxu0 %vm990_vm5, %v4608_v53 }
 0x1e0   : > { %1803 = vmatmul.mubr.bf16.gmra.mrb[32].mxu1 %v4498_v19  ;;  %2188 = vmatprep.mubr.bf16.mxu0 %v3822_v42 }
 0x1e1   : > { %v1092_v45 = vpop.permute.xlu1 %1091 }
 0x1e2   : > { %v1189_v35 = vsel %vm990_vm5, %v4608_v53, %v1092_v45 }
 0x1e3   : > { %1812 = vmatprep.mubr.bf16.mxu1 %v1189_v35 }
 0x1e7   : > { %3028 = vmatmul.mubr.msk.bf16.gmra.mrb[32].mxu0 %vm990_vm5, %v4625_v29 }
 0x1e8   : > { %1813 = vmatmul.mubr.bf16.gmra.mrb[36].mxu1 %v4519_v32  ;;  %2198 = vmatprep.mubr.bf16.mxu0 %v3822_v42 }
 0x1e9   : > { %v1096_v54 = vpop.permute.xlu0 %1095 }
 0x1ea   : > { %v1193_v20 = vsel %vm990_vm5, %v4625_v29, %v1096_v54 }
 0x1eb   : > { %1822 = vmatprep.mubr.bf16.mxu1 %v1193_v20 }
 0x1ed   : > { %v1100_v63 = vpop.permute.xlu1 %1099 }
 0x1ee   : > { %v1197_v19 = vsel %vm990_vm5, %v4631_v21, %v1100_v63 }
 0x1ef   : > { %3029 = vmatmul.mubr.msk.bf16.gmra.mrb[36].mxu0 %vm990_vm5, %v4631_v21 }
 0x1f0   : > { %1823 = vmatmul.mubr.bf16.gmra.mrb[40].mxu1 %v4530_v26  ;;  %2208 = vmatprep.mubr.bf16.mxu0 %v3822_v42 }
 0x1f1   : > { %1832 = vmatprep.mubr.bf16.mxu1 %v1197_v19 }
 0x1f5   : > { %v1104_v18 = vpop.permute.xlu0 %1103 }
 0x1f6   : > { %v1201_v32 = vsel %vm990_vm5, %v4645_v33, %v1104_v18 }
 0x1f7   : > { %3030 = vmatmul.mubr.msk.bf16.gmra.mrb[40].mxu0 %vm990_vm5, %v4645_v33 }
 0x1f8   : > { %1833 = vmatmul.mubr.bf16.gmra.mrb[44].mxu1 %v4545_v7  ;;  %2218 = vmatprep.mubr.bf16.mxu0 %v3822_v42 }
 0x1f9   : > { %1842 = vmatprep.mubr.bf16.mxu1 %v1201_v32  ;;  %v1108_v0 = vpop.permute.xlu1 %1107 }
 0x1fa   : > { %v1205_v61 = vsel %vm990_vm5, %v4651_v49, %v1108_v0 }
 0x1ff   : > { %3031 = vmatmul.mubr.msk.bf16.gmra.mrb[44].mxu0 %vm990_vm5, %v4651_v49 }
 0x200   : > { %1843 = vmatmul.mubr.bf16.gmra.mrb[48].mxu1 %v4557_v13  ;;  %2228 = vmatprep.mubr.bf16.mxu0 %v3822_v42 }
 0x201   : > { %1852 = vmatprep.mubr.bf16.mxu1 %v1205_v61  ;;  %v1112_v1 = vpop.permute.xlu0 %1111 }
 0x202   : > { %v1209_v3 = vsel %vm990_vm5, %v4662_v38, %v1112_v1 }
 0x205   : > { %v1116_v58 = vpop.permute.xlu1 %1115  ;;  %v1090_v41 = vpop.permute.xlu0 %1089 }
 0x206   : > { %v1213_v53 = vsel %vm990_vm5, %v4668_v9, %v1116_v58  ;;  %v1128_v6 = vsel %vm990_vm5, %v1088_v57, %v1090_v41 }
 0x207   : > { %3032 = vmatmul.mubr.msk.bf16.gmra.mrb[48].mxu0 %vm990_vm5, %v4662_v38 }
 0x208   : > { %1853 = vmatmul.mubr.bf16.gmra.mrb[52].mxu1 %v4572_v44  ;;  %2238 = vmatprep.mubr.bf16.mxu0 %v3822_v42 }
 0x209   : > { %1862 = vmatprep.mubr.bf16.mxu1 %v1209_v3  ;;  %v1094_v40 = vpop.permute.xlu1 %1093 }
 0x20a   : > { %v1129_v23 = vsel %vm990_vm5, %v1092_v45, %v1094_v40  ;;  %v1098_v8 = vpop.permute.xlu0 %1097 }
 0x20b   : > { %v1130_v10 = vsel %vm990_vm5, %v1096_v54, %v1098_v8 }
 0x20f   : > { %3033 = vmatmul.mubr.msk.bf16.gmra.mrb[52].mxu0 %vm990_vm5, %v4668_v9 }
 0x210   : > { %1863 = vmatmul.mubr.bf16.gmra.mrb[56].mxu1 %v4581_v55  ;;  %2248 = vmatprep.mubr.bf16.mxu0 %v3822_v42 }
 0x211   : > { %1872 = vmatprep.mubr.bf16.mxu1 %v1213_v53 }
 0x217   : > { %3034 = vmatmul.mubr.msk.bf16.gmra.mrb[56].mxu0 %vm990_vm5, %v4677_v39 }
 0x218   : > { %1873 = vmatmul.mubr.bf16.gmra.mrb[60].mxu1 %v4598_v22  ;;  %2258 = vmatprep.mubr.bf16.mxu0 %v3822_v42 }
 0x219   : > { %1995 = vmatprep.mubr.bf16.mxu1 %v4530_v26  ;;  %v1102_v26 = vpop.permute.xlu1 %1101 }
 0x21a   : > { %v1131_v47 = vsel %vm990_vm5, %v1100_v63, %v1102_v26 }
 0x21d   : > { %v1110_v34 = vpop.permute.xlu1 %1109 }
 0x21f   : > { %3035 = vmatmul.mubr.msk.bf16.gmra.mrb[60].mxu0 %vm990_vm5, %v4668_v9  ;;  %v1289_v9 = vlaneseq }
 0x220   : > { %1996 = vmatmul.mubr.bf16.vlgmr.msra.gmra.mrb[32].mxu1 %v1128_v6 }
 0x221   : > { %2005 = vmatprep.mubr.bf16.mxu1 %v4545_v7  ;;  %v1106_v7 = vpop.permute.xlu0 %1105  ;;  %v1118_v56 = vpop.permute.xlu1 %1117  ;;  %v1290_v42 = vshrl.u32 %v1289_v9, 7 }
 0x222   : > { %v1132_v50 = vsel %vm990_vm5, %v1104_v18, %v1106_v7  ;;  %v1135_v12 = vsel %vm990_vm5, %v1116_v58, %v1118_v56 }
 0x223   : > { %v1291_v37 = vsub.s32 0, %v1290_v42  ;;  %v1295_v57 = vsub.s32 1, %v1290_v42 }
 0x225   : > { %v1114_v24 = vpop.permute.xlu0 %1113  ;;  %v4825_v35 = vrot.slane %v1287_v59, %v1291_v37  ;;  %v4829_v20 = vrot.slane %v1287_v59, %v1295_v57 }
 0x226   : > { %v1134_v33 = vsel %vm990_vm5, %v1112_v1, %v1114_v24 }
 0x228   : > { %2006 = vmatmul.mubr.bf16.gmra.mrb[36].mxu1 %v1129_v23 }
 0x229   : > { %2015 = vmatprep.mubr.bf16.mxu1 %v4557_v13 }
 0x230   : > { %2016 = vmatmul.mubr.bf16.gmra.mrb[40].mxu1 %v1130_v10 }
 0x231   : > { %2025 = vmatprep.mubr.bf16.mxu1 %v4572_v44 }
 0x238   : > { %2026 = vmatmul.mubr.bf16.gmra.mrb[44].mxu1 %v1131_v47 }
 0x239   : > { %2035 = vmatprep.mubr.bf16.mxu1 %v4581_v55  ;;  %v1133_v55 = vsel %vm990_vm5, %v1108_v0, %v1110_v34 }
 0x23b   : > { %v1724_v15 = vpop.f32.mrb[0].mxu1 }
 0x23c   : > { %v1726_v25 = vpop.f32.mrb[1].mxu1  ;;  %v1725_v19 = vadd.f32 %v1724_v15, %v4825_v35 }
 0x23d   : > { %v1728_v29 = vpop.f32.mrb[2].mxu1  ;;  %v1727_v18 = vadd.f32 %v1726_v25, %v4829_v20 }
 0x23e   : > { %v1730_v11 = vpop.f32.mrb[3].mxu1  ;;  %v1729_v0 = vadd.f32 %v1728_v29, %v4825_v35 }
 0x23f   : > { %v1731_v3 = vadd.f32 %v1730_v11, %v4829_v20 }
 0x240   : > { %2036 = vmatmul.mubr.bf16.gmra.mrb[48].mxu1 %v1132_v50 }
 0x241   : > { %2045 = vmatprep.mubr.bf16.mxu1 %v4598_v22 }
 0x243   : > { %v4768_v13 = vpop.f32.mrb[4].mxu1 }
 0x244   : > { %v4770_v44 = vpop.f32.mrb[5].mxu1  ;;  %v1735_v7 = vadd.f32 %v4768_v13, %v4825_v35 }
 0x245   : > { %v4772_v17 = vpop.f32.mrb[6].mxu1  ;;  %v1737_v11 = vadd.f32 %v4770_v44, %v4829_v20 }
 0x246   : > { %v4774_v21 = vpop.f32.mrb[7].mxu1 }
 0x247   : > { %v1741_v9 = vadd.f32 %v4774_v21, %v4829_v20 }
 0x248   : > { %2046 = vmatmul.mubr.bf16.gmra.mrb[52].mxu1 %v1133_v55 }
 0x249   : > { %2055 = vmatprep.mubr.bf16.mxu1 %v4617_v36 }
 0x24b   : > { %v4778_v62 = vpop.f32.mrb[8].mxu1 }
 0x24c   : > { %v4780_v28 = vpop.f32.mrb[9].mxu1  ;;  %v1745_v13 = vadd.f32 %v4778_v62, %v4825_v35 }
 0x24d   : > { %v4782_v51 = vpop.f32.mrb[10].mxu1 }
 0x24e   : > { %v4784_v2 = vpop.f32.mrb[11].mxu1 }
 0x250   : > { %2056 = vmatmul.mubr.bf16.gmra.mrb[56].mxu1 %v1134_v33 }
 0x251   : > { %2065 = vmatprep.mubr.bf16.mxu1 %v4598_v22 }
 0x253   : > { %v4788_v27 = vpop.f32.mrb[12].mxu1 }
 0x254   : > { %v4790_v49 = vpop.f32.mrb[13].mxu1 }
 0x255   : > { %v4792_v36 = vpop.f32.mrb[14].mxu1 }
 0x256   : > { %v4794_v5 = vpop.f32.mrb[15].mxu1 }
 0x258   : > { %2066 = vmatmul.mubr.bf16.gmra.mrb[60].mxu1 %v1135_v12  ;;  %v1739_v12 = vadd.f32 %v4772_v17, %v4825_v35 }
 0x25b   : > { %v4797_v43 = vpop.f32.mrb[16].mxu1 }
 0x25c   : > { %v4799_v52 = vpop.f32.mrb[17].mxu1 }
 0x25d   : > { %v4801_v4 = vpop.f32.mrb[18].mxu1 }
 0x25e   : > { %v4803_v38 = vpop.f32.mrb[19].mxu1 }
 0x263   : > { %v4805_v22 = vpop.f32.mrb[20].mxu1 }
 0x264   : > { %v4807_v60 = vpop.f32.mrb[21].mxu1 }
 0x265   : > { %v4809_v31 = vpop.f32.mrb[22].mxu1 }
 0x266   : > { %v4811_v46 = vpop.f32.mrb[23].mxu1 }
 0x26b   : > { %v4813_v16 = vpop.f32.mrb[24].mxu1 }
 0x26c   : > { %v4815_v39 = vpop.f32.mrb[25].mxu1 }
 0x26d   : > { %v4817_v30 = vpop.f32.mrb[26].mxu1 }
 0x26e   : > { %v4819_v48 = vpop.f32.mrb[27].mxu1 }
 0x273   : > { %v4821_v14 = vpop.f32.mrb[28].mxu1 }
 0x274   : > { %v4823_v45 = vpop.f32.mrb[29].mxu1 }
 0x275   : > { %v4827_v54 = vpop.f32.mrb[30].mxu1 }
 0x276   : > { %v4831_v63 = vpop.f32.mrb[31].mxu1 }
 0x27a   : > { %v2110_v32 = vpop.f32.mrb[0].mxu0 }
 0x27b   : > { %v3235_v61 = vadd.f32 %v2110_v32, %v1725_v19  ;;  %v2112_v1 = vpop.f32.mrb[1].mxu0 }
 0x27c   : > { %v3237_v58 = vadd.f32 %v2112_v1, %v1727_v18  ;;  %v2114_v53 = vpop.f32.mrb[2].mxu0 }
 0x27d   : > { %vm2269_vm6 = vcmp.ge.f32.partialorder %v3235_v61, 0.0  ;;  %v2301_v41 = vmul.f32 0.01, %v3235_v61  ;;  %v3239_v6 = vadd.f32 %v2114_v53, %v1729_v0  ;;  %v2116_v40 = vpop.f32.mrb[3].mxu0 }
 0x27e   : > { %vm2365_vm7 = vcmp.ge.f32.partialorder %v3237_v58, 0.0  ;;  %v2397_v23 = vmul.f32 0.01, %v3237_v58  ;;  %v3241_v8 = vadd.f32 %v2116_v40, %v1731_v3 }
 0x27f   : > { %v2333_v10 = vsel %vm2269_vm6, %v3235_v61, %v2301_v41  ;;  %vm2270_vm8 = vcmp.ge.f32.partialorder %v3239_v6, 0.0  ;;  %v2302_v26 = vmul.f32 0.01, %v3239_v6  ;;  %v1747_v41 = vadd.f32 %v4780_v28, %v4829_v20 }
 0x280   : > { %v2429_v47 = vsel %vm2365_vm7, %v3237_v58, %v2397_v23  ;;  %vm2366_vm9 = vcmp.ge.f32.partialorder %v3241_v8, 0.0  ;;  %v2398_v15 = vmul.f32 0.01, %v3241_v8  ;;  %v1751_v28 = vadd.f32 %v4784_v2, %v4829_v20 }
 0x281   : > { %v2461_v25 = vmul.f32 %v2429_v47, %v2333_v10  ;;  %v2334_v29 = vsel %vm2270_vm8, %v3239_v6, %v2302_v26 }
 0x282   : > { %v2430_v50 = vsel %vm2366_vm9, %v3241_v8, %v2398_v15  ;;  %v2120_v34 = vpop.f32.mrb[4].mxu0  ;;  %v1749_v15 = vadd.f32 %v4782_v51, %v4825_v35  ;;  %v1755_v51 = vadd.f32 %v4788_v27, %v4825_v35 }
 0x283   : > { %v2493_v55 = vadd.f32 %v2461_v25, %v2429_v47  ;;  %v2462_v24 = vmul.f32 %v2430_v50, %v2334_v29  ;;  %v3243_v33 = vadd.f32 %v2120_v34, %v1735_v7  ;;  %v2122_v56 = vpop.f32.mrb[5].mxu0 }
 0x284   : > { %v3245_v42 = vadd.f32 %v2122_v56, %v1737_v11  ;;  %v2124_v37 = vpop.f32.mrb[6].mxu0 }
 0x285   : > { %vm2525_vm10 = vcmp.ge.f32.partialorder %v2493_v55, 0.0  ;;  %v2557_v59 = vmul.f32 0.01, %v2493_v55  ;;  %v2494_v44 = vadd.f32 %v2462_v24, %v2430_v50  ;;  %vm2271_vm11 = vcmp.ge.f32.partialorder %v3243_v33, 0.0  ;;  %v2126_v57 = vpop.f32.mrb[7].mxu0 }
 0x286   : > { %v2303_v19 = vmul.f32 0.01, %v3243_v33  ;;  %vm2367_vm12 = vcmp.ge.f32.partialorder %v3245_v42, 0.0  ;;  %v2399_v18 = vmul.f32 0.01, %v3245_v42  ;;  %v3247_v32 = vadd.f32 %v2124_v37, %v1739_v12 }
 0x287   : > { %v2589_v0 = vsel %vm2525_vm10, %v2493_v55, %v2557_v59  ;;  %vm2526_vm13 = vcmp.ge.f32.partialorder %v2494_v44, 0.0  ;;  %v2558_v17 = vmul.f32 0.01, %v2494_v44  ;;  %v3249_v61 = vadd.f32 %v2126_v57, %v1741_v9 }
 0x288   : > { %v2335_v1 = vsel %vm2271_vm11, %v3243_v33, %v2303_v19  ;;  %v2431_v21 = vsel %vm2367_vm12, %v3245_v42, %v2399_v18  ;;  %vm2272_vm14 = vcmp.ge.f32.partialorder %v3247_v32, 0.0  ;;  %v2304_v62 = vmul.f32 0.01, %v3247_v32 }
 0x289   : > { %v2590_v3 = vsel %vm2526_vm13, %v2494_v44, %v2558_v17  ;;  %v2463_v58 = vmul.f32 %v2431_v21, %v2335_v1  ;;  %vm2368_vm15 = vcmp.ge.f32.partialorder %v3249_v61, 0.0  ;;  %v2400_v53 = vmul.f32 0.01, %v3249_v61 }
 0x28a   : > { %v3110_v6 = vpack.c.bf16 %v2590_v3, %v2589_v0  ;;  %v2336_v40 = vsel %vm2272_vm14, %v3247_v32, %v2304_v62  ;;  %v2130_v23 = vpop.f32.mrb[8].mxu0  ;;  %v1757_v59 = vadd.f32 %v4790_v49, %v4829_v20  ;;  %v1759_v44 = vadd.f32 %v4792_v36, %v4825_v35 }
 0x28b   : > { %v2495_v8 = vadd.f32 %v2463_v58, %v2431_v21  ;;  %v2432_v10 = vsel %vm2368_vm15, %v3249_v61, %v2400_v53  ;;  %v3251_v26 = vadd.f32 %v2130_v23, %v1745_v13  ;;  %v2132_v47 = vpop.f32.mrb[9].mxu0  ;;  %v1761_v58 = vadd.f32 %v4794_v5, %v4829_v20 }
 0x28c   : > { %3111 = vst [vmem:[%s4853_s20] sm:$0xff] %v3110_v6   ;;  %v2464_v7 = vmul.f32 %v2432_v10, %v2336_v40  ;;  %v3253_v25 = vadd.f32 %v2132_v47, %v1747_v41  ;;  %v2134_v29 = vpop.f32.mrb[10].mxu0  ;;  %v1765_v40 = vadd.f32 %v4797_v43, %v4825_v35  ;;  %v1767_v5 = vadd.f32 %v4799_v52, %v4829_v20 }
 0x28d   : > { %v2559_v11 = vmul.f32 0.01, %v2495_v8  ;;  %vm2273_vm0 = vcmp.ge.f32.partialorder %v3251_v26, 0.0  ;;  %v2305_v50 = vmul.f32 0.01, %v3251_v26  ;;  %v3255_v24 = vadd.f32 %v2134_v29, %v1749_v15  ;;  %v2136_v33 = vpop.f32.mrb[11].mxu0 }
 0x28e   : > { %v2496_v34 = vadd.f32 %v2464_v7, %v2432_v10  ;;  %vm2369_vm1 = vcmp.ge.f32.partialorder %v3253_v25, 0.0  ;;  %v2401_v55 = vmul.f32 0.01, %v3253_v25  ;;  %vm2527_vm2 = vcmp.ge.f32.partialorder %v2495_v8, 0.0 }
 0x28f   : > { %v2337_v56 = vsel %vm2273_vm0, %v3251_v26, %v2305_v50  ;;  %v3257_v12 = vadd.f32 %v2136_v33, %v1751_v28  ;;  %vm2274_vm4 = vcmp.ge.f32.partialorder %v3255_v24, 0.0  ;;  %v2306_v2 = vmul.f32 0.01, %v3255_v24 }
 0x290   : > { %vm2528_vm3 = vcmp.ge.f32.partialorder %v2496_v34, 0.0  ;;  %v2560_v9 = vmul.f32 0.01, %v2496_v34  ;;  %v2433_v13 = vsel %vm2369_vm1, %v3253_v25, %v2401_v55  ;;  %v2591_v57 = vsel %vm2527_vm2, %v2495_v8, %v2559_v11 }
 0x291   : > { %v2465_v42 = vmul.f32 %v2433_v13, %v2337_v56  ;;  %vm2370_vm5 = vcmp.ge.f32.partialorder %v3257_v12, 0.0  ;;  %v2402_v37 = vmul.f32 0.01, %v3257_v12  ;;  %v2338_v0 = vsel %vm2274_vm4, %v3255_v24, %v2306_v2 }
 0x292   : > { %v2592_v27 = vsel %vm2528_vm3, %v2496_v34, %v2560_v9  ;;  %v2140_v19 = vpop.f32.mrb[12].mxu0  ;;  %v1769_v50 = vadd.f32 %v4801_v4, %v4825_v35  ;;  %v1771_v2 = vadd.f32 %v4803_v38, %v4829_v20 }
 0x293   : > { %v3115_v18 = vpack.c.bf16 %v2592_v27, %v2591_v57  ;;  %v2497_v32 = vadd.f32 %v2465_v42, %v2433_v13  ;;  %v2434_v17 = vsel %vm2370_vm5, %v3257_v12, %v2402_v37  ;;  %v2142_v61 = vpop.f32.mrb[13].mxu0  ;;  %v3259_v21 = vadd.f32 %v2140_v19, %v1755_v51 }
 0x294   : > { %v2466_v1 = vmul.f32 %v2434_v17, %v2338_v0  ;;  %v3261_v62 = vadd.f32 %v2142_v61, %v1757_v59  ;;  %v2144_v3 = vpop.f32.mrb[14].mxu0 }
 0x295   : > { %3187 = vst [vmem:[%s4853_s20 + $0x8] sm:$0xff] %v3115_v18   ;;  %vm2529_vm6 = vcmp.ge.f32.partialorder %v2497_v32, 0.0  ;;  %v2561_v49 = vmul.f32 0.01, %v2497_v32  ;;  %v3263_v53 = vadd.f32 %v2144_v3, %v1759_v44  ;;  %v2146_v36 = vpop.f32.mrb[15].mxu0  ;;  %vm2275_vm7 = vcmp.ge.f32.partialorder %v3259_v21, 0.0 }
 0x296   : > { %v2498_v41 = vadd.f32 %v2466_v1, %v2434_v17  ;;  %v2307_v6 = vmul.f32 0.01, %v3259_v21  ;;  %vm2371_vm8 = vcmp.ge.f32.partialorder %v3261_v62, 0.0  ;;  %v2403_v23 = vmul.f32 0.01, %v3261_v62 }
 0x297   : > { %vm2276_vm9 = vcmp.ge.f32.partialorder %v3263_v53, 0.0  ;;  %v2308_v8 = vmul.f32 0.01, %v3263_v53  ;;  %v3265_v47 = vadd.f32 %v2146_v36, %v1761_v58  ;;  %v2593_v15 = vsel %vm2529_vm6, %v2497_v32, %v2561_v49 }
 0x298   : > { %vm2530_vm10 = vcmp.ge.f32.partialorder %v2498_v41, 0.0  ;;  %v2562_v10 = vmul.f32 0.01, %v2498_v41  ;;  %v2339_v26 = vsel %vm2275_vm7, %v3259_v21, %v2307_v6  ;;  %v2435_v7 = vsel %vm2371_vm8, %v3261_v62, %v2403_v23 }
 0x299   : > { %v2340_v25 = vsel %vm2276_vm9, %v3263_v53, %v2308_v8  ;;  %v2467_v28 = vmul.f32 %v2435_v7, %v2339_v26  ;;  %vm2372_vm11 = vcmp.ge.f32.partialorder %v3265_v47, 0.0  ;;  %v2404_v11 = vmul.f32 0.01, %v3265_v47 }
 0x29a   : > { %v2594_v29 = vsel %vm2530_vm10, %v2498_v41, %v2562_v10  ;;  %v2150_v43 = vpop.f32.mrb[16].mxu0  ;;  %v1775_v18 = vadd.f32 %v4805_v22, %v4825_v35  ;;  %v1777_v17 = vadd.f32 %v4807_v60, %v4829_v20  ;;  %v1779_v53 = vadd.f32 %v4809_v31, %v4825_v35 }
 0x29b   : > { %v3120_v34 = vpack.c.bf16 %v2594_v29, %v2593_v15  ;;  %v3267_v55 = vadd.f32 %v2150_v43, %v1765_v40  ;;  %v2152_v24 = vpop.f32.mrb[17].mxu0  ;;  %v2499_v33 = vadd.f32 %v2467_v28, %v2435_v7  ;;  %v2436_v51 = vsel %vm2372_vm11, %v3265_v47, %v2404_v11 }
 0x29c   : > { %v3269_v56 = vadd.f32 %v2152_v24, %v1767_v5  ;;  %v2154_v52 = vpop.f32.mrb[18].mxu0  ;;  %v2468_v12 = vmul.f32 %v2436_v51, %v2340_v25  ;;  %v1781_v60 = vadd.f32 %v4811_v46, %v4829_v20  ;;  %v1785_v40 = vadd.f32 %v4813_v16, %v4825_v35 }
 0x29d   : > { %3188 = vst [vmem:[%s4853_s20 + $0x10] sm:$0xff] %v3120_v34   ;;  %vm2277_vm12 = vcmp.ge.f32.partialorder %v3267_v55, 0.0  ;;  %v2309_v9 = vmul.f32 0.01, %v3267_v55  ;;  %v3271_v13 = vadd.f32 %v2154_v52, %v1769_v50  ;;  %v2156_v42 = vpop.f32.mrb[19].mxu0  ;;  %vm2531_vm15 = vcmp.ge.f32.partialorder %v2499_v33, 0.0 }
 0x29e   : > { %v2563_v37 = vmul.f32 0.01, %v2499_v33  ;;  %vm2373_vm13 = vcmp.ge.f32.partialorder %v3269_v56, 0.0  ;;  %v2405_v59 = vmul.f32 0.01, %v3269_v56  ;;  %v2500_v4 = vadd.f32 %v2468_v12, %v2436_v51 }
 0x29f   : > { %v2341_v44 = vsel %vm2277_vm12, %v3267_v55, %v2309_v9  ;;  %vm2278_vm14 = vcmp.ge.f32.partialorder %v3271_v13, 0.0  ;;  %v2310_v57 = vmul.f32 0.01, %v3271_v13  ;;  %v3273_v19 = vadd.f32 %v2156_v42, %v1771_v2 }
 0x2a0   : > { %v2437_v27 = vsel %vm2373_vm13, %v3269_v56, %v2405_v59  ;;  %vm2532_vm0 = vcmp.ge.f32.partialorder %v2500_v4, 0.0  ;;  %v2564_v32 = vmul.f32 0.01, %v2500_v4  ;;  %v2595_v21 = vsel %vm2531_vm15, %v2499_v33, %v2563_v37 }
 0x2a1   : > { %v2469_v0 = vmul.f32 %v2437_v27, %v2341_v44  ;;  %v2342_v38 = vsel %vm2278_vm14, %v3271_v13, %v2310_v57  ;;  %vm2374_vm1 = vcmp.ge.f32.partialorder %v3273_v19, 0.0  ;;  %v2406_v61 = vmul.f32 0.01, %v3273_v19 }
 0x2a2   : > { %v2160_v1 = vpop.f32.mrb[20].mxu0  ;;  %v2596_v62 = vsel %vm2532_vm0, %v2500_v4, %v2564_v32  ;;  %v1787_v16 = vadd.f32 %v4815_v39, %v4829_v20  ;;  %v1789_v56 = vadd.f32 %v4817_v30, %v4825_v35  ;;  %v1791_v39 = vadd.f32 %v4819_v48, %v4829_v20 }
 0x2a3   : > { %v2501_v3 = vadd.f32 %v2469_v0, %v2437_v27  ;;  %v3275_v58 = vadd.f32 %v2160_v1, %v1775_v18  ;;  %v2162_v49 = vpop.f32.mrb[21].mxu0  ;;  %v3125_v22 = vpack.c.bf16 %v2596_v62, %v2595_v21  ;;  %v2438_v36 = vsel %vm2374_vm1, %v3273_v19, %v2406_v61 }
 0x2a4   : > { %v3277_v41 = vadd.f32 %v2162_v49, %v1777_v17  ;;  %v2164_v6 = vpop.f32.mrb[22].mxu0  ;;  %v2470_v23 = vmul.f32 %v2438_v36, %v2342_v38  ;;  %v1795_v42 = vadd.f32 %v4821_v14, %v4825_v35  ;;  %v1797_v14 = vadd.f32 %v4823_v45, %v4829_v20 }
 0x2a5   : > { %vm2279_vm2 = vcmp.ge.f32.partialorder %v3275_v58, 0.0  ;;  %v2166_v8 = vpop.f32.mrb[23].mxu0  ;;  %3189 = vst [vmem:[%s4853_s20 + $0x18] sm:$0xff] %v3125_v22   ;;  %v2311_v10 = vmul.f32 0.01, %v3275_v58  ;;  %v3279_v47 = vadd.f32 %v2164_v6, %v1779_v53  ;;  %vm2533_vm4 = vcmp.ge.f32.partialorder %v2501_v3, 0.0 }
 0x2a6   : > { %vm2375_vm3 = vcmp.ge.f32.partialorder %v3277_v41, 0.0  ;;  %v2407_v26 = vmul.f32 0.01, %v3277_v41  ;;  %v2565_v31 = vmul.f32 0.01, %v2501_v3  ;;  %v2502_v5 = vadd.f32 %v2470_v23, %v2438_v36 }
 0x2a7   : > { %v3281_v15 = vadd.f32 %v2166_v8, %v1781_v60  ;;  %v2343_v7 = vsel %vm2279_vm2, %v3275_v58, %v2311_v10  ;;  %vm2280_vm5 = vcmp.ge.f32.partialorder %v3279_v47, 0.0  ;;  %v2312_v29 = vmul.f32 0.01, %v3279_v47 }
 0x2a8   : > { %v2439_v25 = vsel %vm2375_vm3, %v3277_v41, %v2407_v26  ;;  %vm2534_vm6 = vcmp.ge.f32.partialorder %v2502_v5, 0.0  ;;  %v2566_v46 = vmul.f32 0.01, %v2502_v5  ;;  %v2597_v34 = vsel %vm2533_vm4, %v2501_v3, %v2565_v31 }
 0x2a9   : > { %v2471_v28 = vmul.f32 %v2439_v25, %v2343_v7  ;;  %vm2376_vm7 = vcmp.ge.f32.partialorder %v3281_v15, 0.0  ;;  %v2344_v11 = vsel %vm2280_vm5, %v3279_v47, %v2312_v29  ;;  %v2408_v43 = vmul.f32 0.01, %v3281_v15 }
 0x2aa   : > { %v2170_v50 = vpop.f32.mrb[24].mxu0  ;;  %v2598_v55 = vsel %vm2534_vm6, %v2502_v5, %v2566_v46  ;;  %v1799_v49 = vadd.f32 %v4827_v54, %v4825_v35  ;;  %v1801_v45 = vadd.f32 %v4831_v63, %v4829_v20 }
 0x2ab   : > { %v2503_v24 = vadd.f32 %v2471_v28, %v2439_v25  ;;  %v3283_v33 = vadd.f32 %v2170_v50, %v1785_v40  ;;  %v2172_v51 = vpop.f32.mrb[25].mxu0  ;;  %v3130_v52 = vpack.c.bf16 %v2598_v55, %v2597_v34  ;;  %v2440_v12 = vsel %vm2376_vm7, %v3281_v15, %v2408_v43 }
 0x2ac   : > { %v3285_v9 = vadd.f32 %v2172_v51, %v1787_v16  ;;  %v2174_v13 = vpop.f32.mrb[26].mxu0  ;;  %v2472_v2 = vmul.f32 %v2440_v12, %v2344_v11 }
 0x2ad   : > { %vm2281_vm8 = vcmp.ge.f32.partialorder %v3283_v33, 0.0  ;;  %v2176_v37 = vpop.f32.mrb[27].mxu0  ;;  %3190 = vst [vmem:[%s4853_s20 + $0x20] sm:$0xff] %v3130_v52   ;;  %v2313_v59 = vmul.f32 0.01, %v3283_v33  ;;  %v3287_v44 = vadd.f32 %v2174_v13, %v1789_v56  ;;  %vm2535_vm10 = vcmp.ge.f32.partialorder %v2503_v24, 0.0 }
 0x2ae   : > { %vm2377_vm9 = vcmp.ge.f32.partialorder %v3285_v9, 0.0  ;;  %v2409_v4 = vmul.f32 0.01, %v3285_v9  ;;  %v2567_v30 = vmul.f32 0.01, %v2503_v24  ;;  %v2504_v57 = vadd.f32 %v2472_v2, %v2440_v12 }
 0x2af   : > { %v3289_v27 = vadd.f32 %v2176_v37, %v1791_v39  ;;  %v2345_v19 = vsel %vm2281_vm8, %v3283_v33, %v2313_v59  ;;  %vm2282_vm11 = vcmp.ge.f32.partialorder %v3287_v44, 0.0  ;;  %v2314_v32 = vmul.f32 0.01, %v3287_v44 }
 0x2b0   : > { %v2441_v18 = vsel %vm2377_vm9, %v3285_v9, %v2409_v4  ;;  %vm2536_vm12 = vcmp.ge.f32.partialorder %v2504_v57, 0.0  ;;  %v2568_v48 = vmul.f32 0.01, %v2504_v57  ;;  %v2599_v1 = vsel %vm2535_vm10, %v2503_v24, %v2567_v30 }
 0x2b1   : > { %v2473_v0 = vmul.f32 %v2441_v18, %v2345_v19  ;;  %vm2378_vm13 = vcmp.ge.f32.partialorder %v3289_v27, 0.0  ;;  %v2346_v17 = vsel %vm2282_vm11, %v3287_v44, %v2314_v32  ;;  %v2410_v38 = vmul.f32 0.01, %v3289_v27 }
 0x2b2   : > { %v2180_v61 = vpop.f32.mrb[28].mxu0  ;;  %v2600_v21 = vsel %vm2536_vm12, %v2504_v57, %v2568_v48 }
 0x2b3   : > { %v2505_v62 = vadd.f32 %v2473_v0, %v2441_v18  ;;  %v3291_v3 = vadd.f32 %v2180_v61, %v1795_v42  ;;  %v2182_v58 = vpop.f32.mrb[29].mxu0  ;;  %v3135_v53 = vpack.c.bf16 %v2600_v21, %v2599_v1  ;;  %v2442_v22 = vsel %vm2378_vm13, %v3289_v27, %v2410_v38 }
 0x2b4   : > { %v3293_v36 = vadd.f32 %v2182_v58, %v1797_v14  ;;  %v2184_v41 = vpop.f32.mrb[30].mxu0  ;;  %v2474_v6 = vmul.f32 %v2442_v22, %v2346_v17 }
 0x2b5   : > { %vm2283_vm14 = vcmp.ge.f32.partialorder %v3291_v3, 0.0  ;;  %v2186_v60 = vpop.f32.mrb[31].mxu0  ;;  %3191 = vst [vmem:[%s4853_s20 + $0x28] sm:$0xff] %v3135_v53   ;;  %v2315_v40 = vmul.f32 0.01, %v3291_v3  ;;  %v3295_v8 = vadd.f32 %v2184_v41, %v1799_v49  ;;  %vm2537_vm0 = vcmp.ge.f32.partialorder %v2505_v62, 0.0 }
 0x2b6   : > { %vm2379_vm15 = vcmp.ge.f32.partialorder %v3293_v36, 0.0  ;;  %v2411_v23 = vmul.f32 0.01, %v3293_v36  ;;  %v2569_v10 = vmul.f32 0.01, %v2505_v62  ;;  %v2506_v26 = vadd.f32 %v2474_v6, %v2442_v22 }
 0x2b7   : > { %v3297_v47 = vadd.f32 %v2186_v60, %v1801_v45  ;;  %v2347_v54 = vsel %vm2283_vm14, %v3291_v3, %v2315_v40  ;;  %vm2284_vm1 = vcmp.ge.f32.partialorder %v3295_v8, 0.0  ;;  %v2316_v5 = vmul.f32 0.01, %v3295_v8 }
 0x2b8   : > { %v2443_v31 = vsel %vm2379_vm15, %v3293_v36, %v2411_v23  ;;  %vm2538_vm2 = vcmp.ge.f32.partialorder %v2506_v26, 0.0  ;;  %v2570_v15 = vmul.f32 0.01, %v2506_v26  ;;  %v2601_v46 = vsel %vm2537_vm0, %v2505_v62, %v2569_v10 }
 0x2b9   : > { %v2475_v63 = vmul.f32 %v2443_v31, %v2347_v54  ;;  %vm2380_vm3 = vcmp.ge.f32.partialorder %v3297_v47, 0.0  ;;  %v2348_v7 = vsel %vm2284_vm1, %v3295_v8, %v2316_v5  ;;  %v2412_v25 = vmul.f32 0.01, %v3297_v47 }
 0x2ba   : > { %v2190_v29 = vpop.f32.mrb[32].mxu0  ;;  %v2602_v28 = vsel %vm2538_vm2, %v2506_v26, %v2570_v15 }
 0x2bb   : > { %v2507_v16 = vadd.f32 %v2475_v63, %v2443_v31  ;;  %v2192_v11 = vpop.f32.mrb[33].mxu0  ;;  %v3140_v43 = vpack.c.bf16 %v2602_v28, %v2601_v46  ;;  %v2444_v50 = vsel %vm2380_vm3, %v3297_v47, %v2412_v25 }
 0x2bc   : > { %v2194_v34 = vpop.f32.mrb[34].mxu0  ;;  %v2476_v55 = vmul.f32 %v2444_v50, %v2348_v7 }
 0x2bd   : > { %v2196_v24 = vpop.f32.mrb[35].mxu0  ;;  %3192 = vst [vmem:[%s4853_s20 + $0x30] sm:$0xff] %v3140_v43   ;;  %v2571_v33 = vmul.f32 0.01, %v2507_v16  ;;  %vm2539_vm4 = vcmp.ge.f32.partialorder %v2507_v16, 0.0 }
 0x2be   : > { %v2508_v51 = vadd.f32 %v2476_v55, %v2444_v50 }
 0x2bf   : > { %v2603_v12 = vsel %vm2539_vm4, %v2507_v16, %v2571_v33 }
 0x2c0   : > { %vm2540_vm5 = vcmp.ge.f32.partialorder %v2508_v51, 0.0  ;;  %v2572_v56 = vmul.f32 0.01, %v2508_v51 }
 0x2c2   : > { %v4907_v52 = vpop.f32.mrb[36].mxu0  ;;  %v2604_v9 = vsel %vm2540_vm5, %v2508_v51, %v2572_v56 }
 0x2c3   : > { %v4909_v13 = vpop.f32.mrb[37].mxu0  ;;  %v3145_v39 = vpack.c.bf16 %v2604_v9, %v2603_v12 }
 0x2c4   : > { %v4911_v42 = vpop.f32.mrb[38].mxu0 }
 0x2c5   : > { %v4913_v2 = vpop.f32.mrb[39].mxu0  ;;  %3193 = vst [vmem:[%s4853_s20 + $0x38] sm:$0xff] %v3145_v39  }
 0x2ca   : > { %v4916_v37 = vpop.f32.mrb[40].mxu0 }
 0x2cb   : > { %v4918_v59 = vpop.f32.mrb[41].mxu0 }
 0x2cc   : > { %v4920_v4 = vpop.f32.mrb[42].mxu0 }
 0x2cd   : > { %v4922_v44 = vpop.f32.mrb[43].mxu0 }
 0x2d2   : > { %v4924_v30 = vpop.f32.mrb[44].mxu0 }
 0x2d3   : > { %v4926_v57 = vpop.f32.mrb[45].mxu0 }
 0x2d4   : > { %v4928_v27 = vpop.f32.mrb[46].mxu0 }
 0x2d5   : > { %v4930_v19 = vpop.f32.mrb[47].mxu0 }
 0x2da   : > { %v4932_v18 = vpop.f32.mrb[48].mxu0 }
 0x2db   : > { %v4934_v32 = vpop.f32.mrb[49].mxu0 }
 0x2dc   : > { %v4936_v48 = vpop.f32.mrb[50].mxu0 }
 0x2dd   : > { %v4938_v0 = vpop.f32.mrb[51].mxu0 }
 0x2e2   : > { %v4940_v14 = vpop.f32.mrb[52].mxu0 }
 0x2e3   : > { %v4942_v17 = vpop.f32.mrb[53].mxu0 }
 0x2e4   : > { %v4944_v38 = vpop.f32.mrb[54].mxu0 }
 0x2e5   : > { %v4946_v61 = vpop.f32.mrb[55].mxu0 }
 0x2ea   : > { %v4948_v1 = vpop.f32.mrb[56].mxu0 }
 0x2eb   : > { %v4950_v21 = vpop.f32.mrb[57].mxu0 }
 0x2ec   : > { %v4952_v62 = vpop.f32.mrb[58].mxu0 }
 0x2ed   : > { %v4954_v3 = vpop.f32.mrb[59].mxu0 }
 0x2f2   : > { %v4956_v58 = vpop.f32.mrb[60].mxu0 }
 0x2f3   : > { %v1997_v49 = vpop.f32.mrb[32].mxu1  ;;  %v4958_v53 = vpop.f32.mrb[61].mxu0 }
 0x2f4   : > { %v3298_v22 = vadd.f32 %v1997_v49, %v4825_v35  ;;  %v1999_v36 = vpop.f32.mrb[33].mxu1  ;;  %v4961_v41 = vpop.f32.mrb[62].mxu0 }
 0x2f5   : > { %v3300_v45 = vadd.f32 %v1999_v36, %v4829_v20  ;;  %v2001_v6 = vpop.f32.mrb[34].mxu1  ;;  %v4964_v60 = vpop.f32.mrb[63].mxu0 }
 0x2f6   : > { %v3299_v40 = vadd.f32 %v3298_v22, %v2190_v29  ;;  %v3302_v23 = vadd.f32 %v2001_v6, %v4825_v35  ;;  %v2003_v8 = vpop.f32.mrb[35].mxu1 }
 0x2f7   : > { %v3301_v10 = vadd.f32 %v3300_v45, %v2192_v11  ;;  %v3304_v26 = vadd.f32 %v2003_v8, %v4829_v20 }
 0x2f8   : > { %vm2285_vm6 = vcmp.ge.f32.partialorder %v3299_v40, 0.0  ;;  %v2317_v47 = vmul.f32 0.01, %v3299_v40  ;;  %v3303_v54 = vadd.f32 %v3302_v23, %v2194_v34 }
 0x2f9   : > { %vm2381_vm7 = vcmp.ge.f32.partialorder %v3301_v10, 0.0  ;;  %v2413_v31 = vmul.f32 0.01, %v3301_v10  ;;  %v3305_v5 = vadd.f32 %v3304_v26, %v2196_v24 }
 0x2fa   : > { %v2349_v15 = vsel %vm2285_vm6, %v3299_v40, %v2317_v47  ;;  %vm2286_vm8 = vcmp.ge.f32.partialorder %v3303_v54, 0.0  ;;  %v2318_v63 = vmul.f32 0.01, %v3303_v54 }
 0x2fb   : > { %v2445_v7 = vsel %vm2381_vm7, %v3301_v10, %v2413_v31  ;;  %vm2382_vm9 = vcmp.ge.f32.partialorder %v3305_v5, 0.0  ;;  %v2414_v25 = vmul.f32 0.01, %v3305_v5  ;;  %v2007_v46 = vpop.f32.mrb[36].mxu1 }
 0x2fc   : > { %v2477_v29 = vmul.f32 %v2445_v7, %v2349_v15  ;;  %v2350_v28 = vsel %vm2286_vm8, %v3303_v54, %v2318_v63  ;;  %v3306_v16 = vadd.f32 %v2007_v46, %v4825_v35  ;;  %v2009_v11 = vpop.f32.mrb[37].mxu1 }
 0x2fd   : > { %v2446_v43 = vsel %vm2382_vm9, %v3305_v5, %v2414_v25  ;;  %v3308_v50 = vadd.f32 %v2009_v11, %v4829_v20  ;;  %v2011_v55 = vpop.f32.mrb[38].mxu1 }
 0x2fe   : > { %v2509_v34 = vadd.f32 %v2477_v29, %v2445_v7  ;;  %v2478_v33 = vmul.f32 %v2446_v43, %v2350_v28  ;;  %v3307_v24 = vadd.f32 %v3306_v16, %v4907_v52  ;;  %v3310_v51 = vadd.f32 %v2011_v55, %v4825_v35  ;;  %v2013_v56 = vpop.f32.mrb[39].mxu1 }
 0x2ff   : > { %v3309_v12 = vadd.f32 %v3308_v50, %v4909_v13  ;;  %v3312_v9 = vadd.f32 %v2013_v56, %v4829_v20 }
 0x300   : > { %vm2541_vm10 = vcmp.ge.f32.partialorder %v2509_v34, 0.0  ;;  %v2573_v39 = vmul.f32 0.01, %v2509_v34  ;;  %v2510_v49 = vadd.f32 %v2478_v33, %v2446_v43  ;;  %vm2287_vm11 = vcmp.ge.f32.partialorder %v3307_v24, 0.0 }
 0x301   : > { %v2319_v22 = vmul.f32 0.01, %v3307_v24  ;;  %vm2383_vm12 = vcmp.ge.f32.partialorder %v3309_v12, 0.0  ;;  %v2415_v36 = vmul.f32 0.01, %v3309_v12  ;;  %v3311_v45 = vadd.f32 %v3310_v51, %v4911_v42 }
 0x302   : > { %v2605_v6 = vsel %vm2541_vm10, %v2509_v34, %v2573_v39  ;;  %vm2542_vm13 = vcmp.ge.f32.partialorder %v2510_v49, 0.0  ;;  %v2574_v40 = vmul.f32 0.01, %v2510_v49  ;;  %v3313_v52 = vadd.f32 %v3312_v9, %v4913_v2 }
 0x303   : > { %v2351_v23 = vsel %vm2287_vm11, %v3307_v24, %v2319_v22  ;;  %v2447_v8 = vsel %vm2383_vm12, %v3309_v12, %v2415_v36  ;;  %vm2288_vm14 = vcmp.ge.f32.partialorder %v3311_v45, 0.0  ;;  %v2320_v13 = vmul.f32 0.01, %v3311_v45  ;;  %v2017_v10 = vpop.f32.mrb[40].mxu1 }
 0x304   : > { %v2606_v26 = vsel %vm2542_vm13, %v2510_v49, %v2574_v40  ;;  %v2479_v47 = vmul.f32 %v2447_v8, %v2351_v23  ;;  %vm2384_vm15 = vcmp.ge.f32.partialorder %v3313_v52, 0.0  ;;  %v2416_v54 = vmul.f32 0.01, %v3313_v52  ;;  %v2019_v31 = vpop.f32.mrb[41].mxu1 }
 0x305   : > { %v3150_v5 = vpack.c.bf16 %v2606_v26, %v2605_v6  ;;  %v2352_v15 = vsel %vm2288_vm14, %v3311_v45, %v2320_v13  ;;  %v3314_v42 = vadd.f32 %v2017_v10, %v4825_v35  ;;  %v3316_v63 = vadd.f32 %v2019_v31, %v4829_v20  ;;  %v2021_v7 = vpop.f32.mrb[42].mxu1 }
 0x306   : > { %v2511_v25 = vadd.f32 %v2479_v47, %v2447_v8  ;;  %v2448_v2 = vsel %vm2384_vm15, %v3313_v52, %v2416_v54  ;;  %v3318_v46 = vadd.f32 %v2021_v7, %v4825_v35  ;;  %v2023_v29 = vpop.f32.mrb[43].mxu1 }
 0x307   : > { %3194 = vst [vmem:[%s4853_s20 + $0x40] sm:$0xff] %v3150_v5   ;;  %v2480_v28 = vmul.f32 %v2448_v2, %v2352_v15  ;;  %v3315_v16 = vadd.f32 %v3314_v42, %v4916_v37  ;;  %v3317_v11 = vadd.f32 %v3316_v63, %v4918_v59  ;;  %v3320_v43 = vadd.f32 %v2023_v29, %v4829_v20 }
 0x308   : > { %vm2543_vm0 = vcmp.ge.f32.partialorder %v2511_v25, 0.0  ;;  %v2575_v50 = vmul.f32 0.01, %v2511_v25  ;;  %v3319_v55 = vadd.f32 %v3318_v46, %v4920_v4 }
 0x309   : > { %v2512_v34 = vadd.f32 %v2480_v28, %v2448_v2  ;;  %vm2289_vm1 = vcmp.ge.f32.partialorder %v3315_v16, 0.0  ;;  %v2321_v33 = vmul.f32 0.01, %v3315_v16  ;;  %vm2385_vm2 = vcmp.ge.f32.partialorder %v3317_v11, 0.0 }
 0x30a   : > { %v2417_v24 = vmul.f32 0.01, %v3317_v11  ;;  %vm2290_vm3 = vcmp.ge.f32.partialorder %v3319_v55, 0.0  ;;  %v2322_v51 = vmul.f32 0.01, %v3319_v55  ;;  %v3321_v37 = vadd.f32 %v3320_v43, %v4922_v44 }
 0x30b   : > { %vm2544_vm4 = vcmp.ge.f32.partialorder %v2512_v34, 0.0  ;;  %v2576_v56 = vmul.f32 0.01, %v2512_v34  ;;  %v2353_v12 = vsel %vm2289_vm1, %v3315_v16, %v2321_v33  ;;  %v2027_v9 = vpop.f32.mrb[44].mxu1  ;;  %v2607_v59 = vsel %vm2543_vm0, %v2511_v25, %v2575_v50 }
 0x30c   : > { %v2449_v39 = vsel %vm2385_vm2, %v3317_v11, %v2417_v24  ;;  %v2354_v49 = vsel %vm2290_vm3, %v3319_v55, %v2322_v51  ;;  %v3322_v22 = vadd.f32 %v2027_v9, %v4825_v35  ;;  %v2029_v4 = vpop.f32.mrb[45].mxu1  ;;  %vm2386_vm5 = vcmp.ge.f32.partialorder %v3321_v37, 0.0 }
 0x30d   : > { %v2608_v36 = vsel %vm2544_vm4, %v2512_v34, %v2576_v56  ;;  %v2481_v45 = vmul.f32 %v2449_v39, %v2353_v12  ;;  %v2418_v6 = vmul.f32 0.01, %v3321_v37  ;;  %v2031_v40 = vpop.f32.mrb[46].mxu1  ;;  %v3324_v8 = vadd.f32 %v2029_v4, %v4829_v20 }
 0x30e   : > { %v3155_v52 = vpack.c.bf16 %v2608_v36, %v2607_v59  ;;  %v3323_v23 = vadd.f32 %v3322_v22, %v4924_v30  ;;  %v3326_v44 = vadd.f32 %v2031_v40, %v4825_v35  ;;  %v2033_v13 = vpop.f32.mrb[47].mxu1 }
 0x30f   : > { %v2513_v10 = vadd.f32 %v2481_v45, %v2449_v39  ;;  %v2450_v26 = vsel %vm2386_vm5, %v3321_v37, %v2418_v6  ;;  %v3328_v47 = vadd.f32 %v2033_v13, %v4829_v20  ;;  %v3325_v5 = vadd.f32 %v3324_v8, %v4926_v57 }
 0x310   : > { %3195 = vst [vmem:[%s4853_s20 + $0x48] sm:$0xff] %v3155_v52   ;;  %v2482_v54 = vmul.f32 %v2450_v26, %v2354_v49  ;;  %vm2291_vm6 = vcmp.ge.f32.partialorder %v3323_v23, 0.0  ;;  %v2323_v31 = vmul.f32 0.01, %v3323_v23  ;;  %v3327_v42 = vadd.f32 %v3326_v44, %v4928_v27 }
 0x311   : > { %v2577_v15 = vmul.f32 0.01, %v2513_v10  ;;  %v3329_v30 = vadd.f32 %v3328_v47, %v4930_v19  ;;  %vm2387_vm7 = vcmp.ge.f32.partialorder %v3325_v5, 0.0  ;;  %v2419_v25 = vmul.f32 0.01, %v3325_v5 }
 0x312   : > { %v2514_v63 = vadd.f32 %v2482_v54, %v2450_v26  ;;  %v2355_v7 = vsel %vm2291_vm6, %v3323_v23, %v2323_v31  ;;  %vm2545_vm8 = vcmp.ge.f32.partialorder %v2513_v10, 0.0  ;;  %vm2292_vm9 = vcmp.ge.f32.partialorder %v3327_v42, 0.0 }
 0x313   : > { %v2324_v2 = vmul.f32 0.01, %v3327_v42  ;;  %vm2388_vm10 = vcmp.ge.f32.partialorder %v3329_v30, 0.0  ;;  %v2037_v46 = vpop.f32.mrb[48].mxu1  ;;  %v2451_v28 = vsel %vm2387_vm7, %v3325_v5, %v2419_v25  ;;  %v2420_v16 = vmul.f32 0.01, %v3329_v30 }
 0x314   : > { %vm2546_vm11 = vcmp.ge.f32.partialorder %v2514_v63, 0.0  ;;  %v2578_v29 = vmul.f32 0.01, %v2514_v63  ;;  %v2039_v11 = vpop.f32.mrb[49].mxu1  ;;  %v2483_v57 = vmul.f32 %v2451_v28, %v2355_v7  ;;  %v3330_v27 = vadd.f32 %v2037_v46, %v4825_v35 }
 0x315   : > { %v2356_v43 = vsel %vm2292_vm9, %v3327_v42, %v2324_v2  ;;  %v3332_v19 = vadd.f32 %v2039_v11, %v4829_v20  ;;  %v2041_v50 = vpop.f32.mrb[50].mxu1  ;;  %v2609_v55 = vsel %vm2545_vm8, %v2513_v10, %v2577_v15  ;;  %v2452_v33 = vsel %vm2388_vm10, %v3329_v30, %v2420_v16 }
 0x316   : > { %v2610_v34 = vsel %vm2546_vm11, %v2514_v63, %v2578_v29  ;;  %v3334_v24 = vadd.f32 %v2041_v50, %v4825_v35  ;;  %v2043_v51 = vpop.f32.mrb[51].mxu1  ;;  %v2515_v12 = vadd.f32 %v2483_v57, %v2451_v28  ;;  %v2484_v37 = vmul.f32 %v2452_v33, %v2356_v43 }
 0x317   : > { %v3160_v56 = vpack.c.bf16 %v2610_v34, %v2609_v55  ;;  %v3331_v9 = vadd.f32 %v3330_v27, %v4932_v18  ;;  %v3333_v59 = vadd.f32 %v3332_v19, %v4934_v32  ;;  %v3336_v49 = vadd.f32 %v2043_v51, %v4829_v20 }
 0x318   : > { %v3335_v39 = vadd.f32 %v3334_v24, %v4936_v48  ;;  %vm2547_vm12 = vcmp.ge.f32.partialorder %v2515_v12, 0.0  ;;  %v2579_v22 = vmul.f32 0.01, %v2515_v12  ;;  %v2516_v4 = vadd.f32 %v2484_v37, %v2452_v33 }
 0x319   : > { %3196 = vst [vmem:[%s4853_s20 + $0x50] sm:$0xff] %v3160_v56   ;;  %vm2293_vm13 = vcmp.ge.f32.partialorder %v3331_v9, 0.0  ;;  %v2325_v36 = vmul.f32 0.01, %v3331_v9  ;;  %vm2389_vm14 = vcmp.ge.f32.partialorder %v3333_v59, 0.0  ;;  %v3337_v48 = vadd.f32 %v3336_v49, %v4938_v0 }
 0x31a   : > { %v2421_v45 = vmul.f32 0.01, %v3333_v59  ;;  %vm2294_vm15 = vcmp.ge.f32.partialorder %v3335_v39, 0.0  ;;  %v2611_v6 = vsel %vm2547_vm12, %v2515_v12, %v2579_v22  ;;  %vm2548_vm0 = vcmp.ge.f32.partialorder %v2516_v4, 0.0 }
 0x31b   : > { %v2580_v40 = vmul.f32 0.01, %v2516_v4  ;;  %v2326_v52 = vmul.f32 0.01, %v3335_v39  ;;  %v2047_v18 = vpop.f32.mrb[52].mxu1  ;;  %v2357_v23 = vsel %vm2293_vm13, %v3331_v9, %v2325_v36  ;;  %vm2390_vm1 = vcmp.ge.f32.partialorder %v3337_v48, 0.0 }
 0x31c   : > { %v2453_v32 = vsel %vm2389_vm14, %v3333_v59, %v2421_v45  ;;  %v3338_v8 = vadd.f32 %v2047_v18, %v4825_v35  ;;  %v2049_v44 = vpop.f32.mrb[53].mxu1  ;;  %v2422_v5 = vmul.f32 0.01, %v3337_v48 }
 0x31d   : > { %v2612_v13 = vsel %vm2548_vm0, %v2516_v4, %v2580_v40  ;;  %v2485_v10 = vmul.f32 %v2453_v32, %v2357_v23  ;;  %v2358_v26 = vsel %vm2294_vm15, %v3335_v39, %v2326_v52  ;;  %v3340_v47 = vadd.f32 %v2049_v44, %v4829_v20  ;;  %v2051_v54 = vpop.f32.mrb[54].mxu1 }
 0x31e   : > { %v3165_v31 = vpack.c.bf16 %v2612_v13, %v2611_v6  ;;  %v3339_v15 = vadd.f32 %v3338_v8, %v4940_v14  ;;  %v2053_v42 = vpop.f32.mrb[55].mxu1  ;;  %v3342_v0 = vadd.f32 %v2051_v54, %v4825_v35  ;;  %v2454_v25 = vsel %vm2390_vm1, %v3337_v48, %v2422_v5 }
 0x31f   : > { %v2517_v30 = vadd.f32 %v2485_v10, %v2453_v32  ;;  %v3341_v63 = vadd.f32 %v3340_v47, %v4942_v17  ;;  %v3344_v7 = vadd.f32 %v2053_v42, %v4829_v20  ;;  %v2486_v29 = vmul.f32 %v2454_v25, %v2358_v26 }
 0x320   : > { %3197 = vst [vmem:[%s4853_s20 + $0x58] sm:$0xff] %v3165_v31   ;;  %vm2295_vm2 = vcmp.ge.f32.partialorder %v3339_v15, 0.0  ;;  %v2327_v2 = vmul.f32 0.01, %v3339_v15  ;;  %v3343_v14 = vadd.f32 %v3342_v0, %v4944_v38 }
 0x321   : > { %vm2549_vm3 = vcmp.ge.f32.partialorder %v2517_v30, 0.0  ;;  %v2581_v46 = vmul.f32 0.01, %v2517_v30  ;;  %vm2391_vm4 = vcmp.ge.f32.partialorder %v3341_v63, 0.0  ;;  %v2423_v16 = vmul.f32 0.01, %v3341_v63 }
 0x322   : > { %v2359_v28 = vsel %vm2295_vm2, %v3339_v15, %v2327_v2  ;;  %v3345_v11 = vadd.f32 %v3344_v7, %v4946_v61  ;;  %v2518_v17 = vadd.f32 %v2486_v29, %v2454_v25  ;;  %vm2296_vm5 = vcmp.ge.f32.partialorder %v3343_v14, 0.0 }
 0x323   : > { %v2613_v57 = vsel %vm2549_vm3, %v2517_v30, %v2581_v46  ;;  %v2057_v43 = vpop.f32.mrb[56].mxu1  ;;  %v2455_v27 = vsel %vm2391_vm4, %v3341_v63, %v2423_v16  ;;  %v2328_v19 = vmul.f32 0.01, %v3343_v14 }
 0x324   : > { %vm2392_vm6 = vcmp.ge.f32.partialorder %v3345_v11, 0.0  ;;  %v2059_v50 = vpop.f32.mrb[57].mxu1  ;;  %vm2550_vm7 = vcmp.ge.f32.partialorder %v2518_v17, 0.0  ;;  %v2582_v55 = vmul.f32 0.01, %v2518_v17  ;;  %v2487_v34 = vmul.f32 %v2455_v27, %v2359_v28 }
 0x325   : > { %v2424_v33 = vmul.f32 0.01, %v3345_v11  ;;  %v2061_v24 = vpop.f32.mrb[58].mxu1  ;;  %v2360_v51 = vsel %vm2296_vm5, %v3343_v14, %v2328_v19  ;;  %v3346_v56 = vadd.f32 %v2057_v43, %v4825_v35  ;;  %v3348_v38 = vadd.f32 %v2059_v50, %v4829_v20 }
 0x326   : > { %v3350_v61 = vadd.f32 %v2061_v24, %v4825_v35  ;;  %v2063_v12 = vpop.f32.mrb[59].mxu1  ;;  %v2614_v37 = vsel %vm2550_vm7, %v2518_v17, %v2582_v55  ;;  %v2519_v9 = vadd.f32 %v2487_v34, %v2455_v27 }
 0x327   : > { %v2456_v59 = vsel %vm2392_vm6, %v3345_v11, %v2424_v33  ;;  %v3352_v39 = vadd.f32 %v2063_v12, %v4829_v20  ;;  %v3170_v49 = vpack.c.bf16 %v2614_v37, %v2613_v57  ;;  %v3347_v4 = vadd.f32 %v3346_v56, %v4948_v1 }
 0x328   : > { %v2488_v22 = vmul.f32 %v2456_v59, %v2360_v51  ;;  %v3349_v36 = vadd.f32 %v3348_v38, %v4950_v21  ;;  %vm2551_vm8 = vcmp.ge.f32.partialorder %v2519_v9, 0.0  ;;  %v2583_v45 = vmul.f32 0.01, %v2519_v9 }
 0x329   : > { %v3351_v6 = vadd.f32 %v3350_v61, %v4952_v62  ;;  %v3353_v40 = vadd.f32 %v3352_v39, %v4954_v3  ;;  %3198 = vst [vmem:[%s4853_s20 + $0x60] sm:$0xff] %v3170_v49   ;;  %vm2297_vm9 = vcmp.ge.f32.partialorder %v3347_v4, 0.0  ;;  %v2329_v18 = vmul.f32 0.01, %v3347_v4 }
 0x32a   : > { %v2520_v52 = vadd.f32 %v2488_v22, %v2456_v59  ;;  %vm2393_vm10 = vcmp.ge.f32.partialorder %v3349_v36, 0.0  ;;  %v2615_v23 = vsel %vm2551_vm8, %v2519_v9, %v2583_v45  ;;  %v2425_v32 = vmul.f32 0.01, %v3349_v36 }
 0x32b   : > { %vm2298_vm11 = vcmp.ge.f32.partialorder %v3351_v6, 0.0  ;;  %v2330_v48 = vmul.f32 0.01, %v3351_v6  ;;  %v2067_v8 = vpop.f32.mrb[60].mxu1  ;;  %v2361_v44 = vsel %vm2297_vm9, %v3347_v4, %v2329_v18  ;;  %vm2394_vm13 = vcmp.ge.f32.partialorder %v3353_v40, 0.0 }
 0x32c   : > { %vm2552_vm12 = vcmp.ge.f32.partialorder %v2520_v52, 0.0  ;;  %v2584_v1 = vmul.f32 0.01, %v2520_v52  ;;  %v2069_v21 = vpop.f32.mrb[61].mxu1  ;;  %v2457_v13 = vsel %vm2393_vm10, %v3349_v36, %v2425_v32  ;;  %v2426_v62 = vmul.f32 0.01, %v3353_v40 }
 0x32d   : > { %v2362_v10 = vsel %vm2298_vm11, %v3351_v6, %v2330_v48  ;;  %v3354_v3 = vadd.f32 %v2067_v8, %v4825_v35  ;;  %v2071_v26 = vpop.f32.mrb[62].mxu1  ;;  %v2489_v54 = vmul.f32 %v2457_v13, %v2361_v44  ;;  %v3356_v31 = vadd.f32 %v2069_v21, %v4829_v20 }
 0x32e   : > { %v2616_v47 = vsel %vm2552_vm12, %v2520_v52, %v2584_v1  ;;  %v3358_v5 = vadd.f32 %v2071_v26, %v4825_v35  ;;  %v2073_v15 = vpop.f32.mrb[63].mxu1  ;;  %v2458_v30 = vsel %vm2394_vm13, %v3353_v40, %v2426_v62 }
 0x32f   : > { %v3175_v42 = vpack.c.bf16 %v2616_v47, %v2615_v23  ;;  %v3355_v63 = vadd.f32 %v3354_v3, %v4956_v58  ;;  %v3360_v0 = vadd.f32 %v2073_v15, %v4829_v20  ;;  %v2521_v7 = vadd.f32 %v2489_v54, %v2457_v13 }
 0x330   : > { %v2490_v25 = vmul.f32 %v2458_v30, %v2362_v10  ;;  %v3357_v2 = vadd.f32 %v3356_v31, %v4958_v53  ;;  %v3359_v46 = vadd.f32 %v3358_v5, %v4961_v41 }
 0x331   : > { %3199 = vst [vmem:[%s4853_s20 + $0x68] sm:$0xff] %v3175_v42   ;;  %vm2299_vm14 = vcmp.ge.f32.partialorder %v3355_v63, 0.0  ;;  %v2331_v29 = vmul.f32 0.01, %v3355_v63  ;;  %v3361_v28 = vadd.f32 %v3360_v0, %v4964_v60  ;;  %vm2553_vm15 = vcmp.ge.f32.partialorder %v2521_v7, 0.0 }
 0x332   : > { %v2585_v35 = vmul.f32 0.01, %v2521_v7  ;;  %v2522_v16 = vadd.f32 %v2490_v25, %v2458_v30  ;;  %vm2395_vm0 = vcmp.ge.f32.partialorder %v3357_v2, 0.0  ;;  %v2427_v11 = vmul.f32 0.01, %v3357_v2 }
 0x333   : > { %v2363_v14 = vsel %vm2299_vm14, %v3355_v63, %v2331_v29  ;;  %vm2300_vm1 = vcmp.ge.f32.partialorder %v3359_v46, 0.0  ;;  %v2332_v20 = vmul.f32 0.01, %v3359_v46  ;;  %vm2396_vm3 = vcmp.ge.f32.partialorder %v3361_v28, 0.0 }
 0x334   : > { %vm2554_vm2 = vcmp.ge.f32.partialorder %v2522_v16, 0.0  ;;  %v2586_v58 = vmul.f32 0.01, %v2522_v16  ;;  %v2459_v53 = vsel %vm2395_vm0, %v3357_v2, %v2427_v11  ;;  %v2428_v57 = vmul.f32 0.01, %v3361_v28 }
 0x335   : > { %v2364_v41 = vsel %vm2300_vm1, %v3359_v46, %v2332_v20  ;;  %v2617_v17 = vsel %vm2553_vm15, %v2521_v7, %v2585_v35  ;;  %v2491_v60 = vmul.f32 %v2459_v53, %v2363_v14 }
 0x336   : > { %v2618_v43 = vsel %vm2554_vm2, %v2522_v16, %v2586_v58  ;;  %v2460_v19 = vsel %vm2396_vm3, %v3361_v28, %v2428_v57 }
 0x337   : > { %v3180_v27 = vpack.c.bf16 %v2618_v43, %v2617_v17  ;;  %v2523_v50 = vadd.f32 %v2491_v60, %v2459_v53  ;;  %v2492_v55 = vmul.f32 %v2460_v19, %v2364_v41 }
 0x339   : > { %3200 = vst [vmem:[%s4853_s20 + $0x70] sm:$0xff] %v3180_v27   ;;  %v2587_v34 = vmul.f32 0.01, %v2523_v50  ;;  %v2524_v33 = vadd.f32 %v2492_v55, %v2460_v19  ;;  %vm2555_vm4 = vcmp.ge.f32.partialorder %v2523_v50, 0.0 }
 0x33b   : > { %vm2556_vm5 = vcmp.ge.f32.partialorder %v2524_v33, 0.0  ;;  %v2588_v24 = vmul.f32 0.01, %v2524_v33  ;;  %v2619_v51 = vsel %vm2555_vm4, %v2523_v50, %v2587_v34 }
 0x33d   : > { %v2620_v56 = vsel %vm2556_vm5, %v2524_v33, %v2588_v24 }
 0x33e   : > { %v3185_v38 = vpack.c.bf16 %v2620_v56, %v2619_v51 }
 0x340   : > { %3201 = vst [vmem:[%s4853_s20 + $0x78] sm:$0xff] %v3185_v38  }
 0x341   : > { %3755 = shalt.err (!%p3752_p2)
}
 0x342   : > { %s3756_s10 = scalar_lea.hbm %s5036_s23, 2048  ;;  %s3760_s22 = scalar_lea.hbm %s5088_s3, 4096 }
 0x343   : > { %p3757_p13 = scmp.ne.s32.totalorder %s5036_s23, %s3756_s10  ;;  %p3761_p4 = scmp.lt.u32.totalorder %s5036_s23, %s5088_s3 }
 0x344   : > { %p3762_p5 = scmp.lt.u32.totalorder %s3760_s22, %s3756_s10  ;;  %p3764_p11 = scmp.lt.u32.totalorder %s3756_s10, %s5036_s23 }
 0x345   : > { %p3758_p6 = pnand %p3757_p13, %p5173_p0 }
 0x346   : > { %p3763_p8 = por %p3762_p5, %p3761_p4 }
 0x347   : > { %p3759_p10 = pneg %p3758_p6 }
 0x348   : > { %p3765_p1 = por %p3764_p11, %p3763_p8 }
 0x34a   : > { %p3766_p3 = pnand %p3765_p1, %p3759_p10 }
 0x34c   : > { %3769 = shalt.err (!%p3766_p3)
}
 0x34d   : > { %s3824_s20 = smov 4  }
 0x34e   : > { %3436 = dma.vmem_to_hbm [thread:$0]  (%p5173_p0), %s5038_s24, 2048, %s5036_s23, %s2782_s5, %s3821_s18, %s3821_s18, %s3824_s20  }
 0x34f PF: > { %s2810_s17 = sand.u32 1, %s3800_s12   ;;  %p5174_p7 = scmp.ne.s32.totalorder %s5116_s19, 0 }
 0x350   : > { %p5175_p9 = scmp.ge.s32.totalorder %s3812_s15, 2  ;;  %s2811_s26 = scalar_lea.sflag [#allocation4], %s2810_s17 }
 0x352   : > { %p3450_p12 = pnand %p5175_p9, %p5174_p7 }
 0x354   : > { %3795 = dma.done.wait (!%p3450_p12), %s2811_s26, 2048  }
 0x355   : > { %3797 = vsyncadd (!%p3450_p12), %s2811_s26, 4294965248  ;;  %p17_p2 = scmp.ge.s32.totalorder %s3955_s4, 4   ;;  %s5176_s12 = smov %s3804_s13 }
 0x356   : > { %s5177_s13 = smov %s3808_s14  ;;  %s5178_s14 = smov %s3971_s7 }
 0x357   : > { %s5179_s15 = smov %s3955_s4  ;;  %19 = sbr.rel (!%p17_p2) target bundleno = 6 (0x6), region = 85 }
 0x35e   :  { %2816 = vsyncpa [#allocation3], 1 }
 0x35f   :  { %2818 = vsyncpa [#allocation3 + $0x1], 1 }
 0x360   :  { %2819 = vsyncpa [#allocation6], 1 }
 0x361   :  { %2820 = vsyncpa [#allocation4], 1 }
 0x362   :  { %2822 = vsyncpa [#allocation4 + $0x1], 1 }

</bundles_post_ra>
